<compile_context>
chip_gen: v7x
topology: tpu7x:2x2x1
jax: 0.10.0
libtpu: 0.0.40
codegen_flags: <defaults>
</compile_context>

<pallas_src>
import functools

import jax
import jax.numpy as jnp
from jax.experimental import pallas as pl
from jax.experimental.pallas import tpu as pltpu


# ----------------------------------------------------------------------------
# Kernel: one grid step = one TransformerBlock applied to one batch chunk.
# The activation is carried across the block axis in the resident out_ref.
# ----------------------------------------------------------------------------
def _fwd_kernel(x_hbm, ln1g_ref, ln1b_ref, wqkv_ref, ln2g_ref, ln2b_ref,
                w1_ref, b1_ref, w2_ref, b2_ref,
                out_ref, attnw_ref,
                mask_scr, copy_sem,
                *, bchunk, seq, dim, num_heads, dim_head, window_size):
    bc = pl.program_id(0)           # batch chunk       ("parallel")
    blk = pl.program_id(1)          # transformer block ("arbitrary", carried)
    mc = bchunk * seq               # activation rows handled per step

    @pl.when(blk == 0)
    def _():
        # Stream this chunk's input straight into the resident carry buffer
        # (single manual DMA; no double-buffered pipelined input slot).
        cp = pltpu.make_async_copy(
            x_hbm.at[pl.ds(bc * mc, mc), :], out_ref, copy_sem)
        cp.start()
        cp.wait()
        # Hoisted causal + exact-window additive mask.  Finite sentinel is
        # safe: the diagonal is never masked, so exp(-1e30 - max) -> 0.
        row = jax.lax.broadcasted_iota(jnp.int32, (seq, seq), 0)
        col = jax.lax.broadcasted_iota(jnp.int32, (seq, seq), 1)
        banned = (row < col) | (row > col + window_size)
        mask_scr[...] = jnp.where(banned, jnp.float32(-1e30), jnp.float32(0.0))

    h = out_ref[...].astype(jnp.float32)                  # (mc, D) carried act
    eps = jnp.float32(1e-5)

    def layer_norm(v, g, b):
        # fused single-pass statistics: var = E[x^2] - E[x]^2
        mu = jnp.mean(v, axis=-1, keepdims=True)
        ms = jnp.mean(v * v, axis=-1, keepdims=True)
        return (v - mu) * jax.lax.rsqrt(ms - mu * mu + eps) * g + b

    # ---- pre-norm + fused q/k/v projection (one bf16 MXU matmul) ----------
    x_ = layer_norm(h, ln1g_ref[0], ln1b_ref[0])
    qkv = jnp.dot(x_.astype(jnp.bfloat16), wqkv_ref[0],
                  preferred_element_type=jnp.float32)      # (mc, 3D)
    qkv = qkv.astype(jnp.bfloat16)

    def heads_to_batch(t):
        # (mc, D) -> (H*bchunk, N, dh): head-width lane slices (aligned when
        # dim_head % 128 == 0) + leading-axis concat only; no lane-splitting
        # reshapes, no sublane transposes.
        parts = [t[:, hh * dim_head:(hh + 1) * dim_head]
                 .reshape(bchunk, seq, dim_head) for hh in range(num_heads)]
        return jnp.concatenate(parts, axis=0) if num_heads > 1 else parts[0]

    q = heads_to_batch(qkv[:, :dim])          # dim_head**-0.5 folded in weights
    k = heads_to_batch(qkv[:, dim:2 * dim])
    v = heads_to_batch(qkv[:, 2 * dim:])

    # ---- batched attention over the fused (head * batch-chunk) axis -------
    sim = jnp.einsum('bqd,bkd->bqk', q, k,
                     preferred_element_type=jnp.float32)   # (H*bc, N, N)
    sim = sim + mask_scr[...][None]
    m = jnp.max(sim, axis=-1, keepdims=True)
    p = jnp.exp(sim - m)
    attn = p * pl.reciprocal(jnp.sum(p, axis=-1, keepdims=True), approx=True)

    # head-averaged attention weights, written directly to the bf16 output
    attnw_ref[0] = jnp.mean(attn.reshape(num_heads, bchunk, seq, seq),
                            axis=0).astype(attnw_ref.dtype)

    o = jnp.einsum('bqk,bkd->bqd', attn.astype(jnp.bfloat16), v,
                   preferred_element_type=jnp.float32)     # (H*bc, N, dh)
    parts = [o[hh * bchunk:(hh + 1) * bchunk].reshape(mc, dim_head)
             for hh in range(num_heads)]
    o = jnp.concatenate(parts, axis=-1) if num_heads > 1 else parts[0]
    h_res = o + h                                          # residual 1

    # ---- pre-norm + MLP (bf16 operands, f32 accumulation) -----------------
    h_ = layer_norm(h_res, ln2g_ref[0], ln2b_ref[0])
    m1 = jnp.dot(h_.astype(jnp.bfloat16), w1_ref[0],
                 preferred_element_type=jnp.float32) + b1_ref[0]
    m1 = jnp.maximum(m1, 0.0)
    m2 = jnp.dot(m1.astype(jnp.bfloat16), w2_ref[0],
                 preferred_element_type=jnp.float32) + b2_ref[0]
    out_ref[...] = (m2 + h_res).astype(out_ref.dtype)      # carry + final out


# ----------------------------------------------------------------------------
# Wrapper: one pallas_call over (batch chunks, transformer blocks).
# ----------------------------------------------------------------------------
def transformer_forward_pallas(x, stacked, *, num_heads, dim_head, window_size,
                               batch_chunks=1):
    """x: (B, N, D) f32.  Returns (out (B, N, D) f32, attn (L, B, N, N) bf16)."""
    b, n, d = x.shape
    assert d == num_heads * dim_head
    assert b % batch_chunks == 0
    bchunk = b // batch_chunks
    mc = bchunk * n
    m = b * n
    num_blocks = stacked["ln1_g"].shape[0]

    names = ("ln1_g", "ln1_b", "w_qkv", "ln2_g", "ln2_b", "w1", "b1", "w2", "b2")
    vals = [stacked[name] for name in names]

    def w_spec(v):
        nd = v.ndim
        return pl.BlockSpec((1,) + v.shape[1:],
                            lambda bc, blk, _nd=nd: (blk,) + (0,) * (_nd - 1))

    kernel = functools.partial(
        _fwd_kernel, bchunk=bchunk, seq=n, dim=d, num_heads=num_heads,
        dim_head=dim_head, window_size=window_size)

    out2d, attn_w = pl.pallas_call(
        kernel,
        out_shape=(jax.ShapeDtypeStruct((m, d), x.dtype),
                   jax.ShapeDtypeStruct((num_blocks, b, n, n), jnp.bfloat16)),
        grid=(batch_chunks, num_blocks),
        in_specs=[pl.BlockSpec(memory_space=pl.ANY)]           # x stays in HBM
                 + [w_spec(v) for v in vals],
        out_specs=(pl.BlockSpec((mc, d), lambda bc, blk: (bc, 0)),       # carry
                   pl.BlockSpec((1, bchunk, n, n),
                                lambda bc, blk: (blk, bc, 0, 0))),
        scratch_shapes=[pltpu.VMEM((n, n), jnp.float32),       # additive mask
                        pltpu.SemaphoreType.DMA],              # x -> carry DMA
        compiler_params=pltpu.CompilerParams(
            dimension_semantics=("parallel", "arbitrary"),
            vmem_limit_bytes=64 * 1024 * 1024),
    )(x.reshape(m, d), *vals)
    return out2d.reshape(b, n, d), attn_w


# ----------------------------------------------------------------------------
# Parameter init (deterministic, in-script) + kernel-side packing.
# ----------------------------------------------------------------------------
def init_block_params(key, dim):
    ks = jax.random.split(key, 6)
    s = 0.05
    return {
        "ln1_g": jnp.ones((dim,), jnp.float32),
        "ln1_b": jnp.zeros((dim,), jnp.float32),
        # weights stored pre-transposed: y = x @ W_t  (W_t has shape (in, out))
        "wq_t":  jax.random.normal(ks[0], (dim, dim), jnp.float32) * s,
        "wkv_t": jax.random.normal(ks[1], (dim, 2 * dim), jnp.float32) * s,
        "ln2_g": jnp.ones((dim,), jnp.float32),
        "ln2_b": jnp.zeros((dim,), jnp.float32),
        "w1_t":  jax.random.normal(ks[2], (dim, 4 * dim), jnp.float32) * s,
        "b1":    jax.random.normal(ks[3], (4 * dim,), jnp.float32) * s,
        "w2_t":  jax.random.normal(ks[4], (4 * dim, dim), jnp.float32) * s,
        "b2":    jax.random.normal(ks[5], (dim,), jnp.float32) * s,
    }


def stack_params_for_kernel(block_params, num_heads, dim_head):
    """Stack per-block params on a leading axis.  W_q/W_k/W_v fuse into one
    (D, 3D) matrix with columns grouped [Q | K | V] (heads contiguous within
    each group) so the kernel splits them with lane-aligned slices; the
    dim_head**-0.5 scale is folded into the Q columns.  Matmul weights bf16."""
    scale = jnp.float32(dim_head ** (-0.5))
    dim = num_heads * dim_head

    def stk_vec(name):   # (L, 1, D): last-two block dims equal full array dims
        return jnp.stack([p[name][None, :] for p in block_params])

    def stk_mat(name):
        return jnp.stack([p[name] for p in block_params]).astype(jnp.bfloat16)

    qkv_list = []
    for p in block_params:
        # wkv_t columns are per-head interleaved [k_h | v_h] (PyTorch
        # 'b n (h d)' rearrange + chunk); regroup to [K_all | V_all].
        wkv = p["wkv_t"].reshape(dim, num_heads, 2, dim_head)
        wk = wkv[:, :, 0, :].reshape(dim, dim)
        wv = wkv[:, :, 1, :].reshape(dim, dim)
        qkv_list.append(jnp.concatenate([p["wq_t"] * scale, wk, wv], axis=1))
    w_qkv = jnp.stack(qkv_list).astype(jnp.bfloat16)

    return {
        "ln1_g": stk_vec("ln1_g"), "ln1_b": stk_vec("ln1_b"),
        "w_qkv": w_qkv,
        "ln2_g": stk_vec("ln2_g"), "ln2_b": stk_vec("ln2_b"),
        "w1": stk_mat("w1_t"), "b1": stk_vec("b1"),
        "w2": stk_mat("w2_t"), "b2": stk_vec("b2"),
    }


# ----------------------------------------------------------------------------
# Pure-JAX reference mirroring the PyTorch forward.  It uses the same mixed
# precision policy as the kernel (bf16 MXU operands, f32 accumulation) so the
# comparison isolates structural correctness of the kernel.
# ----------------------------------------------------------------------------
def _block_ref(x, p, num_heads, dim_head, window_size):
    f32, bf16 = jnp.float32, jnp.bfloat16

    def ln(v, g, b):
        mu = jnp.mean(v, axis=-1, keepdims=True)
        var = jnp.mean((v - mu) ** 2, axis=-1, keepdims=True)
        return (v - mu) / jnp.sqrt(var + 1e-5) * g + b

    bsz, n, d = x.shape
    scale = jnp.float32(dim_head ** (-0.5))
    wq = (p["wq_t"] * scale).astype(bf16)
    wkv = p["wkv_t"].astype(bf16)

    x_ = ln(x, p["ln1_g"], p["ln1_b"]).astype(bf16)
    q = jnp.einsum("bnd,de->bne", x_, wq, preferred_element_type=f32)
    kv = jnp.einsum("bnd,de->bne", x_, wkv, preferred_element_type=f32)
    q = q.reshape(bsz, n, num_heads, dim_head).transpose(0, 2, 1, 3)
    kv = kv.reshape(bsz, n, num_heads, 2 * dim_head).transpose(0, 2, 1, 3)
    k, v = kv[..., :dim_head], kv[..., dim_head:]
    sim = jnp.einsum("bhie,bhje->bhij", q.astype(bf16), k.astype(bf16),
                     preferred_element_type=f32)
    row = jnp.arange(n)[:, None]
    col = jnp.arange(n)[None, :]
    mask = (row < col) | (row > col + window_size)
    sim = jnp.where(mask, -jnp.inf, sim)
    attn = jax.nn.softmax(sim, axis=-1)
    attn_w = attn.mean(axis=1)
    o = jnp.einsum("bhij,bhje->bhie", attn.astype(bf16), v.astype(bf16),
                   preferred_element_type=f32)
    o = o.transpose(0, 2, 1, 3).reshape(bsz, n, d)
    h = o + x
    h_ = ln(h, p["ln2_g"], p["ln2_b"]).astype(bf16)
    m1 = jnp.einsum("bnd,de->bne", h_, p["w1_t"].astype(bf16),
                    preferred_element_type=f32) + p["b1"]
    m1 = jnp.maximum(m1, 0.0).astype(bf16)
    m2 = jnp.einsum("bnd,de->bne", m1, p["w2_t"].astype(bf16),
                    preferred_element_type=f32) + p["b2"]
    return m2 + h, attn_w


# ----------------------------------------------------------------------------
if __name__ == "__main__":
    # cfg: num_heads=2, dim_head=128 -> dim=256, window_size=16, num_blocks=2,
    # layer_norm='pre', dropout=0 (eval), positional_encoding != 'rotary'.
    # Shapes are kept small but 128-aligned so the kernel runs its intended
    # lane-dense / unmasked code paths (per the performance review).
    B, N = 2, 128
    NUM_HEADS, DIM_HEAD, WINDOW, NUM_BLOCKS = 2, 128, 16, 2
    DIM = NUM_HEADS * DIM_HEAD

    root = jax.random.PRNGKey(0)
    k_param, k_x = jax.random.split(root)
    keys = jax.random.split(k_param, NUM_BLOCKS)
    block_params = [init_block_params(k, DIM) for k in keys]
    stacked = stack_params_for_kernel(block_params, NUM_HEADS, DIM_HEAD)

    h_in = jax.random.normal(k_x, (B, N, DIM), jnp.float32)

    fwd = jax.jit(functools.partial(
        transformer_forward_pallas, num_heads=NUM_HEADS, dim_head=DIM_HEAD,
        window_size=WINDOW, batch_chunks=2))
    out, attn_w = fwd(h_in, stacked)
    out = jax.block_until_ready(out)
    attn_w = jax.block_until_ready(attn_w)

    # reference check (same bf16-operand / f32-accumulate precision policy)
    h_ref = h_in
    ref_attn = []
    for p in block_params:
        h_ref, aw = _block_ref(h_ref, p, NUM_HEADS, DIM_HEAD, WINDOW)
        ref_attn.append(aw)
    ref_attn = jnp.stack(ref_attn)

    assert out.shape == (B, N, DIM)
    assert attn_w.shape == (NUM_BLOCKS, B, N, N)
    assert jnp.allclose(out, h_ref, atol=3e-2, rtol=3e-2)
    assert jnp.allclose(attn_w.astype(jnp.float32), ref_attn,
                        atol=2e-2, rtol=2e-2)

    print("KERNEL_OK")
</pallas_src>

<mosaic_0001>
module attributes {stable_mosaic.version = 11 : i64} {
  func.func @_fwd_kernel(%arg0: i32, %arg1: i32, %arg2: memref<256x256xf32, #tpu.memory_space<any>>, %arg3: memref<1x1x256xf32, #tpu.memory_space<vmem>>, %arg4: memref<1x1x256xf32, #tpu.memory_space<vmem>>, %arg5: memref<1x256x768xbf16, #tpu.memory_space<vmem>>, %arg6: memref<1x1x256xf32, #tpu.memory_space<vmem>>, %arg7: memref<1x1x256xf32, #tpu.memory_space<vmem>>, %arg8: memref<1x256x1024xbf16, #tpu.memory_space<vmem>>, %arg9: memref<1x1x1024xf32, #tpu.memory_space<vmem>>, %arg10: memref<1x1024x256xbf16, #tpu.memory_space<vmem>>, %arg11: memref<1x1x256xf32, #tpu.memory_space<vmem>>, %arg12: memref<128x256xf32, #tpu.memory_space<vmem>>, %arg13: memref<1x1x128x128xbf16, #tpu.memory_space<vmem>>, %arg14: memref<128x128xf32, #tpu.memory_space<vmem>>, %arg15: memref<!tpu.dma_semaphore, #tpu.memory_space<semaphore_mem>>) attributes {dimension_semantics = [#tpu.dimension_semantics<parallel>, #tpu.dimension_semantics<arbitrary>], iteration_bounds = array<i64: 2, 2>, scalar_prefetch = 0 : i64, scratch_operands = 2 : i64, tpu.core_type = #tpu.core_type<tc>, window_params = [{}, {transform_indices = @transform_1, window_bounds = array<i64: 1, 1, 256>}, {transform_indices = @transform_2, window_bounds = array<i64: 1, 1, 256>}, {transform_indices = @transform_3, window_bounds = array<i64: 1, 256, 768>}, {transform_indices = @transform_4, window_bounds = array<i64: 1, 1, 256>}, {transform_indices = @transform_5, window_bounds = array<i64: 1, 1, 256>}, {transform_indices = @transform_6, window_bounds = array<i64: 1, 256, 1024>}, {transform_indices = @transform_7, window_bounds = array<i64: 1, 1, 1024>}, {transform_indices = @transform_8, window_bounds = array<i64: 1, 1024, 256>}, {transform_indices = @transform_9, window_bounds = array<i64: 1, 1, 256>}, {transform_indices = @transform_10, window_bounds = array<i64: 128, 256>}, {transform_indices = @transform_11, window_bounds = array<i64: 1, 1, 128, 128>}]} {
    %c0_i32 = arith.constant 0 : i32
    %0 = arith.cmpi eq, %arg1, %c0_i32 : i32
    %1 = arith.extui %0 : i1 to i32
    %c0_i32_0 = arith.constant 0 : i32
    %2 = arith.cmpi ne, %1, %c0_i32_0 : i32
    scf.if %2 {
      %c128_i32 = arith.constant 128 : i32
      %130 = arith.muli %arg0, %c128_i32 : i32
      %c0_i32_56 = arith.constant 0 : i32
      %131 = tpu.memref_slice %arg2[%130, %c0_i32_56] : memref<256x256xf32, #tpu.memory_space<any>> -> memref<128x256xf32, #tpu.memory_space<any>>
      tpu.enqueue_dma source(%131 : memref<128x256xf32, #tpu.memory_space<any>>) target(%arg12 : memref<128x256xf32, #tpu.memory_space<vmem>>) target_semaphore(%arg15 : memref<!tpu.dma_semaphore, #tpu.memory_space<semaphore_mem>>)
      %c0_i32_57 = arith.constant 0 : i32
      %132 = tpu.memref_slice %arg2[%130, %c0_i32_57] : memref<256x256xf32, #tpu.memory_space<any>> -> memref<128x256xf32, #tpu.memory_space<any>>
      tpu.wait_dma2 semaphore(%arg15 : memref<!tpu.dma_semaphore, #tpu.memory_space<semaphore_mem>>) src(%132 : memref<128x256xf32, #tpu.memory_space<any>>) dst(%arg12 : memref<128x256xf32, #tpu.memory_space<vmem>>)
      %133 = tpu.iota {dimensions = array<i32: 0>} : vector<128x128xi32>
      %134 = tpu.iota {dimensions = array<i32: 1>} : vector<128x128xi32>
      %135 = arith.cmpi slt, %133, %134 : vector<128x128xi32>
      %c16_i32 = arith.constant 16 : i32
      %136 = vector.broadcast %c16_i32 : i32 to vector<128x128xi32>
      %137 = arith.addi %134, %136 : vector<128x128xi32>
      %138 = arith.cmpi sgt, %133, %137 : vector<128x128xi32>
      %139 = arith.ori %135, %138 : vector<128x128xi1>
      %cst_58 = arith.constant -1.000000e+30 : f32
      %cst_59 = arith.constant 0.000000e+00 : f32
      %140 = vector.broadcast %cst_58 : f32 to vector<128x128xf32>
      %141 = vector.broadcast %cst_59 : f32 to vector<128x128xf32>
      %142 = arith.select %139, %140, %141 : vector<128x128xi1>, vector<128x128xf32>
      %c0_60 = arith.constant 0 : index
      %c0_61 = arith.constant 0 : index
      %143 = vector.load %arg14[%c0_60, %c0_61] : memref<128x128xf32, #tpu.memory_space<vmem>>, vector<128x128xf32>
      tpu.vector_store %arg14[%c0_60, %c0_61], %142 {strides = array<i32>} : memref<128x128xf32, #tpu.memory_space<vmem>>, vector<128x128xf32>,
    } else {
    }
    %c0 = arith.constant 0 : index
    %c0_1 = arith.constant 0 : index
    %3 = vector.load %arg12[%c0, %c0_1] : memref<128x256xf32, #tpu.memory_space<vmem>>, vector<128x256xf32>
    %c0_2 = arith.constant 0 : index
    %c0_3 = arith.constant 0 : index
    %c0_4 = arith.constant 0 : index
    %4 = vector.load %arg3[%c0_2, %c0_3, %c0_4] : memref<1x1x256xf32, #tpu.memory_space<vmem>>, vector<1x1x256xf32>
    %5 = vector.shape_cast %4 : vector<1x1x256xf32> to vector<1x256xf32>
    %c0_5 = arith.constant 0 : index
    %c0_6 = arith.constant 0 : index
    %c0_7 = arith.constant 0 : index
    %6 = vector.load %arg4[%c0_5, %c0_6, %c0_7] : memref<1x1x256xf32, #tpu.memory_space<vmem>>, vector<1x1x256xf32>
    %7 = vector.shape_cast %6 : vector<1x1x256xf32> to vector<1x256xf32>
    %cst = arith.constant dense<0.000000e+00> : vector<128xf32>
    %8 = vector.multi_reduction <add>, %3, %cst [1] : vector<128x256xf32> to vector<128xf32>
    %9 = vector.shape_cast %8 : vector<128xf32> to vector<128x1xf32>
    %cst_8 = arith.constant 2.560000e+02 : f32
    %10 = vector.broadcast %cst_8 : f32 to vector<128x1xf32>
    %11 = arith.divf %9, %10 : vector<128x1xf32>
    %12 = arith.mulf %3, %3 : vector<128x256xf32>
    %cst_9 = arith.constant dense<0.000000e+00> : vector<128xf32>
    %13 = vector.multi_reduction <add>, %12, %cst_9 [1] : vector<128x256xf32> to vector<128xf32>
    %14 = vector.shape_cast %13 : vector<128xf32> to vector<128x1xf32>
    %cst_10 = arith.constant 2.560000e+02 : f32
    %15 = vector.broadcast %cst_10 : f32 to vector<128x1xf32>
    %16 = arith.divf %14, %15 : vector<128x1xf32>
    %17 = vector.broadcast %11 : vector<128x1xf32> to vector<128x256xf32>
    %18 = arith.subf %3, %17 : vector<128x256xf32>
    %19 = arith.mulf %11, %11 : vector<128x1xf32>
    %20 = arith.subf %16, %19 : vector<128x1xf32>
    %cst_11 = arith.constant 9.99999974E-6 : f32
    %21 = vector.broadcast %cst_11 : f32 to vector<128x1xf32>
    %22 = arith.addf %20, %21 : vector<128x1xf32>
    %23 = math.rsqrt %22 : vector<128x1xf32>
    %24 = vector.broadcast %23 : vector<128x1xf32> to vector<128x256xf32>
    %25 = arith.mulf %18, %24 : vector<128x256xf32>
    %26 = vector.broadcast %5 : vector<1x256xf32> to vector<128x256xf32>
    %27 = arith.mulf %25, %26 : vector<128x256xf32>
    %28 = vector.broadcast %7 : vector<1x256xf32> to vector<128x256xf32>
    %29 = arith.addf %27, %28 : vector<128x256xf32>
    %30 = arith.truncf %29 : vector<128x256xf32> to vector<128x256xbf16>
    %c0_12 = arith.constant 0 : index
    %c0_13 = arith.constant 0 : index
    %c0_14 = arith.constant 0 : index
    %31 = vector.load %arg5[%c0_12, %c0_13, %c0_14] : memref<1x256x768xbf16, #tpu.memory_space<vmem>>, vector<1x256x768xbf16>
    %32 = vector.shape_cast %31 : vector<1x256x768xbf16> to vector<256x768xbf16>
    %cst_15 = arith.constant dense<0.000000e+00> : vector<128x768xf32>
    %33 = tpu.matmul %30, %32, %cst_15 {dimension_numbers = #tpu.dot_dimension_numbers<[1], [0], [0], [1], [0, 0, 1, 1], [], []>} : vector<128x256xbf16>, vector<256x768xbf16>, vector<128x768xf32> -> vector<128x768xf32>
    %34 = arith.truncf %33 : vector<128x768xf32> to vector<128x768xbf16>
    %35 = vector.extract_strided_slice %34 {offsets = [0, 0], sizes = [128, 256], strides = [1, 1]} : vector<128x768xbf16> to vector<128x256xbf16>
    %36 = vector.extract_strided_slice %35 {offsets = [0, 0], sizes = [128, 128], strides = [1, 1]} : vector<128x256xbf16> to vector<128x128xbf16>
    %37 = vector.shape_cast %36 : vector<128x128xbf16> to vector<1x128x128xbf16>
    %38 = vector.extract_strided_slice %35 {offsets = [0, 128], sizes = [128, 128], strides = [1, 1]} : vector<128x256xbf16> to vector<128x128xbf16>
    %39 = vector.shape_cast %38 : vector<128x128xbf16> to vector<1x128x128xbf16>
    %40 = tpu.concatenate %37, %39 in 0 : vector<1x128x128xbf16>, vector<1x128x128xbf16> -> vector<2x128x128xbf16>
    %41 = vector.extract_strided_slice %34 {offsets = [0, 256], sizes = [128, 256], strides = [1, 1]} : vector<128x768xbf16> to vector<128x256xbf16>
    %42 = vector.extract_strided_slice %41 {offsets = [0, 0], sizes = [128, 128], strides = [1, 1]} : vector<128x256xbf16> to vector<128x128xbf16>
    %43 = vector.shape_cast %42 : vector<128x128xbf16> to vector<1x128x128xbf16>
    %44 = vector.extract_strided_slice %41 {offsets = [0, 128], sizes = [128, 128], strides = [1, 1]} : vector<128x256xbf16> to vector<128x128xbf16>
    %45 = vector.shape_cast %44 : vector<128x128xbf16> to vector<1x128x128xbf16>
    %46 = tpu.concatenate %43, %45 in 0 : vector<1x128x128xbf16>, vector<1x128x128xbf16> -> vector<2x128x128xbf16>
    %47 = vector.extract_strided_slice %34 {offsets = [0, 512], sizes = [128, 256], strides = [1, 1]} : vector<128x768xbf16> to vector<128x256xbf16>
    %48 = vector.extract_strided_slice %47 {offsets = [0, 0], sizes = [128, 128], strides = [1, 1]} : vector<128x256xbf16> to vector<128x128xbf16>
    %49 = vector.shape_cast %48 : vector<128x128xbf16> to vector<1x128x128xbf16>
    %50 = vector.extract_strided_slice %47 {offsets = [0, 128], sizes = [128, 128], strides = [1, 1]} : vector<128x256xbf16> to vector<128x128xbf16>
    %51 = vector.shape_cast %50 : vector<128x128xbf16> to vector<1x128x128xbf16>
    %52 = tpu.concatenate %49, %51 in 0 : vector<1x128x128xbf16>, vector<1x128x128xbf16> -> vector<2x128x128xbf16>
    "tpu.trace_start"() <{level = 10 : i32, message = "bqd,bkd->bqk"}> : () -> ()
    %cst_16 = arith.constant dense<0.000000e+00> : vector<2x128x128xf32>
    %53 = tpu.matmul %40, %46, %cst_16 {dimension_numbers = #tpu.dot_dimension_numbers<[2], [2], [1], [1], [0, 0, 0, 1, 1, 1], [0], [0]>} : vector<2x128x128xbf16>, vector<2x128x128xbf16>, vector<2x128x128xf32> -> vector<2x128x128xf32>
    "tpu.trace_stop"() : () -> ()
    %c0_17 = arith.constant 0 : index
    %c0_18 = arith.constant 0 : index
    %54 = vector.load %arg14[%c0_17, %c0_18] : memref<128x128xf32, #tpu.memory_space<vmem>>, vector<128x128xf32>
    %55 = vector.shape_cast %54 : vector<128x128xf32> to vector<1x128x128xf32>
    %56 = vector.broadcast %55 : vector<1x128x128xf32> to vector<2x128x128xf32>
    %57 = arith.addf %53, %56 : vector<2x128x128xf32>
    %cst_19 = arith.constant dense<0xFF800000> : vector<2x128xf32>
    %58 = vector.multi_reduction <maximumf>, %57, %cst_19 [2] : vector<2x128x128xf32> to vector<2x128xf32>
    %59 = vector.shape_cast %58 : vector<2x128xf32> to vector<2x128x1xf32>
    %60 = vector.broadcast %59 : vector<2x128x1xf32> to vector<2x128x128xf32>
    %61 = arith.subf %57, %60 : vector<2x128x128xf32>
    %62 = math.exp %61 : vector<2x128x128xf32>
    %cst_20 = arith.constant dense<0.000000e+00> : vector<2x128xf32>
    %63 = vector.multi_reduction <add>, %62, %cst_20 [2] : vector<2x128x128xf32> to vector<2x128xf32>
    %64 = vector.shape_cast %63 : vector<2x128xf32> to vector<2x128x1xf32>
    %65 = tpu.reciprocal %64 {approx = true} : vector<2x128x1xf32> -> vector<2x128x1xf32>
    %66 = vector.broadcast %65 : vector<2x128x1xf32> to vector<2x128x128xf32>
    %67 = arith.mulf %62, %66 : vector<2x128x128xf32>
    %68 = vector.shape_cast %67 : vector<2x128x128xf32> to vector<2x1x128x128xf32>
    %cst_21 = arith.constant dense<0.000000e+00> : vector<1x128x128xf32>
    %69 = vector.multi_reduction <add>, %68, %cst_21 [0] : vector<2x1x128x128xf32> to vector<1x128x128xf32>
    %cst_22 = arith.constant 2.000000e+00 : f32
    %70 = vector.broadcast %cst_22 : f32 to vector<1x128x128xf32>
    %71 = arith.divf %69, %70 : vector<1x128x128xf32>
    %72 = arith.truncf %71 : vector<1x128x128xf32> to vector<1x128x128xbf16>
    %c0_23 = arith.constant 0 : index
    %c0_24 = arith.constant 0 : index
    %c0_25 = arith.constant 0 : index
    %c0_26 = arith.constant 0 : index
    %73 = vector.load %arg13[%c0_23, %c0_24, %c0_25, %c0_26] : memref<1x1x128x128xbf16, #tpu.memory_space<vmem>>, vector<1x1x128x128xbf16>
    %74 = vector.shape_cast %73 : vector<1x1x128x128xbf16> to vector<1x128x128xbf16>
    %75 = vector.shape_cast %72 : vector<1x128x128xbf16> to vector<1x1x128x128xbf16>
    tpu.vector_store %arg13[%c0_23, %c0_24, %c0_25, %c0_26], %75 {strides = array<i32>} : memref<1x1x128x128xbf16, #tpu.memory_space<vmem>>, vector<1x1x128x128xbf16>,
    %76 = arith.truncf %67 : vector<2x128x128xf32> to vector<2x128x128xbf16>
    "tpu.trace_start"() <{level = 10 : i32, message = "bqk,bkd->bqd"}> : () -> ()
    %cst_27 = arith.constant dense<0.000000e+00> : vector<2x128x128xf32>
    %77 = tpu.matmul %76, %52, %cst_27 {dimension_numbers = #tpu.dot_dimension_numbers<[2], [1], [1], [2], [0, 0, 0, 1, 1, 2], [0], [0]>} : vector<2x128x128xbf16>, vector<2x128x128xbf16>, vector<2x128x128xf32> -> vector<2x128x128xf32>
    "tpu.trace_stop"() : () -> ()
    %78 = vector.extract_strided_slice %77 {offsets = [0, 0, 0], sizes = [1, 128, 128], strides = [1, 1, 1]} : vector<2x128x128xf32> to vector<1x128x128xf32>
    %79 = vector.shape_cast %78 : vector<1x128x128xf32> to vector<128x128xf32>
    %80 = vector.extract_strided_slice %77 {offsets = [1, 0, 0], sizes = [1, 128, 128], strides = [1, 1, 1]} : vector<2x128x128xf32> to vector<1x128x128xf32>
    %81 = vector.shape_cast %80 : vector<1x128x128xf32> to vector<128x128xf32>
    %82 = tpu.concatenate %79, %81 in 1 : vector<128x128xf32>, vector<128x128xf32> -> vector<128x256xf32>
    %83 = arith.addf %82, %3 : vector<128x256xf32>
    %c0_28 = arith.constant 0 : index
    %c0_29 = arith.constant 0 : index
    %c0_30 = arith.constant 0 : index
    %84 = vector.load %arg6[%c0_28, %c0_29, %c0_30] : memref<1x1x256xf32, #tpu.memory_space<vmem>>, vector<1x1x256xf32>
    %85 = vector.shape_cast %84 : vector<1x1x256xf32> to vector<1x256xf32>
    %c0_31 = arith.constant 0 : index
    %c0_32 = arith.constant 0 : index
    %c0_33 = arith.constant 0 : index
    %86 = vector.load %arg7[%c0_31, %c0_32, %c0_33] : memref<1x1x256xf32, #tpu.memory_space<vmem>>, vector<1x1x256xf32>
    %87 = vector.shape_cast %86 : vector<1x1x256xf32> to vector<1x256xf32>
    %cst_34 = arith.constant dense<0.000000e+00> : vector<128xf32>
    %88 = vector.multi_reduction <add>, %83, %cst_34 [1] : vector<128x256xf32> to vector<128xf32>
    %89 = vector.shape_cast %88 : vector<128xf32> to vector<128x1xf32>
    %cst_35 = arith.constant 2.560000e+02 : f32
    %90 = vector.broadcast %cst_35 : f32 to vector<128x1xf32>
    %91 = arith.divf %89, %90 : vector<128x1xf32>
    %92 = arith.mulf %83, %83 : vector<128x256xf32>
    %cst_36 = arith.constant dense<0.000000e+00> : vector<128xf32>
    %93 = vector.multi_reduction <add>, %92, %cst_36 [1] : vector<128x256xf32> to vector<128xf32>
    %94 = vector.shape_cast %93 : vector<128xf32> to vector<128x1xf32>
    %cst_37 = arith.constant 2.560000e+02 : f32
    %95 = vector.broadcast %cst_37 : f32 to vector<128x1xf32>
    %96 = arith.divf %94, %95 : vector<128x1xf32>
    %97 = vector.broadcast %91 : vector<128x1xf32> to vector<128x256xf32>
    %98 = arith.subf %83, %97 : vector<128x256xf32>
    %99 = arith.mulf %91, %91 : vector<128x1xf32>
    %100 = arith.subf %96, %99 : vector<128x1xf32>
    %cst_38 = arith.constant 9.99999974E-6 : f32
    %101 = vector.broadcast %cst_38 : f32 to vector<128x1xf32>
    %102 = arith.addf %100, %101 : vector<128x1xf32>
    %103 = math.rsqrt %102 : vector<128x1xf32>
    %104 = vector.broadcast %103 : vector<128x1xf32> to vector<128x256xf32>
    %105 = arith.mulf %98, %104 : vector<128x256xf32>
    %106 = vector.broadcast %85 : vector<1x256xf32> to vector<128x256xf32>
    %107 = arith.mulf %105, %106 : vector<128x256xf32>
    %108 = vector.broadcast %87 : vector<1x256xf32> to vector<128x256xf32>
    %109 = arith.addf %107, %108 : vector<128x256xf32>
    %110 = arith.truncf %109 : vector<128x256xf32> to vector<128x256xbf16>
    %c0_39 = arith.constant 0 : index
    %c0_40 = arith.constant 0 : index
    %c0_41 = arith.constant 0 : index
    %111 = vector.load %arg8[%c0_39, %c0_40, %c0_41] : memref<1x256x1024xbf16, #tpu.memory_space<vmem>>, vector<1x256x1024xbf16>
    %112 = vector.shape_cast %111 : vector<1x256x1024xbf16> to vector<256x1024xbf16>
    %cst_42 = arith.constant dense<0.000000e+00> : vector<128x1024xf32>
    %113 = tpu.matmul %110, %112, %cst_42 {dimension_numbers = #tpu.dot_dimension_numbers<[1], [0], [0], [1], [0, 0, 1, 1], [], []>} : vector<128x256xbf16>, vector<256x1024xbf16>, vector<128x1024xf32> -> vector<128x1024xf32>
    %c0_43 = arith.constant 0 : index
    %c0_44 = arith.constant 0 : index
    %c0_45 = arith.constant 0 : index
    %114 = vector.load %arg9[%c0_43, %c0_44, %c0_45] : memref<1x1x1024xf32, #tpu.memory_space<vmem>>, vector<1x1x1024xf32>
    %115 = vector.shape_cast %114 : vector<1x1x1024xf32> to vector<1x1024xf32>
    %116 = vector.broadcast %115 : vector<1x1024xf32> to vector<128x1024xf32>
    %117 = arith.addf %113, %116 : vector<128x1024xf32>
    %cst_46 = arith.constant 0.000000e+00 : f32
    %118 = vector.broadcast %cst_46 : f32 to vector<128x1024xf32>
    %119 = arith.maximumf %117, %118 : vector<128x1024xf32>
    %120 = arith.truncf %119 : vector<128x1024xf32> to vector<128x1024xbf16>
    %c0_47 = arith.constant 0 : index
    %c0_48 = arith.constant 0 : index
    %c0_49 = arith.constant 0 : index
    %121 = vector.load %arg10[%c0_47, %c0_48, %c0_49] : memref<1x1024x256xbf16, #tpu.memory_space<vmem>>, vector<1x1024x256xbf16>
    %122 = vector.shape_cast %121 : vector<1x1024x256xbf16> to vector<1024x256xbf16>
    %cst_50 = arith.constant dense<0.000000e+00> : vector<128x256xf32>
    %123 = tpu.matmul %120, %122, %cst_50 {dimension_numbers = #tpu.dot_dimension_numbers<[1], [0], [0], [1], [0, 0, 1, 1], [], []>} : vector<128x1024xbf16>, vector<1024x256xbf16>, vector<128x256xf32> -> vector<128x256xf32>
    %c0_51 = arith.constant 0 : index
    %c0_52 = arith.constant 0 : index
    %c0_53 = arith.constant 0 : index
    %124 = vector.load %arg11[%c0_51, %c0_52, %c0_53] : memref<1x1x256xf32, #tpu.memory_space<vmem>>, vector<1x1x256xf32>
    %125 = vector.shape_cast %124 : vector<1x1x256xf32> to vector<1x256xf32>
    %126 = vector.broadcast %125 : vector<1x256xf32> to vector<128x256xf32>
    %127 = arith.addf %123, %126 : vector<128x256xf32>
    %128 = arith.addf %127, %83 : vector<128x256xf32>
    %c0_54 = arith.constant 0 : index
    %c0_55 = arith.constant 0 : index
    %129 = vector.load %arg12[%c0_54, %c0_55] : memref<128x256xf32, #tpu.memory_space<vmem>>, vector<128x256xf32>
    tpu.vector_store %arg12[%c0_54, %c0_55], %128 {strides = array<i32>} : memref<128x256xf32, #tpu.memory_space<vmem>>, vector<128x256xf32>,
    return
  }
  func.func @transform_1(%arg0: i32, %arg1: i32) -> (i32, i32, i32) {
    %c0_i32 = arith.constant 0 : i32
    %c0_i32_0 = arith.constant 0 : i32
    %c0_i32_1 = arith.constant 0 : i32
    return %arg1, %c0_i32, %c0_i32_0 : i32, i32, i32
  }
  func.func @transform_2(%arg0: i32, %arg1: i32) -> (i32, i32, i32) {
    %c0_i32 = arith.constant 0 : i32
    %c0_i32_0 = arith.constant 0 : i32
    %c0_i32_1 = arith.constant 0 : i32
    return %arg1, %c0_i32, %c0_i32_0 : i32, i32, i32
  }
  func.func @transform_3(%arg0: i32, %arg1: i32) -> (i32, i32, i32) {
    %c0_i32 = arith.constant 0 : i32
    %c0_i32_0 = arith.constant 0 : i32
    %c0_i32_1 = arith.constant 0 : i32
    return %arg1, %c0_i32, %c0_i32_0 : i32, i32, i32
  }
  func.func @transform_4(%arg0: i32, %arg1: i32) -> (i32, i32, i32) {
    %c0_i32 = arith.constant 0 : i32
    %c0_i32_0 = arith.constant 0 : i32
    %c0_i32_1 = arith.constant 0 : i32
    return %arg1, %c0_i32, %c0_i32_0 : i32, i32, i32
  }
  func.func @transform_5(%arg0: i32, %arg1: i32) -> (i32, i32, i32) {
    %c0_i32 = arith.constant 0 : i32
    %c0_i32_0 = arith.constant 0 : i32
    %c0_i32_1 = arith.constant 0 : i32
    return %arg1, %c0_i32, %c0_i32_0 : i32, i32, i32
  }
  func.func @transform_6(%arg0: i32, %arg1: i32) -> (i32, i32, i32) {
    %c0_i32 = arith.constant 0 : i32
    %c0_i32_0 = arith.constant 0 : i32
    %c0_i32_1 = arith.constant 0 : i32
    return %arg1, %c0_i32, %c0_i32_0 : i32, i32, i32
  }
  func.func @transform_7(%arg0: i32, %arg1: i32) -> (i32, i32, i32) {
    %c0_i32 = arith.constant 0 : i32
    %c0_i32_0 = arith.constant 0 : i32
    %c0_i32_1 = arith.constant 0 : i32
    return %arg1, %c0_i32, %c0_i32_0 : i32, i32, i32
  }
  func.func @transform_8(%arg0: i32, %arg1: i32) -> (i32, i32, i32) {
    %c0_i32 = arith.constant 0 : i32
    %c0_i32_0 = arith.constant 0 : i32
    %c0_i32_1 = arith.constant 0 : i32
    return %arg1, %c0_i32, %c0_i32_0 : i32, i32, i32
  }
  func.func @transform_9(%arg0: i32, %arg1: i32) -> (i32, i32, i32) {
    %c0_i32 = arith.constant 0 : i32
    %c0_i32_0 = arith.constant 0 : i32
    %c0_i32_1 = arith.constant 0 : i32
    return %arg1, %c0_i32, %c0_i32_0 : i32, i32, i32
  }
  func.func @transform_10(%arg0: i32, %arg1: i32) -> (i32, i32) {
    %c0_i32 = arith.constant 0 : i32
    %c0_i32_0 = arith.constant 0 : i32
    return %arg0, %c0_i32 : i32, i32
  }
  func.func @transform_11(%arg0: i32, %arg1: i32) -> (i32, i32, i32, i32) {
    %c0_i32 = arith.constant 0 : i32
    %c0_i32_0 = arith.constant 0 : i32
    %c0_i32_1 = arith.constant 0 : i32
    return %arg1, %arg0, %c0_i32, %c0_i32_0 : i32, i32, i32, i32
  }
}

</mosaic_0001>

<bundles_post_ra>
// kernel: transformer_forward_pallas.1
= control target key start
LH: loop header
LB: loop body
LE: loop exit
PB: predicated region body
PF: predicated region fallthrough
CT: control target
= control target key end

     0   :  { %s11944_s0 = inlined_call_operand.hbm [shape: f32[256,256], index: 0, kind: input, shape index: {}]   ;;  %s11945_s1 = inlined_call_operand.hbm [shape: f32[2,1,256], index: 1, kind: input, shape index: {}]   ;;  %s11946_s2 = inlined_call_operand.hbm [shape: f32[2,1,256], index: 2, kind: input, shape index: {}]   ;;  %s11947_s3 = inlined_call_operand.hbm [shape: bf16[2,256,768], index: 3, kind: input, shape index: {}]   ;;  %s11948_s4 = inlined_call_operand.hbm [shape: f32[2,1,256], index: 4, kind: input, shape index: {}]   ;;  %s11949_s5 = inlined_call_operand.hbm [shape: f32[2,1,256], index: 5, kind: input, shape index: {}]   ;;  %s11950_s6 = inlined_call_operand.hbm [shape: bf16[2,256,1024], index: 6, kind: input, shape index: {}]   ;;  %s11951_s7 = inlined_call_operand.hbm [shape: f32[2,1,1024], index: 7, kind: input, shape index: {}]   ;;  %s11952_s8 = inlined_call_operand.hbm [shape: bf16[2,1024,256], index: 8, kind: input, shape index: {}]   ;;  %s11953_s9 = inlined_call_operand.hbm [shape: f32[2,1,256], index: 9, kind: input, shape index: {}]   ;;  %s11954_s10 = inlined_call_operand.hbm [shape: f32[256,256], index: 10, kind: output, shape index: {0}]   ;;  %s11955_s11 = inlined_call_operand.hbm [shape: bf16[2,2,128,128], index: 11, kind: output, shape index: {1}]  }
   0x1   :  { %12072 = sst [smem:[#allocation100_spill]] %s11944_s0 }
   0x2   :  { %12073 = sst [smem:[#allocation101_spill]] %s11946_s2 }
   0x3   :  { %12074 = sst [smem:[#allocation102_spill]] %s11948_s4 }
   0x4   :  { %12075 = sst [smem:[#allocation103_spill]] %s11950_s6 }
   0x5   :  { %12076 = sst [smem:[#allocation104_spill]] %s11954_s10 }
   0x6   :  { %12077 = sst [smem:[#allocation105_spill]] %s11955_s11 }
   0x7   :  { %17 = vsyncpa [#allocation5], 0 }
   0x8   :  { %19 = vsyncpa [#allocation5 + $0x1], 0 }
   0x9   :  { %20 = vsyncpa [#allocation8], 0 }
   0xa   :  { %22 = vsyncpa [#allocation8 + $0x1], 0 }
   0xb   :  { %23 = vsyncpa [#allocation11], 0 }
   0xc   :  { %25 = vsyncpa [#allocation11 + $0x1], 0 }
   0xd   :  { %26 = vsyncpa [#allocation14], 0 }
   0xe   :  { %28 = vsyncpa [#allocation14 + $0x1], 0 }
   0xf   :  { %29 = vsyncpa [#allocation17], 0 }
  0x10   :  { %31 = vsyncpa [#allocation17 + $0x1], 0 }
  0x11   :  { %32 = vsyncpa [#allocation6], 0 }
  0x12   :  { %34 = vsyncpa [#allocation6 + $0x1], 0 }
  0x13   :  { %35 = vsyncpa [#allocation21], 0 }
  0x14   :  { %37 = vsyncpa [#allocation21 + $0x1], 0  ;;  %s8702_s17 = smov 0   ;;  %s8704_s18 = smov 0  }
  0x15   :  { %s8706_s19 = smov 0   ;;  %s8708_s20 = smov 0  }
  0x16   :  { %s8710_s21 = smov 0   ;;  %s8712_s22 = smov 0  }
  0x17   :  { %s8714_s23 = smov 0   ;;  %s8716_s24 = smov 0  }
  0x18   :  { %s8718_s25 = smov 0   ;;  %s8720_s26 = smov 0  }
  0x19   :  { %s8722_s27 = smov 0   ;;  %s8724_s28 = smov 0  }
  0x1a   :  { %s8726_s29 = smov 0   ;;  %s8728_s30 = smov 0  }
  0x1b LB: > { %12078 = sst [smem:[#allocation34_spill]] %s8565_s17  ;;  %s8771_s12 = sadd.s32 4294967295, %s8617_s30   ;;  %s8617_s30 = sphi %s8728_s30, %s43_s30   ;;  %s8613_s29 = sphi %s8726_s29, %s12314_s29   ;;  %s8609_s28 = sphi %s8724_s28, %s12313_s28   ;;  %s8605_s27 = sphi %s8722_s27, %s12307_s27   ;;  %s8601_s26 = sphi %s8720_s26, %s12312_s26   ;;  %s8597_s25 = sphi %s8718_s25, %s12306_s25   ;;  %s8593_s24 = sphi %s8716_s24, %s12311_s24   ;;  %s8589_s23 = sphi %s8714_s23, %s12310_s23   ;;  %s8585_s22 = sphi %s8712_s22, %s12304_s22   ;;  %s8581_s21 = sphi %s8710_s21, %s12303_s21   ;;  %s8577_s20 = sphi %s8708_s20, %s12302_s20   ;;  %s8573_s19 = sphi %s8706_s19, %s12301_s19   ;;  %s8569_s18 = sphi %s8704_s18, %s12300_s18   ;;  %s8565_s17 = sphi %s8702_s17, %s12299_s17  }
  0x1c   : > { %12079 = sst [smem:[#allocation35_spill]] %s8569_s18  ;;  %s6548_s13 = sadd.s32 4294967294, %s8617_s30  }
  0x1d   : > { %12080 = sst [smem:[#allocation36_spill]] %s8573_s19  ;;  %s52_s14 = sadd.s32 1, %s8609_s28 }
  0x1e   : > { %12081 = sst [smem:[#allocation37_spill]] %s8577_s20  ;;  %s55_s15 = sadd.s32 1, %s8613_s29 }
  0x1f   : > { %12082 = sst [smem:[#allocation38_spill]] %s8581_s21  ;;  %p53_p0 = scmp.ge.s32.totalorder %s52_s14, 2 }
  0x20   : > { %12083 = sst [smem:[#allocation39_spill]] %s8585_s22  ;;  %s62_s16 = sadd.s32 1, %s8597_s25 }
  0x21   : > { %12084 = sst [smem:[#allocation40_spill]] %s8597_s25  ;;  %p69_p1 = scmp.ne.s32.totalorder %s8597_s25, %s8593_s24 }
  0x22   : > { %12085 = sst [smem:[#allocation41_spill]] %s8601_s26  ;;  %p70_p2 = scmp.eq.s32.totalorder %s8617_s30, 0 }
  0x23   : > { %12086 = sst [smem:[#allocation42_spill]] %s8605_s27  ;;  %s12316_s14 = smov (%p53_p0, %s52_s14), 0 }
  0x24   : > { %12087 = sst [smem:[#allocation43_spill]] %s8613_s29  ;;  %s12318_s15 = smov (!%p53_p0, %s55_s15), %s8613_s29 }
  0x25   : > { %12088 = sst [smem:[#allocation44_spill]] %s8617_s30  ;;  %s59_s10 = ssub.s32 %s8609_s28, %s12316_s14 }
  0x26   : > { %12089 = sst [smem:[#allocation45_spill]] %s12316_s14  ;;  %p8785_p3 = por %p70_p2, %p69_p1 }
  0x27   : > { %p57_p4 = scmp.ge.s32.totalorder %s12318_s15, 2  ;;  %p60_p5 = scmp.eq.s32.totalorder %s59_s10, 0 }
  0x28   : > { %p75_p6 = scmp.ne.s32.totalorder %s8593_s24, %s8589_s23  ;;  %p76_p7 = scmp.eq.s32.totalorder %s8771_s12, 0 }
  0x29   : > { %s12320_s15 = smov (%p57_p4, %s12318_s15), 0  ;;  %s296_s23 = sadd.s32 1, %s8585_s22 }
  0x2a   : > { %12091 = sst [smem:[#allocation46_spill]] %s12320_s15  ;;  %p8796_p8 = por %p76_p7, %p75_p6 }
  0x2b   : > { %s8794_s0 = scalar_select %p60_p5, %s8597_s25, %s62_s16  }
  0x2c   : > { %s12093_s14 = scalar_select %p8796_p8, 1, 0 }
  0x2d   : > { %12092 = sst [smem:[#allocation47_spill]] %s8794_s0  ;;  %s293_s27 = ssub.s32 %s8613_s29, %s12320_s15 }
  0x2e   : > { %p294_p9 = scmp.eq.s32.totalorder %s293_s27, 0  ;;  %p306_p10 = scmp.ne.s32.totalorder %s8585_s22, %s8581_s21 }
  0x2f   : > { %p307_p11 = scmp.eq.s32.totalorder %s8771_s12, 3  ;;  %p312_p13 = scmp.ne.s32.totalorder %s8581_s21, %s8577_s20 }
  0x30   : > { %s8807_s26 = scalar_select %p294_p9, %s8585_s22, %s296_s23  }
  0x31   : > { %p8809_p12 = por %p307_p11, %p306_p10  ;;  %p313_p0 = scmp.eq.s32.totalorder %s6548_s13, 3 }
  0x32   : > { %12094 = sst [smem:[#allocation48_spill]] %s8807_s26  ;;  %s321_s15 = sor.u32 %s293_s27, %s59_s10 }
  0x33   : > { %s12095_s16 = scalar_select %p8809_p12, 1, 0 }
  0x34   : > { %p322_p1 = scmp.eq.s32.totalorder %s321_s15, 0  ;;  %s324_s29 = sadd.s32 1, %s8573_s19 }
  0x35   : > { %12096 = sst [smem:[#allocation49_spill]] %s12095_s16  ;;  %p8816_p2 = por %p313_p0, %p312_p13 }
  0x36   : > { %p334_p4 = scmp.ne.s32.totalorder %s8573_s19, %s8569_s18  ;;  %p340_p6 = scmp.ne.s32.totalorder %s8569_s18, %s8565_s17 }
  0x37   : > { %s12097_s0 = scalar_select %p8816_p2, 1, 0 }
  0x38   : > { %s8823_s23 = scalar_select %p322_p1, %s8573_s19, %s324_s29  }
  0x39   : > { %12098 = sst [smem:[#allocation50_spill]] %s12097_s0  ;;  %p8825_p5 = por %p334_p4, %p307_p11 }
  0x3a   : > { %12099 = sst [smem:[#allocation51_spill]] %s8823_s23  ;;  %p7424_p7 = scmp.lt.s32.totalorder %s8617_s30, 4 }
  0x3b   : > { %s12100_s26 = scalar_select %p8825_p5, 1, 0 }
  0x3c   : > { %p8832_p9 = por %p340_p6, %p313_p0  ;;  %s8837_s10 = sand.u32 1, %s8597_s25  }
  0x3d   : > { %12101 = sst [smem:[#allocation52_spill]] %s12100_s26  ;;  %s8840_s27 = sshll.u32 %s8837_s10, 1 }
  0x3e   : > { %s12102_s13 = scalar_select %p8832_p9, 1, 0 }
  0x3f   : > { %s8843_s15 = sshll.u32 %s8609_s28, 5  ;;  %p8847_p10 = pnand %p7424_p7, %p8785_p3 }
  0x40   : > { %12103 = sst [smem:[#allocation53_spill]] %s12102_s13  ;;  %s8852_s22 = sand.u32 1, %s8617_s30  }
  0x41   : > { %s12104_s29 = scalar_select %p8847_p10, 1, 0 }
  0x42   : > { %s12105_s2 = sld [smem:[#allocation101_spill]]  ;;  %s384_s13 = scalar_lea.vmem [#allocation7], %s8840_s27 }
  0x43   : > { %s392_s11 = sshll.u32 %s384_s13, 4  ;;  %p8870_p0 = pneg %p8847_p10  ;;  %s8862_s11 = int_to_ptr.vmem [resolvable:$true] %s392_s11 }
  0x48   : > { %s8858_s25 = scalar_lea.hbm %s12105_s2, %s8843_s15  ;;  %s8132_s13 = scalar_lea.hbm %s12105_s2, 64 }
  0x49   : > { %s8127_s0 = scalar_lea.hbm %s8858_s25, 32  ;;  %p8133_p6 = scmp.lt.u32.totalorder %s8858_s25, %s12105_s2 }
  0x4a   : > { %p8128_p13 = scmp.ne.s32.totalorder %s8858_s25, %s8127_s0  ;;  %p8134_p7 = scmp.lt.u32.totalorder %s8132_s13, %s8127_s0 }
  0x4b   : > { %p8136_p3 = scmp.lt.u32.totalorder %s8127_s0, %s8858_s25 }
  0x4c   : > { %p8130_p1 = pnand %p8870_p0, %p8128_p13  ;;  %p8135_p11 = por %p8134_p7, %p8133_p6 }
  0x4e   : > { %p8131_p4 = pneg %p8130_p1  ;;  %p8137_p9 = por %p8136_p3, %p8135_p11 }
  0x50   : > { %p8138_p2 = pnand %p8137_p9, %p8131_p4 }
  0x52   : > { %8141 = shalt.err (!%p8138_p2)
}
  0x53   : > { %s8142_s17 = scalar_lea.vmem %s8862_s11, 32  ;;  %s8619_s19 = smov [#allocation7]  }
  0x54   : > { %p8143_p13 = scmp.ne.s32.totalorder %s8862_s11, %s8142_s17  ;;  %s8147_s23 = sshll.u32 %s8619_s19, 4  ;;  %s8148_s23 = int_to_ptr.vmem [resolvable:$false] %s8147_s23 }
  0x55   : > { %s8149_s26 = scalar_lea.vmem %s8148_s23, 64  ;;  %p8150_p5 = scmp.lt.s32.totalorder %s8862_s11, %s8148_s23 }
  0x56   : > { %p8145_p1 = pnand %p8143_p13, %p8870_p0  ;;  %p8151_p8 = scmp.lt.s32.totalorder %s8149_s26, %s8142_s17 }
  0x58   : > { %p8146_p12 = pneg %p8145_p1  ;;  %p8152_p6 = por %p8151_p8, %p8150_p5 }
  0x5a   : > { %p8153_p7 = pnand %p8152_p6, %p8146_p12 }
  0x5c   : > { %8156 = shalt.err (!%p8153_p7)
}
  0x5d   : > { %s12107_s0 = scalar_lea.sflag [#allocation8], %s8852_s22  ;;  %p12108_p2 = scmp.lt.s32.totalorder %s8617_s30, 5 }
  0x5e   : > { %7395 = dma.hbm_to_vmem [thread:$0]  (!%p8847_p10), %s8858_s25, 32, %s8862_s11, %s12107_s0  }
  0x5f   : > { %p12109_p9 = scmp.ge.s32.totalorder %s8617_s30, 1  ;;  %s12111_s4 = sld [smem:[#allocation102_spill]] }
  0x60   : > { %s424_s23 = scalar_lea.vmem [#allocation10], %s8840_s27  ;;  %s6564_s25 = sshll.u32 %s8837_s10, 10 }
  0x61   : > { %p8899_p11 = pnand %p12109_p9, %p12108_p2  ;;  %s432_s26 = sshll.u32 %s424_s23, 4  ;;  %s8910_s26 = int_to_ptr.vmem [resolvable:$true] %s432_s26 }
  0x62   : > { %s11981_s11 = scalar_lea.sflag [#allocation11], %s8852_s22 }
  0x63   : > { %s12110_s17 = scalar_select %p8899_p11, 1, 0 }
  0x65   : > { %s8907_s19 = scalar_lea.hbm %s12111_s4, %s8843_s15  ;;  %s8162_s16 = scalar_lea.hbm %s12111_s4, 64 }
  0x66   : > { %s8157_s0 = scalar_lea.hbm %s8907_s19, 32  ;;  %p8163_p3 = scmp.lt.u32.totalorder %s8907_s19, %s12111_s4 }
  0x67   : > { %p8158_p8 = scmp.ne.s32.totalorder %s8907_s19, %s8157_s0  ;;  %p8164_p4 = scmp.lt.u32.totalorder %s8162_s16, %s8157_s0 }
  0x68   : > { %p8166_p1 = scmp.lt.u32.totalorder %s8157_s0, %s8907_s19 }
  0x69   : > { %p8160_p12 = pnand %p8158_p8, %p8870_p0  ;;  %p8165_p13 = por %p8164_p4, %p8163_p3 }
  0x6b   : > { %p8161_p5 = pneg %p8160_p12  ;;  %p8167_p6 = por %p8166_p1, %p8165_p13 }
  0x6d   : > { %p8168_p7 = pnand %p8167_p6, %p8161_p5 }
  0x6f   : > { %8171 = shalt.err (!%p8168_p7)
}
  0x70   : > { %s8172_s23 = scalar_lea.vmem %s8910_s26, 32  ;;  %s8620_s2 = smov [#allocation10]  }
  0x71   : > { %p8173_p2 = scmp.ne.s32.totalorder %s8910_s26, %s8172_s23  ;;  %s8177_s30 = sshll.u32 %s8620_s2, 4  ;;  %s8178_s30 = int_to_ptr.vmem [resolvable:$false] %s8177_s30 }
  0x72   : > { %s8179_s18 = scalar_lea.vmem %s8178_s30, 64  ;;  %p8180_p12 = scmp.lt.s32.totalorder %s8910_s26, %s8178_s30 }
  0x73   : > { %p8175_p9 = pnand %p8173_p2, %p8870_p0  ;;  %p8181_p11 = scmp.lt.s32.totalorder %s8179_s18, %s8172_s23 }
  0x75   : > { %p8176_p8 = pneg %p8175_p9  ;;  %p8182_p3 = por %p8181_p11, %p8180_p12 }
  0x77   : > { %p8183_p4 = pnand %p8182_p3, %p8176_p8 }
  0x79   : > { %8186 = shalt.err (!%p8183_p4)
}
  0x7a   : > { %7401 = dma.hbm_to_vmem [thread:$0]  (!%p8847_p10), %s8907_s19, 32, %s8910_s26, %s11981_s11  }
  0x7b   : > { %s6974_s0 = sshll.u32 %s8609_s28, 14  ;;  %s12112_s6 = sld [smem:[#allocation103_spill]] }
  0x7c   : > { %s462_s2 = scalar_lea.vmem [#allocation13], %s6564_s25  ;;  %s459_s18 = scalar_lea.sflag [#allocation14], %s8852_s22 }
  0x7d   : > { %s469_s30 = sshll.u32 %s462_s2, 4  ;;  %s8947_s30 = int_to_ptr.vmem [resolvable:$true] %s469_s30 }
  0x81   : > { %s8943_s23 = scalar_lea.hbm %s12112_s6, %s6974_s0  ;;  %s8192_s16 = scalar_lea.hbm %s12112_s6, 32768 }
  0x82   : > { %s8187_s4 = scalar_lea.hbm %s8943_s23, 16384  ;;  %p8193_p1 = scmp.lt.u32.totalorder %s8943_s23, %s12112_s6 }
  0x83   : > { %p8188_p11 = scmp.ne.s32.totalorder %s8943_s23, %s8187_s4  ;;  %p8194_p6 = scmp.lt.u32.totalorder %s8192_s16, %s8187_s4 }
  0x84   : > { %p8196_p2 = scmp.lt.u32.totalorder %s8187_s4, %s8943_s23 }
  0x85   : > { %p8190_p5 = pnand %p8188_p11, %p8870_p0  ;;  %p8195_p7 = por %p8194_p6, %p8193_p1 }
  0x87   : > { %p8191_p13 = pneg %p8190_p5  ;;  %p8197_p9 = por %p8196_p2, %p8195_p7 }
  0x89   : > { %p8198_p8 = pnand %p8197_p9, %p8191_p13 }
  0x8b   : > { %8201 = shalt.err (!%p8198_p8)
}
  0x8c   : > { %s8202_s2 = scalar_lea.vmem %s8947_s30, 16384  ;;  %s8621_s19 = smov [#allocation13]  }
  0x8d   : > { %p8203_p12 = scmp.ne.s32.totalorder %s8947_s30, %s8202_s2  ;;  %s8207_s26 = sshll.u32 %s8621_s19, 4  ;;  %s8208_s26 = int_to_ptr.vmem [resolvable:$false] %s8207_s26 }
  0x8e   : > { %s8209_s11 = scalar_lea.vmem %s8208_s26, 32768  ;;  %p8210_p11 = scmp.lt.s32.totalorder %s8947_s30, %s8208_s26 }
  0x8f   : > { %p8205_p3 = pnand %p8203_p12, %p8870_p0  ;;  %p8211_p5 = scmp.lt.s32.totalorder %s8209_s11, %s8202_s2 }
  0x91   : > { %p8206_p4 = pneg %p8205_p3  ;;  %p8212_p1 = por %p8211_p5, %p8210_p11 }
  0x93   : > { %p8213_p6 = pnand %p8212_p1, %p8206_p4 }
  0x95   : > { %8216 = shalt.err (!%p8213_p6)
}
  0x96   : > { %s8622_s4 = smov 512   ;;  %s8623_s16 = smov 32  }
  0x97   : > { %7407 = dma.hbm_to_vmem [thread:$0]  (!%p8847_p10), %s8943_s23, 16384, %s8947_s30, %s459_s18, %s8622_s4, %s8622_s4, %s8623_s16  }
  0x98   : > { %s8978_s2 = scalar_lea.hbm %s11952_s8, %s6974_s0  ;;  %s502_s26 = scalar_lea.vmem [#allocation16], %s6564_s25 }
  0x99   : > { %s509_s11 = sshll.u32 %s502_s26, 4  ;;  %s11984_s6 = scalar_lea.sflag [#allocation17], %s8852_s22  ;;  %s8982_s11 = int_to_ptr.vmem [resolvable:$true] %s509_s11 }
  0x9a   : > { %s8217_s21 = scalar_lea.hbm %s8978_s2, 16384  ;;  %s8222_s0 = scalar_lea.hbm %s11952_s8, 32768 }
  0x9b   : > { %p8218_p13 = scmp.ne.s32.totalorder %s8978_s2, %s8217_s21  ;;  %p8223_p9 = scmp.lt.u32.totalorder %s8978_s2, %s11952_s8 }
  0x9c   : > { %p8224_p8 = scmp.lt.u32.totalorder %s8222_s0, %s8217_s21  ;;  %p8226_p3 = scmp.lt.u32.totalorder %s8217_s21, %s8978_s2 }
  0x9d   : > { %p8220_p7 = pnand %p8218_p13, %p8870_p0 }
  0x9e   : > { %p8225_p12 = por %p8224_p8, %p8223_p9 }
  0x9f   : > { %p8221_p2 = pneg %p8220_p7 }
  0xa0   : > { %p8227_p4 = por %p8226_p3, %p8225_p12 }
  0xa2   : > { %p8228_p11 = pnand %p8227_p4, %p8221_p2 }
  0xa4   : > { %8231 = shalt.err (!%p8228_p11)
}
  0xa5   : > { %s8232_s25 = scalar_lea.vmem %s8982_s11, 16384  ;;  %s8624_s13 = smov [#allocation16]  }
  0xa6   : > { %p8233_p5 = scmp.ne.s32.totalorder %s8982_s11, %s8232_s25  ;;  %s8237_s19 = sshll.u32 %s8624_s13, 4  ;;  %s8238_s19 = int_to_ptr.vmem [resolvable:$false] %s8237_s19 }
  0xa7   : > { %s8239_s26 = scalar_lea.vmem %s8238_s19, 32768  ;;  %p8240_p13 = scmp.lt.s32.totalorder %s8982_s11, %s8238_s19 }
  0xa8   : > { %p8235_p1 = pnand %p8233_p5, %p8870_p0  ;;  %p8241_p7 = scmp.lt.s32.totalorder %s8239_s26, %s8232_s25 }
  0xaa   : > { %p8236_p6 = pneg %p8235_p1  ;;  %p8242_p9 = por %p8241_p7, %p8240_p13 }
  0xac   : > { %p8243_p8 = pnand %p8242_p9, %p8236_p6 }
  0xae   : > { %8246 = shalt.err (!%p8243_p8)
}
  0xaf   : > { %s8625_s21 = smov 128   ;;  %s8626_s23 = smov 8  }
  0xb0   : > { %7413 = dma.hbm_to_vmem [thread:$0]  (!%p8847_p10), %s8978_s2, 16384, %s8982_s11, %s11984_s6, %s8625_s21, %s8625_s21, %s8626_s23  }
  0xb1   : > { %s9012_s4 = scalar_lea.hbm %s11945_s1, %s8843_s15  ;;  %s365_s16 = scalar_lea.vmem [#allocation4], %s8840_s27 }
  0xb2   : > { %s373_s25 = sshll.u32 %s365_s16, 4  ;;  %s7364_s13 = smul.u32 768, %s8837_s10  ;;  %s9015_s25 = int_to_ptr.vmem [resolvable:$true] %s373_s25 }
  0xb3   : > { %s362_s19 = scalar_lea.sflag [#allocation5], %s8837_s10  ;;  %s8247_s26 = scalar_lea.hbm %s9012_s4, 32 }
  0xb4   : > { %p8248_p2 = scmp.ne.s32.totalorder %s9012_s4, %s8247_s26  ;;  %s8252_s21 = scalar_lea.hbm %s11945_s1, 64 }
  0xb5   : > { %p8253_p4 = scmp.lt.u32.totalorder %s9012_s4, %s11945_s1  ;;  %p8254_p11 = scmp.lt.u32.totalorder %s8252_s21, %s8247_s26 }
  0xb6   : > { %p8250_p12 = pnand %p8248_p2, %p8870_p0  ;;  %p8256_p1 = scmp.lt.u32.totalorder %s8247_s26, %s9012_s4 }
  0xb7   : > { %p8255_p5 = por %p8254_p11, %p8253_p4 }
  0xb8   : > { %p8251_p3 = pneg %p8250_p12 }
  0xb9   : > { %p8257_p6 = por %p8256_p1, %p8255_p5 }
  0xbb   : > { %p8258_p13 = pnand %p8257_p6, %p8251_p3 }
  0xbd   : > { %8261 = shalt.err (!%p8258_p13)
}
  0xbe   : > { %s8262_s0 = scalar_lea.vmem %s9015_s25, 32  ;;  %s8627_s16 = smov [#allocation4]  }
  0xbf   : > { %p8263_p7 = scmp.ne.s32.totalorder %s9015_s25, %s8262_s0  ;;  %s8267_s2 = sshll.u32 %s8627_s16, 4  ;;  %s8268_s2 = int_to_ptr.vmem [resolvable:$false] %s8267_s2 }
  0xc0   : > { %s8269_s11 = scalar_lea.vmem %s8268_s2, 64  ;;  %p8270_p2 = scmp.lt.s32.totalorder %s9015_s25, %s8268_s2 }
  0xc1   : > { %p8265_p9 = pnand %p8263_p7, %p8870_p0  ;;  %p8271_p12 = scmp.lt.s32.totalorder %s8269_s11, %s8262_s0 }
  0xc3   : > { %p8266_p8 = pneg %p8265_p9  ;;  %p8272_p4 = por %p8271_p12, %p8270_p2 }
  0xc5   : > { %p8273_p11 = pnand %p8272_p4, %p8266_p8 }
  0xc7   : > { %8276 = shalt.err (!%p8273_p11)
}
  0xc8   : > { %7392 = dma.hbm_to_vmem [thread:$0]  (!%p8847_p10), %s9012_s4, 32, %s9015_s25, %s362_s19  }
  0xc9   : > { %s7365_s26 = smul.u32 12288, %s8609_s28  ;;  %s403_s21 = scalar_lea.vmem [#allocation9], %s7364_s13 }
  0xca   : > { %s410_s23 = sshll.u32 %s403_s21, 4  ;;  %s8282_s13 = scalar_lea.hbm %s11947_s3, 24576  ;;  %s9048_s23 = int_to_ptr.vmem [resolvable:$true] %s410_s23 }
  0xcb   : > { %s9046_s2 = scalar_lea.hbm %s11947_s3, %s7365_s26 }
  0xcc   : > { %s8277_s0 = scalar_lea.hbm %s9046_s2, 12288  ;;  %p8283_p6 = scmp.lt.u32.totalorder %s9046_s2, %s11947_s3 }
  0xcd   : > { %p8278_p3 = scmp.ne.s32.totalorder %s9046_s2, %s8277_s0  ;;  %p8284_p13 = scmp.lt.u32.totalorder %s8282_s13, %s8277_s0 }
  0xce   : > { %p8286_p9 = scmp.lt.u32.totalorder %s8277_s0, %s9046_s2 }
  0xcf   : > { %p8280_p5 = pnand %p8278_p3, %p8870_p0  ;;  %p8285_p7 = por %p8284_p13, %p8283_p6 }
  0xd1   : > { %p8281_p1 = pneg %p8280_p5  ;;  %p8287_p8 = por %p8286_p9, %p8285_p7 }
  0xd3   : > { %p8288_p2 = pnand %p8287_p8, %p8281_p1 }
  0xd5   : > { %8291 = shalt.err (!%p8288_p2)
}
  0xd6   : > { %s8292_s26 = scalar_lea.vmem %s9048_s23, 12288  ;;  %s8628_s21 = smov [#allocation9]  }
  0xd7   : > { %p8293_p12 = scmp.ne.s32.totalorder %s9048_s23, %s8292_s26  ;;  %s8297_s30 = sshll.u32 %s8628_s21, 4  ;;  %s8298_s30 = int_to_ptr.vmem [resolvable:$false] %s8297_s30 }
  0xd8   : > { %s8299_s16 = scalar_lea.vmem %s8298_s30, 24576  ;;  %p8300_p3 = scmp.lt.s32.totalorder %s9048_s23, %s8298_s30 }
  0xd9   : > { %p8295_p4 = pnand %p8293_p12, %p8870_p0  ;;  %p8301_p5 = scmp.lt.s32.totalorder %s8299_s16, %s8292_s26 }
  0xdb   : > { %p8296_p11 = pneg %p8295_p4  ;;  %p8302_p6 = por %p8301_p5, %p8300_p3 }
  0xdd   : > { %p8303_p13 = pnand %p8302_p6, %p8296_p11 }
  0xdf   : > { %8306 = shalt.err (!%p8303_p13)
}
  0xe0   : > { %s8629_s0 = smov 384   ;;  %s8630_s4 = smov 24  }
  0xe1   : > { %s12113_s25 = scalar_lea.sflag [#allocation8], %s8852_s22  ;;  %s9077_s11 = scalar_lea.hbm %s11949_s5, %s8843_s15 }
  0xe2   : > { %7398 = dma.hbm_to_vmem [thread:$0]  (!%p8847_p10), %s9046_s2, 12288, %s9048_s23, %s12113_s25, %s8629_s0, %s8629_s0, %s8630_s4  }
  0xe3   : > { %s443_s26 = scalar_lea.vmem [#allocation12], %s8840_s27  ;;  %s6567_s30 = sshll.u32 %s8837_s10, 3 }
  0xe4   : > { %s451_s21 = sshll.u32 %s443_s26, 4  ;;  %s8307_s16 = scalar_lea.hbm %s9077_s11, 32  ;;  %s452_s21 = int_to_ptr.vmem [resolvable:$true] %s451_s21 }
  0xe5   : > { %p8308_p1 = scmp.ne.s32.totalorder %s9077_s11, %s8307_s16  ;;  %s8312_s2 = scalar_lea.hbm %s11949_s5, 64 }
  0xe6   : > { %p8313_p8 = scmp.lt.u32.totalorder %s9077_s11, %s11949_s5  ;;  %p8314_p2 = scmp.lt.u32.totalorder %s8312_s2, %s8307_s16 }
  0xe7   : > { %p8310_p7 = pnand %p8308_p1, %p8870_p0  ;;  %p8316_p4 = scmp.lt.u32.totalorder %s8307_s16, %s9077_s11 }
  0xe8   : > { %p8315_p12 = por %p8314_p2, %p8313_p8 }
  0xe9   : > { %p8311_p9 = pneg %p8310_p7 }
  0xea   : > { %p8317_p11 = por %p8316_p4, %p8315_p12 }
  0xec   : > { %p8318_p3 = pnand %p8317_p11, %p8311_p9 }
  0xee   : > { %8321 = shalt.err (!%p8318_p3)
}
  0xef   : > { %s8322_s25 = scalar_lea.vmem %s452_s21, 32  ;;  %s8631_s13 = smov [#allocation12]  }
  0xf0   : > { %p8323_p5 = scmp.ne.s32.totalorder %s452_s21, %s8322_s25  ;;  %s8327_s19 = sshll.u32 %s8631_s13, 4  ;;  %s8328_s19 = int_to_ptr.vmem [resolvable:$false] %s8327_s19 }
  0xf1   : > { %s8329_s6 = scalar_lea.vmem %s8328_s19, 64  ;;  %p8330_p1 = scmp.lt.s32.totalorder %s452_s21, %s8328_s19 }
  0xf2   : > { %p8325_p6 = pnand %p8323_p5, %p8870_p0  ;;  %p8331_p7 = scmp.lt.s32.totalorder %s8329_s6, %s8322_s25 }
  0xf4   : > { %p8326_p13 = pneg %p8325_p6  ;;  %p8332_p10 = por %p8331_p7, %p8330_p1 }
  0xf6   : > { %p8333_p2 = pnand %p8332_p10, %p8326_p13 }
  0xf8   : > { %8336 = shalt.err (!%p8333_p2)
}
  0xf9   : > { %p12114_p8 = scmp.ne.s32.totalorder %s12104_s29, 0  ;;  %s12115_s26 = scalar_lea.sflag [#allocation11], %s8852_s22 }
  0xfa   : > { %s6975_s16 = sshll.u32 %s8609_s28, 7  ;;  %s483_s4 = scalar_lea.vmem [#allocation15], %s6567_s30 }
  0xfb   : > { %7404 = dma.hbm_to_vmem [thread:$0]  (!%p12114_p8), %s9077_s11, 32, %s452_s21, %s12115_s26  }
  0xfc   : > { %s9104_s0 = scalar_lea.hbm %s11951_s7, %s6975_s16  ;;  %s491_s25 = sshll.u32 %s483_s4, 4  ;;  %s492_s25 = int_to_ptr.vmem [resolvable:$true] %s491_s25 }
  0xfd   : > { %s8337_s13 = scalar_lea.hbm %s9104_s0, 128  ;;  %s8342_s19 = scalar_lea.hbm %s11951_s7, 256 }
  0xfe   : > { %p8338_p10 = scmp.ne.s32.totalorder %s9104_s0, %s8337_s13  ;;  %p8343_p4 = scmp.lt.u32.totalorder %s9104_s0, %s11951_s7 }
  0xff   : > { %p8344_p11 = scmp.lt.u32.totalorder %s8342_s19, %s8337_s13  ;;  %p8346_p5 = scmp.lt.u32.totalorder %s8337_s13, %s9104_s0 }
 0x100   : > { %p8340_p9 = pnand %p8338_p10, %p8870_p0 }
 0x101   : > { %p8345_p3 = por %p8344_p11, %p8343_p4 }
 0x102   : > { %p8341_p12 = pneg %p8340_p9 }
 0x103   : > { %p8347_p6 = por %p8346_p5, %p8345_p3 }
 0x105   : > { %p8348_p13 = pnand %p8347_p6, %p8341_p12 }
 0x107   : > { %8351 = shalt.err (!%p8348_p13)
}
 0x108   : > { %s8352_s10 = scalar_lea.vmem %s492_s25, 128  ;;  %s8632_s30 = smov [#allocation15]  }
 0x109   : > { %p8353_p1 = scmp.ne.s32.totalorder %s492_s25, %s8352_s10  ;;  %s8357_s16 = sshll.u32 %s8632_s30, 4  ;;  %s8358_s16 = int_to_ptr.vmem [resolvable:$false] %s8357_s16 }
 0x10a   : > { %s8359_s23 = scalar_lea.vmem %s8358_s16, 256  ;;  %p8360_p10 = scmp.lt.s32.totalorder %s492_s25, %s8358_s16 }
 0x10b   : > { %p8355_p7 = pnand %p8353_p1, %p8870_p0  ;;  %p8361_p9 = scmp.lt.s32.totalorder %s8359_s23, %s8352_s10 }
 0x10d   : > { %p8356_p2 = pneg %p8355_p7  ;;  %p8362_p8 = por %p8361_p9, %p8360_p10 }
 0x10f   : > { %p8363_p4 = pnand %p8362_p8, %p8356_p2 }
 0x111   : > { %8366 = shalt.err (!%p8363_p4)
}
 0x112   : > { %p12116_p11 = scmp.ne.s32.totalorder %s12104_s29, 0  ;;  %s9131_s13 = scalar_lea.hbm %s11953_s9, %s8843_s15 }
 0x113   : > { %s523_s11 = scalar_lea.vmem [#allocation18], %s8840_s27  ;;  %s8367_s19 = scalar_lea.hbm %s9131_s13, 32 }
 0x114   : > { %7410 = dma.hbm_to_vmem [thread:$0]  (!%p12116_p11), %s9104_s0, 128, %s492_s25, %s459_s18  }
 0x115   : > { %s531_s21 = sshll.u32 %s523_s11, 4  ;;  %p8368_p8 = scmp.ne.s32.totalorder %s9131_s13, %s8367_s19  ;;  %s532_s21 = int_to_ptr.vmem [resolvable:$true] %s531_s21 }
 0x116   : > { %s8372_s18 = scalar_lea.hbm %s11953_s9, 64  ;;  %p8373_p5 = scmp.lt.u32.totalorder %s9131_s13, %s11953_s9 }
 0x117   : > { %p8370_p12 = pnand %p8368_p8, %p8870_p0  ;;  %p8374_p6 = scmp.lt.u32.totalorder %s8372_s18, %s8367_s19 }
 0x118   : > { %p8376_p1 = scmp.lt.u32.totalorder %s8367_s19, %s9131_s13 }
 0x119   : > { %p8371_p3 = pneg %p8370_p12  ;;  %p8375_p13 = por %p8374_p6, %p8373_p5 }
 0x11b   : > { %p8377_p7 = por %p8376_p1, %p8375_p13 }
 0x11d   : > { %p8378_p2 = pnand %p8377_p7, %p8371_p3 }
 0x11f   : > { %8381 = shalt.err (!%p8378_p2)
}
 0x120   : > { %s8382_s27 = scalar_lea.vmem %s532_s21, 32  ;;  %s8633_s15 = smov [#allocation18]  }
 0x121   : > { %p8383_p10 = scmp.ne.s32.totalorder %s532_s21, %s8382_s27  ;;  %s8387_s10 = sshll.u32 %s8633_s15, 4  ;;  %s8388_s10 = int_to_ptr.vmem [resolvable:$false] %s8387_s10 }
 0x122   : > { %s8389_s30 = scalar_lea.vmem %s8388_s10, 64  ;;  %p8390_p8 = scmp.lt.s32.totalorder %s532_s21, %s8388_s10 }
 0x123   : > { %p8385_p9 = pnand %p8383_p10, %p8870_p0  ;;  %p8391_p12 = scmp.lt.s32.totalorder %s8389_s30, %s8382_s27 }
 0x125   : > { %p8386_p4 = pneg %p8385_p9  ;;  %p8392_p11 = por %p8391_p12, %p8390_p8 }
 0x127   : > { %p8393_p5 = pnand %p8392_p11, %p8386_p4 }
 0x129   : > { %8396 = shalt.err (!%p8393_p5)
}
 0x12a   : > { %p12117_p6 = scmp.ne.s32.totalorder %s12104_s29, 0  ;;  %s12118_s16 = scalar_lea.sflag [#allocation17], %s8852_s22 }
 0x12b   : > { %p12119_p3 = scmp.ne.s32.totalorder %s12110_s17, 0 }
 0x12c   : > { %7416 = dma.hbm_to_vmem [thread:$0]  (!%p12117_p6), %s9131_s13, 32, %s532_s21, %s12118_s16  }
 0x12d   : > { %540 = sbr.rel (%p12119_p3) target bundleno = 2581 (0xa15), region = 56 }
 0x134   : > { %s542_s20 = sand.u32 1, %s8593_s24   ;;  %p12120_p0 = scmp.ne.s32.totalorder %s12093_s14, 0 }
 0x135   : > { %s9156_s23 = sshll.u32 %s542_s20, 1  ;;  %s543_s2 = scalar_lea.sflag [#allocation5], %s542_s20 }
 0x136   : > { %8534 = dma.done.wait (%p12120_p0), %s543_s2, 32  }
 0x137   : > { %8536 = vsyncadd (%p12120_p0), %s543_s2, 4294967264  ;;  %s551_s22 = sand.u32 1, %s8771_s12  }
 0x138   : > { %s552_s29 = scalar_lea.sflag [#allocation8], %s551_s22 }
 0x139   : > { %8538 = dma.done.wait (%p12120_p0), %s552_s29, 12320  }
 0x13a   : > { %8540 = vsyncadd (%p12120_p0), %s552_s29, 4294954976  ;;  %s7366_s13 = smul.u32 768, %s542_s20  ;;  %s570_s21 = scalar_lea.sflag [#allocation11], %s551_s22 }
 0x13c   : > { %s9169_s11 = scalar_lea.vmem [#allocation9], %s7366_s13 }
 0x13d   : > { %8542 = dma.done.wait (%p12120_p0), %s570_s21, 64  }
 0x13e   : > { %8544 = vsyncadd (%p12120_p0), %s570_s21, 4294967232  ;;  %s6581_s12 = sshll.u32 %s542_s20, 10  ;;  %s588_s26 = scalar_lea.sflag [#allocation14], %s551_s22 }
 0x13f   : > { %s9177_s18 = scalar_lea.vmem [#allocation13], %s6581_s12 }
 0x140   : > { %8546 = dma.done.wait (%p12120_p0), %s588_s26, 16512  }
 0x141   : > { %8548 = vsyncadd (%p12120_p0), %s588_s26, 4294950784  ;;  %s6582_s0 = sshll.u32 %s542_s20, 3  ;;  %s606_s27 = scalar_lea.sflag [#allocation17], %s551_s22 }
 0x142   : > { %s9183_s25 = scalar_lea.vmem [#allocation15], %s6582_s0  ;;  %s9185_s15 = scalar_lea.vmem [#allocation16], %s6581_s12 }
 0x143   : > { %8550 = dma.done.wait (%p12120_p0), %s606_s27, 16416  }
 0x144   : > { %8552 = vsyncadd (%p12120_p0), %s606_s27, 4294950880  ;;  %s12121_s10 = sld [smem:[#allocation38_spill]]  ;;  %s12122_s30 = sld [smem:[#allocation35_spill]] }
 0x145   : > { %s12123_s12 = sld [smem:[#allocation41_spill]] }
 0x14a   : > { %s11987_s16 = sand.u32 1, %s12121_s10   ;;  %s11988_s29 = sand.u32 1, %s12122_s30  }
 0x14b   : > { %s6585_s2 = sshll.u32 %s11987_s16, 8  ;;  %s6586_s20 = sshll.u32 %s11988_s29, 6 }
 0x14c   : > { %s9198_s22 = scalar_lea.vmem [#allocation19], %s6585_s2  ;;  %s9200_s21 = scalar_lea.vmem [#allocation20], %s6586_s20 }
 0x14d   : > { %p6587_p11 = scmp.ne.s32.totalorder %s12123_s12, 0 }
 0x14e   : > { %s12124_s14 = sld [smem:[#allocation42_spill]] (!%p6587_p11)  ;;  %s719_s0 = sshll.u32 (!%p6587_p11), %s9198_s22, 4  ;;  %s720_s0 = int_to_ptr.vmem [resolvable:$true] %s719_s0 }
 0x14f   : > { %705 = sbr.rel (%p6587_p11) target bundleno = 389 (0x185), region = 96  ;;  %s12125_s19 = sld [smem:[#allocation100_spill]] (!%p6587_p11) }
 0x154   : > { %s6588_s26 = sshll.u32 (!%p6587_p11), %s12124_s14, 7 }
 0x155   : > { %s707_s27 = sshra.s32 (!%p6587_p11), %s6588_s26, 3  ;;  %s12126_s4 = smov (!%p6587_p11), %s12125_s19 }
 0x156   : > { %s6978_s6 = sshll.u32 %s707_s27, 8  ;;  %s8399_s20 = scalar_lea.hbm %s12126_s4, 8192 }
 0x157   : > { %s711_s30 = scalar_lea.hbm %s12125_s19, %s6978_s6 }
 0x158   : > { %s8397_s29 = scalar_lea.hbm %s711_s30, 4096  ;;  %p8400_p1 = scmp.lt.u32.totalorder %s711_s30, %s12126_s4 }
 0x159   : > { %p8398_p13 = scmp.ne.s32.totalorder %s711_s30, %s8397_s29  ;;  %p8401_p7 = scmp.lt.u32.totalorder %s8399_s20, %s8397_s29 }
 0x15a   : > { %p8403_p10 = scmp.lt.u32.totalorder %s8397_s29, %s711_s30 }
 0x15b   : > { %p8402_p2 = por %p8401_p7, %p8400_p1 }
 0x15d   : > { %p8404_p9 = por %p8403_p10, %p8402_p2 }
 0x15f   : > { %p8405_p4 = pnand %p8404_p9, %p8398_p13 }
 0x161   : > { %8408 = shalt.err (!%p8405_p4)  }
 0x162   : > { %s8409_s14 = scalar_lea.vmem %s720_s0, 4096  ;;  %s8634_s16 = smov [#allocation19]  }
 0x163   : > { %p8410_p8 = scmp.ne.s32.totalorder %s720_s0, %s8409_s14  ;;  %s8411_s19 = sshll.u32 %s8634_s16, 4  ;;  %s8412_s19 = int_to_ptr.vmem [resolvable:$false] %s8411_s19 }
 0x164   : > { %s8413_s6 = scalar_lea.vmem %s8412_s19, 8192  ;;  %p8414_p12 = scmp.lt.s32.totalorder %s720_s0, %s8412_s19 }
 0x165   : > { %p8415_p5 = scmp.lt.s32.totalorder %s8413_s6, %s8409_s14 }
 0x167   : > { %p8416_p6 = por %p8415_p5, %p8414_p12 }
 0x169   : > { %p8417_p3 = pnand %p8416_p6, %p8410_p8 }
 0x16b   : > { %8420 = shalt.err (!%p8417_p3)  }
 0x16c   : > { %722 = dma.hbm_to_vmem [thread:$0]  %s711_s30, 4096, %s720_s0, [#allocation3] }
 0x16d   : > { %8553 = dma.done.wait [#allocation3], 4096 }
 0x16e   : > { %8554 = vsyncadd [#allocation3], 4294963200  ;;  %v727_v0 = vlaneseq  ;;  %v8635_v6 = vmov 0.0  }
 0x170   : > { %v9214_v1 = vshrl.u32 %v727_v0, 7  ;;  %v9216_v2 = vand.u32 127, %v727_v0 }
 0x172   : > { %vm746_vm0 = vcmp.lt.s32.totalorder %v9214_v1, %v9216_v2  ;;  %v729_v3 = vadd.s32 8, %v9214_v1  ;;  %v730_v4 = vadd.s32 16, %v9214_v1  ;;  %v9223_v5 = vadd.s32 16, %v9216_v2 }
 0x173   : > { %v795_v7 = vsel %vm746_vm0, -1e+30, %v8635_v6  ;;  %v731_v8 = vadd.s32 24, %v9214_v1  ;;  %v732_v9 = vadd.s32 32, %v9214_v1  ;;  %v733_v10 = vadd.s32 40, %v9214_v1 }
 0x174   : > { %811 = vst [vmem:[#allocation2] sm:$0xff] %v795_v7  ;;  %vm747_vm1 = vcmp.lt.s32.totalorder %v729_v3, %v9216_v2  ;;  %vm748_vm2 = vcmp.lt.s32.totalorder %v730_v4, %v9216_v2  ;;  %vm765_vm3 = vcmp.gt.s32.totalorder %v730_v4, %v9223_v5  ;;  %v734_v11 = vadd.s32 48, %v9214_v1 }
 0x175   : > { %v796_v12 = vsel %vm747_vm1, -1e+30, %v8635_v6  ;;  %vm781_vm4 = vmor %vm748_vm2, %vm765_vm3  ;;  %vm749_vm5 = vcmp.lt.s32.totalorder %v731_v8, %v9216_v2  ;;  %vm766_vm6 = vcmp.gt.s32.totalorder %v731_v8, %v9223_v5  ;;  %vm750_vm7 = vcmp.lt.s32.totalorder %v732_v9, %v9216_v2 }
 0x176   : > { %812 = vst [vmem:[#allocation2 + $0x8] sm:$0xff] %v796_v12  ;;  %v797_v13 = vsel %vm781_vm4, -1e+30, %v8635_v6  ;;  %vm782_vm8 = vmor %vm749_vm5, %vm766_vm6  ;;  %vm767_vm9 = vcmp.gt.s32.totalorder %v732_v9, %v9223_v5  ;;  %vm751_vm10 = vcmp.lt.s32.totalorder %v733_v10, %v9216_v2  ;;  %vm768_vm11 = vcmp.gt.s32.totalorder %v733_v10, %v9223_v5 }
 0x177   : > { %813 = vst [vmem:[#allocation2 + $0x10] sm:$0xff] %v797_v13  ;;  %v798_v14 = vsel %vm782_vm8, -1e+30, %v8635_v6  ;;  %vm783_vm12 = vmor %vm750_vm7, %vm767_vm9  ;;  %vm752_vm13 = vcmp.lt.s32.totalorder %v734_v11, %v9216_v2  ;;  %vm769_vm14 = vcmp.gt.s32.totalorder %v734_v11, %v9223_v5  ;;  %v735_v15 = vadd.s32 56, %v9214_v1 }
 0x178   : > { %814 = vst [vmem:[#allocation2 + $0x18] sm:$0xff] %v798_v14  ;;  %v799_v16 = vsel %vm783_vm12, -1e+30, %v8635_v6  ;;  %vm784_vm15 = vmor %vm751_vm10, %vm768_vm11  ;;  %v736_v17 = vadd.s32 64, %v9214_v1  ;;  %v737_v18 = vadd.s32 72, %v9214_v1  ;;  %v738_v19 = vadd.s32 80, %v9214_v1 }
 0x179   : > { %815 = vst [vmem:[#allocation2 + $0x20] sm:$0xff] %v799_v16  ;;  %v800_v20 = vsel %vm784_vm15, -1e+30, %v8635_v6  ;;  %vm785_vm0 = vmor %vm752_vm13, %vm769_vm14  ;;  %vm753_vm1 = vcmp.lt.s32.totalorder %v735_v15, %v9216_v2  ;;  %vm770_vm2 = vcmp.gt.s32.totalorder %v735_v15, %v9223_v5  ;;  %v739_v21 = vadd.s32 88, %v9214_v1 }
 0x17a   : > { %816 = vst [vmem:[#allocation2 + $0x28] sm:$0xff] %v800_v20  ;;  %v801_v22 = vsel %vm785_vm0, -1e+30, %v8635_v6  ;;  %vm786_vm3 = vmor %vm753_vm1, %vm770_vm2  ;;  %vm754_vm4 = vcmp.lt.s32.totalorder %v736_v17, %v9216_v2  ;;  %vm771_vm5 = vcmp.gt.s32.totalorder %v736_v17, %v9223_v5  ;;  %vm755_vm6 = vcmp.lt.s32.totalorder %v737_v18, %v9216_v2 }
 0x17b   : > { %817 = vst [vmem:[#allocation2 + $0x30] sm:$0xff] %v801_v22  ;;  %v802_v23 = vsel %vm786_vm3, -1e+30, %v8635_v6  ;;  %vm787_vm7 = vmor %vm754_vm4, %vm771_vm5  ;;  %vm772_vm8 = vcmp.gt.s32.totalorder %v737_v18, %v9223_v5  ;;  %vm756_vm9 = vcmp.lt.s32.totalorder %v738_v19, %v9216_v2  ;;  %vm773_vm10 = vcmp.gt.s32.totalorder %v738_v19, %v9223_v5 }
 0x17c   : > { %818 = vst [vmem:[#allocation2 + $0x38] sm:$0xff] %v802_v23  ;;  %v803_v24 = vsel %vm787_vm7, -1e+30, %v8635_v6  ;;  %vm788_vm11 = vmor %vm755_vm6, %vm772_vm8  ;;  %vm757_vm12 = vcmp.lt.s32.totalorder %v739_v21, %v9216_v2  ;;  %vm774_vm13 = vcmp.gt.s32.totalorder %v739_v21, %v9223_v5  ;;  %v740_v25 = vadd.s32 96, %v9214_v1 }
 0x17d   : > { %819 = vst [vmem:[#allocation2 + $0x40] sm:$0xff] %v803_v24  ;;  %v804_v26 = vsel %vm788_vm11, -1e+30, %v8635_v6  ;;  %vm789_vm14 = vmor %vm756_vm9, %vm773_vm10  ;;  %v741_v27 = vadd.s32 104, %v9214_v1  ;;  %v742_v28 = vadd.s32 112, %v9214_v1  ;;  %v743_v29 = vadd.s32 120, %v9214_v1 }
 0x17e   : > { %820 = vst [vmem:[#allocation2 + $0x48] sm:$0xff] %v804_v26  ;;  %v805_v30 = vsel %vm789_vm14, -1e+30, %v8635_v6  ;;  %vm790_vm15 = vmor %vm757_vm12, %vm774_vm13  ;;  %vm758_vm0 = vcmp.lt.s32.totalorder %v740_v25, %v9216_v2  ;;  %vm775_vm1 = vcmp.gt.s32.totalorder %v740_v25, %v9223_v5 }
 0x17f   : > { %821 = vst [vmem:[#allocation2 + $0x50] sm:$0xff] %v805_v30  ;;  %v806_v31 = vsel %vm790_vm15, -1e+30, %v8635_v6  ;;  %vm791_vm2 = vmor %vm758_vm0, %vm775_vm1  ;;  %vm759_vm3 = vcmp.lt.s32.totalorder %v741_v27, %v9216_v2  ;;  %vm776_vm4 = vcmp.gt.s32.totalorder %v741_v27, %v9223_v5  ;;  %vm760_vm5 = vcmp.lt.s32.totalorder %v742_v28, %v9216_v2 }
 0x180   : > { %822 = vst [vmem:[#allocation2 + $0x58] sm:$0xff] %v806_v31  ;;  %v807_v32 = vsel %vm791_vm2, -1e+30, %v8635_v6  ;;  %vm792_vm6 = vmor %vm759_vm3, %vm776_vm4  ;;  %vm777_vm7 = vcmp.gt.s32.totalorder %v742_v28, %v9223_v5  ;;  %vm761_vm8 = vcmp.lt.s32.totalorder %v743_v29, %v9216_v2  ;;  %vm778_vm9 = vcmp.gt.s32.totalorder %v743_v29, %v9223_v5 }
 0x181   : > { %823 = vst [vmem:[#allocation2 + $0x60] sm:$0xff] %v807_v32  ;;  %v808_v33 = vsel %vm792_vm6, -1e+30, %v8635_v6  ;;  %vm793_vm10 = vmor %vm760_vm5, %vm777_vm7 }
 0x182   : > { %824 = vst [vmem:[#allocation2 + $0x68] sm:$0xff] %v808_v33  ;;  %v809_v34 = vsel %vm793_vm10, -1e+30, %v8635_v6  ;;  %vm794_vm11 = vmor %vm761_vm8, %vm778_vm9 }
 0x183   : > { %825 = vst [vmem:[#allocation2 + $0x70] sm:$0xff] %v809_v34  ;;  %v810_v35 = vsel %vm794_vm11, -1e+30, %v8635_v6 }
 0x184   : > { %826 = vst [vmem:[#allocation2 + $0x78] sm:$0xff] %v810_v35 }
 0x185 PF: > { %v9284_v36 = vld [vmem:[%s9198_s22] sm:$0xff]  ;;  %v9287_v37 = vld [vmem:[%s9198_s22 + $0x8] sm:$0xff]  ;;  %v9290_v38 = vld [vmem:[%s9198_s22 + $0x10] sm:$0xff]  ;;  %s12130_s17 = scalar_lea.vmem [#allocation4], %s9156_s23  ;;  %s12131_s29 = scalar_lea.vmem [#allocation7], %s9156_s23 }
 0x186   : > { %v861_v39 = vadd.f32 %v9287_v37, %v9284_v36  ;;  %v926_v40 = vmul.f32 %v9284_v36, %v9284_v36  ;;  %v927_v41 = vmul.f32 %v9287_v37, %v9287_v37  ;;  %v9299_v42 = vld [vmem:[%s9198_s22 + $0x18] sm:$0xff]  ;;  %v928_v43 = vmul.f32 %v9290_v38, %v9290_v38  ;;  %v9308_v47 = vld [vmem:[%s9198_s22 + $0x20] sm:$0xff]  ;;  %v9311_v48 = vld [vmem:[%s9198_s22 + $0x28] sm:$0xff]  ;;  %s12158_s13 = scalar_lea.vmem [#allocation12], %s9156_s23  ;;  %s12255_s26 = sld [smem:[#allocation52_spill]] }
 0x187   : > { %v929_v44 = vmul.f32 %v9299_v42, %v9299_v42  ;;  %v864_v46 = vadd.f32 %v9299_v42, %v9290_v38  ;;  %v9314_v50 = vld [vmem:[%s9198_s22 + $0x30] sm:$0xff]  ;;  %v9317_v51 = vld [vmem:[%s9198_s22 + $0x38] sm:$0xff]  ;;  %v867_v52 = vadd.f32 %v9311_v48, %v9308_v47  ;;  %v930_v53 = vmul.f32 %v9308_v47, %v9308_v47  ;;  %v9332_v58 = vld [vmem:[%s9198_s22 + $0x40] sm:$0xff]  ;;  %s6248_s2 = sshll.u32 %s9200_s21, 4  ;;  %s12256_s14 = sld [smem:[#allocation105_spill]]  ;;  %s11722_s2 = int_to_ptr.vmem [resolvable:$true] %s6248_s2 }
 0x188   : > { %862 = vadd.xlane.f32.xlu0 %v861_v39  ;;  %v958_v45 = vadd.f32 %v927_v41, %v926_v40  ;;  %v931_v54 = vmul.f32 %v9311_v48, %v9311_v48  ;;  %v870_v55 = vadd.f32 %v9317_v51, %v9314_v50  ;;  %v932_v56 = vmul.f32 %v9314_v50, %v9314_v50  ;;  %v9335_v60 = vld [vmem:[%s9198_s22 + $0x48] sm:$0xff]  ;;  %v7551_v62 = vld [vmem:[%s9169_s11] ss:$24 sps:$4 sm:$0xff]   ;;  %v7552_v0 = vld [vmem:[%s9169_s11 + $0x34] ss:$24 sps:$4 sm:$0xff]  }
 0x189   : > { %v961_v49 = vadd.f32 %v929_v44, %v928_v43  ;;  %v933_v57 = vmul.f32 %v9317_v51, %v9317_v51  ;;  %v7549_v61 = vld [vmem:[%s9169_s11 + $0x4] ss:$24 sps:$4 sm:$0xff]   ;;  %v9341_v1 = vld [vmem:[%s9198_s22 + $0x50] sm:$0xff]  ;;  %v9344_v2 = vld [vmem:[%s9198_s22 + $0x58] sm:$0xff]  ;;  %v873_v3 = vadd.f32 %v9335_v60, %v9332_v58  ;;  %v934_v4 = vmul.f32 %v9332_v58, %v9332_v58 }
 0x18a   : > { %959 = vadd.xlane.f32.xlu1 %v958_v45  ;;  %v964_v59 = vadd.f32 %v931_v54, %v930_v53  ;;  %1828 = vmatprep.subr.bf16.mxu1 %v7549_v61  ;;  %v935_v5 = vmul.f32 %v9335_v60, %v9335_v60  ;;  %v7554_v6 = vld [vmem:[%s9169_s11 + $0x30] ss:$24 sps:$4 sm:$0xff]   ;;  %v876_v7 = vadd.f32 %v9344_v2, %v9341_v1  ;;  %v7555_v10 = vld [vmem:[%s9169_s11 + $0x64] ss:$24 sps:$4 sm:$0xff]   ;;  %v7557_v14 = vld [vmem:[%s9169_s11 + $0x60] ss:$24 sps:$4 sm:$0xff]  }
 0x18b   : > { %v967_v63 = vadd.f32 %v933_v57, %v932_v56  ;;  %1829 = vmatpush1.bf16.msra.mxu1 %v7551_v62  ;;  %v936_v8 = vmul.f32 %v9341_v1, %v9341_v1  ;;  %v937_v9 = vmul.f32 %v9344_v2, %v9344_v2  ;;  %v9361_v12 = vld [vmem:[%s9198_s22 + $0x60] sm:$0xff]  ;;  %v9364_v13 = vld [vmem:[%s9198_s22 + $0x68] sm:$0xff]  ;;  %v7558_v16 = vld [vmem:[%s9169_s11 + $0x94] ss:$24 sps:$4 sm:$0xff]  }
 0x18c   : > { %865 = vadd.xlane.f32.xlu0 %v864_v46  ;;  %1830 = vmatprep.subr.bf16.mxu1 %v7552_v0  ;;  %v970_v11 = vadd.f32 %v935_v5, %v934_v4  ;;  %v841_v17 = vld [vmem:[%s9198_s22 + $0x70] sm:$0xff]  ;;  %v842_v18 = vld [vmem:[%s9198_s22 + $0x78] sm:$0xff]  ;;  %v879_v19 = vadd.f32 %v9364_v13, %v9361_v12  ;;  %v938_v20 = vmul.f32 %v9361_v12, %v9361_v12  ;;  %v7561_v26 = vld [vmem:[%s9169_s11 + $0xc4] ss:$24 sps:$4 sm:$0xff]   ;;  %p12258_p11 = scmp.ne.s32.totalorder %s12255_s26, 0 }
 0x18d   : > { %v973_v15 = vadd.f32 %v937_v9, %v936_v8  ;;  %v939_v21 = vmul.f32 %v9364_v13, %v9364_v13  ;;  %v7560_v22 = vld [vmem:[%s9169_s11 + $0x90] ss:$24 sps:$4 sm:$0xff]   ;;  %v882_v23 = vadd.f32 %v842_v18, %v841_v17  ;;  %v940_v24 = vmul.f32 %v841_v17, %v841_v17  ;;  %v843_v27 = vld [vmem:[%s9198_s22 + $0x80] sm:$0xff]  ;;  %v846_v31 = vld [vmem:[%s9198_s22 + $0x98] sm:$0xff] }
 0x18e   : > { %962 = vadd.xlane.f32.xlu1 %v961_v49  ;;  %v941_v25 = vmul.f32 %v842_v18, %v842_v18  ;;  %v844_v28 = vld [vmem:[%s9198_s22 + $0x88] sm:$0xff]  ;;  %v845_v30 = vld [vmem:[%s9198_s22 + $0x90] sm:$0xff]  ;;  %v7563_v32 = vld [vmem:[%s9169_s11 + $0xc0] ss:$24 sps:$4 sm:$0xff]   ;;  %v942_v39 = vmul.f32 %v843_v27, %v843_v27  ;;  %v945_v45 = vmul.f32 %v846_v31, %v846_v31 }
 0x18f   : > { %1831 = vmatpush1.bf16.msra.mxu1 %v7554_v6  ;;  %v976_v29 = vadd.f32 %v939_v21, %v938_v20  ;;  %v7564_v34 = vld [vmem:[%s9169_s11 + $0xf4] ss:$24 sps:$4 sm:$0xff]   ;;  %v885_v35 = vadd.f32 %v844_v28, %v843_v27  ;;  %v943_v40 = vmul.f32 %v844_v28, %v844_v28  ;;  %v7566_v41 = vld [vmem:[%s9169_s11 + $0xf0] ss:$24 sps:$4 sm:$0xff]   ;;  %v888_v43 = vadd.f32 %v846_v31, %v845_v30  ;;  %v7567_v46 = vld [vmem:[%s9169_s11 + $0x124] ss:$24 sps:$4 sm:$0xff]  }
 0x190   : > { %868 = vadd.xlane.f32.xlu0 %v867_v52  ;;  %1832 = vmatprep.subr.bf16.mxu1 %v7555_v10  ;;  %v979_v33 = vadd.f32 %v941_v25, %v940_v24  ;;  %v944_v44 = vmul.f32 %v845_v30, %v845_v30  ;;  %v847_v49 = vld [vmem:[%s9198_s22 + $0xa0] sm:$0xff]  ;;  %v848_v52 = vld [vmem:[%s9198_s22 + $0xa8] sm:$0xff]  ;;  %v849_v54 = vld [vmem:[%s9198_s22 + $0xb0] sm:$0xff] }
 0x191   : > { %v982_v53 = vadd.f32 %v943_v40, %v942_v39  ;;  %v7570_v57 = vld [vmem:[%s9169_s11 + $0x154] ss:$24 sps:$4 sm:$0xff]   ;;  %v891_v61 = vadd.f32 %v848_v52, %v847_v49  ;;  %v946_v62 = vmul.f32 %v847_v49, %v847_v49  ;;  %v7572_v0 = vld [vmem:[%s9169_s11 + $0x150] ss:$24 sps:$4 sm:$0xff]   ;;  %v948_v4 = vmul.f32 %v849_v54, %v849_v54  ;;  %v7573_v6 = vld [vmem:[%s9169_s11 + $0x184] ss:$24 sps:$4 sm:$0xff]  }
 0x192   : > { %871 = vadd.xlane.f32.xlu1 %v870_v55  ;;  %v7569_v55 = vld [vmem:[%s9169_s11 + $0x120] ss:$24 sps:$4 sm:$0xff]   ;;  %v985_v56 = vadd.f32 %v945_v45, %v944_v44  ;;  %v852_v8 = vld [vmem:[%s9198_s22 + $0xc8] sm:$0xff]  ;;  %v853_v10 = vld [vmem:[%s9198_s22 + $0xd0] sm:$0xff] }
 0x193   : > { %1833 = vmatpush1.bf16.msra.mxu1 %v7557_v14  ;;  %v7575_v14 = vld [vmem:[%s9169_s11 + $0x180] ss:$24 sps:$4 sm:$0xff]   ;;  %v7578_v17 = vld [vmem:[%s9169_s11 + $0x1b0] ss:$24 sps:$4 sm:$0xff]   ;;  %v951_v20 = vmul.f32 %v852_v8, %v852_v8  ;;  %v7579_v21 = vld [vmem:[%s9169_s11 + $0x1e4] ss:$24 sps:$4 sm:$0xff]  }
 0x194   : > { %965 = vadd.xlane.f32.xlu0 %v964_v59  ;;  %1834 = vmatprep.subr.bf16.mxu1 %v7558_v16  ;;  %v850_v59 = vld [vmem:[%s9198_s22 + $0xb8] sm:$0xff]  ;;  %v855_v25 = vld [vmem:[%s9198_s22 + $0xe0] sm:$0xff]  ;;  %v857_v30 = vld [vmem:[%s9198_s22 + $0xf0] sm:$0xff] }
 0x195   : > { %v949_v5 = vmul.f32 %v850_v59, %v850_v59  ;;  %v7576_v16 = vld [vmem:[%s9169_s11 + $0x1b4] ss:$24 sps:$4 sm:$0xff]   ;;  %v7581_v27 = vld [vmem:[%s9169_s11 + $0x1e0] ss:$24 sps:$4 sm:$0xff]   ;;  %v7585_v40 = vld [vmem:[%s9169_s11 + $0x244] ss:$24 sps:$4 sm:$0xff]  }
 0x196   : > { %968 = vadd.xlane.f32.xlu1 %v967_v63  ;;  %v947_v63 = vmul.f32 %v848_v52, %v848_v52  ;;  %v858_v31 = vld [vmem:[%s9198_s22 + $0xf8] sm:$0xff] }
 0x197   : > { %1835 = vmatpush1.bf16.msra.mxu1 %v7560_v22  ;;  %v957_v44 = vmul.f32 %v858_v31, %v858_v31  ;;  %v7587_v45 = vld [vmem:[%s9169_s11 + $0x240] ss:$24 sps:$4 sm:$0xff]   ;;  %v7588_v49 = vld [vmem:[%s9169_s11 + $0x274] ss:$24 sps:$4 sm:$0xff]  }
 0x198   : > { %874 = vadd.xlane.f32.xlu0 %v873_v3  ;;  %1836 = vmatprep.subr.bf16.mxu1 %v7561_v26  ;;  %v894_v3 = vadd.f32 %v850_v59, %v849_v54  ;;  %v988_v9 = vadd.f32 %v947_v63, %v946_v62  ;;  %v856_v26 = vld [vmem:[%s9198_s22 + $0xe8] sm:$0xff] }
 0x199   : > { %v955_v39 = vmul.f32 %v856_v26, %v856_v26  ;;  %v7591_v54 = vld [vmem:[%s9169_s11 + $0x2a4] ss:$24 sps:$4 sm:$0xff]  }
 0x19a   : > { %877 = vadd.xlane.f32.xlu1 %v876_v7  ;;  %v851_v7 = vld [vmem:[%s9198_s22 + $0xc0] sm:$0xff]  ;;  %v7599_v59 = vld [vmem:[%s9169_s11 + $0xc] ss:$24 sps:$4 sm:$0xff]  }
 0x19b   : > { %1837 = vmatpush1.bf16.msra.mxu1 %v7563_v32  ;;  %v897_v18 = vadd.f32 %v852_v8, %v851_v7 }
 0x19c   : > { %971 = vadd.xlane.f32.xlu0 %v970_v11  ;;  %1838 = vmatprep.subr.bf16.mxu1 %v7564_v34  ;;  %v854_v11 = vld [vmem:[%s9198_s22 + $0xd8] sm:$0xff]  ;;  %v903_v34 = vadd.f32 %v856_v26, %v855_v25 }
 0x19d   : > { %v900_v22 = vadd.f32 %v854_v11, %v853_v10  ;;  %v953_v24 = vmul.f32 %v854_v11, %v854_v11 }
 0x19e   : > { %974 = vadd.xlane.f32.xlu1 %v973_v15  ;;  %v991_v15 = vadd.f32 %v949_v5, %v948_v4 }
 0x19f   : > { %1839 = vmatpush1.bf16.msra.mxu1 %v7566_v41  ;;  %v906_v41 = vadd.f32 %v858_v31, %v857_v30 }
 0x1a0   : > { %880 = vadd.xlane.f32.xlu0 %v879_v19  ;;  %1840 = vmatprep.subr.bf16.mxu1 %v7567_v46  ;;  %v950_v19 = vmul.f32 %v851_v7, %v851_v7 }
 0x1a2   : > { %883 = vadd.xlane.f32.xlu1 %v882_v23  ;;  %v952_v23 = vmul.f32 %v853_v10, %v853_v10  ;;  %v994_v28 = vadd.f32 %v951_v20, %v950_v19 }
 0x1a3   : > { %1841 = vmatpush1.bf16.msra.mxu1 %v7569_v55  ;;  %v7593_v55 = vld [vmem:[%s9169_s11 + $0x2a0] ss:$24 sps:$4 sm:$0xff]  }
 0x1a4   : > { %977 = vadd.xlane.f32.xlu0 %v976_v29  ;;  %1842 = vmatprep.subr.bf16.mxu1 %v7570_v57  ;;  %v7582_v29 = vld [vmem:[%s9169_s11 + $0x214] ss:$24 sps:$4 sm:$0xff]   ;;  %v997_v32 = vadd.f32 %v953_v24, %v952_v23  ;;  %v7596_v57 = vld [vmem:[%s9169_s11 + $0x2d0] ss:$24 sps:$4 sm:$0xff]  }
 0x1a6   : > { %980 = vadd.xlane.f32.xlu1 %v979_v33  ;;  %v7584_v33 = vld [vmem:[%s9169_s11 + $0x210] ss:$24 sps:$4 sm:$0xff]  }
 0x1a7   : > { %1843 = vmatpush1.bf16.msra.mxu1 %v7572_v0 }
 0x1a8   : > { %886 = vadd.xlane.f32.xlu0 %v885_v35  ;;  %1844 = vmatprep.subr.bf16.mxu1 %v7573_v6  ;;  %v954_v35 = vmul.f32 %v855_v25, %v855_v25 }
 0x1aa   : > { %889 = vadd.xlane.f32.xlu1 %v888_v43  ;;  %v956_v43 = vmul.f32 %v857_v30, %v857_v30  ;;  %v1000_v46 = vadd.f32 %v955_v39, %v954_v35 }
 0x1ab   : > { %1845 = vmatpush1.bf16.msra.mxu1 %v7575_v14 }
 0x1ac   : > { %983 = vadd.xlane.f32.xlu0 %v982_v53  ;;  %1846 = vmatprep.subr.bf16.mxu1 %v7576_v16  ;;  %v1003_v52 = vadd.f32 %v957_v44, %v956_v43  ;;  %v7590_v53 = vld [vmem:[%s9169_s11 + $0x270] ss:$24 sps:$4 sm:$0xff]  }
 0x1ae   : > { %986 = vadd.xlane.f32.xlu1 %v985_v56  ;;  %v7594_v56 = vld [vmem:[%s9169_s11 + $0x2d4] ss:$24 sps:$4 sm:$0xff]  }
 0x1af   : > { %1847 = vmatpush1.bf16.msra.mxu1 %v7578_v17  ;;  %v1151_v17 = vlaneseq }
 0x1b0   : > { %892 = vadd.xlane.f32.xlu0 %v891_v61  ;;  %1848 = vmatprep.subr.bf16.mxu1 %v7579_v21 }
 0x1b1   : > { %v9424_v24 = vshrl.u32 %v1151_v17, 7 }
 0x1b2   : > { %895 = vadd.xlane.f32.xlu1 %v894_v3 }
 0x1b3   : > { %1849 = vmatpush1.bf16.msra.mxu1 %v7581_v27  ;;  %12127 = vst [vmem:[#allocation54_spill] sm:$0xff] %v9424_v24 }
 0x1b4   : > { %989 = vadd.xlane.f32.xlu0 %v988_v9  ;;  %1850 = vmatprep.subr.bf16.mxu1 %v7582_v29 }
 0x1b6   : > { %992 = vadd.xlane.f32.xlu1 %v991_v15 }
 0x1b7   : > { %1851 = vmatpush1.bf16.msra.mxu1 %v7584_v33  ;;  %v9431_v33 = vsub.s32 1, %v9424_v24 }
 0x1b8   : > { %898 = vadd.xlane.f32.xlu0 %v897_v18  ;;  %1852 = vmatprep.subr.bf16.mxu1 %v7585_v40  ;;  %v859_v40 = vld [vmem:[%s12130_s17] sm:$0x3]  ;;  %s8421_s17 = scalar_lea.vmem %s11722_s2, 1024 }
 0x1b9   : > { %12128 = vst [vmem:[#allocation55_spill] sm:$0xff] %v9431_v33  ;;  %p8422_p0 = scmp.ne.s32.totalorder %s11722_s2, %s8421_s17 }
 0x1ba   : > { %901 = vadd.xlane.f32.xlu1 %v900_v22 }
 0x1bb   : > { %1853 = vmatpush1.bf16.msra.mxu1 %v7587_v45  ;;  %p8423_p13 = pnand %p8422_p0, %p12258_p11 }
 0x1bc   : > { %995 = vadd.xlane.f32.xlu0 %v994_v28  ;;  %1854 = vmatprep.subr.bf16.mxu1 %v7588_v49 }
 0x1bd   : > { %p8424_p1 = pneg %p8423_p13 }
 0x1be   : > { %998 = vadd.xlane.f32.xlu1 %v997_v32 }
 0x1bf   : > { %1855 = vmatpush1.bf16.msra.mxu1 %v7590_v53 }
 0x1c0   : > { %904 = vadd.xlane.f32.xlu0 %v903_v34  ;;  %1856 = vmatprep.subr.bf16.mxu1 %v7591_v54  ;;  %v9434_v34 = vsub.s32 0, %v9424_v24  ;;  %v10740_v24 = vld [vmem:[%s9177_s18 + $0x158] sm:$0xff] }
 0x1c2   : > { %907 = vadd.xlane.f32.xlu1 %v906_v41  ;;  %12129 = vst [vmem:[#allocation56_spill] sm:$0xff] %v9434_v34 }
 0x1c3   : > { %1857 = vmatpush1.bf16.msra.mxu1 %v7593_v55  ;;  %v9447_v55 = vrot.slane %v859_v40, %v9431_v33 }
 0x1c4   : > { %1001 = vadd.xlane.f32.xlu0 %v1000_v46  ;;  %1858 = vmatprep.subr.bf16.mxu1 %v7594_v56 }
 0x1c6   : > { %1004 = vadd.xlane.f32.xlu1 %v1003_v52  ;;  %v860_v52 = vld [vmem:[%s12131_s29] sm:$0x3]  ;;  %s8636_s29 = smov [#allocation20]  }
 0x1c7   : > { %1859 = vmatpush1.bf16.msra.mxu1 %v7596_v57 }
 0x1c8   : > { %1941 = vmatprep.subr.bf16.mxu1 %v7599_v59 }
 0x215   : > { %v863_v61 = vpop.xlane.xlu0 %862 }
 0x216   : > { %v910_v62 = vmul.f32 0.00390625, %v863_v61 }
 0x217   : > { %v960_v63 = vpop.xlane.xlu1 %959 }
 0x218   : > { %v1006_v0 = vmul.f32 0.00390625, %v960_v63  ;;  %v1054_v3 = vmul.f32 %v910_v62, %v910_v62  ;;  %v1022_v41 = vsub.f32 %v9284_v36, %v910_v62  ;;  %v1023_v43 = vsub.f32 %v9287_v37, %v910_v62 }
 0x219   : > { %v866_v4 = vpop.xlane.xlu0 %865  ;;  %v9450_v36 = vrot.slane %v859_v40, %v9434_v34  ;;  %v7597_v40 = vld [vmem:[%s9169_s11 + $0x8] ss:$24 sps:$4 sm:$0xff]  }
 0x21a   : > { %v1070_v5 = vsub.f32 %v1006_v0, %v1054_v3  ;;  %v911_v6 = vmul.f32 0.00390625, %v866_v4  ;;  %v9457_v3 = vrot.slane %v860_v52, %v9431_v33 }
 0x21b   : > { %v963_v7 = vpop.xlane.xlu1 %962 }
 0x21c   : > { %v1086_v8 = vadd.f32 1e-05, %v1070_v5  ;;  %v1007_v9 = vmul.f32 0.00390625, %v963_v7  ;;  %v1055_v10 = vmul.f32 %v911_v6, %v911_v6  ;;  %v1025_v37 = vsub.f32 %v9299_v42, %v911_v6 }
 0x21d   : > { %v869_v11 = vpop.xlane.xlu0 %868  ;;  %v1024_v63 = vsub.f32 %v9290_v38, %v911_v6 }
 0x21e   : > { %7885 = vrsqrt.f32 %v1086_v8  ;;  %v9418_v14 = vmul.f32 0.00390625, %v869_v11  ;;  %v1071_v15 = vsub.f32 %v1007_v9, %v1055_v10 }
 0x21f   : > { %v872_v16 = vpop.xlane.xlu1 %871 }
 0x220   : > { %v9420_v18 = vmul.f32 0.00390625, %v872_v16  ;;  %v1056_v19 = vmul.f32 %v9418_v14, %v9418_v14  ;;  %v1087_v20 = vadd.f32 1e-05, %v1071_v15  ;;  %v9464_v15 = vrot.slane %v860_v52, %v9434_v34 }
 0x221   : > { %v966_v21 = vpop.xlane.xlu0 %965  ;;  %v1026_v38 = vsub.f32 %v9308_v47, %v9418_v14  ;;  %v1027_v6 = vsub.f32 %v9311_v48, %v9418_v14 }
 0x222   : > { %v1008_v22 = vmul.f32 0.00390625, %v966_v21  ;;  %7887 = vrsqrt.f32 %v1087_v20  ;;  %v1057_v26 = vmul.f32 %v9420_v18, %v9420_v18  ;;  %v1029_v47 = vsub.f32 %v9317_v51, %v9420_v18 }
 0x223   : > { %v969_v23 = vpop.xlane.xlu1 %968 }
 0x224   : > { %v1072_v25 = vsub.f32 %v1008_v22, %v1056_v19  ;;  %v1009_v27 = vmul.f32 0.00390625, %v969_v23 }
 0x225   : > { %v875_v28 = vpop.xlane.xlu0 %874 }
 0x226   : > { %v1088_v29 = vadd.f32 1e-05, %v1072_v25  ;;  %v1073_v30 = vsub.f32 %v1009_v27, %v1057_v26  ;;  %v9428_v31 = vmul.f32 0.00390625, %v875_v28  ;;  %v1028_v25 = vsub.f32 %v9314_v50, %v9420_v18 }
 0x227   : > { %v878_v32 = vpop.xlane.xlu1 %877 }
 0x228   : > { %v7886_v35 = vpop.eup %7885  ;;  %7889 = vrsqrt.f32 %v1088_v29  ;;  %v1089_v39 = vadd.f32 1e-05, %v1073_v30  ;;  %v9440_v44 = vmul.f32 0.00390625, %v878_v32  ;;  %v1058_v45 = vmul.f32 %v9428_v31, %v9428_v31 }
 0x229   : > { %v972_v46 = vpop.xlane.xlu0 %971  ;;  %v1119_v54 = vmul.f32 %v7886_v35, %v1023_v43  ;;  %v1118_v56 = vmul.f32 %v7886_v35, %v1022_v41 }
 0x22a   : > { %7891 = vrsqrt.f32 %v1089_v39  ;;  %v1010_v49 = vmul.f32 0.00390625, %v972_v46  ;;  %v1059_v59 = vmul.f32 %v9440_v44, %v9440_v44 }
 0x22b   : > { %v975_v53 = vpop.xlane.xlu1 %974  ;;  %v1162_v42 = vmul.f32 %v9447_v55, %v1119_v54  ;;  %v1161_v11 = vmul.f32 %v9450_v36, %v1118_v56  ;;  %v7602_v54 = vld [vmem:[%s9169_s11 + $0x3c] ss:$24 sps:$4 sm:$0xff]  }
 0x22c   : > { %v1074_v57 = vsub.f32 %v1010_v49, %v1058_v45  ;;  %v1011_v61 = vmul.f32 0.00390625, %v975_v53  ;;  %v7888_v62 = vpop.eup %7887 }
 0x22d   : > { %v881_v0 = vpop.xlane.xlu0 %880  ;;  %v1121_v8 = vmul.f32 %v7888_v62, %v1025_v37  ;;  %v1120_v10 = vmul.f32 %v7888_v62, %v1024_v63  ;;  %v1205_v27 = vadd.f32 %v9457_v3, %v1162_v42  ;;  %v1204_v29 = vadd.f32 %v9464_v15, %v1161_v11 }
 0x22e   : > { %v1090_v4 = vadd.f32 1e-05, %v1074_v57  ;;  %v1075_v5 = vsub.f32 %v1011_v61, %v1059_v59  ;;  %v9459_v7 = vmul.f32 0.00390625, %v881_v0  ;;  %v1030_v62 = vsub.f32 %v9332_v58, %v9428_v31 }
 0x22f   : > { %v884_v9 = vpop.xlane.xlu1 %883  ;;  %v1164_v21 = vmul.f32 %v9447_v55, %v1121_v8  ;;  %v1163_v22 = vmul.f32 %v9450_v36, %v1120_v10  ;;  %v1031_v63 = vsub.f32 %v9335_v60, %v9428_v31 }
 0x230   : > { %7893 = vrsqrt.f32 %v1090_v4  ;;  %v1091_v16 = vadd.f32 1e-05, %v1075_v5  ;;  %v9470_v17 = vmul.f32 0.00390625, %v884_v9  ;;  %v1060_v19 = vmul.f32 %v9459_v7, %v9459_v7  ;;  %v7600_v9 = vld [vmem:[%s9169_s11 + $0x38] ss:$24 sps:$4 sm:$0xff]  }
 0x231   : > { %v978_v20 = vpop.xlane.xlu0 %977  ;;  %v1207_v28 = vadd.f32 %v9457_v3, %v1164_v21  ;;  %v1206_v35 = vadd.f32 %v9464_v15, %v1163_v22 }
 0x232   : > { %v7890_v23 = vpop.eup %7889  ;;  %7895 = vrsqrt.f32 %v1091_v16  ;;  %v1012_v48 = vmul.f32 0.00390625, %v978_v20  ;;  %v1061_v14 = vmul.f32 %v9470_v17, %v9470_v17  ;;  %v1033_v16 = vsub.f32 %v9344_v2, %v9440_v44 }
 0x233   : > { %v981_v26 = vpop.xlane.xlu1 %980  ;;  %v1123_v39 = vmul.f32 %v7890_v23, %v1027_v6  ;;  %v9486_v51 = vpack.c.bf16 %v1207_v28, %v1205_v27  ;;  %v1122_v43 = vmul.f32 %v7890_v23, %v1026_v38  ;;  %v9491_v53 = vpack.c.bf16 %v1206_v35, %v1204_v29  ;;  %v7605_v38 = vld [vmem:[%s9169_s11 + $0x6c] ss:$24 sps:$4 sm:$0xff]  }
 0x234   : > { %v7892_v30 = vpop.eup %7891  ;;  %v1076_v32 = vsub.f32 %v1012_v48, %v1060_v19  ;;  %v1013_v50 = vmul.f32 0.00390625, %v981_v26  ;;  %v1032_v6 = vsub.f32 %v9341_v1, %v9440_v44 }
 0x235   : > { %v887_v18 = vpop.xlane.xlu0 %886  ;;  %v1125_v41 = vmul.f32 %v7892_v30, %v1029_v47  ;;  %v1124_v45 = vmul.f32 %v7892_v30, %v1028_v25  ;;  %1860 = vmatprep.mubr.bf16.mxu1 %v9486_v51  ;;  %v1166_v37 = vmul.f32 %v9447_v55, %v1123_v39  ;;  %v1165_v59 = vmul.f32 %v9450_v36, %v1122_v43  ;;  %v7608_v30 = vld [vmem:[%s9169_s11 + $0x9c] ss:$24 sps:$4 sm:$0xff]  }
 0x236   : > { %v1092_v46 = vadd.f32 1e-05, %v1076_v32  ;;  %v1077_v49 = vsub.f32 %v1013_v50, %v1061_v14  ;;  %v9489_v52 = vmul.f32 0.00390625, %v887_v18  ;;  %1861 = vmatmul.mubr.bf16.vlgmr.msra.gmra.mrb[0].mxu1 %v9491_v53  ;;  %v7603_v14 = vld [vmem:[%s9169_s11 + $0x68] ss:$24 sps:$4 sm:$0xff]  }
 0x237   : > { %v890_v56 = vpop.xlane.xlu1 %889  ;;  %v1168_v57 = vmul.f32 %v9447_v55, %v1125_v41  ;;  %v1167_v61 = vmul.f32 %v9450_v36, %v1124_v45  ;;  %1942 = vmatpush1.bf16.msra.mxu1 %v7597_v40  ;;  %v1209_v42 = vadd.f32 %v9457_v3, %v1166_v37  ;;  %v1208_v31 = vadd.f32 %v9464_v15, %v1165_v59  ;;  %v7611_v59 = vld [vmem:[%s9169_s11 + $0xcc] ss:$24 sps:$4 sm:$0xff]  }
 0x238   : > { %7897 = vrsqrt.f32 %v1092_v46  ;;  %v1093_v0 = vadd.f32 1e-05, %v1077_v49  ;;  %v9504_v4 = vmul.f32 0.00390625, %v890_v56  ;;  %v1062_v5 = vmul.f32 %v9489_v52, %v9489_v52  ;;  %1943 = vmatprep.subr.bf16.mxu1 %v7602_v54  ;;  %v7606_v54 = vld [vmem:[%s9169_s11 + $0x98] ss:$24 sps:$4 sm:$0xff]  }
 0x239   : > { %v984_v8 = vpop.xlane.xlu0 %983  ;;  %v1211_v58 = vadd.f32 %v9457_v3, %v1168_v57  ;;  %v1210_v11 = vadd.f32 %v9464_v15, %v1167_v61  ;;  %v1034_v40 = vsub.f32 %v9361_v12, %v9459_v7  ;;  %v1035_v41 = vsub.f32 %v9364_v13, %v9459_v7  ;;  %v8077_v61 = vld [vmem:[%s9198_s22 + $0x70] sm:$0xff] }
 0x23a   : > { %v7894_v10 = vpop.eup %7893  ;;  %7899 = vrsqrt.f32 %v1093_v0  ;;  %v1014_v60 = vmul.f32 0.00390625, %v984_v8  ;;  %v1063_v19 = vmul.f32 %v9504_v4, %v9504_v4 }
 0x23b   : > { %v987_v20 = vpop.xlane.xlu1 %986  ;;  %v9520_v21 = vpack.c.bf16 %v1211_v58, %v1209_v42  ;;  %v9522_v47 = vpack.c.bf16 %v1210_v11, %v1208_v31  ;;  %v1127_v48 = vmul.f32 %v7894_v10, %v1031_v63  ;;  %1944 = vmatpush1.bf16.msra.mxu1 %v7600_v9  ;;  %v1126_v2 = vmul.f32 %v7894_v10, %v1030_v62  ;;  %v8078_v63 = vld [vmem:[%s9198_s22 + $0x78] sm:$0xff] }
 0x23c   : > { %v7896_v22 = vpop.eup %7895  ;;  %v1078_v23 = vsub.f32 %v1014_v60, %v1062_v5  ;;  %v1015_v25 = vmul.f32 0.00390625, %v987_v20  ;;  %1945 = vmatprep.subr.bf16.mxu1 %v7605_v38  ;;  %v1036_v62 = vsub.f32 %v8077_v61, %v9470_v17  ;;  %v1037_v0 = vsub.f32 %v8078_v63, %v9470_v17  ;;  %v7609_v38 = vld [vmem:[%s9169_s11 + $0xc8] ss:$24 sps:$4 sm:$0xff]  }
 0x23d   : > { %1870 = vmatprep.mubr.bf16.mxu1 %v9520_v21  ;;  %v893_v1 = vpop.xlane.xlu0 %892  ;;  %v1129_v26 = vmul.f32 %v7896_v22, %v1033_v16  ;;  %v1128_v44 = vmul.f32 %v7896_v22, %v1032_v6  ;;  %v1170_v32 = vmul.f32 %v9447_v55, %v1127_v48  ;;  %v1169_v39 = vmul.f32 %v9450_v36, %v1126_v2  ;;  %v8079_v2 = vld [vmem:[%s9198_s22 + $0x80] sm:$0xff] }
 0x23e   : > { %v1094_v27 = vadd.f32 1e-05, %v1078_v23  ;;  %v1079_v28 = vsub.f32 %v1015_v25, %v1063_v19  ;;  %v9526_v29 = vmul.f32 0.00390625, %v893_v1  ;;  %1871 = vmatmul.mubr.bf16.gmra.mrb[4].mxu1 %v9522_v47  ;;  %v7614_v23 = vld [vmem:[%s9169_s11 + $0xfc] ss:$24 sps:$4 sm:$0xff]  }
 0x23f   : > { %v896_v50 = vpop.xlane.xlu1 %895  ;;  %v1172_v35 = vmul.f32 %v9447_v55, %v1129_v26  ;;  %v1171_v18 = vmul.f32 %v9450_v36, %v1128_v44  ;;  %1946 = vmatpush1.bf16.msra.mxu1 %v7603_v14  ;;  %v1213_v12 = vadd.f32 %v9457_v3, %v1170_v32  ;;  %v1212_v37 = vadd.f32 %v9464_v15, %v1169_v39  ;;  %v7612_v39 = vld [vmem:[%s9169_s11 + $0xf8] ss:$24 sps:$4 sm:$0xff]  }
 0x240   : > { %7901 = vrsqrt.f32 %v1094_v27  ;;  %v1095_v43 = vadd.f32 1e-05, %v1079_v28  ;;  %v9538_v45 = vmul.f32 0.00390625, %v896_v50  ;;  %v1064_v46 = vmul.f32 %v9526_v29, %v9526_v29  ;;  %1947 = vmatprep.subr.bf16.mxu1 %v7608_v30  ;;  %v8080_v27 = vld [vmem:[%s9198_s22 + $0x88] sm:$0xff] }
 0x241   : > { %v990_v49 = vpop.xlane.xlu0 %989  ;;  %v1215_v56 = vadd.f32 %v9457_v3, %v1172_v35  ;;  %v1214_v57 = vadd.f32 %v9464_v15, %v1171_v18  ;;  %v1038_v44 = vsub.f32 %v8079_v2, %v9489_v52  ;;  %v1039_v28 = vsub.f32 %v8080_v27, %v9489_v52  ;;  %v7618_v27 = vld [vmem:[%s9169_s11 + $0x158] ss:$24 sps:$4 sm:$0xff]  }
 0x242   : > { %v7898_v13 = vpop.eup %7897  ;;  %7903 = vrsqrt.f32 %v1095_v43  ;;  %v1016_v7 = vmul.f32 0.00390625, %v990_v49  ;;  %v1065_v5 = vmul.f32 %v9538_v45, %v9538_v45  ;;  %v7617_v49 = vld [vmem:[%s9169_s11 + $0x12c] ss:$24 sps:$4 sm:$0xff]  }
 0x243   : > { %v993_v8 = vpop.xlane.xlu1 %992  ;;  %v9554_v9 = vpack.c.bf16 %v1215_v56, %v1213_v12  ;;  %v9556_v60 = vpack.c.bf16 %v1214_v57, %v1212_v37  ;;  %v1131_v31 = vmul.f32 %v7898_v13, %v1035_v41  ;;  %1948 = vmatpush1.bf16.msra.mxu1 %v7606_v54  ;;  %v1130_v6 = vmul.f32 %v7898_v13, %v1034_v40  ;;  %v8081_v54 = vld [vmem:[%s9198_s22 + $0x90] sm:$0xff]  ;;  %v8082_v56 = vld [vmem:[%s9198_s22 + $0x98] sm:$0xff] }
 0x244   : > { %v7900_v42 = vpop.eup %7899  ;;  %v1080_v58 = vsub.f32 %v1016_v7, %v1064_v46  ;;  %v1017_v10 = vmul.f32 0.00390625, %v993_v8  ;;  %1949 = vmatprep.subr.bf16.mxu1 %v7611_v59  ;;  %v1040_v12 = vsub.f32 %v8081_v54, %v9504_v4  ;;  %v1041_v13 = vsub.f32 %v8082_v56, %v9504_v4  ;;  %v7615_v8 = vld [vmem:[%s9169_s11 + $0x128] ss:$24 sps:$4 sm:$0xff]  }
 0x245   : > { %1880 = vmatprep.mubr.bf16.mxu1 %v9554_v9  ;;  %v899_v11 = vpop.xlane.xlu0 %898  ;;  %v1133_v17 = vmul.f32 %v7900_v42, %v1037_v0  ;;  %v1132_v16 = vmul.f32 %v7900_v42, %v1036_v62  ;;  %v1174_v25 = vmul.f32 %v9447_v55, %v1131_v31  ;;  %v1173_v14 = vmul.f32 %v9450_v36, %v1130_v6 }
 0x246   : > { %v1096_v19 = vadd.f32 1e-05, %v1080_v58  ;;  %v1081_v20 = vsub.f32 %v1017_v10, %v1065_v5  ;;  %v9560_v22 = vmul.f32 0.00390625, %v899_v11  ;;  %1881 = vmatmul.mubr.bf16.gmra.mrb[8].mxu1 %v9556_v60 }
 0x247   : > { %v902_v48 = vpop.xlane.xlu1 %901  ;;  %v1176_v1 = vmul.f32 %v9447_v55, %v1133_v17  ;;  %v1175_v26 = vmul.f32 %v9450_v36, %v1132_v16  ;;  %1950 = vmatpush1.bf16.msra.mxu1 %v7609_v38  ;;  %v1217_v18 = vadd.f32 %v9457_v3, %v1174_v25  ;;  %v1216_v43 = vadd.f32 %v9464_v15, %v1173_v14  ;;  %v7620_v38 = vld [vmem:[%s9169_s11 + $0x15c] ss:$24 sps:$4 sm:$0xff]  }
 0x248   : > { %7905 = vrsqrt.f32 %v1096_v19  ;;  %v1097_v30 = vadd.f32 1e-05, %v1081_v20  ;;  %v9572_v32 = vmul.f32 0.00390625, %v902_v48  ;;  %v1066_v50 = vmul.f32 %v9560_v22, %v9560_v22  ;;  %1951 = vmatprep.subr.bf16.mxu1 %v7614_v23  ;;  %v8083_v23 = vld [vmem:[%s9198_s22 + $0xa0] sm:$0xff]  ;;  %v8084_v48 = vld [vmem:[%s9198_s22 + $0xa8] sm:$0xff] }
 0x249   : > { %v996_v35 = vpop.xlane.xlu0 %995  ;;  %v1219_v40 = vadd.f32 %v9457_v3, %v1176_v1  ;;  %v1218_v46 = vadd.f32 %v9464_v15, %v1175_v26  ;;  %v1042_v25 = vsub.f32 %v8083_v23, %v9526_v29  ;;  %v1043_v1 = vsub.f32 %v8084_v48, %v9526_v29 }
 0x24a   : > { %v7902_v52 = vpop.eup %7901  ;;  %7907 = vrsqrt.f32 %v1097_v30  ;;  %v1018_v41 = vmul.f32 0.00390625, %v996_v35  ;;  %v1067_v7 = vmul.f32 %v9572_v32, %v9572_v32 }
 0x24b   : > { %v999_v37 = vpop.xlane.xlu1 %998  ;;  %v9588_v57 = vpack.c.bf16 %v1219_v40, %v1217_v18  ;;  %v9590_v63 = vpack.c.bf16 %v1218_v46, %v1216_v43  ;;  %v1135_v0 = vmul.f32 %v7902_v52, %v1039_v28  ;;  %1952 = vmatpush1.bf16.msra.mxu1 %v7612_v39  ;;  %v1134_v42 = vmul.f32 %v7902_v52, %v1038_v44  ;;  %v7623_v18 = vld [vmem:[%s9169_s11 + $0x18c] ss:$24 sps:$4 sm:$0xff]  }
 0x24c   : > { %v7904_v59 = vpop.eup %7903  ;;  %v1082_v61 = vsub.f32 %v1018_v41, %v1066_v50  ;;  %v1019_v62 = vmul.f32 0.00390625, %v999_v37  ;;  %1953 = vmatprep.subr.bf16.mxu1 %v7617_v49  ;;  %v8085_v40 = vld [vmem:[%s9198_s22 + $0xb0] sm:$0xff]  ;;  %v8086_v41 = vld [vmem:[%s9198_s22 + $0xb8] sm:$0xff] }
 0x24d   : > { %1890 = vmatprep.mubr.bf16.mxu1 %v9588_v57  ;;  %v905_v5 = vpop.xlane.xlu0 %904  ;;  %v1137_v4 = vmul.f32 %v7904_v59, %v1041_v13  ;;  %v1136_v58 = vmul.f32 %v7904_v59, %v1040_v12  ;;  %v1178_v17 = vmul.f32 %v9447_v55, %v1135_v0  ;;  %v1177_v19 = vmul.f32 %v9450_v36, %v1134_v42  ;;  %v7621_v59 = vld [vmem:[%s9169_s11 + $0x188] ss:$24 sps:$4 sm:$0xff]  }
 0x24e   : > { %v1098_v10 = vadd.f32 1e-05, %v1082_v61  ;;  %v1083_v31 = vsub.f32 %v1019_v62, %v1067_v7  ;;  %v9594_v11 = vmul.f32 0.00390625, %v905_v5  ;;  %1891 = vmatmul.mubr.bf16.gmra.mrb[12].mxu1 %v9590_v63  ;;  %v1044_v52 = vsub.f32 %v8085_v40, %v9538_v45 }
 0x24f   : > { %v908_v6 = vpop.xlane.xlu1 %907  ;;  %v1180_v16 = vmul.f32 %v9447_v55, %v1137_v4  ;;  %v1179_v20 = vmul.f32 %v9450_v36, %v1136_v58  ;;  %1954 = vmatpush1.bf16.msra.mxu1 %v7615_v8  ;;  %v1221_v28 = vadd.f32 %v9457_v3, %v1178_v17  ;;  %v1220_v35 = vadd.f32 %v9464_v15, %v1177_v19  ;;  %v7626_v8 = vld [vmem:[%s9169_s11 + $0x1bc] ss:$24 sps:$4 sm:$0xff]   ;;  %v7624_v19 = vld [vmem:[%s9169_s11 + $0x1b8] ss:$24 sps:$4 sm:$0xff]  }
 0x250   : > { %7909 = vrsqrt.f32 %v1098_v10  ;;  %v1099_v14 = vadd.f32 1e-05, %v1083_v31  ;;  %v9606_v26 = vmul.f32 0.00390625, %v908_v6  ;;  %v1068_v2 = vmul.f32 %v9594_v11, %v9594_v11  ;;  %1955 = vmatprep.subr.bf16.mxu1 %v7620_v38  ;;  %v8087_v31 = vld [vmem:[%s9198_s22 + $0xc0] sm:$0xff]  ;;  %v8088_v6 = vld [vmem:[%s9198_s22 + $0xc8] sm:$0xff] }
 0x251   : > { %v1002_v44 = vpop.xlane.xlu0 %1001  ;;  %v1223_v30 = vadd.f32 %v9457_v3, %v1180_v16  ;;  %v1222_v39 = vadd.f32 %v9464_v15, %v1179_v20  ;;  %v1045_v43 = vsub.f32 %v8086_v41, %v9538_v45  ;;  %v1046_v38 = vsub.f32 %v8087_v31, %v9560_v22 }
 0x252   : > { %v7906_v29 = vpop.eup %7905  ;;  %7911 = vrsqrt.f32 %v1099_v14  ;;  %v1020_v50 = vmul.f32 0.00390625, %v1002_v44  ;;  %v1069_v46 = vmul.f32 %v9606_v26, %v9606_v26  ;;  %v1047_v16 = vsub.f32 %v8088_v6, %v9560_v22  ;;  %v7629_v44 = vld [vmem:[%s9169_s11 + $0x1ec] ss:$24 sps:$4 sm:$0xff]   ;;  %v8090_v22 = vld [vmem:[%s9198_s22 + $0xd8] sm:$0xff]  ;;  %v7633_v6 = vld [vmem:[%s9169_s11 + $0x248] ss:$24 sps:$4 sm:$0xff]  }
 0x253   : > { %v1005_v49 = vpop.xlane.xlu1 %1004  ;;  %v9622_v54 = vpack.c.bf16 %v1223_v30, %v1221_v28  ;;  %v9624_v7 = vpack.c.bf16 %v1222_v39, %v1220_v35  ;;  %v1139_v37 = vmul.f32 %v7906_v29, %v1043_v1  ;;  %1956 = vmatpush1.bf16.msra.mxu1 %v7618_v27  ;;  %v1138_v45 = vmul.f32 %v7906_v29, %v1042_v25  ;;  %v8089_v1 = vld [vmem:[%s9198_s22 + $0xd0] sm:$0xff]  ;;  %v7627_v39 = vld [vmem:[%s9169_s11 + $0x1e8] ss:$24 sps:$4 sm:$0xff]  }
 0x254   : > { %v7908_v12 = vpop.eup %7907  ;;  %v1084_v56 = vsub.f32 %v1020_v50, %v1068_v2  ;;  %v1021_v13 = vmul.f32 0.00390625, %v1005_v49  ;;  %1957 = vmatprep.subr.bf16.mxu1 %v7623_v18  ;;  %v1048_v14 = vsub.f32 %v8089_v1, %v9572_v32  ;;  %v1049_v27 = vsub.f32 %v8090_v22, %v9572_v32  ;;  %v7632_v32 = vld [vmem:[%s9169_s11 + $0x21c] ss:$24 sps:$4 sm:$0xff]   ;;  %v7636_v1 = vld [vmem:[%s9169_s11 + $0x278] ss:$24 sps:$4 sm:$0xff]  }
 0x255   : > { %1900 = vmatprep.mubr.bf16.mxu1 %v9622_v54  ;;  %v1141_v61 = vmul.f32 %v7908_v12, %v1045_v43  ;;  %v1140_v62 = vmul.f32 %v7908_v12, %v1044_v52  ;;  %v1182_v4 = vmul.f32 %v9447_v55, %v1139_v37  ;;  %v1181_v58 = vmul.f32 %v9450_v36, %v1138_v45  ;;  %v8091_v49 = vld [vmem:[%s9198_s22 + $0xe0] sm:$0xff]  ;;  %v7630_v37 = vld [vmem:[%s9169_s11 + $0x218] ss:$24 sps:$4 sm:$0xff]  }
 0x256   : > { %v1100_v0 = vadd.f32 1e-05, %v1084_v56  ;;  %v1085_v5 = vsub.f32 %v1021_v13, %v1069_v46  ;;  %1901 = vmatmul.mubr.bf16.gmra.mrb[16].mxu1 %v9624_v7  ;;  %v1050_v12 = vsub.f32 %v8091_v49, %v9594_v11  ;;  %v8092_v56 = vld [vmem:[%s9198_s22 + $0xe8] sm:$0xff] }
 0x257   : > { %v1184_v42 = vmul.f32 %v9447_v55, %v1141_v61  ;;  %v1183_v10 = vmul.f32 %v9450_v36, %v1140_v62  ;;  %1958 = vmatpush1.bf16.msra.mxu1 %v7621_v59  ;;  %v1225_v20 = vadd.f32 %v9457_v3, %v1182_v4  ;;  %v1224_v2 = vadd.f32 %v9464_v15, %v1181_v58  ;;  %v7635_v4 = vld [vmem:[%s9169_s11 + $0x24c] ss:$24 sps:$4 sm:$0xff]  }
 0x258   : > { %7913 = vrsqrt.f32 %v1100_v0  ;;  %v1101_v17 = vadd.f32 1e-05, %v1085_v5  ;;  %1959 = vmatprep.subr.bf16.mxu1 %v7626_v8  ;;  %v1051_v13 = vsub.f32 %v8092_v56, %v9594_v11  ;;  %v8093_v0 = vld [vmem:[%s9198_s22 + $0xf0] sm:$0xff]  ;;  %v7662_v49 = vld [vmem:[%s9169_s11 + $0x104] ss:$24 sps:$4 sm:$0xff]  }
 0x259   : > { %v1227_v23 = vadd.f32 %v9457_v3, %v1184_v42  ;;  %v1226_v25 = vadd.f32 %v9464_v15, %v1183_v10  ;;  %v1052_v5 = vsub.f32 %v8093_v0, %v9606_v26  ;;  %v8094_v42 = vld [vmem:[%s9198_s22 + $0xf8] sm:$0xff] }
 0x25a   : > { %v7910_v48 = vpop.eup %7909  ;;  %7915 = vrsqrt.f32 %v1101_v17  ;;  %v1053_v11 = vsub.f32 %v8094_v42, %v9606_v26  ;;  %v7665_v56 = vld [vmem:[%s9169_s11 + $0x134] ss:$24 sps:$4 sm:$0xff]   ;;  %v7672_v0 = vld [vmem:[%s9169_s11 + $0x1c0] ss:$24 sps:$4 sm:$0xff]  }
 0x25b   : > { %v9648_v28 = vpack.c.bf16 %v1227_v23, %v1225_v20  ;;  %v1143_v30 = vmul.f32 %v7910_v48, %v1047_v16  ;;  %v1142_v29 = vmul.f32 %v7910_v48, %v1046_v38  ;;  %v9650_v35 = vpack.c.bf16 %v1226_v25, %v1224_v2  ;;  %1960 = vmatpush1.bf16.msra.mxu1 %v7624_v19  ;;  %v7638_v23 = vld [vmem:[%s9169_s11 + $0x27c] ss:$24 sps:$4 sm:$0xff]   ;;  %v7678_v42 = vld [vmem:[%s9169_s11 + $0x220] ss:$24 sps:$4 sm:$0xff]  }
 0x25c   : > { %v7912_v50 = vpop.eup %7911  ;;  %1961 = vmatprep.subr.bf16.mxu1 %v7629_v44 }
 0x25d   : > { %1910 = vmatprep.mubr.bf16.mxu1 %v9648_v28  ;;  %v1145_v18 = vmul.f32 %v7912_v50, %v1049_v27  ;;  %v1186_v40 = vmul.f32 %v9447_v55, %v1143_v30  ;;  %v1144_v52 = vmul.f32 %v7912_v50, %v1048_v14  ;;  %v1185_v41 = vmul.f32 %v9450_v36, %v1142_v29  ;;  %v7639_v30 = vld [vmem:[%s9169_s11 + $0x2a8] ss:$24 sps:$4 sm:$0xff]   ;;  %v7647_v29 = vld [vmem:[%s9169_s11 + $0x14] ss:$24 sps:$4 sm:$0xff]  }
 0x25e   : > { %1911 = vmatmul.mubr.bf16.gmra.mrb[20].mxu1 %v9650_v35  ;;  %v7645_v50 = vld [vmem:[%s9169_s11 + $0x10] ss:$24 sps:$4 sm:$0xff]  }
 0x25f   : > { %v1188_v43 = vmul.f32 %v9447_v55, %v1145_v18  ;;  %v1187_v46 = vmul.f32 %v9450_v36, %v1144_v52  ;;  %1962 = vmatpush1.bf16.msra.mxu1 %v7627_v39  ;;  %v1229_v59 = vadd.f32 %v9457_v3, %v1186_v40  ;;  %v1228_v8 = vadd.f32 %v9464_v15, %v1185_v41  ;;  %v7650_v39 = vld [vmem:[%s9169_s11 + $0x44] ss:$24 sps:$4 sm:$0xff]   ;;  %v7648_v18 = vld [vmem:[%s9169_s11 + $0x40] ss:$24 sps:$4 sm:$0xff]   ;;  %v7653_v40 = vld [vmem:[%s9169_s11 + $0x74] ss:$24 sps:$4 sm:$0xff]  }
 0x260   : > { %1963 = vmatprep.subr.bf16.mxu1 %v7632_v32  ;;  %v7651_v52 = vld [vmem:[%s9169_s11 + $0x70] ss:$24 sps:$4 sm:$0xff]   ;;  %v7656_v32 = vld [vmem:[%s9169_s11 + $0xa4] ss:$24 sps:$4 sm:$0xff]   ;;  %v7654_v41 = vld [vmem:[%s9169_s11 + $0xa0] ss:$24 sps:$4 sm:$0xff]  }
 0x261   : > { %v1231_v61 = vadd.f32 %v9457_v3, %v1188_v43  ;;  %v1230_v45 = vadd.f32 %v9464_v15, %v1187_v46  ;;  %v7659_v43 = vld [vmem:[%s9169_s11 + $0xd4] ss:$24 sps:$4 sm:$0xff]   ;;  %v7657_v46 = vld [vmem:[%s9169_s11 + $0xd0] ss:$24 sps:$4 sm:$0xff]  }
 0x262   : > { %v7914_v62 = vpop.eup %7913 }
 0x263   : > { %v9674_v58 = vpack.c.bf16 %v1231_v61, %v1229_v59  ;;  %v1147_v10 = vmul.f32 %v7914_v62, %v1051_v13  ;;  %v1146_v31 = vmul.f32 %v7914_v62, %v1050_v12  ;;  %v9676_v17 = vpack.c.bf16 %v1230_v45, %v1228_v8  ;;  %1964 = vmatpush1.bf16.msra.mxu1 %v7630_v37  ;;  %v7660_v12 = vld [vmem:[%s9169_s11 + $0x100] ss:$24 sps:$4 sm:$0xff]   ;;  %v7663_v13 = vld [vmem:[%s9169_s11 + $0x130] ss:$24 sps:$4 sm:$0xff]   ;;  %v7668_v37 = vld [vmem:[%s9169_s11 + $0x164] ss:$24 sps:$4 sm:$0xff]  }
 0x264   : > { %v7916_v38 = vpop.eup %7915  ;;  %1965 = vmatprep.subr.bf16.mxu1 %v7635_v4  ;;  %v7666_v59 = vld [vmem:[%s9169_s11 + $0x160] ss:$24 sps:$4 sm:$0xff]   ;;  %v7671_v61 = vld [vmem:[%s9169_s11 + $0x194] ss:$24 sps:$4 sm:$0xff]   ;;  %v7669_v45 = vld [vmem:[%s9169_s11 + $0x190] ss:$24 sps:$4 sm:$0xff]  }
 0x265   : > { %1920 = vmatprep.mubr.bf16.mxu1 %v9674_v58  ;;  %v1149_v16 = vmul.f32 %v7916_v38, %v1053_v11  ;;  %v1190_v19 = vmul.f32 %v9447_v55, %v1147_v10  ;;  %v1148_v20 = vmul.f32 %v7916_v38, %v1052_v5  ;;  %v1189_v26 = vmul.f32 %v9450_v36, %v1146_v31  ;;  %v7674_v62 = vld [vmem:[%s9169_s11 + $0x1c4] ss:$24 sps:$4 sm:$0xff]   ;;  %v7677_v5 = vld [vmem:[%s9169_s11 + $0x1f4] ss:$24 sps:$4 sm:$0xff]   ;;  %v7675_v8 = vld [vmem:[%s9169_s11 + $0x1f0] ss:$24 sps:$4 sm:$0xff]  }
 0x266   : > { %1921 = vmatmul.mubr.bf16.gmra.mrb[24].mxu1 %v9676_v17  ;;  %v7680_v4 = vld [vmem:[%s9169_s11 + $0x224] ss:$24 sps:$4 sm:$0xff]   ;;  %v7683_v11 = vld [vmem:[%s9169_s11 + $0x254] ss:$24 sps:$4 sm:$0xff]   ;;  %v7681_v10 = vld [vmem:[%s9169_s11 + $0x250] ss:$24 sps:$4 sm:$0xff]  }
 0x267   : > { %v1192_v25 = vmul.f32 %v9447_v55, %v1149_v16  ;;  %v1191_v48 = vmul.f32 %v9450_v36, %v1148_v20  ;;  %1966 = vmatpush1.bf16.msra.mxu1 %v7633_v6  ;;  %v1233_v14 = vadd.f32 %v9457_v3, %v1190_v19  ;;  %v1232_v22 = vadd.f32 %v9464_v15, %v1189_v26  ;;  %v7641_v55 = vld [vmem:[%s9169_s11 + $0x2ac] ss:$24 sps:$4 sm:$0xff]   ;;  %v7684_v38 = vld [vmem:[%s9169_s11 + $0x280] ss:$24 sps:$4 sm:$0xff]   ;;  %v7687_v16 = vld [vmem:[%s9169_s11 + $0x2b0] ss:$24 sps:$4 sm:$0xff]  }
 0x268   : > { %1967 = vmatprep.subr.bf16.mxu1 %v7638_v23  ;;  %v7686_v31 = vld [vmem:[%s9169_s11 + $0x284] ss:$24 sps:$4 sm:$0xff]   ;;  %v7689_v6 = vld [vmem:[%s9169_s11 + $0x2b4] ss:$24 sps:$4 sm:$0xff]   ;;  %v7690_v20 = vld [vmem:[%s9169_s11 + $0x2e0] ss:$24 sps:$4 sm:$0xff]  }
 0x269   : > { %v1235_v2 = vadd.f32 %v9457_v3, %v1192_v25  ;;  %v1234_v44 = vadd.f32 %v9464_v15, %v1191_v48  ;;  %v7644_v3 = vld [vmem:[%s9169_s11 + $0x2dc] ss:$24 sps:$4 sm:$0xff]   ;;  %v7642_v15 = vld [vmem:[%s9169_s11 + $0x2d8] ss:$24 sps:$4 sm:$0xff]  }
 0x26a   : > { %v7692_v19 = vld [vmem:[%s9169_s11 + $0x2e4] ss:$24 sps:$4 sm:$0xff]   ;;  %s12157_s11 = scalar_lea.vmem [#allocation10], %s9156_s23 }
 0x26b   : > { %v9692_v27 = vpack.c.bf16 %v1235_v2, %v1233_v14  ;;  %v9694_v36 = vpack.c.bf16 %v1234_v44, %v1232_v22  ;;  %1968 = vmatpush1.bf16.msra.mxu1 %v7636_v1 }
 0x26c   : > { %1969 = vmatprep.subr.bf16.mxu1 %v7641_v55 }
 0x26d   : > { %1930 = vmatprep.mubr.bf16.mxu1 %v9692_v27 }
 0x26e   : > { %1931 = vmatmul.mubr.bf16.gmra.mrb[28].mxu1 %v9694_v36 }
 0x26f   : > { %1970 = vmatpush1.bf16.msra.mxu1 %v7639_v30  ;;  %1973 = vmatprep.mubr.bf16.mxu1 %v9486_v51 }
 0x270   : > { %1971 = vmatprep.subr.bf16.mxu1 %v7644_v3 }
 0x273   : > { %1972 = vmatpush1.bf16.msra.mxu1 %v7642_v15 }
 0x274   : > { %2054 = vmatprep.subr.bf16.mxu1 %v7647_v29 }
 0x276   : > { %1974 = vmatmul.mubr.bf16.vlgmr.msra.gmra.mrb[32].mxu1 %v9491_v53 }
 0x277   : > { %1983 = vmatprep.mubr.bf16.mxu1 %v9520_v21  ;;  %2055 = vmatpush1.bf16.msra.mxu1 %v7645_v50 }
 0x278   : > { %2056 = vmatprep.subr.bf16.mxu1 %v7650_v39 }
 0x27b   : > { %2057 = vmatpush1.bf16.msra.mxu1 %v7648_v18 }
 0x27c   : > { %2058 = vmatprep.subr.bf16.mxu1 %v7653_v40 }
 0x27e   : > { %1984 = vmatmul.mubr.bf16.gmra.mrb[36].mxu1 %v9522_v47 }
 0x27f   : > { %1993 = vmatprep.mubr.bf16.mxu1 %v9554_v9  ;;  %2059 = vmatpush1.bf16.msra.mxu1 %v7651_v52 }
 0x280   : > { %2060 = vmatprep.subr.bf16.mxu1 %v7656_v32 }
 0x283   : > { %2061 = vmatpush1.bf16.msra.mxu1 %v7654_v41 }
 0x284   : > { %2062 = vmatprep.subr.bf16.mxu1 %v7659_v43 }
 0x286   : > { %1994 = vmatmul.mubr.bf16.gmra.mrb[40].mxu1 %v9556_v60 }
 0x287   : > { %2003 = vmatprep.mubr.bf16.mxu1 %v9588_v57  ;;  %2063 = vmatpush1.bf16.msra.mxu1 %v7657_v46 }
 0x288   : > { %2064 = vmatprep.subr.bf16.mxu1 %v7662_v49 }
 0x28b   : > { %2065 = vmatpush1.bf16.msra.mxu1 %v7660_v12 }
 0x28c   : > { %2066 = vmatprep.subr.bf16.mxu1 %v7665_v56 }
 0x28e   : > { %2004 = vmatmul.mubr.bf16.gmra.mrb[44].mxu1 %v9590_v63 }
 0x28f   : > { %2013 = vmatprep.mubr.bf16.mxu1 %v9622_v54  ;;  %2067 = vmatpush1.bf16.msra.mxu1 %v7663_v13 }
 0x290   : > { %2068 = vmatprep.subr.bf16.mxu1 %v7668_v37 }
 0x293   : > { %2069 = vmatpush1.bf16.msra.mxu1 %v7666_v59 }
 0x294   : > { %2070 = vmatprep.subr.bf16.mxu1 %v7671_v61 }
 0x296   : > { %2014 = vmatmul.mubr.bf16.gmra.mrb[48].mxu1 %v9624_v7 }
 0x297   : > { %2023 = vmatprep.mubr.bf16.mxu1 %v9648_v28  ;;  %2071 = vmatpush1.bf16.msra.mxu1 %v7669_v45 }
 0x298   : > { %2072 = vmatprep.subr.bf16.mxu1 %v7674_v62 }
 0x29b   : > { %2073 = vmatpush1.bf16.msra.mxu1 %v7672_v0 }
 0x29c   : > { %2074 = vmatprep.subr.bf16.mxu1 %v7677_v5 }
 0x29e   : > { %2024 = vmatmul.mubr.bf16.gmra.mrb[52].mxu1 %v9650_v35 }
 0x29f   : > { %2033 = vmatprep.mubr.bf16.mxu1 %v9674_v58  ;;  %2075 = vmatpush1.bf16.msra.mxu1 %v7675_v8 }
 0x2a0   : > { %2076 = vmatprep.subr.bf16.mxu1 %v7680_v4 }
 0x2a3   : > { %2077 = vmatpush1.bf16.msra.mxu1 %v7678_v42 }
 0x2a4   : > { %2078 = vmatprep.subr.bf16.mxu1 %v7683_v11 }
 0x2a6   : > { %2034 = vmatmul.mubr.bf16.gmra.mrb[56].mxu1 %v9676_v17 }
 0x2a7   : > { %2043 = vmatprep.mubr.bf16.mxu1 %v9692_v27  ;;  %2079 = vmatpush1.bf16.msra.mxu1 %v7681_v10 }
 0x2a8   : > { %2080 = vmatprep.subr.bf16.mxu1 %v7686_v31 }
 0x2ab   : > { %2081 = vmatpush1.bf16.msra.mxu1 %v7684_v38 }
 0x2ac   : > { %2082 = vmatprep.subr.bf16.mxu1 %v7689_v6 }
 0x2ae   : > { %2044 = vmatmul.mubr.bf16.gmra.mrb[60].mxu1 %v9694_v36 }
 0x2af   : > { %2083 = vmatpush1.bf16.msra.mxu1 %v7687_v16  ;;  %2086 = vmatprep.mubr.bf16.mxu1 %v9486_v51 }
 0x2b0   : > { %2084 = vmatprep.subr.bf16.mxu1 %v7692_v19 }
 0x2b3   : > { %2085 = vmatpush1.bf16.msra.mxu1 %v7690_v20 }
 0x2b6   : > { %2087 = vmatmul.mubr.bf16.vlgmr.msra.gmra.mrb[64].mxu1 %v9491_v53 }
 0x2b7   : > { %2096 = vmatprep.mubr.bf16.mxu1 %v9520_v21 }
 0x2be   : > { %2097 = vmatmul.mubr.bf16.gmra.mrb[68].mxu1 %v9522_v47 }
 0x2bf   : > { %2106 = vmatprep.mubr.bf16.mxu1 %v9554_v9 }
 0x2c6   : > { %2107 = vmatmul.mubr.bf16.gmra.mrb[72].mxu1 %v9556_v60 }
 0x2c7   : > { %2116 = vmatprep.mubr.bf16.mxu1 %v9588_v57 }
 0x2ce   : > { %2117 = vmatmul.mubr.bf16.gmra.mrb[76].mxu1 %v9590_v63 }
 0x2cf   : > { %2126 = vmatprep.mubr.bf16.mxu1 %v9622_v54 }
 0x2d6   : > { %2127 = vmatmul.mubr.bf16.gmra.mrb[80].mxu1 %v9624_v7 }
 0x2d7   : > { %2136 = vmatprep.mubr.bf16.mxu1 %v9648_v28 }
 0x2de   : > { %2137 = vmatmul.mubr.bf16.gmra.mrb[84].mxu1 %v9650_v35 }
 0x2df   : > { %2146 = vmatprep.mubr.bf16.mxu1 %v9674_v58 }
 0x2e6   : > { %2147 = vmatmul.mubr.bf16.gmra.mrb[88].mxu1 %v9676_v17 }
 0x2e7   : > { %2156 = vmatprep.mubr.bf16.mxu1 %v9692_v27 }
 0x2ee   : > { %2157 = vmatmul.mubr.bf16.gmra.mrb[92].mxu1 %v9694_v36 }
 0x309   : > { %v1862_v51 = vpop.f32.mrb[0].mxu1 }
 0x30a   : > { %v1864_v53 = vpop.f32.mrb[1].mxu1 }
 0x30b   : > { %v1866_v21 = vpop.f32.mrb[2].mxu1 }
 0x30c   : > { %v2167_v47 = vpack.c.bf16 %v1866_v21, %v1862_v51  ;;  %v1868_v9 = vpop.f32.mrb[3].mxu1 }
 0x30d   : > { %v2168_v60 = vpack.c.bf16 %v1868_v9, %v1864_v53 }
 0x30e   : > { %7124 = vmatprep.mubr.bf16.mxu1 %v2167_v47 }
 0x30f   : > { %7156 = vmatprep.mubr.bf16.mxu0 %v2168_v60 }
 0x311   : > { %v9765_v57 = vpop.f32.mrb[4].mxu1 }
 0x312   : > { %v9767_v63 = vpop.f32.mrb[5].mxu1 }
 0x313   : > { %v9769_v54 = vpop.f32.mrb[6].mxu1 }
 0x314   : > { %v2173_v7 = vpack.c.bf16 %v9769_v54, %v9765_v57  ;;  %v9773_v28 = vpop.f32.mrb[7].mxu1 }
 0x315   : > { %v2174_v35 = vpack.c.bf16 %v9773_v28, %v9767_v63 }
 0x319   : > { %v9777_v58 = vpop.f32.mrb[8].mxu1 }
 0x31a   : > { %v9779_v17 = vpop.f32.mrb[9].mxu1 }
 0x31b   : > { %v9781_v23 = vpop.f32.mrb[10].mxu1 }
 0x31c   : > { %v2179_v26 = vpack.c.bf16 %v9781_v23, %v9777_v58  ;;  %v9785_v25 = vpop.f32.mrb[11].mxu1 }
 0x31d   : > { %v2180_v48 = vpack.c.bf16 %v9785_v25, %v9779_v17 }
 0x321   : > { %v9789_v1 = vpop.f32.mrb[12].mxu1 }
 0x322   : > { %v9791_v14 = vpop.f32.mrb[13].mxu1 }
 0x323   : > { %v9793_v2 = vpop.f32.mrb[14].mxu1 }
 0x324   : > { %v2185_v44 = vpack.c.bf16 %v9793_v2, %v9789_v1  ;;  %v9797_v22 = vpop.f32.mrb[15].mxu1 }
 0x325   : > { %v2186_v55 = vpack.c.bf16 %v9797_v22, %v9791_v14 }
 0x329   : > { %v9801_v27 = vpop.f32.mrb[16].mxu1 }
 0x32a   : > { %v9803_v36 = vpop.f32.mrb[17].mxu1 }
 0x32b   : > { %v9805_v30 = vpop.f32.mrb[18].mxu1 }
 0x32c   : > { %v2191_v3 = vpack.c.bf16 %v9805_v30, %v9801_v27  ;;  %v9809_v15 = vpop.f32.mrb[19].mxu1 }
 0x32d   : > { %v2192_v29 = vpack.c.bf16 %v9809_v15, %v9803_v36 }
 0x331   : > { %v9813_v50 = vpop.f32.mrb[20].mxu1 }
 0x332   : > { %v9815_v39 = vpop.f32.mrb[21].mxu1 }
 0x333   : > { %v9817_v18 = vpop.f32.mrb[22].mxu1 }
 0x334   : > { %v2197_v40 = vpack.c.bf16 %v9817_v18, %v9813_v50  ;;  %v9821_v52 = vpop.f32.mrb[23].mxu1 }
 0x335   : > { %v2198_v32 = vpack.c.bf16 %v9821_v52, %v9815_v39 }
 0x339   : > { %v9825_v41 = vpop.f32.mrb[24].mxu1 }
 0x33a   : > { %v9827_v43 = vpop.f32.mrb[25].mxu1 }
 0x33b   : > { %v9829_v46 = vpop.f32.mrb[26].mxu1 }
 0x33c   : > { %v2203_v49 = vpack.c.bf16 %v9829_v46, %v9825_v41  ;;  %v9833_v12 = vpop.f32.mrb[27].mxu1 }
 0x33d   : > { %v2204_v56 = vpack.c.bf16 %v9833_v12, %v9827_v43 }
 0x341   : > { %v9837_v13 = vpop.f32.mrb[28].mxu1 }
 0x342   : > { %v9839_v37 = vpop.f32.mrb[29].mxu1 }
 0x343   : > { %v9841_v59 = vpop.f32.mrb[30].mxu1 }
 0x344   : > { %v2209_v61 = vpack.c.bf16 %v9841_v59, %v9837_v13  ;;  %v9845_v45 = vpop.f32.mrb[31].mxu1  ;;  %v9908_v59 = vld [vmem:[#allocation2] sm:$0xff] }
 0x345   : > { %v2210_v62 = vpack.c.bf16 %v9845_v45, %v9839_v37 }
 0x349   : > { %v1975_v0 = vpop.f32.mrb[32].mxu1 }
 0x34a   : > { %v1977_v5 = vpop.f32.mrb[33].mxu1 }
 0x34b   : > { %v1979_v8 = vpop.f32.mrb[34].mxu1 }
 0x34c   : > { %v2169_v4 = vpack.c.bf16 %v1979_v8, %v1975_v0  ;;  %v1981_v42 = vpop.f32.mrb[35].mxu1 }
 0x34d   : > { %v2170_v11 = vpack.c.bf16 %v1981_v42, %v1977_v5 }
 0x34e   : > { %7108 = vmatprep.subr.bf16.mxu1 %v2169_v4 }
 0x34f   : > { %7109 = vmatpush3.bf16.xpose.msra.mxu1 %v2169_v4  ;;  %7140 = vmatprep.subr.bf16.mxu0 %v2170_v11 }
 0x350   : > { %7141 = vmatpush3.bf16.xpose.msra.mxu0 %v2170_v11 }
 0x351   : > { %v1985_v10 = vpop.f32.mrb[36].mxu1 }
 0x352   : > { %v1987_v31 = vpop.f32.mrb[37].mxu1 }
 0x353   : > { %v1989_v38 = vpop.f32.mrb[38].mxu1 }
 0x354   : > { %v2175_v6 = vpack.c.bf16 %v1989_v38, %v1985_v10  ;;  %v1991_v16 = vpop.f32.mrb[39].mxu1 }
 0x355   : > { %v2176_v19 = vpack.c.bf16 %v1991_v16, %v1987_v31 }
 0x356   : > { %7110 = vmatprep.subr.bf16.mxu1 %v2175_v6 }
 0x357   : > { %7111 = vmatpush3.bf16.xpose.msra.mxu1 %v2175_v6  ;;  %7142 = vmatprep.subr.bf16.mxu0 %v2176_v19 }
 0x358   : > { %7143 = vmatpush3.bf16.xpose.msra.mxu0 %v2176_v19 }
 0x359   : > { %v1995_v20 = vpop.f32.mrb[40].mxu1 }
 0x35a   : > { %v1997_v51 = vpop.f32.mrb[41].mxu1 }
 0x35b   : > { %v1999_v53 = vpop.f32.mrb[42].mxu1 }
 0x35c   : > { %v2181_v21 = vpack.c.bf16 %v1999_v53, %v1995_v20  ;;  %v2001_v47 = vpop.f32.mrb[43].mxu1 }
 0x35d   : > { %v2182_v9 = vpack.c.bf16 %v2001_v47, %v1997_v51 }
 0x35e   : > { %7112 = vmatprep.subr.bf16.mxu1 %v2181_v21 }
 0x35f   : > { %7113 = vmatpush3.bf16.xpose.msra.mxu1 %v2181_v21  ;;  %7144 = vmatprep.subr.bf16.mxu0 %v2182_v9 }
 0x360   : > { %7145 = vmatpush3.bf16.xpose.msra.mxu0 %v2182_v9 }
 0x361   : > { %v2005_v60 = vpop.f32.mrb[44].mxu1 }
 0x362   : > { %v2007_v0 = vpop.f32.mrb[45].mxu1 }
 0x363   : > { %v2009_v5 = vpop.f32.mrb[46].mxu1 }
 0x364   : > { %v2187_v8 = vpack.c.bf16 %v2009_v5, %v2005_v60  ;;  %v2011_v4 = vpop.f32.mrb[47].mxu1 }
 0x365   : > { %v2188_v42 = vpack.c.bf16 %v2011_v4, %v2007_v0 }
 0x366   : > { %7114 = vmatprep.subr.bf16.mxu1 %v2187_v8 }
 0x367   : > { %7115 = vmatpush3.bf16.xpose.msra.mxu1 %v2187_v8  ;;  %7146 = vmatprep.subr.bf16.mxu0 %v2188_v42 }
 0x368   : > { %7147 = vmatpush3.bf16.xpose.msra.mxu0 %v2188_v42 }
 0x369   : > { %v2015_v11 = vpop.f32.mrb[48].mxu1 }
 0x36a   : > { %v2017_v10 = vpop.f32.mrb[49].mxu1 }
 0x36b   : > { %v2019_v31 = vpop.f32.mrb[50].mxu1 }
 0x36c   : > { %v2193_v38 = vpack.c.bf16 %v2019_v31, %v2015_v11  ;;  %v2021_v6 = vpop.f32.mrb[51].mxu1 }
 0x36d   : > { %v2194_v16 = vpack.c.bf16 %v2021_v6, %v2017_v10 }
 0x36e   : > { %7116 = vmatprep.subr.bf16.mxu1 %v2193_v38 }
 0x36f   : > { %7117 = vmatpush3.bf16.xpose.msra.mxu1 %v2193_v38  ;;  %7148 = vmatprep.subr.bf16.mxu0 %v2194_v16 }
 0x370   : > { %7149 = vmatpush3.bf16.xpose.msra.mxu0 %v2194_v16 }
 0x371   : > { %v2025_v19 = vpop.f32.mrb[52].mxu1 }
 0x372   : > { %v2027_v20 = vpop.f32.mrb[53].mxu1 }
 0x373   : > { %v2029_v51 = vpop.f32.mrb[54].mxu1 }
 0x374   : > { %v2199_v53 = vpack.c.bf16 %v2029_v51, %v2025_v19  ;;  %v2031_v21 = vpop.f32.mrb[55].mxu1 }
 0x375   : > { %v2200_v47 = vpack.c.bf16 %v2031_v21, %v2027_v20 }
 0x376   : > { %7118 = vmatprep.subr.bf16.mxu1 %v2199_v53 }
 0x377   : > { %7119 = vmatpush3.bf16.xpose.msra.mxu1 %v2199_v53  ;;  %7150 = vmatprep.subr.bf16.mxu0 %v2200_v47 }
 0x378   : > { %7151 = vmatpush3.bf16.xpose.msra.mxu0 %v2200_v47 }
 0x379   : > { %v2035_v9 = vpop.f32.mrb[56].mxu1 }
 0x37a   : > { %v2037_v60 = vpop.f32.mrb[57].mxu1 }
 0x37b   : > { %v2039_v0 = vpop.f32.mrb[58].mxu1 }
 0x37c   : > { %v2205_v5 = vpack.c.bf16 %v2039_v0, %v2035_v9  ;;  %v2041_v8 = vpop.f32.mrb[59].mxu1 }
 0x37d   : > { %v2206_v4 = vpack.c.bf16 %v2041_v8, %v2037_v60 }
 0x37e   : > { %7120 = vmatprep.subr.bf16.mxu1 %v2205_v5 }
 0x37f   : > { %7121 = vmatpush3.bf16.xpose.msra.mxu1 %v2205_v5  ;;  %7152 = vmatprep.subr.bf16.mxu0 %v2206_v4  ;;  %v9912_v5 = vld [vmem:[#allocation2 + $0x8] sm:$0xff] }
 0x380   : > { %7153 = vmatpush3.bf16.xpose.msra.mxu0 %v2206_v4 }
 0x381   : > { %v2045_v42 = vpop.f32.mrb[60].mxu1 }
 0x382   : > { %v2047_v11 = vpop.f32.mrb[61].mxu1 }
 0x383   : > { %v2049_v10 = vpop.f32.mrb[62].mxu1 }
 0x384   : > { %v2211_v31 = vpack.c.bf16 %v2049_v10, %v2045_v42  ;;  %v2051_v38 = vpop.f32.mrb[63].mxu1 }
 0x385   : > { %v2212_v6 = vpack.c.bf16 %v2051_v38, %v2047_v11  ;;  %v9919_v11 = vld [vmem:[#allocation2 + $0x10] sm:$0xff] }
 0x386   : > { %7122 = vmatprep.subr.bf16.mxu1 %v2211_v31 }
 0x387   : > { %7123 = vmatpush3.bf16.xpose.msra.mxu1 %v2211_v31  ;;  %7154 = vmatprep.subr.bf16.mxu0 %v2212_v6 }
 0x388   : > { %7155 = vmatpush3.bf16.xpose.msra.mxu0 %v2212_v6 }
 0x389   : > { %v2088_v16 = vpop.f32.mrb[64].mxu1 }
 0x38a   : > { %v2090_v19 = vpop.f32.mrb[65].mxu1 }
 0x38b   : > { %v2092_v20 = vpop.f32.mrb[66].mxu1 }
 0x38c   : > { %v2171_v51 = vpack.c.bf16 %v2092_v20, %v2088_v16  ;;  %v2094_v53 = vpop.f32.mrb[67].mxu1  ;;  %v9929_v16 = vld [vmem:[#allocation2 + $0x18] sm:$0xff]  ;;  %v9935_v20 = vld [vmem:[#allocation2 + $0x20] sm:$0xff] }
 0x38d   : > { %v9849_v21 = vpack.c.bf16 %v2094_v53, %v2090_v19 }
 0x38e   : > { %7125 = vmatmul.mubr.bf16.vlgmr.msra.gmra.mrb[96].mxu1 %v2173_v7  ;;  %7172 = vmatprep.subr.bf16.mxu1 %v2171_v51 }
 0x38f   : > { %7128 = vmatprep.mubr.bf16.mxu1 %v2179_v26  ;;  %7157 = vmatmul.mubr.bf16.vlgmr.msra.gmra.mrb[0].mxu0 %v2174_v35 }
 0x390   : > { %7173 = vmatpush3.bf16.msra.mxu1 %v2171_v51  ;;  %7160 = vmatprep.mubr.bf16.mxu0 %v2180_v48 }
 0x391   : > { %v2098_v47 = vpop.f32.mrb[68].mxu1 }
 0x392   : > { %v2100_v9 = vpop.f32.mrb[69].mxu1 }
 0x393   : > { %v2102_v60 = vpop.f32.mrb[70].mxu1 }
 0x394   : > { %v2177_v0 = vpack.c.bf16 %v2102_v60, %v2098_v47  ;;  %v2104_v57 = vpop.f32.mrb[71].mxu1  ;;  %v9943_v60 = vld [vmem:[#allocation2 + $0x28] sm:$0xff] }
 0x395   : > { %v9863_v54 = vpack.c.bf16 %v2104_v57, %v2100_v9 }
 0x396   : > { %7129 = vmatmul.mubr.bf16.gmra.mrb[100].mxu1 %v2185_v44  ;;  %7174 = vmatprep.subr.bf16.mxu1 %v2177_v0 }
 0x397   : > { %7132 = vmatprep.mubr.bf16.mxu1 %v2191_v3  ;;  %7161 = vmatmul.mubr.bf16.gmra.mrb[4].mxu0 %v2186_v55 }
 0x398   : > { %7175 = vmatpush3.bf16.msra.mxu1 %v2177_v0  ;;  %7164 = vmatprep.mubr.bf16.mxu0 %v2192_v29 }
 0x399   : > { %v2108_v63 = vpop.f32.mrb[72].mxu1 }
 0x39a   : > { %v2110_v7 = vpop.f32.mrb[73].mxu1 }
 0x39b   : > { %v2112_v28 = vpop.f32.mrb[74].mxu1 }
 0x39c   : > { %v2183_v35 = vpack.c.bf16 %v2112_v28, %v2108_v63  ;;  %v2114_v58 = vpop.f32.mrb[75].mxu1 }
 0x39d   : > { %v9877_v17 = vpack.c.bf16 %v2114_v58, %v2110_v7  ;;  %v9949_v7 = vld [vmem:[#allocation2 + $0x30] sm:$0xff] }
 0x39e   : > { %7133 = vmatmul.mubr.bf16.gmra.mrb[104].mxu1 %v2197_v40  ;;  %7176 = vmatprep.subr.bf16.mxu1 %v2183_v35 }
 0x39f   : > { %7136 = vmatprep.mubr.bf16.mxu1 %v2203_v49  ;;  %7165 = vmatmul.mubr.bf16.gmra.mrb[8].mxu0 %v2198_v32 }
 0x3a0   : > { %7177 = vmatpush3.bf16.msra.mxu1 %v2183_v35  ;;  %7168 = vmatprep.mubr.bf16.mxu0 %v2204_v56 }
 0x3a1   : > { %v2118_v23 = vpop.f32.mrb[76].mxu1 }
 0x3a2   : > { %v2120_v26 = vpop.f32.mrb[77].mxu1 }
 0x3a3   : > { %v2122_v25 = vpop.f32.mrb[78].mxu1 }
 0x3a4   : > { %v2189_v48 = vpack.c.bf16 %v2122_v25, %v2118_v23  ;;  %v2124_v1 = vpop.f32.mrb[79].mxu1 }
 0x3a5   : > { %v9891_v14 = vpack.c.bf16 %v2124_v1, %v2120_v26  ;;  %v2222_v26 = vld [vmem:[#allocation2 + $0x38] sm:$0xff] }
 0x3a6   : > { %7137 = vmatmul.mubr.bf16.gmra.mrb[108].mxu1 %v2209_v61  ;;  %7178 = vmatprep.subr.bf16.mxu1 %v2189_v48 }
 0x3a7   : > { %7169 = vmatmul.mubr.bf16.gmra.mrb[12].mxu0 %v2210_v62  ;;  %7179 = vmatpush3.bf16.msra.mxu1 %v2189_v48  ;;  %v2223_v48 = vld [vmem:[#allocation2 + $0x40] sm:$0xff] }
 0x3a9   : > { %v2128_v2 = vpop.f32.mrb[80].mxu1 }
 0x3aa   : > { %v2130_v44 = vpop.f32.mrb[81].mxu1 }
 0x3ab   : > { %v2132_v22 = vpop.f32.mrb[82].mxu1 }
 0x3ac   : > { %v2195_v55 = vpack.c.bf16 %v2132_v22, %v2128_v2  ;;  %v2134_v27 = vpop.f32.mrb[83].mxu1 }
 0x3ad   : > { %v9899_v36 = vpack.c.bf16 %v2134_v27, %v2130_v44 }
 0x3ae   : > { %7180 = vmatprep.subr.bf16.mxu1 %v2195_v55 }
 0x3af   : > { %7181 = vmatpush3.bf16.msra.mxu1 %v2195_v55  ;;  %v2224_v55 = vld [vmem:[#allocation2 + $0x48] sm:$0xff] }
 0x3b1   : > { %v2138_v30 = vpop.f32.mrb[84].mxu1 }
 0x3b2   : > { %v2140_v3 = vpop.f32.mrb[85].mxu1 }
 0x3b3   : > { %v2142_v15 = vpop.f32.mrb[86].mxu1 }
 0x3b4   : > { %v2201_v29 = vpack.c.bf16 %v2142_v15, %v2138_v30  ;;  %v2144_v50 = vpop.f32.mrb[87].mxu1  ;;  %v2225_v15 = vld [vmem:[#allocation2 + $0x50] sm:$0xff] }
 0x3b5   : > { %v9901_v39 = vpack.c.bf16 %v2144_v50, %v2140_v3 }
 0x3b6   : > { %7182 = vmatprep.subr.bf16.mxu1 %v2201_v29 }
 0x3b7   : > { %7183 = vmatpush3.bf16.msra.mxu1 %v2201_v29 }
 0x3b9   : > { %v2148_v18 = vpop.f32.mrb[88].mxu1 }
 0x3ba   : > { %v2150_v40 = vpop.f32.mrb[89].mxu1 }
 0x3bb   : > { %v2152_v52 = vpop.f32.mrb[90].mxu1 }
 0x3bc   : > { %v2207_v32 = vpack.c.bf16 %v2152_v52, %v2148_v18  ;;  %v2154_v41 = vpop.f32.mrb[91].mxu1  ;;  %v2226_v52 = vld [vmem:[#allocation2 + $0x58] sm:$0xff] }
 0x3bd   : > { %v9903_v43 = vpack.c.bf16 %v2154_v41, %v2150_v40  ;;  %v2227_v41 = vld [vmem:[#allocation2 + $0x60] sm:$0xff] }
 0x3be   : > { %7184 = vmatprep.subr.bf16.mxu1 %v2207_v32 }
 0x3bf   : > { %7185 = vmatpush3.bf16.msra.mxu1 %v2207_v32 }
 0x3c1   : > { %v2158_v46 = vpop.f32.mrb[92].mxu1 }
 0x3c2   : > { %v2160_v49 = vpop.f32.mrb[93].mxu1 }
 0x3c3   : > { %v2162_v12 = vpop.f32.mrb[94].mxu1 }
 0x3c4   : > { %v2213_v56 = vpack.c.bf16 %v2162_v12, %v2158_v46  ;;  %v2164_v13 = vpop.f32.mrb[95].mxu1 }
 0x3c5   : > { %v9905_v37 = vpack.c.bf16 %v2164_v13, %v2160_v49  ;;  %v2228_v13 = vld [vmem:[#allocation2 + $0x68] sm:$0xff] }
 0x3c6   : > { %7186 = vmatprep.subr.bf16.mxu1 %v2213_v56 }
 0x3c7   : > { %7187 = vmatpush3.bf16.msra.mxu1 %v2213_v56 }
 0x3c8   : > { %7204 = vmatprep.subr.bf16.mxu1 %v9849_v21 }
 0x461   : > { %v7126_v61 = vpop.f32.mrb[96].mxu1 }
 0x462   : > { %v2265_v45 = vpop.f32.mrb[97].mxu1  ;;  %v9910_v62 = vpop.f32.mrb[0].mxu0  ;;  %v9932_v19 = vadd.f32 %v7126_v61, %v9919_v11 }
 0x463   : > { %v9915_v8 = vadd.f32 %v2265_v45, %v9908_v59  ;;  %v7127_v4 = vpop.f32.mrb[98].mxu1  ;;  %v9917_v42 = vpop.f32.mrb[1].mxu0 }
 0x464   : > { %v2268_v10 = vpop.f32.mrb[99].mxu1  ;;  %v9921_v31 = vpop.f32.mrb[2].mxu0  ;;  %v9938_v51 = vadd.f32 %v7127_v4, %v9929_v16 }
 0x465   : > { %v9924_v38 = vadd.f32 %v2268_v10, %v9912_v5  ;;  %v9926_v6 = vpop.f32.mrb[3].mxu0  ;;  %2425 = vmax.xlane.f32.xlu0 %v9915_v8  ;;  %v2229_v10 = vld [vmem:[#allocation2 + $0x70] sm:$0xff] }
 0x467   : > { %2427 = vmax.xlane.f32.xlu1 %v9924_v38 }
 0x469   : > { %v7130_v53 = vpop.f32.mrb[100].mxu1  ;;  %2429 = vmax.xlane.f32.xlu0 %v9932_v19 }
 0x46a   : > { %v2281_v47 = vpop.f32.mrb[101].mxu1  ;;  %v9941_v9 = vpop.f32.mrb[4].mxu0  ;;  %v9958_v25 = vadd.f32 %v7130_v53, %v9949_v7 }
 0x46b   : > { %v9946_v0 = vadd.f32 %v2281_v47, %v9935_v20  ;;  %v7131_v57 = vpop.f32.mrb[102].mxu1  ;;  %v2378_v63 = vpop.f32.mrb[5].mxu0  ;;  %2431 = vmax.xlane.f32.xlu1 %v9938_v51 }
 0x46c   : > { %v2284_v28 = vpop.f32.mrb[103].mxu1  ;;  %v9951_v35 = vpop.f32.mrb[6].mxu0  ;;  %v9961_v1 = vadd.f32 %v7131_v57, %v2222_v26 }
 0x46d   : > { %v9954_v58 = vadd.f32 %v2284_v28, %v9943_v60  ;;  %v2381_v23 = vpop.f32.mrb[7].mxu0  ;;  %2433 = vmax.xlane.f32.xlu0 %v9946_v0 }
 0x46f   : > { %2435 = vmax.xlane.f32.xlu1 %v9954_v58 }
 0x471   : > { %v7134_v2 = vpop.f32.mrb[104].mxu1  ;;  %2437 = vmax.xlane.f32.xlu0 %v9958_v25 }
 0x472   : > { %v2297_v44 = vpop.f32.mrb[105].mxu1  ;;  %v7166_v22 = vpop.f32.mrb[8].mxu0  ;;  %v9970_v32 = vadd.f32 %v7134_v2, %v2225_v15  ;;  %v2230_v2 = vld [vmem:[#allocation2 + $0x78] sm:$0xff] }
 0x473   : > { %v9964_v27 = vadd.f32 %v2297_v44, %v2223_v48  ;;  %v7135_v30 = vpop.f32.mrb[106].mxu1  ;;  %v2394_v3 = vpop.f32.mrb[9].mxu0  ;;  %2439 = vmax.xlane.f32.xlu1 %v9961_v1 }
 0x474   : > { %v2300_v29 = vpop.f32.mrb[107].mxu1  ;;  %v7167_v50 = vpop.f32.mrb[10].mxu0  ;;  %v9973_v46 = vadd.f32 %v7135_v30, %v2226_v52 }
 0x475   : > { %v9967_v18 = vadd.f32 %v2300_v29, %v2224_v55  ;;  %v2397_v40 = vpop.f32.mrb[11].mxu0  ;;  %2441 = vmax.xlane.f32.xlu0 %v9964_v27  ;;  %v9990_v29 = vadd.f32 %v9917_v42, %v9908_v59  ;;  %v10009_v59 = vadd.f32 %v2378_v63, %v9935_v20  ;;  %v10022_v42 = vadd.f32 %v9951_v35, %v2222_v26 }
 0x477   : > { %2443 = vmax.xlane.f32.xlu1 %v9967_v18 }
 0x479   : > { %v7138_v49 = vpop.f32.mrb[108].mxu1  ;;  %2445 = vmax.xlane.f32.xlu0 %v9970_v32 }
 0x47a   : > { %v2313_v12 = vpop.f32.mrb[109].mxu1  ;;  %v7170_v56 = vpop.f32.mrb[12].mxu0  ;;  %v9982_v44 = vadd.f32 %v7138_v49, %v2229_v10  ;;  %v10000_v49 = vadd.f32 %v9910_v62, %v9919_v11  ;;  %v10018_v62 = vadd.f32 %v9941_v9, %v9949_v7  ;;  %v10025_v11 = vadd.f32 %v2394_v3, %v2223_v48 }
 0x47b   : > { %v9976_v61 = vadd.f32 %v2313_v12, %v2227_v41  ;;  %v7139_v45 = vpop.f32.mrb[110].mxu1  ;;  %v2410_v4 = vpop.f32.mrb[13].mxu0  ;;  %2447 = vmax.xlane.f32.xlu1 %v9973_v46  ;;  %v9995_v12 = vadd.f32 %v9926_v6, %v9912_v5  ;;  %v10013_v5 = vadd.f32 %v2381_v23, %v9943_v60  ;;  %v10031_v6 = vadd.f32 %v7166_v22, %v2225_v15 }
 0x47c   : > { %v2316_v53 = vpop.f32.mrb[111].mxu1  ;;  %v7171_v47 = vpop.f32.mrb[14].mxu0  ;;  %v9985_v30 = vadd.f32 %v7139_v45, %v2230_v2  ;;  %v10005_v45 = vadd.f32 %v9921_v31, %v9929_v16  ;;  %v10028_v31 = vadd.f32 %v2397_v40, %v2224_v55  ;;  %v10034_v16 = vadd.f32 %v7167_v50, %v2226_v52 }
 0x47d   : > { %v9979_v57 = vadd.f32 %v2316_v53, %v2228_v13  ;;  %v2413_v28 = vpop.f32.mrb[15].mxu0  ;;  %2449 = vmax.xlane.f32.xlu0 %v9976_v61  ;;  %v10037_v20 = vadd.f32 %v2410_v4, %v2227_v41  ;;  %v10040_v9 = vadd.f32 %v7171_v47, %v2230_v2  ;;  %v10043_v60 = vadd.f32 %v7170_v56, %v2229_v10 }
 0x47e   : > { %v10046_v63 = vadd.f32 %v2413_v28, %v2228_v13 }
 0x47f   : > { %2451 = vmax.xlane.f32.xlu1 %v9979_v57 }
 0x481   : > { %2453 = vmax.xlane.f32.xlu0 %v9982_v44 }
 0x483   : > { %2455 = vmax.xlane.f32.xlu1 %v9985_v30 }
 0x485   : > { %2457 = vmax.xlane.f32.xlu0 %v9990_v29 }
 0x487   : > { %2459 = vmax.xlane.f32.xlu1 %v9995_v12 }
 0x489   : > { %2461 = vmax.xlane.f32.xlu0 %v10000_v49 }
 0x48b   : > { %2463 = vmax.xlane.f32.xlu1 %v10005_v45 }
 0x48d   : > { %2465 = vmax.xlane.f32.xlu0 %v10009_v59 }
 0x48f   : > { %2467 = vmax.xlane.f32.xlu1 %v10013_v5 }
 0x491   : > { %2469 = vmax.xlane.f32.xlu0 %v10018_v62 }
 0x493   : > { %2471 = vmax.xlane.f32.xlu1 %v10022_v42 }
 0x495   : > { %2473 = vmax.xlane.f32.xlu0 %v10025_v11 }
 0x497   : > { %2475 = vmax.xlane.f32.xlu1 %v10028_v31 }
 0x499   : > { %2477 = vmax.xlane.f32.xlu0 %v10031_v6 }
 0x49b   : > { %2479 = vmax.xlane.f32.xlu1 %v10034_v16 }
 0x49d   : > { %2481 = vmax.xlane.f32.xlu0 %v10037_v20 }
 0x49f   : > { %2487 = vmax.xlane.f32.xlu1 %v10040_v9 }
 0x4a1   : > { %2485 = vmax.xlane.f32.xlu0 %v10043_v60 }
 0x4a3   : > { %2483 = vmax.xlane.f32.xlu1 %v10046_v63 }
 0x4f2   : > { %v2426_v7 = vpop.xlane.xlu0 %2425 }
 0x4f3   : > { %v2489_v35 = vsub.f32 %v9915_v8, %v2426_v7 }
 0x4f4   : > { %v2428_v23 = vpop.xlane.xlu1 %2427 }
 0x4f5   : > { %v2521_v26 = vmul.f32 1.442695, %v2489_v35  ;;  %v2490_v48 = vsub.f32 %v9924_v38, %v2428_v23 }
 0x4f6   : > { %v2430_v22 = vpop.xlane.xlu0 %2429 }
 0x4f7   : > { %7917 = vpow2.f32 %v2521_v26  ;;  %v2523_v55 = vmul.f32 1.442695, %v2490_v48  ;;  %v2491_v3 = vsub.f32 %v9932_v19, %v2430_v22 }
 0x4f8   : > { %v2432_v15 = vpop.xlane.xlu1 %2431 }
 0x4f9   : > { %7919 = vpow2.f32 %v2523_v55  ;;  %v2525_v50 = vmul.f32 1.442695, %v2491_v3  ;;  %v2492_v40 = vsub.f32 %v9938_v51, %v2432_v15 }
 0x4fa   : > { %v2434_v52 = vpop.xlane.xlu0 %2433 }
 0x4fb   : > { %7921 = vpow2.f32 %v2525_v50  ;;  %v2527_v41 = vmul.f32 1.442695, %v2492_v40  ;;  %v2493_v56 = vsub.f32 %v9946_v0, %v2434_v52 }
 0x4fc   : > { %v2436_v8 = vpop.xlane.xlu1 %2435 }
 0x4fd   : > { %7923 = vpow2.f32 %v2527_v41  ;;  %v2529_v13 = vmul.f32 1.442695, %v2493_v56  ;;  %v2494_v38 = vsub.f32 %v9954_v58, %v2436_v8 }
 0x4fe   : > { %v2438_v4 = vpop.xlane.xlu0 %2437 }
 0x4ff   : > { %7925 = vpow2.f32 %v2529_v13  ;;  %v2531_v10 = vmul.f32 1.442695, %v2494_v38  ;;  %v2495_v19 = vsub.f32 %v9958_v25, %v2438_v4 }
 0x500   : > { %v2440_v53 = vpop.xlane.xlu1 %2439 }
 0x501   : > { %v10057_v47 = vpop.eup %7917  ;;  %7927 = vpow2.f32 %v2531_v10  ;;  %v2533_v51 = vmul.f32 1.442695, %v2495_v19  ;;  %v2496_v28 = vsub.f32 %v9961_v1, %v2440_v53 }
 0x502   : > { %2585 = vadd.xlane.f32.xlu0 %v10057_v47  ;;  %v2442_v0 = vpop.xlane.xlu0 %2441 }
 0x503   : > { %v10061_v2 = vpop.eup %7919  ;;  %7929 = vpow2.f32 %v2533_v51  ;;  %v2535_v7 = vmul.f32 1.442695, %v2496_v28  ;;  %v2497_v58 = vsub.f32 %v9964_v27, %v2442_v0 }
 0x504   : > { %2587 = vadd.xlane.f32.xlu1 %v10061_v2  ;;  %v2444_v35 = vpop.xlane.xlu1 %2443 }
 0x505   : > { %v10065_v25 = vpop.eup %7921  ;;  %7931 = vpow2.f32 %v2535_v7  ;;  %v2537_v23 = vmul.f32 1.442695, %v2497_v58  ;;  %v2498_v26 = vsub.f32 %v9967_v18, %v2444_v35 }
 0x506   : > { %2589 = vadd.xlane.f32.xlu0 %v10065_v25  ;;  %v2446_v1 = vpop.xlane.xlu0 %2445 }
 0x507   : > { %v10069_v48 = vpop.eup %7923  ;;  %7933 = vpow2.f32 %v2537_v23  ;;  %v2539_v22 = vmul.f32 1.442695, %v2498_v26  ;;  %v2499_v55 = vsub.f32 %v9970_v32, %v2446_v1 }
 0x508   : > { %2591 = vadd.xlane.f32.xlu1 %v10069_v48  ;;  %v2448_v27 = vpop.xlane.xlu1 %2447 }
 0x509   : > { %v10073_v3 = vpop.eup %7925  ;;  %7935 = vpow2.f32 %v2539_v22  ;;  %v2541_v15 = vmul.f32 1.442695, %v2499_v55  ;;  %v2500_v50 = vsub.f32 %v9973_v46, %v2448_v27 }
 0x50a   : > { %2593 = vadd.xlane.f32.xlu0 %v10073_v3  ;;  %v2450_v18 = vpop.xlane.xlu0 %2449 }
 0x50b   : > { %v10077_v40 = vpop.eup %7927  ;;  %7937 = vpow2.f32 %v2541_v15  ;;  %v2543_v52 = vmul.f32 1.442695, %v2500_v50  ;;  %v2501_v41 = vsub.f32 %v9976_v61, %v2450_v18 }
 0x50c   : > { %2595 = vadd.xlane.f32.xlu1 %v10077_v40  ;;  %v2452_v32 = vpop.xlane.xlu1 %2451 }
 0x50d   : > { %v10081_v56 = vpop.eup %7929  ;;  %7939 = vpow2.f32 %v2543_v52  ;;  %v2545_v8 = vmul.f32 1.442695, %v2501_v41  ;;  %v2502_v13 = vsub.f32 %v9979_v57, %v2452_v32 }
 0x50e   : > { %2597 = vadd.xlane.f32.xlu0 %v10081_v56  ;;  %v2454_v46 = vpop.xlane.xlu0 %2453 }
 0x50f   : > { %v10085_v38 = vpop.eup %7931  ;;  %7941 = vpow2.f32 %v2545_v8  ;;  %v2547_v4 = vmul.f32 1.442695, %v2502_v13  ;;  %v2503_v10 = vsub.f32 %v9982_v44, %v2454_v46 }
 0x510   : > { %2599 = vadd.xlane.f32.xlu1 %v10085_v38  ;;  %v2456_v61 = vpop.xlane.xlu1 %2455 }
 0x511   : > { %v10089_v19 = vpop.eup %7933  ;;  %7943 = vpow2.f32 %v2547_v4  ;;  %v2549_v53 = vmul.f32 1.442695, %v2503_v10  ;;  %v2504_v51 = vsub.f32 %v9985_v30, %v2456_v61 }
 0x512   : > { %2601 = vadd.xlane.f32.xlu0 %v10089_v19  ;;  %v2458_v57 = vpop.xlane.xlu0 %2457 }
 0x513   : > { %v10093_v28 = vpop.eup %7935  ;;  %7945 = vpow2.f32 %v2549_v53  ;;  %v2551_v0 = vmul.f32 1.442695, %v2504_v51  ;;  %v2505_v7 = vsub.f32 %v9990_v29, %v2458_v57 }
 0x514   : > { %2603 = vadd.xlane.f32.xlu1 %v10093_v28  ;;  %v2460_v44 = vpop.xlane.xlu1 %2459 }
 0x515   : > { %v10097_v58 = vpop.eup %7937  ;;  %7947 = vpow2.f32 %v2551_v0  ;;  %v2553_v35 = vmul.f32 1.442695, %v2505_v7  ;;  %v2506_v23 = vsub.f32 %v9995_v12, %v2460_v44 }
 0x516   : > { %2605 = vadd.xlane.f32.xlu0 %v10097_v58  ;;  %v2462_v30 = vpop.xlane.xlu0 %2461 }
 0x517   : > { %v10101_v26 = vpop.eup %7939  ;;  %7949 = vpow2.f32 %v2553_v35  ;;  %v2555_v1 = vmul.f32 1.442695, %v2506_v23  ;;  %v2507_v22 = vsub.f32 %v10000_v49, %v2462_v30 }
 0x518   : > { %2607 = vadd.xlane.f32.xlu1 %v10101_v26  ;;  %v2464_v29 = vpop.xlane.xlu1 %2463 }
 0x519   : > { %v10105_v55 = vpop.eup %7941  ;;  %7951 = vpow2.f32 %v2555_v1  ;;  %v2557_v27 = vmul.f32 1.442695, %v2507_v22  ;;  %v2508_v15 = vsub.f32 %v10005_v45, %v2464_v29 }
 0x51a   : > { %2609 = vadd.xlane.f32.xlu0 %v10105_v55  ;;  %v2466_v12 = vpop.xlane.xlu0 %2465 }
 0x51b   : > { %v10109_v50 = vpop.eup %7943  ;;  %7953 = vpow2.f32 %v2557_v27  ;;  %v2559_v18 = vmul.f32 1.442695, %v2508_v15  ;;  %v2509_v52 = vsub.f32 %v10009_v59, %v2466_v12 }
 0x51c   : > { %2611 = vadd.xlane.f32.xlu1 %v10109_v50  ;;  %v2468_v49 = vpop.xlane.xlu1 %2467 }
 0x51d   : > { %v10113_v41 = vpop.eup %7945  ;;  %7955 = vpow2.f32 %v2559_v18  ;;  %v2561_v32 = vmul.f32 1.442695, %v2509_v52  ;;  %v2510_v8 = vsub.f32 %v10013_v5, %v2468_v49 }
 0x51e   : > { %2613 = vadd.xlane.f32.xlu0 %v10113_v41  ;;  %v2470_v45 = vpop.xlane.xlu0 %2469 }
 0x51f   : > { %v10117_v13 = vpop.eup %7947  ;;  %7957 = vpow2.f32 %v2561_v32  ;;  %v2563_v46 = vmul.f32 1.442695, %v2510_v8  ;;  %v2511_v4 = vsub.f32 %v10018_v62, %v2470_v45 }
 0x520   : > { %2615 = vadd.xlane.f32.xlu1 %v10117_v13  ;;  %v2472_v59 = vpop.xlane.xlu1 %2471 }
 0x521   : > { %v10121_v10 = vpop.eup %7949  ;;  %7959 = vpow2.f32 %v2563_v46  ;;  %v2565_v61 = vmul.f32 1.442695, %v2511_v4  ;;  %v2512_v53 = vsub.f32 %v10022_v42, %v2472_v59 }
 0x522   : > { %2617 = vadd.xlane.f32.xlu0 %v10121_v10  ;;  %v2474_v5 = vpop.xlane.xlu0 %2473 }
 0x523   : > { %v10125_v51 = vpop.eup %7951  ;;  %7961 = vpow2.f32 %v2565_v61  ;;  %v2567_v57 = vmul.f32 1.442695, %v2512_v53  ;;  %v2513_v0 = vsub.f32 %v10025_v11, %v2474_v5 }
 0x524   : > { %2619 = vadd.xlane.f32.xlu1 %v10125_v51  ;;  %v2476_v62 = vpop.xlane.xlu1 %2475 }
 0x525   : > { %v10129_v7 = vpop.eup %7953  ;;  %7963 = vpow2.f32 %v2567_v57  ;;  %v2569_v44 = vmul.f32 1.442695, %v2513_v0  ;;  %v2514_v35 = vsub.f32 %v10028_v31, %v2476_v62 }
 0x526   : > { %2621 = vadd.xlane.f32.xlu0 %v10129_v7  ;;  %v2478_v42 = vpop.xlane.xlu0 %2477 }
 0x527   : > { %v10133_v23 = vpop.eup %7955  ;;  %7965 = vpow2.f32 %v2569_v44  ;;  %v2571_v30 = vmul.f32 1.442695, %v2514_v35  ;;  %v2515_v1 = vsub.f32 %v10031_v6, %v2478_v42 }
 0x528   : > { %2623 = vadd.xlane.f32.xlu1 %v10133_v23  ;;  %v2480_v11 = vpop.xlane.xlu1 %2479 }
 0x529   : > { %v10137_v22 = vpop.eup %7957  ;;  %7967 = vpow2.f32 %v2571_v30  ;;  %v2573_v29 = vmul.f32 1.442695, %v2515_v1  ;;  %v2516_v27 = vsub.f32 %v10034_v16, %v2480_v11 }
 0x52a   : > { %2625 = vadd.xlane.f32.xlu0 %v10137_v22  ;;  %v2482_v31 = vpop.xlane.xlu0 %2481 }
 0x52b   : > { %v10141_v15 = vpop.eup %7959  ;;  %7969 = vpow2.f32 %v2573_v29  ;;  %v2575_v12 = vmul.f32 1.442695, %v2516_v27  ;;  %v2517_v18 = vsub.f32 %v10037_v20, %v2482_v31 }
 0x52c   : > { %2627 = vadd.xlane.f32.xlu1 %v10141_v15  ;;  %v2488_v6 = vpop.xlane.xlu1 %2487 }
 0x52d   : > { %v10145_v52 = vpop.eup %7961  ;;  %7971 = vpow2.f32 %v2575_v12  ;;  %v2577_v49 = vmul.f32 1.442695, %v2517_v18  ;;  %v2520_v20 = vsub.f32 %v10040_v9, %v2488_v6 }
 0x52e   : > { %2629 = vadd.xlane.f32.xlu0 %v10145_v52  ;;  %v2486_v32 = vpop.xlane.xlu0 %2485 }
 0x52f   : > { %v10148_v16 = vpop.eup %7963  ;;  %7973 = vpow2.f32 %v2577_v49  ;;  %v2519_v8 = vsub.f32 %v10043_v60, %v2486_v32  ;;  %v2583_v60 = vmul.f32 1.442695, %v2520_v20 }
 0x530   : > { %2631 = vadd.xlane.f32.xlu1 %v10148_v16  ;;  %v2484_v45 = vpop.xlane.xlu1 %2483 }
 0x531   : > { %v10152_v46 = vpop.eup %7965  ;;  %v2581_v4 = vmul.f32 1.442695, %v2519_v8  ;;  %v2518_v59 = vsub.f32 %v10046_v63, %v2484_v45 }
 0x532   : > { %2633 = vadd.xlane.f32.xlu0 %v10152_v46 }
 0x533   : > { %v10157_v61 = vpop.eup %7967  ;;  %7975 = vpow2.f32 %v2581_v4  ;;  %v2579_v53 = vmul.f32 1.442695, %v2518_v59 }
 0x534   : > { %2635 = vadd.xlane.f32.xlu1 %v10157_v61 }
 0x535   : > { %v10160_v5 = vpop.eup %7969  ;;  %7977 = vpow2.f32 %v2579_v53 }
 0x536   : > { %2637 = vadd.xlane.f32.xlu0 %v10160_v5  ;;  %7979 = vpow2.f32 %v2583_v60 }
 0x537   : > { %v10163_v57 = vpop.eup %7971 }
 0x538   : > { %2639 = vadd.xlane.f32.xlu1 %v10163_v57 }
 0x539   : > { %v10166_v9 = vpop.eup %7973 }
 0x53a   : > { %2641 = vadd.xlane.f32.xlu0 %v10166_v9 }
 0x53d   : > { %v10169_v63 = vpop.eup %7975 }
 0x53e   : > { %2645 = vadd.xlane.f32.xlu0 %v10169_v63 }
 0x53f   : > { %v10172_v0 = vpop.eup %7977 }
 0x540   : > { %2643 = vadd.xlane.f32.xlu1 %v10172_v0  ;;  %v10175_v62 = vpop.eup %7979 }
 0x544   : > { %2647 = vadd.xlane.f32.xlu1 %v10175_v62 }
 0x58f   : > { %v2586_v44 = vpop.xlane.xlu0 %2585 }
 0x590   : > { %7981 = vrcp.f32 %v2586_v44 }
 0x591   : > { %v2588_v35 = vpop.xlane.xlu1 %2587 }
 0x592   : > { %7983 = vrcp.f32 %v2588_v35 }
 0x593   : > { %v2590_v42 = vpop.xlane.xlu0 %2589 }
 0x594   : > { %7985 = vrcp.f32 %v2590_v42 }
 0x595   : > { %v2592_v30 = vpop.xlane.xlu1 %2591 }
 0x596   : > { %7987 = vrcp.f32 %v2592_v30 }
 0x597   : > { %v2594_v1 = vpop.xlane.xlu0 %2593 }
 0x598   : > { %7989 = vrcp.f32 %v2594_v1 }
 0x599   : > { %v2596_v11 = vpop.xlane.xlu1 %2595 }
 0x59a   : > { %v7982_v29 = vpop.eup %7981  ;;  %7991 = vrcp.f32 %v2596_v11 }
 0x59b   : > { %v2598_v27 = vpop.xlane.xlu0 %2597  ;;  %v10179_v18 = vmul.f32 %v7982_v29, %v10057_v47 }
 0x59c   : > { %v7984_v31 = vpop.eup %7983  ;;  %7993 = vrcp.f32 %v2598_v27 }
 0x59d   : > { %v2600_v12 = vpop.xlane.xlu1 %2599  ;;  %v10182_v6 = vmul.f32 %v7984_v31, %v10061_v2 }
 0x59e   : > { %v7986_v49 = vpop.eup %7985  ;;  %7995 = vrcp.f32 %v2600_v12 }
 0x59f   : > { %v2602_v32 = vpop.xlane.xlu0 %2601  ;;  %v2826_v8 = vpack.c.bf16 %v10182_v6, %v10179_v18  ;;  %v10187_v20 = vmul.f32 %v7986_v49, %v10065_v25 }
 0x5a0   : > { %v7988_v45 = vpop.eup %7987  ;;  %7997 = vrcp.f32 %v2602_v32 }
 0x5a1   : > { %v10190_v4 = vmul.f32 %v7988_v45, %v10069_v48  ;;  %v2604_v59 = vpop.xlane.xlu1 %2603  ;;  %7188 = vmatprep.mubr.bf16.mxu1 %v2826_v8 }
 0x5a2   : > { %v7990_v47 = vpop.eup %7989  ;;  %7999 = vrcp.f32 %v2604_v59 }
 0x5a3   : > { %v2606_v2 = vpop.xlane.xlu0 %2605  ;;  %v2827_v53 = vpack.c.bf16 %v10190_v4, %v10187_v20  ;;  %v10195_v35 = vmul.f32 %v7990_v47, %v10073_v3 }
 0x5a4   : > { %v7992_v60 = vpop.eup %7991  ;;  %8001 = vrcp.f32 %v2606_v2 }
 0x5a5   : > { %v2608_v44 = vpop.xlane.xlu1 %2607  ;;  %7189 = vmatmul.mubr.bf16.vlgmr.msra.gmra.mrb[112].mxu1 %v2827_v53  ;;  %v10198_v25 = vmul.f32 %v7992_v60, %v10077_v40 }
 0x5a6   : > { %v7994_v48 = vpop.eup %7993  ;;  %8003 = vrcp.f32 %v2608_v44  ;;  %7205 = vmatpush3.bf16.msra.mxu1 %v9849_v21 }
 0x5a7   : > { %7206 = vmatprep.subr.bf16.mxu1 %v9863_v54  ;;  %v2610_v42 = vpop.xlane.xlu0 %2609  ;;  %v2828_v30 = vpack.c.bf16 %v10198_v25, %v10195_v35  ;;  %v10205_v3 = vmul.f32 %v7994_v48, %v10081_v56 }
 0x5a8   : > { %v7996_v1 = vpop.eup %7995  ;;  %8005 = vrcp.f32 %v2610_v42 }
 0x5a9   : > { %v2612_v11 = vpop.xlane.xlu1 %2611  ;;  %7192 = vmatprep.mubr.bf16.mxu1 %v2828_v30  ;;  %v10208_v40 = vmul.f32 %v7996_v1, %v10085_v38 }
 0x5aa   : > { %v7998_v29 = vpop.eup %7997  ;;  %8007 = vrcp.f32 %v2612_v11  ;;  %7207 = vmatpush3.bf16.msra.mxu1 %v9863_v54 }
 0x5ab   : > { %7208 = vmatprep.subr.bf16.mxu1 %v9877_v17  ;;  %v2614_v21 = vpop.xlane.xlu0 %2613  ;;  %v2829_v27 = vpack.c.bf16 %v10208_v40, %v10205_v3  ;;  %v10215_v56 = vmul.f32 %v7998_v29, %v10089_v19 }
 0x5ac   : > { %v8000_v31 = vpop.eup %7999  ;;  %8009 = vrcp.f32 %v2614_v21 }
 0x5ad   : > { %v2616_v12 = vpop.xlane.xlu1 %2615  ;;  %7193 = vmatmul.mubr.bf16.gmra.mrb[116].mxu1 %v2829_v27  ;;  %v10218_v38 = vmul.f32 %v8000_v31, %v10093_v28 }
 0x5ae   : > { %v8002_v49 = vpop.eup %8001  ;;  %8011 = vrcp.f32 %v2616_v12  ;;  %7209 = vmatpush3.bf16.msra.mxu1 %v9877_v17 }
 0x5af   : > { %7210 = vmatprep.subr.bf16.mxu1 %v9891_v14  ;;  %v2618_v54 = vpop.xlane.xlu0 %2617  ;;  %v2830_v32 = vpack.c.bf16 %v10218_v38, %v10215_v56  ;;  %v10225_v19 = vmul.f32 %v8002_v49, %v10097_v58 }
 0x5b0   : > { %v8004_v8 = vpop.eup %8003  ;;  %8013 = vrcp.f32 %v2618_v54 }
 0x5b1   : > { %v2620_v45 = vpop.xlane.xlu1 %2619  ;;  %7196 = vmatprep.mubr.bf16.mxu1 %v2830_v32  ;;  %v10228_v28 = vmul.f32 %v8004_v8, %v10101_v26 }
 0x5b2   : > { %v8006_v59 = vpop.eup %8005  ;;  %8015 = vrcp.f32 %v2620_v45  ;;  %7211 = vmatpush3.bf16.msra.mxu1 %v9891_v14 }
 0x5b3   : > { %7212 = vmatprep.subr.bf16.mxu1 %v9899_v36  ;;  %v2622_v17 = vpop.xlane.xlu0 %2621  ;;  %v2831_v47 = vpack.c.bf16 %v10228_v28, %v10225_v19  ;;  %v10235_v58 = vmul.f32 %v8006_v59, %v10105_v55 }
 0x5b4   : > { %v8008_v2 = vpop.eup %8007  ;;  %8017 = vrcp.f32 %v2622_v17 }
 0x5b5   : > { %v2624_v53 = vpop.xlane.xlu1 %2623  ;;  %7197 = vmatmul.mubr.bf16.gmra.mrb[120].mxu1 %v2831_v47  ;;  %v10238_v26 = vmul.f32 %v8008_v2, %v10109_v50 }
 0x5b6   : > { %v8010_v60 = vpop.eup %8009  ;;  %8019 = vrcp.f32 %v2624_v53  ;;  %7213 = vmatpush3.bf16.msra.mxu1 %v9899_v36 }
 0x5b7   : > { %7214 = vmatprep.subr.bf16.mxu1 %v9901_v39  ;;  %v2626_v14 = vpop.xlane.xlu0 %2625  ;;  %v2832_v44 = vpack.c.bf16 %v10238_v26, %v10235_v58  ;;  %v10245_v55 = vmul.f32 %v8010_v60, %v10113_v41 }
 0x5b8   : > { %v8012_v48 = vpop.eup %8011  ;;  %8021 = vrcp.f32 %v2626_v14 }
 0x5b9   : > { %v2628_v42 = vpop.xlane.xlu1 %2627  ;;  %7200 = vmatprep.mubr.bf16.mxu1 %v2832_v44  ;;  %v10248_v50 = vmul.f32 %v8012_v48, %v10117_v13 }
 0x5ba   : > { %v8014_v30 = vpop.eup %8013  ;;  %8023 = vrcp.f32 %v2628_v42  ;;  %7215 = vmatpush3.bf16.msra.mxu1 %v9901_v39 }
 0x5bb   : > { %7216 = vmatprep.subr.bf16.mxu1 %v9903_v43  ;;  %v2630_v36 = vpop.xlane.xlu0 %2629  ;;  %v2833_v1 = vpack.c.bf16 %v10248_v50, %v10245_v55  ;;  %v2697_v11 = vmul.f32 %v8014_v30, %v10121_v10 }
 0x5bc   : > { %v8016_v29 = vpop.eup %8015  ;;  %8025 = vrcp.f32 %v2630_v36 }
 0x5bd   : > { %v2632_v21 = vpop.xlane.xlu1 %2631  ;;  %7201 = vmatmul.mubr.bf16.gmra.mrb[124].mxu1 %v2833_v1  ;;  %v2698_v41 = vmul.f32 %v8016_v29, %v10125_v51  ;;  %v2713_v13 = vadd.f32 %v2697_v11, %v10179_v18 }
 0x5be   : > { %v8018_v27 = vpop.eup %8017  ;;  %8027 = vrcp.f32 %v2632_v21  ;;  %7217 = vmatpush3.bf16.msra.mxu1 %v9903_v43 }
 0x5bf   : > { %v2699_v39 = vmul.f32 %v8018_v27, %v10129_v7  ;;  %7218 = vmatprep.subr.bf16.mxu1 %v9905_v37  ;;  %v2634_v31 = vpop.xlane.xlu0 %2633  ;;  %v2714_v12 = vadd.f32 %v2698_v41, %v10182_v6  ;;  %v2834_v10 = vpack.c.bf16 %v2698_v41, %v2697_v11  ;;  %v2730_v18 = vmul.f32 0.5, %v2713_v13 }
 0x5c0   : > { %v8020_v49 = vpop.eup %8019  ;;  %8029 = vrcp.f32 %v2634_v31 }
 0x5c1   : > { %v2715_v54 = vadd.f32 %v2699_v39, %v10187_v20  ;;  %v2700_v51 = vmul.f32 %v8020_v49, %v10133_v23  ;;  %v2636_v32 = vpop.xlane.xlu1 %2635  ;;  %v2731_v8 = vmul.f32 0.5, %v2714_v12  ;;  %7220 = vmatprep.mubr.bf16.mxu1 %v2834_v10 }
 0x5c2   : > { %v8022_v43 = vpop.eup %8021  ;;  %8031 = vrcp.f32 %v2636_v32  ;;  %7219 = vmatpush3.bf16.msra.mxu1 %v9905_v37 }
 0x5c3   : > { %v2716_v7 = vadd.f32 %v2700_v51, %v10190_v4  ;;  %v7000_v45 = vpack.c.bf16 %v2731_v8, %v2730_v18  ;;  %v2638_v6 = vpop.xlane.xlu0 %2637  ;;  %v2835_v59 = vpack.c.bf16 %v2700_v51, %v2699_v39  ;;  %v2701_v20 = vmul.f32 %v8022_v43, %v10137_v22 }
 0x5c4   : > { %v8024_v17 = vpop.eup %8023  ;;  %8033 = vrcp.f32 %v2638_v6  ;;  %v2732_v47 = vmul.f32 0.5, %v2715_v54 }
 0x5c5   : > { %v2733_v23 = vmul.f32 0.5, %v2716_v7  ;;  %7001 = vst [vmem:[%s9200_s21] sm:$0xff] %v7000_v45   ;;  %v2640_v2 = vpop.xlane.xlu1 %2639  ;;  %7221 = vmatmul.mubr.bf16.vlgmr.msra.gmra.mrb[128].mxu1 %v2835_v59  ;;  %v2702_v53 = vmul.f32 %v8024_v17, %v10141_v15  ;;  %v2717_v37 = vadd.f32 %v2701_v20, %v10195_v35 }
 0x5c6   : > { %v8026_v60 = vpop.eup %8025  ;;  %8035 = vrcp.f32 %v2640_v2 }
 0x5c7   : > { %v7005_v4 = vpack.c.bf16 %v2733_v23, %v2732_v47  ;;  %v2642_v14 = vpop.xlane.xlu0 %2641  ;;  %v2718_v44 = vadd.f32 %v2702_v53, %v10198_v25  ;;  %v2836_v48 = vpack.c.bf16 %v2702_v53, %v2701_v20  ;;  %v2703_v42 = vmul.f32 %v8026_v60, %v10145_v52 }
 0x5c8   : > { %v8028_v22 = vpop.eup %8027  ;;  %8037 = vrcp.f32 %v2642_v14  ;;  %v2734_v30 = vmul.f32 0.5, %v2717_v37  ;;  %v3460_v14 = vld [vmem:[%s9177_s18] sm:$0xff] }
 0x5c9   : > { %7037 = vst [vmem:[%s9200_s21 + $0x8] sm:$0xff] %v7005_v4   ;;  %v2735_v36 = vmul.f32 0.5, %v2718_v44  ;;  %7224 = vmatprep.mubr.bf16.mxu1 %v2836_v48  ;;  %v2704_v15 = vmul.f32 %v8028_v22, %v10148_v16  ;;  %v2719_v1 = vadd.f32 %v2703_v42, %v10205_v3  ;;  %v3472_v22 = vld [vmem:[%s9177_s18 + $0x60] sm:$0xff] }
 0x5ca   : > { %v8030_v11 = vpop.eup %8029 }
 0x5cb   : > { %v7010_v35 = vpack.c.bf16 %v2735_v36, %v2734_v30  ;;  %v2646_v29 = vpop.xlane.xlu0 %2645  ;;  %v2720_v21 = vadd.f32 %v2704_v15, %v10208_v40  ;;  %v2837_v25 = vpack.c.bf16 %v2704_v15, %v2703_v42  ;;  %v2705_v52 = vmul.f32 %v8030_v11, %v10152_v46  ;;  %v3465_v42 = vld [vmem:[%s9177_s18 + $0x28] sm:$0xff] }
 0x5cc   : > { %v8032_v41 = vpop.eup %8031  ;;  %8039 = vrcp.f32 %v2646_v29  ;;  %v2736_v27 = vmul.f32 0.5, %v2719_v1  ;;  %v3469_v1 = vld [vmem:[%s9177_s18 + $0x48] sm:$0xff] }
 0x5cd   : > { %7038 = vst [vmem:[%s9200_s21 + $0x10] sm:$0xff] %v7010_v35   ;;  %v2644_v13 = vpop.xlane.xlu1 %2643  ;;  %v2737_v39 = vmul.f32 0.5, %v2720_v21  ;;  %7225 = vmatmul.mubr.bf16.gmra.mrb[132].mxu1 %v2837_v25  ;;  %v2706_v16 = vmul.f32 %v8032_v41, %v10157_v61  ;;  %v2721_v3 = vadd.f32 %v2705_v52, %v10215_v56  ;;  %v3473_v11 = vld [vmem:[%s9177_s18 + $0x68] sm:$0xff]  ;;  %v3476_v35 = vld [vmem:[%s9177_s18 + $0x80] sm:$0xff] }
 0x5ce   : > { %v8034_v31 = vpop.eup %8033  ;;  %8041 = vrcp.f32 %v2644_v13  ;;  %v6714_v29 = vcombine.high %v3469_v1, %v3473_v11  ;;  %v3480_v21 = vld [vmem:[%s9177_s18 + $0xa0] sm:$0xff]  ;;  %v3477_v25 = vld [vmem:[%s9177_s18 + $0x88] sm:$0xff]  ;;  %v6713_v13 = vcombine.low %v3469_v1, %v3473_v11 }
 0x5cf   : > { %v7015_v12 = vpack.c.bf16 %v2737_v39, %v2736_v27  ;;  %v2722_v40 = vadd.f32 %v2706_v16, %v10218_v38  ;;  %v2838_v10 = vpack.c.bf16 %v2706_v16, %v2705_v52  ;;  %v2707_v49 = vmul.f32 %v8034_v31, %v10160_v5  ;;  %v3481_v41 = vld [vmem:[%s9177_s18 + $0xa8] sm:$0xff]  ;;  %v3484_v16 = vld [vmem:[%s9177_s18 + $0xc0] sm:$0xff] }
 0x5d0   : > { %v8036_v54 = vpop.eup %8035  ;;  %v2738_v51 = vmul.f32 0.5, %v2721_v3  ;;  %v6720_v27 = vcombine.high %v3476_v35, %v3480_v21  ;;  %v6722_v39 = vcombine.high %v3477_v25, %v3481_v41  ;;  %v3488_v31 = vld [vmem:[%s9177_s18 + $0xe0] sm:$0xff]  ;;  %v3485_v3 = vld [vmem:[%s9177_s18 + $0xc8] sm:$0xff] }
 0x5d1   : > { %7039 = vst [vmem:[%s9200_s21 + $0x18] sm:$0xff] %v7015_v12   ;;  %v2648_v46 = vpop.xlane.xlu1 %2647  ;;  %v2739_v32 = vmul.f32 0.5, %v2722_v40  ;;  %7228 = vmatprep.mubr.bf16.mxu1 %v2838_v10  ;;  %v2708_v61 = vmul.f32 %v8036_v54, %v10163_v57  ;;  %v2723_v18 = vadd.f32 %v2707_v49, %v10225_v19  ;;  %v3489_v12 = vld [vmem:[%s9177_s18 + $0xe8] sm:$0xff]  ;;  %v6719_v40 = vcombine.low %v3476_v35, %v3480_v21 }
 0x5d2   : > { %v8038_v8 = vpop.eup %8037  ;;  %8043 = vrcp.f32 %v2648_v46  ;;  %v6721_v10 = vcombine.low %v3477_v25, %v3481_v41  ;;  %v6730_v54 = vcombine.high %v3485_v3, %v3489_v12  ;;  %v3492_v46 = vld [vmem:[%s9177_s18 + $0x100] sm:$0xff] }
 0x5d3   : > { %v7020_v56 = vpack.c.bf16 %v2739_v32, %v2738_v51  ;;  %v2724_v38 = vadd.f32 %v2708_v61, %v10228_v28  ;;  %v2839_v43 = vpack.c.bf16 %v2708_v61, %v2707_v49  ;;  %v2740_v7 = vmul.f32 0.5, %v2723_v18  ;;  %v3496_v51 = vld [vmem:[%s9177_s18 + $0x120] sm:$0xff]  ;;  %v3493_v32 = vld [vmem:[%s9177_s18 + $0x108] sm:$0xff] }
 0x5d4   : > { %v2709_v45 = vmul.f32 %v8038_v8, %v10166_v9  ;;  %v6728_v49 = vcombine.high %v3484_v16, %v3488_v31  ;;  %v3497_v61 = vld [vmem:[%s9177_s18 + $0x128] sm:$0xff]  ;;  %v6727_v18 = vcombine.low %v3484_v16, %v3488_v31  ;;  %v6729_v8 = vcombine.low %v3485_v3, %v3489_v12  ;;  %v8096_v31 = vld [vmem:[%s9198_s22 + $0x8] sm:$0xff] }
 0x5d5   : > { %7040 = vst [vmem:[%s9200_s21 + $0x20] sm:$0xff] %v7020_v56   ;;  %v2741_v5 = vmul.f32 0.5, %v2724_v38  ;;  %7229 = vmatmul.mubr.bf16.gmra.mrb[136].mxu1 %v2839_v43  ;;  %v6736_v56 = vcombine.high %v3492_v46, %v3496_v51  ;;  %v6738_v38 = vcombine.high %v3493_v32, %v3497_v61  ;;  %v3500_v43 = vld [vmem:[%s9177_s18 + $0x140] sm:$0xff] }
 0x5d6   : > { %v8040_v6 = vpop.eup %8039  ;;  %v2725_v19 = vadd.f32 %v2709_v45, %v10235_v58 }
 0x5d7   : > { %v7025_v59 = vpack.c.bf16 %v2741_v5, %v2740_v7  ;;  %v2711_v20 = vmul.f32 %v8040_v6, %v10169_v63  ;;  %v3504_v7 = vld [vmem:[%s9177_s18 + $0x160] sm:$0xff]  ;;  %v3501_v5 = vld [vmem:[%s9177_s18 + $0x148] sm:$0xff]  ;;  %v6735_v6 = vcombine.low %v3492_v46, %v3496_v51 }
 0x5d8   : > { %v8042_v17 = vpop.eup %8041  ;;  %v2742_v2 = vmul.f32 0.5, %v2725_v19  ;;  %v3508_v19 = vld [vmem:[%s9177_s18 + $0x180] sm:$0xff] }
 0x5d9   : > { %7041 = vst [vmem:[%s9200_s21 + $0x28] sm:$0xff] %v7025_v59   ;;  %v2710_v57 = vmul.f32 %v8042_v17, %v10172_v0  ;;  %v2727_v0 = vadd.f32 %v2711_v20, %v10245_v55  ;;  %v3461_v55 = vld [vmem:[%s9177_s18 + $0x8] sm:$0xff]  ;;  %v6737_v59 = vcombine.low %v3493_v32, %v3497_v61  ;;  %v6744_v17 = vcombine.high %v3500_v43, %v3504_v7 }
 0x5da   : > { %v6705_v30 = vcombine.low %v3461_v55, %v3465_v42  ;;  %v6706_v36 = vcombine.high %v3461_v55, %v3465_v42 }
 0x5db   : > { %v2726_v28 = vadd.f32 %v2710_v57, %v10238_v26  ;;  %v2840_v47 = vpack.c.bf16 %v2710_v57, %v2709_v45  ;;  %v2744_v60 = vmul.f32 0.5, %v2727_v0  ;;  %v3505_v45 = vld [vmem:[%s9177_s18 + $0x168] sm:$0xff]  ;;  %v3516_v0 = vld [vmem:[%s9177_s18 + $0x1c0] sm:$0xff] }
 0x5dc   : > { %v8044_v23 = vpop.eup %8043  ;;  %4383 = vmatprep.subr.bf16.mxu1 %v6706_v36  ;;  %v6746_v57 = vcombine.high %v3501_v5, %v3505_v45 }
 0x5dd   : > { %v2743_v9 = vmul.f32 0.5, %v2726_v28  ;;  %7232 = vmatprep.mubr.bf16.mxu1 %v2840_v47  ;;  %v2712_v53 = vmul.f32 %v8044_v23, %v10175_v62  ;;  %v3464_v62 = vld [vmem:[%s9177_s18 + $0x20] sm:$0xff]  ;;  %4384 = vmatpush1.bf16.msra.mxu1 %v6705_v30  ;;  %v3509_v28 = vld [vmem:[%s9177_s18 + $0x188] sm:$0xff]  ;;  %v6743_v23 = vcombine.low %v3500_v43, %v3504_v7 }
 0x5de   : > { %v6703_v44 = vcombine.low %v3460_v14, %v3464_v62  ;;  %v6704_v48 = vcombine.high %v3460_v14, %v3464_v62  ;;  %4385 = vmatprep.subr.bf16.mxu1 %v6714_v29  ;;  %v3513_v47 = vld [vmem:[%s9177_s18 + $0x1a8] sm:$0xff] }
 0x5df   : > { %v7030_v58 = vpack.c.bf16 %v2743_v9, %v2742_v2  ;;  %v2728_v63 = vadd.f32 %v2712_v53, %v10248_v50  ;;  %v2841_v26 = vpack.c.bf16 %v2712_v53, %v2711_v20  ;;  %v3468_v50 = vld [vmem:[%s9177_s18 + $0x40] sm:$0xff]  ;;  %v6745_v2 = vcombine.low %v3501_v5, %v3505_v45 }
 0x5e0   : > { %v6712_v15 = vcombine.high %v3468_v50, %v3472_v22  ;;  %4270 = vmatprep.subr.bf16.mxu0 %v6704_v48  ;;  %v6711_v52 = vcombine.low %v3468_v50, %v3472_v22  ;;  %v3512_v20 = vld [vmem:[%s9177_s18 + $0x1a0] sm:$0xff]  ;;  %v6754_v53 = vcombine.high %v3509_v28, %v3513_v47 }
 0x5e1   : > { %7042 = vst [vmem:[%s9200_s21 + $0x30] sm:$0xff] %v7030_v58   ;;  %v2745_v37 = vmul.f32 0.5, %v2728_v63  ;;  %7233 = vmatmul.mubr.bf16.gmra.mrb[140].mxu1 %v2841_v26  ;;  %4271 = vmatpush1.bf16.msra.mxu0 %v6703_v44  ;;  %v6752_v9 = vcombine.high %v3508_v19, %v3512_v20  ;;  %v3520_v58 = vld [vmem:[%s9177_s18 + $0x1e0] sm:$0xff]  ;;  %v3517_v63 = vld [vmem:[%s9177_s18 + $0x1c8] sm:$0xff] }
 0x5e2   : > { %4272 = vmatprep.subr.bf16.mxu0 %v6712_v15  ;;  %4386 = vmatpush1.bf16.msra.mxu1 %v6713_v13  ;;  %v3521_v26 = vld [vmem:[%s9177_s18 + $0x1e8] sm:$0xff]  ;;  %v6759_v55 = vcombine.low %v3516_v0, %v3520_v58 }
 0x5e3   : > { %v7035_v4 = vpack.c.bf16 %v2745_v37, %v2744_v60  ;;  %4387 = vmatprep.subr.bf16.mxu1 %v6722_v39  ;;  %v6751_v60 = vcombine.low %v3508_v19, %v3512_v20  ;;  %v6753_v37 = vcombine.low %v3509_v28, %v3513_v47  ;;  %v6762_v14 = vcombine.high %v3517_v63, %v3521_v26  ;;  %v8095_v39 = vld [vmem:[%s9198_s22] sm:$0xff]  ;;  %v8102_v47 = vld [vmem:[%s9198_s22 + $0x30] sm:$0xff] }
 0x5e4   : > { %v6761_v48 = vcombine.low %v3517_v63, %v3521_v26  ;;  %v8103_v63 = vld [vmem:[%s9198_s22 + $0x48] sm:$0xff] }
 0x5e5   : > { %7043 = vst [vmem:[%s9200_s21 + $0x38] sm:$0xff] %v7035_v4   ;;  %4273 = vmatpush1.bf16.msra.mxu0 %v6711_v52  ;;  %v6760_v4 = vcombine.high %v3516_v0, %v3520_v58  ;;  %s8425_s21 = sshll.u32 %s8636_s29, 4  ;;  %s8426_s21 = int_to_ptr.vmem [resolvable:$false] %s8425_s21 }
 0x5e6   : > { %4274 = vmatprep.subr.bf16.mxu0 %v6720_v27  ;;  %4388 = vmatpush1.bf16.msra.mxu1 %v6721_v10  ;;  %v8097_v10 = vld [vmem:[%s9198_s22 + $0x10] sm:$0xff]  ;;  %p8428_p7 = scmp.lt.s32.totalorder %s11722_s2, %s8426_s21 }
 0x5e7   : > { %4389 = vmatprep.subr.bf16.mxu1 %v6730_v54  ;;  %v8098_v54 = vld [vmem:[%s9198_s22 + $0x18] sm:$0xff] }
 0x5e9   : > { %4275 = vmatpush1.bf16.msra.mxu0 %v6719_v40 }
 0x5ea   : > { %4276 = vmatprep.subr.bf16.mxu0 %v6728_v49  ;;  %4390 = vmatpush1.bf16.msra.mxu1 %v6729_v8 }
 0x5eb   : > { %4391 = vmatprep.subr.bf16.mxu1 %v6738_v38 }
 0x5ed   : > { %4277 = vmatpush1.bf16.msra.mxu0 %v6727_v18 }
 0x5ee   : > { %4278 = vmatprep.subr.bf16.mxu0 %v6736_v56  ;;  %4392 = vmatpush1.bf16.msra.mxu1 %v6737_v59  ;;  %v8099_v56 = vld [vmem:[%s9198_s22 + $0x28] sm:$0xff] }
 0x5ef   : > { %4393 = vmatprep.subr.bf16.mxu1 %v6746_v57 }
 0x5f1   : > { %4279 = vmatpush1.bf16.msra.mxu0 %v6735_v6  ;;  %v8100_v6 = vld [vmem:[%s9198_s22 + $0x20] sm:$0xff] }
 0x5f2   : > { %4280 = vmatprep.subr.bf16.mxu0 %v6744_v17  ;;  %4394 = vmatpush1.bf16.msra.mxu1 %v6745_v2  ;;  %v8101_v17 = vld [vmem:[%s9198_s22 + $0x38] sm:$0xff] }
 0x5f3   : > { %4395 = vmatprep.subr.bf16.mxu1 %v6754_v53 }
 0x5f5   : > { %4281 = vmatpush1.bf16.msra.mxu0 %v6743_v23 }
 0x5f6   : > { %4282 = vmatprep.subr.bf16.mxu0 %v6752_v9  ;;  %4396 = vmatpush1.bf16.msra.mxu1 %v6753_v37 }
 0x5f7   : > { %4397 = vmatprep.subr.bf16.mxu1 %v6762_v14 }
 0x5f9   : > { %4283 = vmatpush1.bf16.msra.mxu0 %v6751_v60 }
 0x5fa   : > { %4284 = vmatprep.subr.bf16.mxu0 %v6760_v4  ;;  %4398 = vmatpush1.bf16.msra.mxu1 %v6761_v48 }
 0x5fd   : > { %4285 = vmatpush1.bf16.msra.mxu0 %v6759_v55 }
 0x678   : > { %v7190_v62 = vpop.f32.mrb[112].mxu1 }
 0x679   : > { %v2876_v44 = vpop.f32.mrb[113].mxu1  ;;  %v10379_v59 = vadd.f32 %v8100_v6, %v7190_v62  ;;  %v8104_v62 = vld [vmem:[%s9198_s22 + $0x40] sm:$0xff] }
 0x67a   : > { %v7191_v42 = vpop.f32.mrb[114].mxu1  ;;  %v10352_v16 = vadd.f32 %v8095_v39, %v2876_v44  ;;  %v8105_v44 = vld [vmem:[%s9198_s22 + $0x58] sm:$0xff] }
 0x67b   : > { %v2879_v50 = vpop.f32.mrb[115].mxu1  ;;  %12137 = vst [vmem:[#allocation62_spill] sm:$0xff] %v10379_v59  ;;  %v10387_v23 = vadd.f32 %v8102_v47, %v7191_v42  ;;  %v3138_v0 = vmul.f32 %v10379_v59, %v10379_v59  ;;  %v3525_v39 = vld [vmem:[%s9177_s18 + $0x208] sm:$0xff] }
 0x67c   : > { %12132 = vst [vmem:[#allocation57_spill] sm:$0xff] %v10352_v16  ;;  %v10358_v49 = vadd.f32 %v8097_v10, %v2879_v50  ;;  %v3134_v18 = vmul.f32 %v10352_v16, %v10352_v16  ;;  %v3529_v10 = vld [vmem:[%s9177_s18 + $0x228] sm:$0xff] }
 0x67d   : > { %12139 = vst [vmem:[#allocation64_spill] sm:$0xff] %v10387_v23  ;;  %v3140_v4 = vmul.f32 %v10387_v23, %v10387_v23 }
 0x67e   : > { %12134 = vst [vmem:[#allocation59_spill] sm:$0xff] %v10358_v49  ;;  %v3136_v5 = vmul.f32 %v10358_v49, %v10358_v49 }
 0x680   : > { %v10329_v22 = vpop.f32.mrb[116].mxu1 }
 0x681   : > { %v2892_v30 = vpop.f32.mrb[117].mxu1 }
 0x682   : > { %v10331_v36 = vpop.f32.mrb[118].mxu1  ;;  %v10409_v55 = vadd.f32 %v8104_v62, %v2892_v30  ;;  %v3540_v62 = vld [vmem:[%s9177_s18 + $0x280] sm:$0xff] }
 0x683   : > { %v10333_v15 = vpop.f32.mrb[119].mxu1 }
 0x688   : > { %v10335_v1 = vpop.f32.mrb[120].mxu1 }
 0x689   : > { %v10337_v11 = vpop.f32.mrb[121].mxu1 }
 0x68a   : > { %v10339_v35 = vpop.f32.mrb[122].mxu1 }
 0x68b   : > { %v10341_v29 = vpop.f32.mrb[123].mxu1 }
 0x690   : > { %v10343_v21 = vpop.f32.mrb[124].mxu1 }
 0x691   : > { %v10345_v25 = vpop.f32.mrb[125].mxu1 }
 0x692   : > { %v10347_v41 = vpop.f32.mrb[126].mxu1 }
 0x693   : > { %v10349_v52 = vpop.f32.mrb[127].mxu1 }
 0x698   : > { %v7222_v13 = vpop.f32.mrb[128].mxu1 }
 0x699   : > { %v2973_v27 = vpop.f32.mrb[129].mxu1  ;;  %v10374_v38 = vadd.f32 %v8099_v56, %v7222_v13  ;;  %v3524_v13 = vld [vmem:[%s9177_s18 + $0x200] sm:$0xff]  ;;  %v6770_v56 = vcombine.high %v3525_v39, %v3529_v10 }
 0x69a   : > { %v10355_v3 = vadd.f32 %v8096_v31, %v2973_v27  ;;  %v7223_v12 = vpop.f32.mrb[130].mxu1  ;;  %v3528_v27 = vld [vmem:[%s9177_s18 + $0x220] sm:$0xff] }
 0x69b   : > { %v2976_v40 = vpop.f32.mrb[131].mxu1  ;;  %12136 = vst [vmem:[#allocation61_spill] sm:$0xff] %v10374_v38  ;;  %v10382_v57 = vadd.f32 %v8101_v17, %v7223_v12  ;;  %v3076_v2 = vadd.f32 %v10374_v38, %v10379_v59  ;;  %v3139_v9 = vmul.f32 %v10374_v38, %v10374_v38  ;;  %v8106_v31 = vld [vmem:[%s9198_s22 + $0x50] sm:$0xff]  ;;  %v6768_v30 = vcombine.high %v3524_v13, %v3528_v27 }
 0x69c   : > { %12133 = vst [vmem:[#allocation58_spill] sm:$0xff] %v10355_v3  ;;  %v10361_v46 = vadd.f32 %v8098_v54, %v2976_v40  ;;  %v3070_v51 = vadd.f32 %v10355_v3, %v10352_v16  ;;  %v3135_v32 = vmul.f32 %v10355_v3, %v10355_v3  ;;  %v10421_v12 = vadd.f32 %v8106_v31, %v10333_v15  ;;  %v3545_v31 = vld [vmem:[%s9177_s18 + $0x2a8] sm:$0xff] }
 0x69d   : > { %12138 = vst [vmem:[#allocation63_spill] sm:$0xff] %v10382_v57  ;;  %v3079_v53 = vadd.f32 %v10382_v57, %v10387_v23  ;;  %v3141_v58 = vmul.f32 %v10382_v57, %v10382_v57  ;;  %v3172_v37 = vadd.f32 %v3139_v9, %v3138_v0  ;;  %4286 = vmatprep.subr.bf16.mxu0 %v6768_v30 }
 0x69e   : > { %12135 = vst [vmem:[#allocation60_spill] sm:$0xff] %v10361_v46  ;;  %3071 = vadd.xlane.f32.xlu0 %v3070_v51  ;;  %v3073_v61 = vadd.f32 %v10361_v46, %v10358_v49  ;;  %v3137_v8 = vmul.f32 %v10361_v46, %v10361_v46  ;;  %v3166_v7 = vadd.f32 %v3135_v32, %v3134_v18 }
 0x69f   : > { %v3175_v50 = vadd.f32 %v3141_v58, %v3140_v4  ;;  %v6767_v32 = vcombine.low %v3524_v13, %v3528_v27  ;;  %v3142_v18 = vmul.f32 %v10409_v55, %v10409_v55  ;;  %v3144_v6 = vmul.f32 %v10421_v12, %v10421_v12  ;;  %4399 = vmatprep.subr.bf16.mxu1 %v6770_v56  ;;  %v8108_v58 = vld [vmem:[%s9198_s22 + $0x60] sm:$0xff]  ;;  %v8110_v13 = vld [vmem:[%s9198_s22 + $0x70] sm:$0xff] }
 0x6a0   : > { %3074 = vadd.xlane.f32.xlu1 %v3073_v61  ;;  %v7226_v43 = vpop.f32.mrb[132].mxu1  ;;  %v3169_v20 = vadd.f32 %v3137_v8, %v3136_v5  ;;  %v6769_v61 = vcombine.low %v3525_v39, %v3529_v10  ;;  %v3536_v5 = vld [vmem:[%s9177_s18 + $0x260] sm:$0xff]  ;;  %v10458_v27 = vadd.f32 %v8110_v13, %v10331_v36 }
 0x6a1   : > { %v2989_v45 = vpop.f32.mrb[133].mxu1  ;;  %4287 = vmatpush1.bf16.msra.mxu0 %v6767_v32  ;;  %v3552_v56 = vld [vmem:[%s9177_s18 + $0x2e0] sm:$0xff] }
 0x6a2   : > { %3167 = vadd.xlane.f32.xlu0 %v3166_v7  ;;  %v10384_v19 = vpop.f32.mrb[134].mxu1  ;;  %v10400_v26 = vadd.f32 %v8103_v63, %v2989_v45  ;;  %v3532_v7 = vld [vmem:[%s9177_s18 + $0x240] sm:$0xff]  ;;  %v3533_v45 = vld [vmem:[%s9177_s18 + $0x248] sm:$0xff]  ;;  %4400 = vmatpush1.bf16.msra.mxu1 %v6769_v61  ;;  %v10447_v63 = vadd.f32 %v8108_v58, %v10329_v22 }
 0x6a3   : > { %v2992_v28 = vpop.f32.mrb[135].mxu1  ;;  %v6776_v17 = vcombine.high %v3532_v7, %v3536_v5  ;;  %v6775_v9 = vcombine.low %v3532_v7, %v3536_v5  ;;  %v8113_v58 = vld [vmem:[%s9198_s22 + $0x98] sm:$0xff]  ;;  %v8114_v13 = vld [vmem:[%s9198_s22 + $0x90] sm:$0xff] }
 0x6a4   : > { %3170 = vadd.xlane.f32.xlu1 %v3169_v20  ;;  %v10412_v48 = vadd.f32 %v8105_v44, %v2992_v28  ;;  %v3082_v54 = vadd.f32 %v10400_v26, %v10409_v55  ;;  %v3143_v51 = vmul.f32 %v10400_v26, %v10400_v26  ;;  %v3537_v20 = vld [vmem:[%s9177_s18 + $0x268] sm:$0xff]  ;;  %v8107_v28 = vld [vmem:[%s9198_s22 + $0x68] sm:$0xff] }
 0x6a5   : > { %v10443_v47 = vadd.f32 %v8107_v28, %v7226_v43  ;;  %4288 = vmatprep.subr.bf16.mxu0 %v6776_v17  ;;  %v6778_v0 = vcombine.high %v3533_v45, %v3537_v20  ;;  %v3544_v44 = vld [vmem:[%s9177_s18 + $0x2a0] sm:$0xff] }
 0x6a6   : > { %3077 = vadd.xlane.f32.xlu0 %v3076_v2  ;;  %v3085_v15 = vadd.f32 %v10412_v48, %v10421_v12  ;;  %v3145_v8 = vmul.f32 %v10412_v48, %v10412_v48  ;;  %v3178_v2 = vadd.f32 %v3143_v51, %v3142_v18  ;;  %4289 = vmatpush1.bf16.msra.mxu0 %v6775_v9  ;;  %v8111_v17 = vld [vmem:[%s9198_s22 + $0x88] sm:$0xff] }
 0x6a7   : > { %4401 = vmatprep.subr.bf16.mxu1 %v6778_v0  ;;  %v6784_v39 = vcombine.high %v3540_v62, %v3544_v44  ;;  %v3147_v30 = vmul.f32 %v10443_v47, %v10443_v47  ;;  %v6783_v10 = vcombine.low %v3540_v62, %v3544_v44  ;;  %v3556_v62 = vld [vmem:[%s9177_s18 + $0x300] sm:$0xff] }
 0x6a8   : > { %3080 = vadd.xlane.f32.xlu1 %v3079_v53  ;;  %v10402_v60 = vpop.f32.mrb[136].mxu1  ;;  %v6777_v53 = vcombine.low %v3533_v45, %v3537_v20  ;;  %v3181_v4 = vadd.f32 %v3145_v8, %v3144_v6  ;;  %v3548_v8 = vld [vmem:[%s9177_s18 + $0x2c0] sm:$0xff]  ;;  %v3549_v45 = vld [vmem:[%s9177_s18 + $0x2c8] sm:$0xff] }
 0x6a9   : > { %v10406_v14 = vpop.f32.mrb[137].mxu1  ;;  %4290 = vmatprep.subr.bf16.mxu0 %v6784_v39  ;;  %v6792_v5 = vcombine.high %v3548_v8, %v3552_v56  ;;  %v3553_v6 = vld [vmem:[%s9177_s18 + $0x2e8] sm:$0xff]  ;;  %v6791_v9 = vcombine.low %v3548_v8, %v3552_v56  ;;  %v3560_v44 = vld [vmem:[%s9177_s18 + $0x320] sm:$0xff]  ;;  %v10502_v39 = vadd.f32 %v8114_v13, %v10341_v29 }
 0x6aa   : > { %3173 = vadd.xlane.f32.xlu0 %v3172_v37  ;;  %v10414_v42 = vpop.f32.mrb[138].mxu1  ;;  %v8109_v37 = vld [vmem:[%s9198_s22 + $0x78] sm:$0xff]  ;;  %4402 = vmatpush1.bf16.msra.mxu1 %v6777_v53  ;;  %v10485_v20 = vadd.f32 %v8111_v17, %v10406_v14  ;;  %v8112_v53 = vld [vmem:[%s9198_s22 + $0x80] sm:$0xff]  ;;  %v3568_v8 = vld [vmem:[%s9177_s18 + $0x360] sm:$0xff] }
 0x6ab   : > { %v10423_v40 = vpop.f32.mrb[139].mxu1  ;;  %v10451_v43 = vadd.f32 %v8109_v37, %v10384_v19  ;;  %v3088_v19 = vadd.f32 %v10443_v47, %v10447_v63  ;;  %4291 = vmatpush1.bf16.msra.mxu0 %v6783_v10  ;;  %v10491_v0 = vadd.f32 %v8112_v53, %v10337_v11  ;;  %12144 = vst [vmem:[#allocation69_spill] sm:$0xff] %v10502_v39  ;;  %v3565_v56 = vld [vmem:[%s9177_s18 + $0x348] sm:$0xff]  ;;  %v8115_v17 = vld [vmem:[%s9198_s22 + $0xa8] sm:$0xff] }
 0x6ac   : > { %3176 = vadd.xlane.f32.xlu1 %v3175_v50  ;;  %v3541_v50 = vld [vmem:[%s9177_s18 + $0x288] sm:$0xff]  ;;  %12141 = vst [vmem:[#allocation66_spill] sm:$0xff] %v10485_v20  ;;  %4292 = vmatprep.subr.bf16.mxu0 %v6792_v5  ;;  %v10495_v37 = vadd.f32 %v8113_v58, %v10423_v40  ;;  %v6800_v11 = vcombine.high %v3556_v62, %v3560_v44  ;;  %v8116_v58 = vld [vmem:[%s9198_s22 + $0xa0] sm:$0xff]  ;;  %v3576_v13 = vld [vmem:[%s9177_s18 + $0x3a0] sm:$0xff] }
 0x6ad   : > { %12140 = vst [vmem:[#allocation65_spill] sm:$0xff] %v10451_v43  ;;  %v6785_v51 = vcombine.low %v3541_v50, %v3545_v31  ;;  %v3091_v61 = vadd.f32 %v10451_v43, %v10458_v27  ;;  %v3149_v18 = vmul.f32 %v10451_v43, %v10451_v43  ;;  %12142 = vst [vmem:[#allocation67_spill] sm:$0xff] %v10491_v0 }
 0x6ae   : > { %3083 = vadd.xlane.f32.xlu0 %v3082_v54  ;;  %v6786_v54 = vcombine.high %v3541_v50, %v3545_v31  ;;  %12143 = vst [vmem:[#allocation68_spill] sm:$0xff] %v10495_v37  ;;  %v3557_v50 = vld [vmem:[%s9177_s18 + $0x308] sm:$0xff]  ;;  %v6794_v31 = vcombine.high %v3549_v45, %v3553_v6  ;;  %v3094_v40 = vadd.f32 %v10485_v20, %v10491_v0 }
 0x6af   : > { %4293 = vmatpush1.bf16.msra.mxu0 %v6791_v9  ;;  %v6799_v10 = vcombine.low %v3556_v62, %v3560_v44  ;;  %v3150_v29 = vmul.f32 %v10491_v0, %v10491_v0  ;;  %v3152_v5 = vmul.f32 %v10502_v39, %v10502_v39 }
 0x6b0   : > { %3086 = vadd.xlane.f32.xlu1 %v3085_v15  ;;  %v3146_v15 = vmul.f32 %v10447_v63, %v10447_v63  ;;  %4403 = vmatprep.subr.bf16.mxu1 %v6786_v54 }
 0x6b1   : > { %4404 = vmatpush1.bf16.msra.mxu1 %v6785_v51  ;;  %4294 = vmatprep.subr.bf16.mxu0 %v6800_v11  ;;  %v3097_v51 = vadd.f32 %v10495_v37, %v10502_v39  ;;  %v8118_v11 = vld [vmem:[%s9198_s22 + $0xb0] sm:$0xff] }
 0x6b2   : > { %3179 = vadd.xlane.f32.xlu0 %v3178_v2  ;;  %v3184_v28 = vadd.f32 %v3147_v30, %v3146_v15  ;;  %v3148_v2 = vmul.f32 %v10458_v27, %v10458_v27  ;;  %v3151_v30 = vmul.f32 %v10485_v20, %v10485_v20  ;;  %4405 = vmatprep.subr.bf16.mxu1 %v6794_v31  ;;  %v3573_v31 = vld [vmem:[%s9177_s18 + $0x388] sm:$0xff]  ;;  %v10783_v20 = vld [vmem:[%s9177_s18 + $0x1f8] sm:$0xff] }
 0x6b3   : > { %4295 = vmatpush1.bf16.msra.mxu0 %v6799_v10  ;;  %12172 = vst [vmem:[#allocation95_spill] sm:$0xff] %v10783_v20 }
 0x6b4   : > { %3182 = vadd.xlane.f32.xlu1 %v3181_v4  ;;  %v10461_v22 = vpop.f32.mrb[140].mxu1  ;;  %v3187_v14 = vadd.f32 %v3149_v18, %v3148_v2  ;;  %v6793_v4 = vcombine.low %v3549_v45, %v3553_v6  ;;  %v3564_v18 = vld [vmem:[%s9177_s18 + $0x340] sm:$0xff]  ;;  %v3569_v6 = vld [vmem:[%s9177_s18 + $0x368] sm:$0xff]  ;;  %v3190_v2 = vadd.f32 %v3151_v30, %v3150_v29 }
 0x6b5   : > { %v10467_v36 = vpop.f32.mrb[141].mxu1  ;;  %v6808_v45 = vcombine.high %v3564_v18, %v3568_v8  ;;  %v6807_v9 = vcombine.low %v3564_v18, %v3568_v8  ;;  %v6810_v53 = vcombine.high %v3565_v56, %v3569_v6  ;;  %v3584_v18 = vld [vmem:[%s9177_s18 + $0x3e0] sm:$0xff]  ;;  %v3581_v8 = vld [vmem:[%s9177_s18 + $0x3c8] sm:$0xff] }
 0x6b6   : > { %3089 = vadd.xlane.f32.xlu0 %v3088_v19  ;;  %v10469_v32 = vpop.f32.mrb[142].mxu1  ;;  %v3561_v19 = vld [vmem:[%s9177_s18 + $0x328] sm:$0xff]  ;;  %4406 = vmatpush1.bf16.msra.mxu1 %v6793_v4 }
 0x6b7   : > { %v10479_v7 = vpop.f32.mrb[143].mxu1  ;;  %v6802_v54 = vcombine.high %v3557_v50, %v3561_v19  ;;  %v6801_v15 = vcombine.low %v3557_v50, %v3561_v19  ;;  %4296 = vmatprep.subr.bf16.mxu0 %v6808_v45  ;;  %v8117_v4 = vld [vmem:[%s9198_s22 + $0xb8] sm:$0xff]  ;;  %v3572_v50 = vld [vmem:[%s9177_s18 + $0x380] sm:$0xff]  ;;  %v10538_v19 = vadd.f32 %v8118_v11, %v10339_v35  ;;  %v10576_v11 = vld [vmem:[%s9177_s18 + $0x18] sm:$0xff] }
 0x6b8   : > { %3092 = vadd.xlane.f32.xlu1 %v3091_v61  ;;  %v3153_v61 = vmul.f32 %v10495_v37, %v10495_v37  ;;  %v10531_v62 = vadd.f32 %v8117_v4, %v10414_v42  ;;  %4297 = vmatpush1.bf16.msra.mxu0 %v6807_v9  ;;  %v6815_v10 = vcombine.low %v3572_v50, %v3576_v13  ;;  %v3585_v45 = vld [vmem:[%s9177_s18 + $0x3e8] sm:$0xff] }
 0x6b9   : > { %4407 = vmatprep.subr.bf16.mxu1 %v6802_v54  ;;  %12148 = vst [vmem:[#allocation73_spill] sm:$0xff] %v10538_v19 }
 0x6ba   : > { %3185 = vadd.xlane.f32.xlu0 %v3184_v28  ;;  %v10523_v28 = vadd.f32 %v8115_v17, %v10402_v60  ;;  %12147 = vst [vmem:[#allocation72_spill] sm:$0xff] %v10531_v62  ;;  %v3193_v44 = vadd.f32 %v3153_v61, %v3152_v5  ;;  %4408 = vmatpush1.bf16.msra.mxu1 %v6801_v15  ;;  %v3580_v15 = vld [vmem:[%s9177_s18 + $0x3c0] sm:$0xff] }
 0x6bb   : > { %v6809_v60 = vcombine.low %v3565_v56, %v3569_v6  ;;  %4409 = vmatprep.subr.bf16.mxu1 %v6810_v53  ;;  %v3103_v29 = vadd.f32 %v10531_v62, %v10538_v19  ;;  %v3156_v56 = vmul.f32 %v10538_v19, %v10538_v19  ;;  %v6824_v5 = vcombine.high %v3580_v15, %v3584_v18  ;;  %v8119_v6 = vld [vmem:[%s9198_s22 + $0xc8] sm:$0xff] }
 0x6bc   : > { %3188 = vadd.xlane.f32.xlu1 %v3187_v14  ;;  %12145 = vst [vmem:[#allocation70_spill] sm:$0xff] %v10523_v28  ;;  %v10527_v14 = vadd.f32 %v8116_v58, %v10335_v1  ;;  %v6816_v1 = vcombine.high %v3572_v50, %v3576_v13  ;;  %v3155_v30 = vmul.f32 %v10523_v28, %v10523_v28  ;;  %v8120_v58 = vld [vmem:[%s9198_s22 + $0xc0] sm:$0xff] }
 0x6bd   : > { %v10559_v17 = vadd.f32 %v8119_v6, %v10467_v36  ;;  %v6823_v9 = vcombine.low %v3580_v15, %v3584_v18  ;;  %v6826_v53 = vcombine.high %v3581_v8, %v3585_v45  ;;  %v10563_v4 = vadd.f32 %v8120_v58, %v10345_v25  ;;  %v10570_v13 = vld [vmem:[%s9177_s18 + $0x10] sm:$0xff]  ;;  %v8122_v25 = vld [vmem:[%s9198_s22 + $0xd0] sm:$0xff]  ;;  %v10764_v19 = vld [vmem:[%s9177_s18 + $0x198] sm:$0xff] }
 0x6be   : > { %3095 = vadd.xlane.f32.xlu0 %v3094_v40  ;;  %12146 = vst [vmem:[#allocation71_spill] sm:$0xff] %v10527_v14  ;;  %v3577_v40 = vld [vmem:[%s9177_s18 + $0x3a8] sm:$0xff]  ;;  %v3100_v42 = vadd.f32 %v10523_v28, %v10527_v14  ;;  %v3154_v35 = vmul.f32 %v10527_v14, %v10527_v14  ;;  %4298 = vmatprep.subr.bf16.mxu0 %v6816_v1  ;;  %12167 = vst [vmem:[#allocation90_spill] sm:$0xff] %v10764_v19  ;;  %v10767_v28 = vld [vmem:[%s9177_s18 + $0x1b8] sm:$0xff] }
 0x6bf   : > { %v6818_v54 = vcombine.high %v3573_v31, %v3577_v40  ;;  %4410 = vmatpush1.bf16.msra.mxu1 %v6809_v60  ;;  %v6817_v61 = vcombine.low %v3573_v31, %v3577_v40  ;;  %4299 = vmatpush1.bf16.msra.mxu0 %v6815_v10  ;;  %12149 = vst [vmem:[#allocation74_spill] sm:$0xff] %v10559_v17  ;;  %12150 = vst [vmem:[#allocation75_spill] sm:$0xff] %v10563_v4  ;;  %v10573_v31 = vld [vmem:[%s9177_s18 + $0x30] sm:$0xff] }
 0x6c0   : > { %3098 = vadd.xlane.f32.xlu1 %v3097_v51  ;;  %v3157_v51 = vmul.f32 %v10531_v62, %v10531_v62  ;;  %4300 = vmatprep.subr.bf16.mxu0 %v6824_v5  ;;  %v6825_v50 = vcombine.low %v3581_v8, %v3585_v45  ;;  %v10580_v1 = vadd.f32 %v8122_v25, %v10349_v52  ;;  %v8125_v45 = vld [vmem:[%s9198_s22 + $0xf8] sm:$0xff] }
 0x6c1   : > { %4411 = vmatprep.subr.bf16.mxu1 %v6818_v54  ;;  %v3159_v40 = vmul.f32 %v10559_v17, %v10559_v17  ;;  %v10615_v6 = vadd.f32 %v8125_v45, %v10469_v32  ;;  %12168 = vst [vmem:[#allocation91_spill] sm:$0xff] %v10767_v28  ;;  %v10770_v14 = vld [vmem:[%s9177_s18 + $0x1d0] sm:$0xff] }
 0x6c2   : > { %3191 = vadd.xlane.f32.xlu0 %v3190_v2  ;;  %v3196_v2 = vadd.f32 %v3155_v30, %v3154_v35  ;;  %v3199_v36 = vadd.f32 %v3157_v51, %v3156_v56  ;;  %12152 = vst [vmem:[#allocation77_spill] sm:$0xff] %v10580_v1  ;;  %v10589_v30 = vld [vmem:[%s9177_s18 + $0x38] sm:$0xff]  ;;  %v3160_v8 = vmul.f32 %v10580_v1, %v10580_v1  ;;  %12169 = vst [vmem:[#allocation92_spill] sm:$0xff] %v10770_v14  ;;  %v10794_v62 = vld [vmem:[%s9177_s18 + $0x210] sm:$0xff] }
 0x6c3   : > { %4412 = vmatpush1.bf16.msra.mxu1 %v6817_v61  ;;  %4301 = vmatpush1.bf16.msra.mxu0 %v6823_v9  ;;  %v6710_v54 = vcombine.high %v10576_v11, %v10589_v30  ;;  %v8123_v61 = vld [vmem:[%s9198_s22 + $0xe8] sm:$0xff]  ;;  %v8124_v56 = vld [vmem:[%s9198_s22 + $0xe0] sm:$0xff]  ;;  %12155 = vst [vmem:[#allocation80_spill] sm:$0xff] %v10615_v6  ;;  %v8126_v9 = vld [vmem:[%s9198_s22 + $0xf0] sm:$0xff] }
 0x6c4   : > { %3194 = vadd.xlane.f32.xlu1 %v3193_v44  ;;  %v8121_v44 = vld [vmem:[%s9198_s22 + $0xd8] sm:$0xff]  ;;  %4413 = vmatprep.subr.bf16.mxu1 %v6826_v53  ;;  %v10605_v15 = vadd.f32 %v8123_v61, %v10461_v22  ;;  %v10611_v5 = vadd.f32 %v8124_v56, %v10343_v21  ;;  %v10619_v53 = vadd.f32 %v8126_v9, %v10347_v41  ;;  %v3069_v61 = vld [vmem:[%s12158_s13] sm:$0x3] }
 0x6c5   : > { %v10567_v60 = vadd.f32 %v8121_v44, %v10479_v7  ;;  %v3106_v7 = vadd.f32 %v10559_v17, %v10563_v4  ;;  %v3165_v41 = vmul.f32 %v10615_v6, %v10615_v6  ;;  %v10656_v9 = vld [vmem:[%s9177_s18 + $0x78] sm:$0xff]  ;;  %12173 = vst [vmem:[#allocation96_spill] sm:$0xff] %v10794_v62 }
 0x6c6   : > { %3101 = vadd.xlane.f32.xlu0 %v3100_v42  ;;  %v6708_v42 = vcombine.high %v10570_v13, %v10573_v31  ;;  %12153 = vst [vmem:[#allocation78_spill] sm:$0xff] %v10605_v15  ;;  %12154 = vst [vmem:[#allocation79_spill] sm:$0xff] %v10611_v5  ;;  %v3112_v22 = vadd.f32 %v10605_v15, %v10611_v5  ;;  %v3163_v58 = vmul.f32 %v10605_v15, %v10605_v15  ;;  %v10729_v15 = vld [vmem:[%s9177_s18 + $0x170] sm:$0xff]  ;;  %v10780_v17 = vld [vmem:[%s9177_s18 + $0x1d8] sm:$0xff] }
 0x6c7   : > { %12151 = vst [vmem:[#allocation76_spill] sm:$0xff] %v10567_v60  ;;  %v3109_v35 = vadd.f32 %v10567_v60, %v10580_v1  ;;  %v3161_v51 = vmul.f32 %v10567_v60, %v10567_v60  ;;  %4414 = vmatpush1.bf16.msra.mxu1 %v6825_v50  ;;  %12156 = vst [vmem:[#allocation81_spill] sm:$0xff] %v10619_v53  ;;  %v3115_v21 = vadd.f32 %v10615_v6, %v10619_v53  ;;  %v10716_v6 = vld [vmem:[%s9177_s18 + $0x118] sm:$0xff] }
 0x6c8   : > { %3104 = vadd.xlane.f32.xlu1 %v3103_v29  ;;  %v3158_v29 = vmul.f32 %v10563_v4, %v10563_v4  ;;  %4496 = vmatprep.subr.bf16.mxu0 %v6708_v42  ;;  %v3162_v32 = vmul.f32 %v10611_v5, %v10611_v5  ;;  %12161 = vst [vmem:[#allocation84_spill] sm:$0xff] %v10716_v6  ;;  %12164 = vst [vmem:[#allocation87_spill] sm:$0xff] %v10729_v15  ;;  %v10753_v4 = vld [vmem:[%s9177_s18 + $0x1b0] sm:$0xff]  ;;  %v10851_v14 = vld [vmem:[%s9177_s18 + $0x278] sm:$0xff] }
 0x6c9   : > { %4609 = vmatprep.subr.bf16.mxu1 %v6710_v54  ;;  %v3068_v54 = vld [vmem:[%s12157_s11] sm:$0x3]  ;;  %12166 = vst [vmem:[#allocation89_spill] sm:$0xff] %v10753_v4  ;;  %12171 = vst [vmem:[#allocation94_spill] sm:$0xff] %v10780_v17  ;;  %v10797_v15 = vld [vmem:[%s9177_s18 + $0x230] sm:$0xff]  ;;  %s8427_s11 = scalar_lea.vmem %s8426_s21, 2048 }
 0x6ca   : > { %3197 = vadd.xlane.f32.xlu0 %v3196_v2  ;;  %v3202_v18 = vadd.f32 %v3159_v40, %v3158_v29  ;;  %v3205_v2 = vadd.f32 %v3161_v51, %v3160_v8  ;;  %v3208_v44 = vadd.f32 %v3163_v58, %v3162_v32  ;;  %v10647_v8 = vld [vmem:[%s9177_s18 + $0x70] sm:$0xff]  ;;  %v10650_v45 = vrot.slane %v3068_v54, %v9434_v34  ;;  %p8429_p2 = scmp.lt.s32.totalorder %s8427_s11, %s8421_s17 }
 0x6cb   : > { %12174 = vst [vmem:[#allocation97_spill] sm:$0xff] %v10797_v15 }
 0x6cc   : > { %3200 = vadd.xlane.f32.xlu1 %v3199_v36  ;;  %v3164_v36 = vmul.f32 %v10619_v53, %v10619_v53  ;;  %p8430_p10 = por %p8429_p2, %p8428_p7 }
 0x6ce   : > { %3107 = vadd.xlane.f32.xlu0 %v3106_v7  ;;  %v3211_v50 = vadd.f32 %v3165_v41, %v3164_v36  ;;  %v10664_v41 = vrot.slane %v3068_v54, %v9431_v33  ;;  %v10670_v36 = vld [vmem:[%s9177_s18 + $0x98] sm:$0xff]  ;;  %p8431_p9 = pnand %p8430_p10, %p8424_p1 }
 0x6d0   : > { %3110 = vadd.xlane.f32.xlu1 %v3109_v35 }
 0x6d2   : > { %3203 = vadd.xlane.f32.xlu0 %v3202_v18  ;;  %v10644_v18 = vld [vmem:[%s9177_s18 + $0x50] sm:$0xff] }
 0x6d4   : > { %3206 = vadd.xlane.f32.xlu1 %v3205_v2  ;;  %v10653_v2 = vld [vmem:[%s9177_s18 + $0x58] sm:$0xff] }
 0x6d6   : > { %3113 = vadd.xlane.f32.xlu0 %v3112_v22  ;;  %v10659_v22 = vld [vmem:[%s9177_s18 + $0x90] sm:$0xff] }
 0x6d8   : > { %3116 = vadd.xlane.f32.xlu1 %v3115_v21 }
 0x6da   : > { %3209 = vadd.xlane.f32.xlu0 %v3208_v44  ;;  %v10667_v44 = vld [vmem:[%s9177_s18 + $0xb0] sm:$0xff] }
 0x6dc   : > { %3212 = vadd.xlane.f32.xlu1 %v3211_v50  ;;  %v10673_v50 = vld [vmem:[%s9177_s18 + $0xb8] sm:$0xff] }
 0x72b   : > { %v3072_v25 = vpop.xlane.xlu0 %3071 }
 0x72c   : > { %v10633_v7 = vmul.f32 0.00390625, %v3072_v25 }
 0x72d   : > { %v3075_v40 = vpop.xlane.xlu1 %3074 }
 0x72e   : > { %v10635_v42 = vmul.f32 0.00390625, %v3075_v40  ;;  %v3262_v29 = vmul.f32 %v10633_v7, %v10633_v7  ;;  %v10676_v40 = vrot.slane %v3069_v61, %v9434_v34 }
 0x72f   : > { %v3168_v35 = vpop.xlane.xlu0 %3167 }
 0x730   : > { %v3214_v51 = vmul.f32 0.00390625, %v3168_v35  ;;  %v3263_v21 = vmul.f32 %v10635_v42, %v10635_v42  ;;  %v10679_v35 = vrot.slane %v3069_v61, %v9431_v33  ;;  %v10696_v33 = vld [vmem:[%s9177_s18 + $0xd8] sm:$0xff]  ;;  %v10713_v61 = vld [vmem:[%s9177_s18 + $0x130] sm:$0xff] }
 0x731   : > { %v3171_v56 = vpop.xlane.xlu1 %3170  ;;  %12160 = vst [vmem:[#allocation83_spill] sm:$0xff] %v10713_v61 }
 0x732   : > { %v3278_v58 = vsub.f32 %v3214_v51, %v3262_v29  ;;  %v3215_v32 = vmul.f32 0.00390625, %v3171_v56  ;;  %v10686_v51 = vld [vmem:[%s9177_s18 + $0xd0] sm:$0xff]  ;;  %v10699_v29 = vld [vmem:[%s9177_s18 + $0xf8] sm:$0xff] }
 0x733   : > { %v3078_v25 = vpop.xlane.xlu0 %3077  ;;  %v10689_v56 = vld [vmem:[%s9177_s18 + $0xf0] sm:$0xff] }
 0x734   : > { %v3294_v52 = vadd.f32 1e-05, %v3278_v58  ;;  %v3279_v10 = vsub.f32 %v3215_v32, %v3263_v21  ;;  %v10691_v34 = vmul.f32 0.00390625, %v3078_v25  ;;  %v10710_v25 = vld [vmem:[%s9177_s18 + $0x110] sm:$0xff]  ;;  %v10723_v21 = vld [vmem:[%s9177_s18 + $0x138] sm:$0xff] }
 0x735   : > { %v3081_v54 = vpop.xlane.xlu1 %3080  ;;  %12159 = vst [vmem:[#allocation82_spill] sm:$0xff] %v10710_v25  ;;  %12162 = vst [vmem:[#allocation85_spill] sm:$0xff] %v10723_v21  ;;  %v10726_v32 = vld [vmem:[%s9177_s18 + $0x150] sm:$0xff]  ;;  %v10804_v25 = vld [vmem:[%s9177_s18 + $0x218] sm:$0xff] }
 0x736   : > { %8045 = vrsqrt.f32 %v3294_v52  ;;  %v3295_v53 = vadd.f32 1e-05, %v3279_v10  ;;  %12163 = vst [vmem:[#allocation86_spill] sm:$0xff] %v10726_v32  ;;  %v10731_v5 = vmul.f32 0.00390625, %v3081_v54  ;;  %v3264_v54 = vmul.f32 %v10691_v34, %v10691_v34  ;;  %v10747_v10 = vld [vmem:[%s9177_s18 + $0x178] sm:$0xff]  ;;  %v10750_v52 = vld [vmem:[%s9177_s18 + $0x190] sm:$0xff] }
 0x737   : > { %v3174_v60 = vpop.xlane.xlu0 %3173  ;;  %12165 = vst [vmem:[#allocation88_spill] sm:$0xff] %v10747_v10 }
 0x738   : > { %8047 = vrsqrt.f32 %v3295_v53  ;;  %v3216_v1 = vmul.f32 0.00390625, %v3174_v60  ;;  %v3265_v53 = vmul.f32 %v10731_v5, %v10731_v5  ;;  %v10777_v60 = vld [vmem:[%s9177_s18 + $0x1f0] sm:$0xff] }
 0x739   : > { %v3177_v58 = vpop.xlane.xlu1 %3176  ;;  %12170 = vst [vmem:[#allocation93_spill] sm:$0xff] %v10777_v60  ;;  %v10848_v60 = vld [vmem:[%s9177_s18 + $0x258] sm:$0xff] }
 0x73a   : > { %v3280_v37 = vsub.f32 %v3216_v1, %v3264_v54  ;;  %v3217_v39 = vmul.f32 0.00390625, %v3177_v58  ;;  %v10807_v1 = vld [vmem:[%s9177_s18 + $0x238] sm:$0xff]  ;;  %v3230_v58 = vsub.f32 %v10352_v16, %v10633_v7  ;;  %v10837_v16 = vld [vmem:[%s9177_s18 + $0x270] sm:$0xff] }
 0x73b   : > { %v3084_v0 = vpop.xlane.xlu0 %3083  ;;  %12176 = vst [vmem:[#allocation99_spill] sm:$0xff] %v10837_v16 }
 0x73c   : > { %v3296_v32 = vadd.f32 1e-05, %v3280_v37  ;;  %v3281_v6 = vsub.f32 %v3217_v39, %v3265_v53  ;;  %v10799_v61 = vmul.f32 0.00390625, %v3084_v0  ;;  %v3232_v37 = vsub.f32 %v10358_v49, %v10635_v42 }
 0x73d   : > { %v3087_v10 = vpop.xlane.xlu1 %3086  ;;  %v3233_v0 = vsub.f32 %v10361_v46, %v10635_v42 }
 0x73e   : > { %8049 = vrsqrt.f32 %v3296_v32  ;;  %v3297_v39 = vadd.f32 1e-05, %v3281_v6  ;;  %v10823_v54 = vmul.f32 0.00390625, %v3087_v10  ;;  %v3231_v6 = vsub.f32 %v10355_v3, %v10633_v7  ;;  %v10834_v10 = vld [vmem:[%s9177_s18 + $0x250] sm:$0xff] }
 0x73f   : > { %v3180_v28 = vpop.xlane.xlu0 %3179  ;;  %v3266_v21 = vmul.f32 %v10799_v61, %v10799_v61  ;;  %12175 = vst [vmem:[#allocation98_spill] sm:$0xff] %v10834_v10 }
 0x740   : > { %v8046_v32 = vpop.eup %8045  ;;  %8051 = vrsqrt.f32 %v3297_v39  ;;  %v3218_v53 = vmul.f32 0.00390625, %v3180_v28  ;;  %v3267_v28 = vmul.f32 %v10823_v54, %v10823_v54 }
 0x741   : > { %v3326_v15 = vmul.f32 %v8046_v32, %v3230_v58  ;;  %v3183_v62 = vpop.xlane.xlu1 %3182  ;;  %v3327_v17 = vmul.f32 %v8046_v32, %v3231_v6 }
 0x742   : > { %v8048_v39 = vpop.eup %8047  ;;  %v3282_v3 = vsub.f32 %v3218_v53, %v3266_v21  ;;  %v3219_v20 = vmul.f32 0.00390625, %v3183_v62 }
 0x743   : > { %v3328_v49 = vmul.f32 %v8048_v39, %v3232_v37  ;;  %v3090_v19 = vpop.xlane.xlu0 %3089  ;;  %v3329_v4 = vmul.f32 %v8048_v39, %v3233_v0  ;;  %v3369_v42 = vmul.f32 %v10650_v45, %v3326_v15  ;;  %v3370_v53 = vmul.f32 %v10664_v41, %v3327_v17 }
 0x744   : > { %v3298_v7 = vadd.f32 1e-05, %v3282_v3  ;;  %v3283_v46 = vsub.f32 %v3219_v20, %v3267_v28  ;;  %v10856_v21 = vmul.f32 0.00390625, %v3090_v19  ;;  %v3234_v0 = vsub.f32 %v10379_v59, %v10691_v34 }
 0x745   : > { %v3093_v62 = vpop.xlane.xlu1 %3092  ;;  %v3372_v32 = vmul.f32 %v10664_v41, %v3329_v4  ;;  %v3371_v6 = vmul.f32 %v10650_v45, %v3328_v49  ;;  %v3235_v3 = vsub.f32 %v10374_v38, %v10691_v34  ;;  %v3413_v4 = vadd.f32 %v10679_v35, %v3370_v53 }
 0x746   : > { %8053 = vrsqrt.f32 %v3298_v7  ;;  %v3299_v20 = vadd.f32 1e-05, %v3283_v46  ;;  %v10869_v19 = vmul.f32 0.00390625, %v3093_v62  ;;  %v3412_v39 = vadd.f32 %v10676_v40, %v3369_v42 }
 0x747   : > { %v3186_v17 = vpop.xlane.xlu0 %3185  ;;  %v3415_v49 = vadd.f32 %v10679_v35, %v3372_v32  ;;  %v3268_v15 = vmul.f32 %v10856_v21, %v10856_v21  ;;  %v3414_v37 = vadd.f32 %v10676_v40, %v3371_v6  ;;  %v3236_v34 = vsub.f32 %v10387_v23, %v10731_v5 }
 0x748   : > { %v8050_v28 = vpop.eup %8049  ;;  %8055 = vrsqrt.f32 %v3299_v20  ;;  %v3220_v58 = vmul.f32 0.00390625, %v3186_v17  ;;  %v3237_v46 = vsub.f32 %v10382_v57, %v10731_v5  ;;  %v3269_v7 = vmul.f32 %v10869_v19, %v10869_v19 }
 0x749   : > { %v3189_v53 = vpop.xlane.xlu1 %3188  ;;  %v10883_v62 = vpack.c.bf16 %v3415_v49, %v3413_v4  ;;  %v10885_v38 = vpack.c.bf16 %v3414_v37, %v3412_v39  ;;  %v3331_v17 = vmul.f32 %v8050_v28, %v3235_v3  ;;  %v3330_v59 = vmul.f32 %v8050_v28, %v3234_v0 }
 0x74a   : > { %v8052_v42 = vpop.eup %8051  ;;  %v3284_v32 = vsub.f32 %v3220_v58, %v3268_v15  ;;  %v3221_v20 = vmul.f32 0.00390625, %v3189_v53  ;;  %v12177_v37 = vcombine.low %v10570_v13, %v10573_v31  ;;  %v12178_v15 = vcombine.low %v10576_v11, %v10589_v30 }
 0x74b   : > { %4302 = vmatprep.mubr.bf16.mxu0 %v10883_v62  ;;  %4415 = vmatprep.mubr.bf16.mxu1 %v10883_v62  ;;  %v3096_v6 = vpop.xlane.xlu0 %3095  ;;  %v3333_v23 = vmul.f32 %v8052_v42, %v3237_v46  ;;  %v3332_v5 = vmul.f32 %v8052_v42, %v3236_v34  ;;  %v3374_v58 = vmul.f32 %v10664_v41, %v3331_v17 }
 0x74c   : > { %v3300_v57 = vadd.f32 1e-05, %v3284_v32  ;;  %v3285_v16 = vsub.f32 %v3221_v20, %v3269_v7  ;;  %v10889_v10 = vmul.f32 0.00390625, %v3096_v6  ;;  %4303 = vmatmul.mubr.bf16.vlgmr.msra.gmra.mrb[16].mxu0 %v10885_v38  ;;  %4416 = vmatmul.mubr.bf16.vlgmr.msra.gmra.mrb[144].mxu1 %v10885_v38  ;;  %v3373_v4 = vmul.f32 %v10650_v45, %v3330_v59 }
 0x74d   : > { %4497 = vmatpush1.bf16.msra.mxu0 %v12177_v37  ;;  %4610 = vmatpush1.bf16.msra.mxu1 %v12178_v15  ;;  %v3099_v0 = vpop.xlane.xlu1 %3098  ;;  %v3376_v3 = vmul.f32 %v10664_v41, %v3333_v23  ;;  %v3375_v49 = vmul.f32 %v10650_v45, %v3332_v5  ;;  %v3238_v39 = vsub.f32 %v10409_v55, %v10799_v61 }
 0x74e   : > { %v3239_v28 = vsub.f32 %v10400_v26, %v10799_v61  ;;  %8057 = vrsqrt.f32 %v3300_v57  ;;  %v3301_v13 = vadd.f32 1e-05, %v3285_v16  ;;  %v12179_v31 = vcombine.high %v10644_v18, %v10647_v8 }
 0x74f   : > { %v12180_v11 = vcombine.high %v10653_v2, %v10656_v9  ;;  %v10913_v23 = vmul.f32 0.00390625, %v3099_v0  ;;  %v3270_v59 = vmul.f32 %v10889_v10, %v10889_v10  ;;  %v3192_v30 = vpop.xlane.xlu0 %3191  ;;  %v3417_v34 = vadd.f32 %v10679_v35, %v3374_v58 }
 0x750   : > { %4498 = vmatprep.subr.bf16.mxu0 %v12179_v31  ;;  %v3419_v61 = vadd.f32 %v10679_v35, %v3376_v3  ;;  %v8054_v57 = vpop.eup %8053  ;;  %8059 = vrsqrt.f32 %v3301_v13  ;;  %v3222_v16 = vmul.f32 0.00390625, %v3192_v30  ;;  %v3416_v46 = vadd.f32 %v10676_v40, %v3373_v4 }
 0x751   : > { %4611 = vmatprep.subr.bf16.mxu1 %v12180_v11  ;;  %v3418_v7 = vadd.f32 %v10676_v40, %v3375_v49  ;;  %v3240_v53 = vsub.f32 %v10421_v12, %v10823_v54  ;;  %v3241_v42 = vsub.f32 %v10412_v48, %v10823_v54  ;;  %v12181_v32 = vcombine.low %v10644_v18, %v10647_v8  ;;  %v3195_v6 = vpop.xlane.xlu1 %3194 }
 0x752   : > { %v12182_v20 = vcombine.low %v10653_v2, %v10656_v9  ;;  %v3271_v17 = vmul.f32 %v10913_v23, %v10913_v23  ;;  %v8056_v5 = vpop.eup %8055  ;;  %v3286_v58 = vsub.f32 %v3222_v16, %v3270_v59  ;;  %v3223_v37 = vmul.f32 0.00390625, %v3195_v6 }
 0x753   : > { %4499 = vmatpush1.bf16.msra.mxu0 %v12181_v32  ;;  %v10933_v15 = vpack.c.bf16 %v3419_v61, %v3417_v34  ;;  %v10935_v0 = vpack.c.bf16 %v3418_v7, %v3416_v46  ;;  %v12183_v54 = vcombine.high %v10659_v22, %v10667_v44  ;;  %v12184_v18 = vcombine.high %v10670_v36, %v10673_v50  ;;  %v3102_v8 = vpop.xlane.xlu0 %3101 }
 0x754   : > { %4612 = vmatpush1.bf16.msra.mxu1 %v12182_v20  ;;  %v3335_v2 = vmul.f32 %v8054_v57, %v3239_v28  ;;  %v3337_v9 = vmul.f32 %v8056_v5, %v3241_v42  ;;  %v3334_v3 = vmul.f32 %v8054_v57, %v3238_v39  ;;  %v3302_v49 = vadd.f32 1e-05, %v3286_v58 }
 0x755   : > { %4500 = vmatprep.subr.bf16.mxu0 %v12183_v54  ;;  %4613 = vmatprep.subr.bf16.mxu1 %v12184_v18  ;;  %v3287_v13 = vsub.f32 %v3223_v37, %v3271_v17  ;;  %v10947_v31 = vmul.f32 0.00390625, %v3102_v8  ;;  %v3336_v11 = vmul.f32 %v8056_v5, %v3240_v53  ;;  %v3105_v59 = vpop.xlane.xlu1 %3104  ;;  %v3242_v34 = vsub.f32 %v10447_v63, %v10856_v21 }
 0x756   : > { %4312 = vmatprep.mubr.bf16.mxu0 %v10933_v15  ;;  %4425 = vmatprep.mubr.bf16.mxu1 %v10933_v15  ;;  %v3378_v28 = vmul.f32 %v10664_v41, %v3335_v2  ;;  %v3380_v39 = vmul.f32 %v10664_v41, %v3337_v9  ;;  %v3377_v30 = vmul.f32 %v10650_v45, %v3334_v3  ;;  %8061 = vrsqrt.f32 %v3302_v49 }
 0x757   : > { %4313 = vmatmul.mubr.bf16.gmra.mrb[20].mxu0 %v10935_v0  ;;  %4426 = vmatmul.mubr.bf16.gmra.mrb[148].mxu1 %v10935_v0  ;;  %v3243_v61 = vsub.f32 %v10443_v47, %v10856_v21  ;;  %v3303_v57 = vadd.f32 1e-05, %v3287_v13  ;;  %v12185_v16 = vcombine.low %v10659_v22, %v10667_v44  ;;  %v12186_v46 = vcombine.low %v10670_v36, %v10673_v50  ;;  %v3198_v42 = vpop.xlane.xlu0 %3197 }
 0x758   : > { %v3244_v7 = vsub.f32 %v10458_v27, %v10869_v19  ;;  %v10966_v53 = vmul.f32 0.00390625, %v3105_v59  ;;  %v12187_v32 = vcombine.high %v10686_v51, %v10689_v56  ;;  %v12188_v21 = vcombine.high %v10696_v33, %v10699_v29  ;;  %v8058_v36 = vpop.eup %8057 }
 0x759   : > { %4501 = vmatpush1.bf16.msra.mxu0 %v12185_v16  ;;  %4614 = vmatpush1.bf16.msra.mxu1 %v12186_v46  ;;  %v3421_v22 = vadd.f32 %v10679_v35, %v3378_v28  ;;  %v3423_v44 = vadd.f32 %v10679_v35, %v3380_v39  ;;  %8063 = vrsqrt.f32 %v3303_v57  ;;  %v3272_v50 = vmul.f32 %v10947_v31, %v10947_v31  ;;  %v3201_v58 = vpop.xlane.xlu1 %3200  ;;  %v12194_v16 = vld [vmem:[#allocation84_spill] sm:$0xff] }
 0x75a   : > { %4502 = vmatprep.subr.bf16.mxu0 %v12187_v32  ;;  %4615 = vmatprep.subr.bf16.mxu1 %v12188_v21  ;;  %v3224_v20 = vmul.f32 0.00390625, %v3198_v42  ;;  %v3379_v17 = vmul.f32 %v10650_v45, %v3336_v11  ;;  %v3245_v6 = vsub.f32 %v10451_v43, %v10869_v19  ;;  %v3273_v5 = vmul.f32 %v10966_v53, %v10966_v53  ;;  %v8060_v18 = vpop.eup %8059 }
 0x75b   : > { %v10983_v37 = vpack.c.bf16 %v3423_v44, %v3421_v22  ;;  %v3420_v54 = vadd.f32 %v10676_v40, %v3377_v30  ;;  %v12189_v2 = vcombine.low %v10686_v51, %v10689_v56  ;;  %v12190_v9 = vcombine.low %v10696_v33, %v10699_v29  ;;  %v3108_v13 = vpop.xlane.xlu0 %3107  ;;  %v12191_v33 = vld [vmem:[#allocation82_spill] sm:$0xff]  ;;  %v12192_v29 = vld [vmem:[#allocation83_spill] sm:$0xff] }
 0x75c   : > { %v3288_v8 = vsub.f32 %v3224_v20, %v3272_v50  ;;  %v3225_v3 = vmul.f32 0.00390625, %v3201_v58  ;;  %v3422_v19 = vadd.f32 %v10676_v40, %v3379_v17  ;;  %v3339_v49 = vmul.f32 %v8058_v36, %v3243_v61  ;;  %v12195_v61 = vld [vmem:[#allocation85_spill] sm:$0xff]  ;;  %v12197_v22 = vld [vmem:[#allocation67_spill] sm:$0xff] }
 0x75d   : > { %4503 = vmatpush1.bf16.msra.mxu0 %v12189_v2  ;;  %4616 = vmatpush1.bf16.msra.mxu1 %v12190_v9  ;;  %v3341_v11 = vmul.f32 %v8060_v18, %v3245_v6  ;;  %v3338_v59 = vmul.f32 %v8058_v36, %v3242_v34  ;;  %v3340_v28 = vmul.f32 %v8060_v18, %v3244_v7  ;;  %v10995_v51 = vmul.f32 0.00390625, %v3108_v13  ;;  %v3111_v42 = vpop.xlane.xlu1 %3110  ;;  %v12198_v36 = vld [vmem:[#allocation66_spill] sm:$0xff] }
 0x75e   : > { %4322 = vmatprep.mubr.bf16.mxu0 %v10983_v37  ;;  %4435 = vmatprep.mubr.bf16.mxu1 %v10983_v37  ;;  %v3304_v39 = vadd.f32 1e-05, %v3288_v8  ;;  %v3289_v30 = vsub.f32 %v3225_v3, %v3273_v5  ;;  %v10997_v56 = vpack.c.bf16 %v3422_v19, %v3420_v54  ;;  %v12193_v57 = vcombine.high %v12191_v33, %v12192_v29  ;;  %v12201_v9 = vld [vmem:[#allocation86_spill] sm:$0xff]  ;;  %v12202_v3 = vld [vmem:[#allocation87_spill] sm:$0xff] }
 0x75f   : > { %v12196_v46 = vcombine.high %v12194_v16, %v12195_v61  ;;  %v3382_v32 = vmul.f32 %v10664_v41, %v3339_v49  ;;  %v3384_v34 = vmul.f32 %v10664_v41, %v3341_v11  ;;  %v3381_v7 = vmul.f32 %v10650_v45, %v3338_v59  ;;  %v12204_v49 = vld [vmem:[#allocation88_spill] sm:$0xff] }
 0x760   : > { %4504 = vmatprep.subr.bf16.mxu0 %v12193_v57  ;;  %v3383_v21 = vmul.f32 %v10650_v45, %v3340_v28  ;;  %v3246_v44 = vsub.f32 %v12197_v22, %v10889_v10  ;;  %v3247_v50 = vsub.f32 %v12198_v36, %v10889_v10  ;;  %8065 = vrsqrt.f32 %v3304_v39  ;;  %4323 = vmatmul.mubr.bf16.gmra.mrb[24].mxu0 %v10997_v56  ;;  %v3204_v10 = vpop.xlane.xlu0 %3203  ;;  %v8062_v8 = vpop.eup %8061  ;;  %v12206_v28 = vld [vmem:[#allocation69_spill] sm:$0xff] }
 0x761   : > { %4617 = vmatprep.subr.bf16.mxu1 %v12196_v46  ;;  %v3305_v20 = vadd.f32 1e-05, %v3289_v30  ;;  %4436 = vmatmul.mubr.bf16.gmra.mrb[152].mxu1 %v10997_v56  ;;  %v12199_v17 = vcombine.low %v12191_v33, %v12192_v29  ;;  %v12200_v6 = vcombine.low %v12194_v16, %v12195_v61  ;;  %v11021_v5 = vmul.f32 0.00390625, %v3111_v42  ;;  %v12207_v30 = vld [vmem:[#allocation68_spill] sm:$0xff]  ;;  %v3207_v57 = vpop.xlane.xlu1 %3206 }
 0x762   : > { %v3274_v58 = vmul.f32 %v10995_v51, %v10995_v51  ;;  %v3425_v54 = vadd.f32 %v10679_v35, %v3382_v32  ;;  %v3427_v18 = vadd.f32 %v10679_v35, %v3384_v34  ;;  %v3226_v2 = vmul.f32 0.00390625, %v3204_v10 }
 0x763   : > { %4505 = vmatpush1.bf16.msra.mxu0 %v12199_v17  ;;  %4618 = vmatpush1.bf16.msra.mxu1 %v12200_v6  ;;  %8067 = vrsqrt.f32 %v3305_v20  ;;  %v12203_v19 = vcombine.high %v12201_v9, %v12202_v3  ;;  %v12205_v13 = vcombine.high %v10740_v24, %v12204_v49  ;;  %v3424_v11 = vadd.f32 %v10676_v40, %v3381_v7  ;;  %v8064_v61 = vpop.eup %8063 }
 0x764   : > { %v3426_v59 = vadd.f32 %v10676_v40, %v3383_v21  ;;  %v3248_v39 = vsub.f32 %v12206_v28, %v10913_v23  ;;  %v3249_v33 = vsub.f32 %v12207_v30, %v10913_v23  ;;  %v3275_v29 = vmul.f32 %v11021_v5, %v11021_v5  ;;  %v3114_v23 = vpop.xlane.xlu0 %3113 }
 0x765   : > { %4506 = vmatprep.subr.bf16.mxu0 %v12203_v19  ;;  %4619 = vmatprep.subr.bf16.mxu1 %v12205_v13  ;;  %v11041_v16 = vpack.c.bf16 %v3427_v18, %v3425_v54  ;;  %v3290_v46 = vsub.f32 %v3226_v2, %v3274_v58  ;;  %v3227_v42 = vmul.f32 0.00390625, %v3207_v57  ;;  %v3343_v34 = vmul.f32 %v8062_v8, %v3247_v50  ;;  %v12210_v18 = vld [vmem:[#allocation89_spill] sm:$0xff]  ;;  %v12215_v13 = vld [vmem:[#allocation71_spill] sm:$0xff] }
 0x766   : > { %v11043_v32 = vpack.c.bf16 %v3426_v59, %v3424_v11  ;;  %v12208_v7 = vcombine.low %v12201_v9, %v12202_v3  ;;  %v12209_v21 = vcombine.low %v10740_v24, %v12204_v49  ;;  %v3345_v20 = vmul.f32 %v8064_v61, %v3249_v33  ;;  %v12212_v24 = vld [vmem:[#allocation90_spill] sm:$0xff]  ;;  %v12213_v9 = vld [vmem:[#allocation91_spill] sm:$0xff] }
 0x767   : > { %v3342_v17 = vmul.f32 %v8062_v8, %v3246_v44  ;;  %v3344_v6 = vmul.f32 %v8064_v61, %v3248_v39  ;;  %v3306_v10 = vadd.f32 1e-05, %v3290_v46  ;;  %v3291_v54 = vsub.f32 %v3227_v42, %v3275_v29  ;;  %4332 = vmatprep.mubr.bf16.mxu0 %v11041_v16  ;;  %4445 = vmatprep.mubr.bf16.mxu1 %v11041_v16  ;;  %v3117_v44 = vpop.xlane.xlu1 %3116  ;;  %v12216_v59 = vld [vmem:[#allocation70_spill] sm:$0xff] }
 0x768   : > { %4507 = vmatpush1.bf16.msra.mxu0 %v12208_v7  ;;  %4620 = vmatpush1.bf16.msra.mxu1 %v12209_v21  ;;  %v11053_v58 = vmul.f32 0.00390625, %v3114_v23  ;;  %v3386_v50 = vmul.f32 %v10664_v41, %v3343_v34  ;;  %v12211_v2 = vcombine.high %v10750_v52, %v12210_v18  ;;  %v12214_v3 = vcombine.high %v12212_v24, %v12213_v9  ;;  %v12219_v21 = vld [vmem:[#allocation92_spill] sm:$0xff]  ;;  %v12220_v23 = vld [vmem:[#allocation93_spill] sm:$0xff] }
 0x769   : > { %v3388_v8 = vmul.f32 %v10664_v41, %v3345_v20  ;;  %v3385_v19 = vmul.f32 %v10650_v45, %v3342_v17  ;;  %v3387_v49 = vmul.f32 %v10650_v45, %v3344_v6  ;;  %v3250_v11 = vsub.f32 %v12215_v13, %v10947_v31  ;;  %4333 = vmatmul.mubr.bf16.gmra.mrb[28].mxu0 %v11043_v32  ;;  %v12222_v17 = vld [vmem:[#allocation94_spill] sm:$0xff]  ;;  %v12223_v6 = vld [vmem:[#allocation95_spill] sm:$0xff] }
 0x76a   : > { %4508 = vmatprep.subr.bf16.mxu0 %v12211_v2  ;;  %4621 = vmatprep.subr.bf16.mxu1 %v12214_v3  ;;  %v3251_v39 = vsub.f32 %v12216_v59, %v10947_v31  ;;  %8069 = vrsqrt.f32 %v3306_v10  ;;  %v3307_v33 = vadd.f32 1e-05, %v3291_v54  ;;  %v12217_v29 = vcombine.low %v10750_v52, %v12210_v18  ;;  %v3210_v31 = vpop.xlane.xlu0 %3209  ;;  %v8066_v7 = vpop.eup %8065  ;;  %v12225_v2 = vld [vmem:[#allocation73_spill] sm:$0xff] }
 0x76b   : > { %4446 = vmatmul.mubr.bf16.gmra.mrb[156].mxu1 %v11043_v32  ;;  %v12218_v57 = vcombine.low %v12212_v24, %v12213_v9  ;;  %v11077_v61 = vmul.f32 0.00390625, %v3117_v44  ;;  %v3276_v46 = vmul.f32 %v11053_v58, %v11053_v58  ;;  %v3429_v42 = vadd.f32 %v10679_v35, %v3386_v50  ;;  %v12226_v24 = vld [vmem:[#allocation72_spill] sm:$0xff]  ;;  %v3213_v44 = vpop.xlane.xlu1 %3212 }
 0x76c   : > { %4509 = vmatpush1.bf16.msra.mxu0 %v12217_v29  ;;  %v3431_v34 = vadd.f32 %v10679_v35, %v3388_v8  ;;  %8071 = vrsqrt.f32 %v3307_v33  ;;  %v3228_v52 = vmul.f32 0.00390625, %v3210_v31  ;;  %v12221_v20 = vcombine.high %v12219_v21, %v12220_v23  ;;  %v11100_v33 = vld [vmem:[%s9177_s18 + $0x290] sm:$0xff] }
 0x76d   : > { %4622 = vmatpush1.bf16.msra.mxu1 %v12218_v57  ;;  %v12224_v10 = vcombine.high %v12222_v17, %v12223_v6  ;;  %v3428_v54 = vadd.f32 %v10676_v40, %v3385_v19  ;;  %v3430_v18 = vadd.f32 %v10676_v40, %v3387_v49  ;;  %v3252_v50 = vsub.f32 %v12225_v2, %v10966_v53  ;;  %v11103_v29 = vld [vmem:[%s9177_s18 + $0x2b0] sm:$0xff]  ;;  %v8068_v57 = vpop.eup %8067 }
 0x76e   : > { %4510 = vmatprep.subr.bf16.mxu0 %v12221_v20  ;;  %v3253_v9 = vsub.f32 %v12226_v24, %v10966_v53  ;;  %v3277_v3 = vmul.f32 %v11077_v61, %v11077_v61  ;;  %v11097_v8 = vpack.c.bf16 %v3431_v34, %v3429_v42  ;;  %v3292_v19 = vsub.f32 %v3228_v52, %v3276_v46  ;;  %v12229_v52 = vld [vmem:[#allocation96_spill] sm:$0xff] }
 0x76f   : > { %4623 = vmatprep.subr.bf16.mxu1 %v12224_v10  ;;  %v3229_v31 = vmul.f32 0.00390625, %v3213_v44  ;;  %v11105_v49 = vpack.c.bf16 %v3430_v18, %v3428_v54  ;;  %v3347_v20 = vmul.f32 %v8066_v7, %v3251_v39  ;;  %v12227_v10 = vcombine.low %v12219_v21, %v12220_v23  ;;  %v12230_v21 = vld [vmem:[#allocation97_spill] sm:$0xff]  ;;  %v3543_v54 = vld [vmem:[%s9177_s18 + $0x298] sm:$0xff] }
 0x770   : > { %v12228_v53 = vcombine.low %v12222_v17, %v12223_v6  ;;  %v3349_v42 = vmul.f32 %v8068_v57, %v3253_v9  ;;  %v3346_v34 = vmul.f32 %v8066_v7, %v3250_v11  ;;  %v3348_v4 = vmul.f32 %v8068_v57, %v3252_v50  ;;  %4342 = vmatprep.mubr.bf16.mxu0 %v11097_v8  ;;  %v3547_v18 = vld [vmem:[%s9177_s18 + $0x2b8] sm:$0xff] }
 0x771   : > { %4511 = vmatpush1.bf16.msra.mxu0 %v12227_v10  ;;  %v3308_v24 = vadd.f32 1e-05, %v3292_v19  ;;  %v3293_v2 = vsub.f32 %v3229_v31, %v3277_v3  ;;  %4455 = vmatprep.mubr.bf16.mxu1 %v11097_v8  ;;  %v3390_v39 = vmul.f32 %v10664_v41, %v3347_v20  ;;  %v6788_v46 = vcombine.high %v11100_v33, %v11103_v29  ;;  %v12233_v50 = vld [vmem:[#allocation75_spill] sm:$0xff]  ;;  %v12234_v3 = vld [vmem:[#allocation74_spill] sm:$0xff] }
 0x772   : > { %4624 = vmatpush1.bf16.msra.mxu1 %v12228_v53  ;;  %v12231_v23 = vcombine.high %v12229_v52, %v12230_v21  ;;  %v12232_v17 = vcombine.high %v10804_v25, %v10807_v1  ;;  %v3392_v11 = vmul.f32 %v10664_v41, %v3349_v42  ;;  %v3389_v7 = vmul.f32 %v10650_v45, %v3346_v34  ;;  %v11148_v20 = vld [vmem:[%s9177_s18 + $0x2f0] sm:$0xff] }
 0x773   : > { %v3391_v6 = vmul.f32 %v10650_v45, %v3348_v4  ;;  %v3254_v9 = vsub.f32 %v12233_v50, %v10995_v51  ;;  %v3255_v44 = vsub.f32 %v12234_v3, %v10995_v51  ;;  %8073 = vrsqrt.f32 %v3308_v24  ;;  %4343 = vmatmul.mubr.bf16.gmra.mrb[32].mxu0 %v11105_v49  ;;  %4456 = vmatmul.mubr.bf16.gmra.mrb[160].mxu1 %v11105_v49  ;;  %v11145_v24 = vld [vmem:[%s9177_s18 + $0x2d0] sm:$0xff] }
 0x774   : > { %4512 = vmatprep.subr.bf16.mxu0 %v12231_v23  ;;  %4625 = vmatprep.subr.bf16.mxu1 %v12232_v17  ;;  %v3309_v57 = vadd.f32 1e-05, %v3293_v2  ;;  %v12235_v19 = vcombine.low %v12229_v52, %v12230_v21  ;;  %v12236_v4 = vcombine.low %v10804_v25, %v10807_v1  ;;  %v3433_v31 = vadd.f32 %v10679_v35, %v3390_v39  ;;  %v8070_v10 = vpop.eup %8069  ;;  %v12237_v53 = vld [vmem:[#allocation77_spill] sm:$0xff]  ;;  %v12238_v34 = vld [vmem:[#allocation98_spill] sm:$0xff]  ;;  %v12239_v25 = vld [vmem:[#allocation99_spill] sm:$0xff] }
 0x775   : > { %v3435_v51 = vadd.f32 %v10679_v35, %v3392_v11  ;;  %v3434_v2 = vadd.f32 %v10676_v40, %v3391_v6  ;;  %v3256_v42 = vsub.f32 %v12237_v53, %v11021_v5  ;;  %v12240_v1 = vcombine.high %v12238_v34, %v12239_v25  ;;  %v12242_v23 = vld [vmem:[#allocation76_spill] sm:$0xff]  ;;  %v3551_v6 = vld [vmem:[%s9177_s18 + $0x2d8] sm:$0xff] }
 0x776   : > { %4513 = vmatpush1.bf16.msra.mxu0 %v12235_v19  ;;  %4626 = vmatpush1.bf16.msra.mxu1 %v12236_v4  ;;  %8075 = vrsqrt.f32 %v3309_v57  ;;  %v12241_v39 = vcombine.high %v10848_v60, %v10851_v14  ;;  %v3432_v52 = vadd.f32 %v10676_v40, %v3389_v7  ;;  %v6790_v21 = vcombine.high %v3543_v54, %v3547_v18  ;;  %v3555_v57 = vld [vmem:[%s9177_s18 + $0x2f8] sm:$0xff]  ;;  %v8072_v53 = vpop.eup %8071 }
 0x777   : > { %4514 = vmatprep.subr.bf16.mxu0 %v12240_v1  ;;  %v3257_v17 = vsub.f32 %v12242_v23, %v11021_v5  ;;  %v11161_v11 = vpack.c.bf16 %v3435_v51, %v3433_v31  ;;  %v3351_v19 = vmul.f32 %v8070_v10, %v3255_v44  ;;  %v3350_v4 = vmul.f32 %v8070_v10, %v3254_v9 }
 0x778   : > { %4627 = vmatprep.subr.bf16.mxu1 %v12241_v39  ;;  %v11165_v1 = vpack.c.bf16 %v3434_v2, %v3432_v52  ;;  %v6787_v39 = vcombine.low %v11100_v33, %v11103_v29  ;;  %v6789_v3 = vcombine.low %v3543_v54, %v3547_v18  ;;  %v6795_v7 = vcombine.low %v11145_v24, %v11148_v20  ;;  %v11179_v2 = vld [vmem:[%s9177_s18 + $0x310] sm:$0xff] }
 0x779   : > { %v12243_v5 = vcombine.low %v12238_v34, %v12239_v25  ;;  %v12244_v31 = vcombine.low %v10848_v60, %v10851_v14  ;;  %v3353_v9 = vmul.f32 %v8072_v53, %v3257_v17  ;;  %v3394_v44 = vmul.f32 %v10664_v41, %v3351_v19  ;;  %v11182_v33 = vld [vmem:[%s9177_s18 + $0x330] sm:$0xff]  ;;  %4352 = vmatprep.mubr.bf16.mxu0 %v11161_v11  ;;  %v12245_v34 = vld [vmem:[#allocation79_spill] sm:$0xff] }
 0x77a   : > { %v3352_v51 = vmul.f32 %v8072_v53, %v3256_v42  ;;  %4465 = vmatprep.mubr.bf16.mxu1 %v11161_v11  ;;  %v6796_v29 = vcombine.high %v11145_v24, %v11148_v20  ;;  %v6798_v54 = vcombine.high %v3551_v6, %v3555_v57  ;;  %v3393_v14 = vmul.f32 %v10650_v45, %v3350_v4  ;;  %v3559_v53 = vld [vmem:[%s9177_s18 + $0x318] sm:$0xff] }
 0x77b   : > { %4515 = vmatpush1.bf16.msra.mxu0 %v12243_v5  ;;  %4628 = vmatpush1.bf16.msra.mxu1 %v12244_v31  ;;  %v6797_v60 = vcombine.low %v3551_v6, %v3555_v57  ;;  %v3396_v18 = vmul.f32 %v10664_v41, %v3353_v9  ;;  %v3563_v42 = vld [vmem:[%s9177_s18 + $0x338] sm:$0xff]  ;;  %v3258_v25 = vsub.f32 %v12245_v34, %v11053_v58  ;;  %v3566_v5 = vld [vmem:[%s9177_s18 + $0x350] sm:$0xff] }
 0x77c   : > { %4516 = vmatprep.subr.bf16.mxu0 %v6788_v46  ;;  %4629 = vmatprep.subr.bf16.mxu1 %v6790_v21  ;;  %v3395_v10 = vmul.f32 %v10650_v45, %v3352_v51  ;;  %v12246_v52 = vld [vmem:[#allocation78_spill] sm:$0xff]  ;;  %v6804_v46 = vcombine.high %v11179_v2, %v11182_v33  ;;  %v3437_v24 = vadd.f32 %v10679_v35, %v3394_v44 }
 0x77d   : > { %v3259_v17 = vsub.f32 %v12246_v52, %v11053_v58  ;;  %4353 = vmatmul.mubr.bf16.gmra.mrb[36].mxu0 %v11165_v1  ;;  %4466 = vmatmul.mubr.bf16.gmra.mrb[164].mxu1 %v11165_v1  ;;  %v3439_v20 = vadd.f32 %v10679_v35, %v3396_v18  ;;  %v8074_v6 = vpop.eup %8073  ;;  %v12247_v58 = vld [vmem:[#allocation81_spill] sm:$0xff]  ;;  %v3436_v19 = vadd.f32 %v10676_v40, %v3393_v14  ;;  %v3567_v44 = vld [vmem:[%s9177_s18 + $0x358] sm:$0xff] }
 0x77e   : > { %v3438_v21 = vadd.f32 %v10676_v40, %v3395_v10  ;;  %v3260_v57 = vsub.f32 %v12247_v58, %v11077_v61  ;;  %v6806_v4 = vcombine.high %v3559_v53, %v3563_v42  ;;  %v3570_v9 = vld [vmem:[%s9177_s18 + $0x370] sm:$0xff]  ;;  %v3571_v51 = vld [vmem:[%s9177_s18 + $0x378] sm:$0xff]  ;;  %v3354_v10 = vmul.f32 %v8074_v6, %v3258_v25 }
 0x77f   : > { %4517 = vmatpush1.bf16.msra.mxu0 %v6787_v39  ;;  %4630 = vmatpush1.bf16.msra.mxu1 %v6789_v3  ;;  %v12248_v39 = vld [vmem:[#allocation80_spill] sm:$0xff]  ;;  %v11210_v3 = vpack.c.bf16 %v3439_v20, %v3437_v24  ;;  %v3355_v18 = vmul.f32 %v8074_v6, %v3259_v17  ;;  %v6812_v25 = vcombine.high %v3566_v5, %v3570_v9 }
 0x780   : > { %4518 = vmatprep.subr.bf16.mxu0 %v6796_v29  ;;  %4631 = vmatprep.subr.bf16.mxu1 %v6798_v54  ;;  %v3261_v31 = vsub.f32 %v12248_v39, %v11077_v61  ;;  %v8076_v52 = vpop.eup %8075  ;;  %v11215_v34 = vpack.c.bf16 %v3438_v21, %v3436_v19  ;;  %v6803_v29 = vcombine.low %v11179_v2, %v11182_v33  ;;  %v3574_v33 = vld [vmem:[%s9177_s18 + $0x390] sm:$0xff]  ;;  %v3579_v21 = vld [vmem:[%s9177_s18 + $0x3b8] sm:$0xff] }
 0x781   : > { %v6805_v54 = vcombine.low %v3559_v53, %v3563_v42  ;;  %v3398_v61 = vmul.f32 %v10664_v41, %v3355_v18  ;;  %v3356_v24 = vmul.f32 %v8076_v52, %v3260_v57  ;;  %4362 = vmatprep.mubr.bf16.mxu0 %v11210_v3  ;;  %4475 = vmatprep.mubr.bf16.mxu1 %v11210_v3  ;;  %v3578_v42 = vld [vmem:[%s9177_s18 + $0x3b0] sm:$0xff] }
 0x782   : > { %v3357_v14 = vmul.f32 %v8076_v52, %v3261_v31  ;;  %v6814_v17 = vcombine.high %v3567_v44, %v3571_v51  ;;  %v3397_v20 = vmul.f32 %v10650_v45, %v3354_v10  ;;  %v6813_v53 = vcombine.low %v3567_v44, %v3571_v51  ;;  %v3575_v52 = vld [vmem:[%s9177_s18 + $0x398] sm:$0xff] }
 0x783   : > { %4519 = vmatpush1.bf16.msra.mxu0 %v6795_v7  ;;  %4632 = vmatpush1.bf16.msra.mxu1 %v6797_v60  ;;  %v3399_v2 = vmul.f32 %v10650_v45, %v3356_v24  ;;  %v6811_v60 = vcombine.low %v3566_v5, %v3570_v9  ;;  %v6820_v19 = vcombine.high %v3574_v33, %v3578_v42  ;;  %v3582_v5 = vld [vmem:[%s9177_s18 + $0x3d0] sm:$0xff]  ;;  %v3583_v44 = vld [vmem:[%s9177_s18 + $0x3d8] sm:$0xff]  ;;  %v7698_v24 = vld [vmem:[%s9185_s15 + $0x14] ss:$8 sps:$4 sm:$0xff]  }
 0x784   : > { %4520 = vmatprep.subr.bf16.mxu0 %v6804_v46  ;;  %4633 = vmatprep.subr.bf16.mxu1 %v6806_v4  ;;  %v3400_v7 = vmul.f32 %v10664_v41, %v3357_v14  ;;  %v3441_v41 = vadd.f32 %v10679_v35, %v3398_v61  ;;  %v3440_v6 = vadd.f32 %v10676_v40, %v3397_v20  ;;  %v3586_v9 = vld [vmem:[%s9177_s18 + $0x3f0] sm:$0xff]  ;;  %v3587_v51 = vld [vmem:[%s9177_s18 + $0x3f8] sm:$0xff]  ;;  %v7704_v20 = vld [vmem:[%s9185_s15 + $0x34] ss:$8 sps:$4 sm:$0xff]   ;;  %s12252_s18 = sld [smem:[#allocation42_spill]] }
 0x785   : > { %4363 = vmatmul.mubr.bf16.gmra.mrb[40].mxu0 %v11215_v34  ;;  %4476 = vmatmul.mubr.bf16.gmra.mrb[168].mxu1 %v11215_v34  ;;  %v3442_v46 = vadd.f32 %v10676_v40, %v3399_v2  ;;  %v6822_v4 = vcombine.high %v3575_v52, %v3579_v21  ;;  %v6819_v18 = vcombine.low %v3574_v33, %v3578_v42  ;;  %v7695_v14 = vld [vmem:[%s9185_s15 + $0x4] ss:$8 sps:$4 sm:$0xff]   ;;  %v7693_v61 = vld [vmem:[%s9185_s15] ss:$8 sps:$4 sm:$0xff]   ;;  %v7710_v2 = vld [vmem:[%s9185_s15 + $0x54] ss:$8 sps:$4 sm:$0xff]  }
 0x786   : > { %v3443_v45 = vadd.f32 %v10679_v35, %v3400_v7  ;;  %v6821_v35 = vcombine.low %v3575_v52, %v3579_v21  ;;  %v6828_v40 = vcombine.high %v3582_v5, %v3586_v9  ;;  %v6830_v10 = vcombine.high %v3583_v44, %v3587_v51  ;;  %v7705_v7 = vld [vmem:[%s9185_s15 + $0x40] ss:$8 sps:$4 sm:$0xff]   ;;  %v7722_v42 = vld [vmem:[%s9185_s15 + $0x94] ss:$8 sps:$4 sm:$0xff]  }
 0x787   : > { %4521 = vmatpush1.bf16.msra.mxu0 %v6803_v29  ;;  %4634 = vmatpush1.bf16.msra.mxu1 %v6805_v54  ;;  %v11238_v31 = vpack.c.bf16 %v3442_v46, %v3440_v6  ;;  %v6827_v29 = vcombine.low %v3582_v5, %v3586_v9  ;;  %v6829_v54 = vcombine.low %v3583_v44, %v3587_v51  ;;  %v7711_v33 = vld [vmem:[%s9185_s15 + $0x60] ss:$8 sps:$4 sm:$0xff]   ;;  %v7728_v21 = vld [vmem:[%s9185_s15 + $0xb4] ss:$8 sps:$4 sm:$0xff]  }
 0x788   : > { %4522 = vmatprep.subr.bf16.mxu0 %v6812_v25  ;;  %4635 = vmatprep.subr.bf16.mxu1 %v6814_v17  ;;  %v11235_v57 = vpack.c.bf16 %v3443_v45, %v3441_v41  ;;  %v7701_v25 = vld [vmem:[%s9185_s15 + $0x24] ss:$8 sps:$4 sm:$0xff]   ;;  %v7699_v17 = vld [vmem:[%s9185_s15 + $0x20] ss:$8 sps:$4 sm:$0xff]   ;;  %v7734_v45 = vld [vmem:[%s9185_s15 + $0xd4] ss:$8 sps:$4 sm:$0xff]  }
 0x789   : > { %v7723_v52 = vld [vmem:[%s9185_s15 + $0xa0] ss:$8 sps:$4 sm:$0xff]   ;;  %v7740_v6 = vld [vmem:[%s9185_s15 + $0xf4] ss:$8 sps:$4 sm:$0xff]  }
 0x78a   : > { %4372 = vmatprep.mubr.bf16.mxu0 %v11235_v57  ;;  %4485 = vmatprep.mubr.bf16.mxu1 %v11235_v57  ;;  %v7729_v41 = vld [vmem:[%s9185_s15 + $0xc0] ss:$8 sps:$4 sm:$0xff]   ;;  %v11314_v5 = vld [vmem:[%s9183_s25] sm:$0xff]  ;;  %s12253_s25 = sld [smem:[#allocation41_spill]]  ;;  %s6964_s0 = sshll.u32 %s12252_s18, 4 }
 0x78b   : > { %4523 = vmatpush1.bf16.msra.mxu0 %v6811_v60  ;;  %4636 = vmatpush1.bf16.msra.mxu1 %v6813_v53  ;;  %v7716_v60 = vld [vmem:[%s9185_s15 + $0x74] ss:$8 sps:$4 sm:$0xff]   ;;  %v7717_v53 = vld [vmem:[%s9185_s15 + $0x80] ss:$8 sps:$4 sm:$0xff]  }
 0x78c   : > { %4524 = vmatprep.subr.bf16.mxu0 %v6820_v19  ;;  %4637 = vmatprep.subr.bf16.mxu1 %v6822_v4  ;;  %v7735_v46 = vld [vmem:[%s9185_s15 + $0xe0] ss:$8 sps:$4 sm:$0xff]   ;;  %v7743_v19 = vld [vmem:[%s9185_s15 + $0x104] ss:$8 sps:$4 sm:$0xff]   ;;  %v12250_v44 = vld [vmem:[#allocation56_spill] sm:$0xff] }
 0x78d   : > { %4373 = vmatmul.mubr.bf16.gmra.mrb[44].mxu0 %v11238_v31  ;;  %4486 = vmatmul.mubr.bf16.gmra.mrb[172].mxu1 %v11238_v31  ;;  %v11319_v51 = vrot.slane %v11314_v5, %v12250_v44 }
 0x78e   : > { %4528 = vmatprep.mubr.bf16.mxu0 %v10883_v62  ;;  %4641 = vmatprep.mubr.bf16.mxu1 %v10883_v62  ;;  %v7696_v62 = vld [vmem:[%s9185_s15 + $0x10] ss:$8 sps:$4 sm:$0xff]  }
 0x78f   : > { %4525 = vmatpush1.bf16.msra.mxu0 %v6819_v18  ;;  %4638 = vmatpush1.bf16.msra.mxu1 %v6821_v35 }
 0x790   : > { %4526 = vmatprep.subr.bf16.mxu0 %v6828_v40  ;;  %4639 = vmatprep.subr.bf16.mxu1 %v6830_v10  ;;  %s6965_s27 = sshll.u32 %s12253_s25, 5 }
 0x791   : > { %s6245_s10 = sadd.s32 %s6965_s27, %s6964_s0 }
 0x792   : > { %s6966_s30 = sshll.u32 %s6245_s10, 6 }
 0x793   : > { %4527 = vmatpush1.bf16.msra.mxu0 %v6827_v29  ;;  %4640 = vmatpush1.bf16.msra.mxu1 %v6829_v54  ;;  %s11720_s16 = scalar_lea.hbm %s12256_s14, %s6966_s30 }
 0x794   : > { %5694 = vmatprep.subr.bf16.mxu0 %v7695_v14 }
 0x796   : > { %4529 = vmatmul.mubr.bf16.vlgmr.msra.gmra.mrb[48].mxu0 %v10885_v38  ;;  %4642 = vmatmul.mubr.bf16.vlgmr.msra.gmra.mrb[176].mxu1 %v10885_v38  ;;  %v7702_v38 = vld [vmem:[%s9185_s15 + $0x30] ss:$8 sps:$4 sm:$0xff]  }
 0x797   : > { %4538 = vmatprep.mubr.bf16.mxu0 %v10933_v15  ;;  %4651 = vmatprep.mubr.bf16.mxu1 %v10933_v15  ;;  %v7707_v15 = vld [vmem:[%s9185_s15 + $0x44] ss:$8 sps:$4 sm:$0xff]  }
 0x798   : > { %5695 = vmatpush1.bf16.msra.mxu0 %v7693_v61 }
 0x799   : > { %5696 = vmatprep.subr.bf16.mxu0 %v7698_v24 }
 0x79c   : > { %5697 = vmatpush1.bf16.msra.mxu0 %v7696_v62 }
 0x79d   : > { %5698 = vmatprep.subr.bf16.mxu0 %v7701_v25 }
 0x79e   : > { %4539 = vmatmul.mubr.bf16.gmra.mrb[52].mxu0 %v10935_v0  ;;  %4652 = vmatmul.mubr.bf16.gmra.mrb[180].mxu1 %v10935_v0  ;;  %v7708_v0 = vld [vmem:[%s9185_s15 + $0x50] ss:$8 sps:$4 sm:$0xff]  }
 0x79f   : > { %4548 = vmatprep.mubr.bf16.mxu0 %v10983_v37  ;;  %4661 = vmatprep.mubr.bf16.mxu1 %v10983_v37  ;;  %v7713_v37 = vld [vmem:[%s9185_s15 + $0x64] ss:$8 sps:$4 sm:$0xff]  }
 0x7a0   : > { %5699 = vmatpush1.bf16.msra.mxu0 %v7699_v17 }
 0x7a1   : > { %5700 = vmatprep.subr.bf16.mxu0 %v7704_v20 }
 0x7a4   : > { %5701 = vmatpush1.bf16.msra.mxu0 %v7702_v38 }
 0x7a5   : > { %5702 = vmatprep.subr.bf16.mxu0 %v7707_v15 }
 0x7a6   : > { %4549 = vmatmul.mubr.bf16.gmra.mrb[56].mxu0 %v10997_v56  ;;  %4662 = vmatmul.mubr.bf16.gmra.mrb[184].mxu1 %v10997_v56  ;;  %v7714_v56 = vld [vmem:[%s9185_s15 + $0x70] ss:$8 sps:$4 sm:$0xff]  }
 0x7a7   : > { %4558 = vmatprep.mubr.bf16.mxu0 %v11041_v16  ;;  %4671 = vmatprep.mubr.bf16.mxu1 %v11041_v16  ;;  %v7719_v16 = vld [vmem:[%s9185_s15 + $0x84] ss:$8 sps:$4 sm:$0xff]  }
 0x7a8   : > { %5703 = vmatpush1.bf16.msra.mxu0 %v7705_v7 }
 0x7a9   : > { %5704 = vmatprep.subr.bf16.mxu0 %v7710_v2 }
 0x7ac   : > { %5705 = vmatpush1.bf16.msra.mxu0 %v7708_v0 }
 0x7ad   : > { %5706 = vmatprep.subr.bf16.mxu0 %v7713_v37 }
 0x7ae   : > { %4559 = vmatmul.mubr.bf16.gmra.mrb[60].mxu0 %v11043_v32  ;;  %4672 = vmatmul.mubr.bf16.gmra.mrb[188].mxu1 %v11043_v32  ;;  %v7720_v32 = vld [vmem:[%s9185_s15 + $0x90] ss:$8 sps:$4 sm:$0xff]  }
 0x7af   : > { %4568 = vmatprep.mubr.bf16.mxu0 %v11097_v8  ;;  %4681 = vmatprep.mubr.bf16.mxu1 %v11097_v8  ;;  %v7725_v8 = vld [vmem:[%s9185_s15 + $0xa4] ss:$8 sps:$4 sm:$0xff]  }
 0x7b0   : > { %5707 = vmatpush1.bf16.msra.mxu0 %v7711_v33 }
 0x7b1   : > { %5708 = vmatprep.subr.bf16.mxu0 %v7716_v60 }
 0x7b4   : > { %5709 = vmatpush1.bf16.msra.mxu0 %v7714_v56 }
 0x7b5   : > { %5710 = vmatprep.subr.bf16.mxu0 %v7719_v16 }
 0x7b6   : > { %4569 = vmatmul.mubr.bf16.gmra.mrb[64].mxu0 %v11105_v49  ;;  %4682 = vmatmul.mubr.bf16.gmra.mrb[192].mxu1 %v11105_v49  ;;  %v7726_v49 = vld [vmem:[%s9185_s15 + $0xb0] ss:$8 sps:$4 sm:$0xff]  }
 0x7b7   : > { %4578 = vmatprep.mubr.bf16.mxu0 %v11161_v11  ;;  %4691 = vmatprep.mubr.bf16.mxu1 %v11161_v11  ;;  %v7731_v11 = vld [vmem:[%s9185_s15 + $0xc4] ss:$8 sps:$4 sm:$0xff]  }
 0x7b8   : > { %5711 = vmatpush1.bf16.msra.mxu0 %v7717_v53 }
 0x7b9   : > { %5712 = vmatprep.subr.bf16.mxu0 %v7722_v42 }
 0x7bc   : > { %5713 = vmatpush1.bf16.msra.mxu0 %v7720_v32 }
 0x7bd   : > { %5714 = vmatprep.subr.bf16.mxu0 %v7725_v8 }
 0x7be   : > { %4579 = vmatmul.mubr.bf16.gmra.mrb[68].mxu0 %v11165_v1  ;;  %4692 = vmatmul.mubr.bf16.gmra.mrb[196].mxu1 %v11165_v1  ;;  %v7732_v1 = vld [vmem:[%s9185_s15 + $0xd0] ss:$8 sps:$4 sm:$0xff]  }
 0x7bf   : > { %4588 = vmatprep.mubr.bf16.mxu0 %v11210_v3  ;;  %4701 = vmatprep.mubr.bf16.mxu1 %v11210_v3  ;;  %v7737_v3 = vld [vmem:[%s9185_s15 + $0xe4] ss:$8 sps:$4 sm:$0xff]  }
 0x7c0   : > { %5715 = vmatpush1.bf16.msra.mxu0 %v7723_v52 }
 0x7c1   : > { %5716 = vmatprep.subr.bf16.mxu0 %v7728_v21 }
 0x7c4   : > { %5717 = vmatpush1.bf16.msra.mxu0 %v7726_v49 }
 0x7c5   : > { %5718 = vmatprep.subr.bf16.mxu0 %v7731_v11 }
 0x7c6   : > { %4589 = vmatmul.mubr.bf16.gmra.mrb[72].mxu0 %v11215_v34  ;;  %4702 = vmatmul.mubr.bf16.gmra.mrb[200].mxu1 %v11215_v34  ;;  %v7738_v34 = vld [vmem:[%s9185_s15 + $0xf0] ss:$8 sps:$4 sm:$0xff]  }
 0x7c7   : > { %4598 = vmatprep.mubr.bf16.mxu0 %v11235_v57  ;;  %4711 = vmatprep.mubr.bf16.mxu1 %v11235_v57  ;;  %v12249_v57 = vld [vmem:[#allocation54_spill] sm:$0xff] }
 0x7c8   : > { %5719 = vmatpush1.bf16.msra.mxu0 %v7729_v41  ;;  %v3600_v4 = vsub.s32 2, %v12249_v57  ;;  %v3604_v9 = vsub.s32 3, %v12249_v57  ;;  %v7741_v41 = vld [vmem:[%s9185_s15 + $0x100] ss:$8 sps:$4 sm:$0xff]  }
 0x7c9   : > { %5720 = vmatprep.subr.bf16.mxu0 %v7734_v45 }
 0x7ca   : > { %v11322_v18 = vrot.slane %v11314_v5, %v3600_v4  ;;  %v11329_v40 = vrot.slane %v11314_v5, %v3604_v9 }
 0x7cc   : > { %5721 = vmatpush1.bf16.msra.mxu0 %v7732_v1 }
 0x7cd   : > { %5722 = vmatprep.subr.bf16.mxu0 %v7737_v3  ;;  %v7746_v3 = vld [vmem:[%s9185_s15 + $0x114] ss:$8 sps:$4 sm:$0xff]  }
 0x7ce   : > { %4599 = vmatmul.mubr.bf16.gmra.mrb[76].mxu0 %v11238_v31  ;;  %4712 = vmatmul.mubr.bf16.gmra.mrb[204].mxu1 %v11238_v31  ;;  %v12251_v31 = vld [vmem:[#allocation55_spill] sm:$0xff] }
 0x7cf   : > { %v11326_v35 = vrot.slane %v11314_v5, %v12251_v31 }
 0x7d0   : > { %5723 = vmatpush1.bf16.msra.mxu0 %v7735_v46 }
 0x7d1   : > { %5724 = vmatprep.subr.bf16.mxu0 %v7740_v6 }
 0x7d4   : > { %5725 = vmatpush1.bf16.msra.mxu0 %v7738_v34 }
 0x7d5   : > { %5807 = vmatprep.subr.bf16.mxu0 %v7743_v19 }
 0x81f   : > { %v4304_v10 = vpop.f32.mrb[16].mxu0  ;;  %v4417_v29 = vpop.f32.mrb[144].mxu1 }
 0x820   : > { %v4305_v54 = vadd.f32 %v4304_v10, %v11319_v51  ;;  %v4418_v14 = vadd.f32 %v4417_v29, %v11322_v18  ;;  %v4306_v61 = vpop.f32.mrb[17].mxu0  ;;  %v4419_v24 = vpop.f32.mrb[145].mxu1 }
 0x821   : > { %v4307_v62 = vadd.f32 %v4306_v61, %v11326_v35  ;;  %v4420_v25 = vadd.f32 %v4419_v24, %v11329_v40  ;;  %v4308_v17 = vpop.f32.mrb[18].mxu0  ;;  %v4421_v20 = vpop.f32.mrb[146].mxu1 }
 0x822   : > { %v4309_v38 = vadd.f32 %v4308_v17, %v11319_v51  ;;  %v4422_v15 = vadd.f32 %v4421_v20, %v11322_v18  ;;  %v4310_v7 = vpop.f32.mrb[19].mxu0  ;;  %v4423_v2 = vpop.f32.mrb[147].mxu1  ;;  %v4722_v33 = vmax.f32 %v4305_v54, 0.0  ;;  %v4724_v60 = vmax.f32 %v4418_v14, 0.0  ;;  %v7749_v20 = vld [vmem:[%s9185_s15 + $0x124] ss:$8 sps:$4 sm:$0xff]  }
 0x823   : > { %v4311_v0 = vadd.f32 %v4310_v7, %v11326_v35  ;;  %v4424_v37 = vadd.f32 %v4423_v2, %v11329_v40  ;;  %v4723_v53 = vmax.f32 %v4307_v62, 0.0  ;;  %v4725_v42 = vmax.f32 %v4420_v25, 0.0  ;;  %v7744_v62 = vld [vmem:[%s9185_s15 + $0x110] ss:$8 sps:$4 sm:$0xff]  }
 0x824   : > { %v4730_v56 = vmax.f32 %v4309_v38, 0.0  ;;  %v4732_v16 = vmax.f32 %v4422_v15, 0.0 }
 0x825   : > { %v4731_v32 = vmax.f32 %v4311_v0, 0.0  ;;  %v4733_v8 = vmax.f32 %v4424_v37, 0.0 }
 0x826   : > { %v4850_v52 = vpack.c.bf16 %v4730_v56, %v4722_v33  ;;  %v11339_v21 = vpack.c.bf16 %v4732_v16, %v4724_v60 }
 0x827   : > { %v4851_v49 = vpack.c.bf16 %v4731_v32, %v4723_v53  ;;  %v11341_v11 = vpack.c.bf16 %v4733_v8, %v4725_v42  ;;  %v7747_v32 = vld [vmem:[%s9185_s15 + $0x120] ss:$8 sps:$4 sm:$0xff]  }
 0x829   : > { %5726 = vmatprep.mubr.bf16.mxu0 %v4851_v49  ;;  %v7752_v49 = vld [vmem:[%s9185_s15 + $0x134] ss:$8 sps:$4 sm:$0xff]  }
 0x82a   : > { %v4314_v45 = vpop.f32.mrb[20].mxu0  ;;  %v4427_v1 = vpop.f32.mrb[148].mxu1  ;;  %5727 = vmatmul.mubr.bf16.vlgmr.msra.gmra.mrb[80].mxu0 %v4850_v52 }
 0x82b   : > { %v4315_v46 = vadd.f32 %v4314_v45, %v11319_v51  ;;  %v4428_v6 = vadd.f32 %v4427_v1, %v11322_v18  ;;  %v4316_v34 = vpop.f32.mrb[21].mxu0  ;;  %v4429_v19 = vpop.f32.mrb[149].mxu1  ;;  %5808 = vmatpush1.bf16.msra.mxu0 %v7741_v41 }
 0x82c   : > { %v4317_v4 = vadd.f32 %v4316_v34, %v11326_v35  ;;  %v4430_v9 = vadd.f32 %v4429_v19, %v11329_v40  ;;  %v4318_v10 = vpop.f32.mrb[22].mxu0  ;;  %v4431_v29 = vpop.f32.mrb[150].mxu1  ;;  %5809 = vmatprep.subr.bf16.mxu0 %v7746_v3 }
 0x82d   : > { %v4319_v54 = vadd.f32 %v4318_v10, %v11319_v51  ;;  %v4432_v14 = vadd.f32 %v4431_v29, %v11322_v18  ;;  %v4320_v61 = vpop.f32.mrb[23].mxu0  ;;  %v4433_v24 = vpop.f32.mrb[151].mxu1  ;;  %v4738_v38 = vmax.f32 %v4315_v46, 0.0  ;;  %v4740_v15 = vmax.f32 %v4428_v6, 0.0 }
 0x82e   : > { %v4321_v25 = vadd.f32 %v4320_v61, %v11326_v35  ;;  %v4434_v17 = vadd.f32 %v4433_v24, %v11329_v40  ;;  %v4739_v0 = vmax.f32 %v4317_v4, 0.0  ;;  %v4741_v37 = vmax.f32 %v4430_v9, 0.0  ;;  %v7755_v24 = vld [vmem:[%s9185_s15 + $0x144] ss:$8 sps:$4 sm:$0xff]  }
 0x82f   : > { %v4746_v7 = vmax.f32 %v4319_v54, 0.0  ;;  %v4748_v2 = vmax.f32 %v4432_v14, 0.0  ;;  %5810 = vmatpush1.bf16.msra.mxu0 %v7744_v62  ;;  %v7750_v54 = vld [vmem:[%s9185_s15 + $0x130] ss:$8 sps:$4 sm:$0xff]  }
 0x830   : > { %v4747_v33 = vmax.f32 %v4321_v25, 0.0  ;;  %v4749_v60 = vmax.f32 %v4434_v17, 0.0  ;;  %5811 = vmatprep.subr.bf16.mxu0 %v7749_v20 }
 0x831   : > { %v4858_v56 = vpack.c.bf16 %v4746_v7, %v4738_v38  ;;  %v11355_v16 = vpack.c.bf16 %v4748_v2, %v4740_v15 }
 0x832   : > { %v4859_v53 = vpack.c.bf16 %v4747_v33, %v4739_v0  ;;  %v11357_v42 = vpack.c.bf16 %v4749_v60, %v4741_v37 }
 0x833   : > { %v4324_v8 = vpop.f32.mrb[24].mxu0  ;;  %5812 = vmatpush1.bf16.msra.mxu0 %v7747_v32  ;;  %v7753_v32 = vld [vmem:[%s9185_s15 + $0x140] ss:$8 sps:$4 sm:$0xff]  }
 0x834   : > { %v4437_v52 = vpop.f32.mrb[152].mxu1  ;;  %v4325_v41 = vadd.f32 %v4324_v8, %v11319_v51  ;;  %v4326_v1 = vpop.f32.mrb[25].mxu0  ;;  %5736 = vmatprep.mubr.bf16.mxu0 %v4859_v53  ;;  %5813 = vmatprep.subr.bf16.mxu0 %v7752_v49 }
 0x835   : > { %v4438_v45 = vadd.f32 %v4437_v52, %v11322_v18  ;;  %v4439_v3 = vpop.f32.mrb[153].mxu1  ;;  %v4327_v46 = vadd.f32 %v4326_v1, %v11326_v35  ;;  %v4328_v34 = vpop.f32.mrb[26].mxu0  ;;  %5737 = vmatmul.mubr.bf16.gmra.mrb[84].mxu0 %v4858_v56 }
 0x836   : > { %v4440_v6 = vadd.f32 %v4439_v3, %v11329_v40  ;;  %v4441_v19 = vpop.f32.mrb[154].mxu1  ;;  %v4329_v4 = vadd.f32 %v4328_v34, %v11319_v51  ;;  %v4330_v10 = vpop.f32.mrb[27].mxu0  ;;  %v4754_v62 = vmax.f32 %v4325_v41, 0.0 }
 0x837   : > { %v4442_v9 = vadd.f32 %v4441_v19, %v11322_v18  ;;  %v4443_v29 = vpop.f32.mrb[155].mxu1  ;;  %v4331_v14 = vadd.f32 %v4330_v10, %v11326_v35  ;;  %v4756_v25 = vmax.f32 %v4438_v45, 0.0  ;;  %v4755_v38 = vmax.f32 %v4327_v46, 0.0  ;;  %5814 = vmatpush1.bf16.msra.mxu0 %v7750_v54  ;;  %v7758_v45 = vld [vmem:[%s9185_s15 + $0x154] ss:$8 sps:$4 sm:$0xff]  }
 0x838   : > { %v4444_v61 = vadd.f32 %v4443_v29, %v11329_v40  ;;  %v4762_v17 = vmax.f32 %v4329_v4, 0.0  ;;  %v4757_v15 = vmax.f32 %v4440_v6, 0.0  ;;  %5815 = vmatprep.subr.bf16.mxu0 %v7755_v24  ;;  %v7756_v54 = vld [vmem:[%s9185_s15 + $0x150] ss:$8 sps:$4 sm:$0xff]  }
 0x839   : > { %v4764_v20 = vmax.f32 %v4442_v9, 0.0  ;;  %v4763_v7 = vmax.f32 %v4331_v14, 0.0 }
 0x83a   : > { %v4765_v2 = vmax.f32 %v4444_v61, 0.0  ;;  %v4866_v0 = vpack.c.bf16 %v4762_v17, %v4754_v62 }
 0x83b   : > { %v11371_v37 = vpack.c.bf16 %v4764_v20, %v4756_v25  ;;  %v4867_v33 = vpack.c.bf16 %v4763_v7, %v4755_v38  ;;  %5816 = vmatpush1.bf16.msra.mxu0 %v7753_v32  ;;  %v7761_v25 = vld [vmem:[%s9185_s15 + $0x164] ss:$8 sps:$4 sm:$0xff]   ;;  %v7759_v32 = vld [vmem:[%s9185_s15 + $0x160] ss:$8 sps:$4 sm:$0xff]  }
 0x83c   : > { %v11373_v60 = vpack.c.bf16 %v4765_v2, %v4757_v15  ;;  %v4334_v56 = vpop.f32.mrb[28].mxu0  ;;  %5817 = vmatprep.subr.bf16.mxu0 %v7758_v45  ;;  %v7764_v45 = vld [vmem:[%s9185_s15 + $0x174] ss:$8 sps:$4 sm:$0xff]  }
 0x83d   : > { %v4335_v8 = vadd.f32 %v4334_v56, %v11319_v51  ;;  %v4336_v49 = vpop.f32.mrb[29].mxu0  ;;  %5746 = vmatprep.mubr.bf16.mxu0 %v4867_v33 }
 0x83e   : > { %v4447_v53 = vpop.f32.mrb[156].mxu1  ;;  %v4337_v1 = vadd.f32 %v4336_v49, %v11326_v35  ;;  %v4338_v46 = vpop.f32.mrb[30].mxu0  ;;  %5747 = vmatmul.mubr.bf16.gmra.mrb[88].mxu0 %v4866_v0 }
 0x83f   : > { %v4448_v52 = vadd.f32 %v4447_v53, %v11322_v18  ;;  %v4449_v41 = vpop.f32.mrb[157].mxu1  ;;  %v4339_v34 = vadd.f32 %v4338_v46, %v11319_v51  ;;  %v4340_v4 = vpop.f32.mrb[31].mxu0  ;;  %v4770_v14 = vmax.f32 %v4335_v8, 0.0  ;;  %5818 = vmatpush1.bf16.msra.mxu0 %v7756_v54  ;;  %v7762_v54 = vld [vmem:[%s9185_s15 + $0x170] ss:$8 sps:$4 sm:$0xff]  }
 0x840   : > { %v4450_v3 = vadd.f32 %v4449_v41, %v11329_v40  ;;  %v4451_v6 = vpop.f32.mrb[158].mxu1  ;;  %v4341_v10 = vadd.f32 %v4340_v4, %v11326_v35  ;;  %v4771_v17 = vmax.f32 %v4337_v1, 0.0  ;;  %5819 = vmatprep.subr.bf16.mxu0 %v7761_v25  ;;  %v7767_v25 = vld [vmem:[%s9185_s15 + $0x184] ss:$8 sps:$4 sm:$0xff]  }
 0x841   : > { %v4452_v19 = vadd.f32 %v4451_v6, %v11322_v18  ;;  %v4453_v9 = vpop.f32.mrb[159].mxu1  ;;  %v4772_v61 = vmax.f32 %v4448_v52, 0.0  ;;  %v4778_v24 = vmax.f32 %v4339_v34, 0.0 }
 0x842   : > { %v4454_v29 = vadd.f32 %v4453_v9, %v11329_v40  ;;  %v4773_v20 = vmax.f32 %v4450_v3, 0.0  ;;  %v4779_v38 = vmax.f32 %v4341_v10, 0.0 }
 0x843   : > { %v4780_v62 = vmax.f32 %v4452_v19, 0.0  ;;  %v4874_v7 = vpack.c.bf16 %v4778_v24, %v4770_v14  ;;  %5820 = vmatpush1.bf16.msra.mxu0 %v7759_v32 }
 0x844   : > { %v4781_v15 = vmax.f32 %v4454_v29, 0.0  ;;  %v4875_v0 = vpack.c.bf16 %v4779_v38, %v4771_v17  ;;  %5821 = vmatprep.subr.bf16.mxu0 %v7764_v45 }
 0x845   : > { %v11387_v2 = vpack.c.bf16 %v4780_v62, %v4772_v61 }
 0x846   : > { %v11389_v33 = vpack.c.bf16 %v4781_v15, %v4773_v20  ;;  %v4344_v56 = vpop.f32.mrb[32].mxu0  ;;  %v4457_v53 = vpop.f32.mrb[160].mxu1  ;;  %5756 = vmatprep.mubr.bf16.mxu0 %v4875_v0 }
 0x847   : > { %v4345_v8 = vadd.f32 %v4344_v56, %v11319_v51  ;;  %v4458_v52 = vadd.f32 %v4457_v53, %v11322_v18  ;;  %v4346_v49 = vpop.f32.mrb[33].mxu0  ;;  %v4459_v41 = vpop.f32.mrb[161].mxu1  ;;  %5757 = vmatmul.mubr.bf16.gmra.mrb[92].mxu0 %v4874_v7 }
 0x848   : > { %v4347_v1 = vadd.f32 %v4346_v49, %v11326_v35  ;;  %v4460_v3 = vadd.f32 %v4459_v41, %v11329_v40  ;;  %v4348_v46 = vpop.f32.mrb[34].mxu0  ;;  %v4461_v6 = vpop.f32.mrb[162].mxu1  ;;  %5822 = vmatpush1.bf16.msra.mxu0 %v7762_v54 }
 0x849   : > { %v4349_v34 = vadd.f32 %v4348_v46, %v11319_v51  ;;  %v4462_v19 = vadd.f32 %v4461_v6, %v11322_v18  ;;  %v4350_v4 = vpop.f32.mrb[35].mxu0  ;;  %v4463_v9 = vpop.f32.mrb[163].mxu1  ;;  %v4786_v14 = vmax.f32 %v4345_v8, 0.0  ;;  %v4788_v61 = vmax.f32 %v4458_v52, 0.0  ;;  %v7765_v8 = vld [vmem:[%s9185_s15 + $0x180] ss:$8 sps:$4 sm:$0xff]   ;;  %5823 = vmatprep.subr.bf16.mxu0 %v7767_v25 }
 0x84a   : > { %v4351_v10 = vadd.f32 %v4350_v4, %v11326_v35  ;;  %v4464_v29 = vadd.f32 %v4463_v9, %v11329_v40  ;;  %v4787_v17 = vmax.f32 %v4347_v1, 0.0  ;;  %v4789_v20 = vmax.f32 %v4460_v3, 0.0  ;;  %v7770_v3 = vld [vmem:[%s9185_s15 + $0x194] ss:$8 sps:$4 sm:$0xff]  }
 0x84b   : > { %v4794_v24 = vmax.f32 %v4349_v34, 0.0  ;;  %v4796_v62 = vmax.f32 %v4462_v19, 0.0 }
 0x84c   : > { %v4795_v38 = vmax.f32 %v4351_v10, 0.0  ;;  %v4797_v15 = vmax.f32 %v4464_v29, 0.0  ;;  %5824 = vmatpush1.bf16.msra.mxu0 %v7765_v8 }
 0x84d   : > { %v4882_v0 = vpack.c.bf16 %v4794_v24, %v4786_v14  ;;  %v11403_v7 = vpack.c.bf16 %v4796_v62, %v4788_v61  ;;  %v7768_v61 = vld [vmem:[%s9185_s15 + $0x190] ss:$8 sps:$4 sm:$0xff]   ;;  %5825 = vmatprep.subr.bf16.mxu0 %v7770_v3 }
 0x84e   : > { %v4883_v56 = vpack.c.bf16 %v4795_v38, %v4787_v17  ;;  %v11405_v53 = vpack.c.bf16 %v4797_v15, %v4789_v20  ;;  %v7773_v20 = vld [vmem:[%s9185_s15 + $0x1a4] ss:$8 sps:$4 sm:$0xff]  }
 0x850   : > { %v4354_v32 = vpop.f32.mrb[36].mxu0  ;;  %v4467_v49 = vpop.f32.mrb[164].mxu1  ;;  %5766 = vmatprep.mubr.bf16.mxu0 %v4883_v56  ;;  %5826 = vmatpush1.bf16.msra.mxu0 %v7768_v61 }
 0x851   : > { %v4355_v52 = vadd.f32 %v4354_v32, %v11319_v51  ;;  %v4468_v41 = vadd.f32 %v4467_v49, %v11322_v18  ;;  %v4356_v45 = vpop.f32.mrb[37].mxu0  ;;  %v4469_v1 = vpop.f32.mrb[165].mxu1  ;;  %5767 = vmatmul.mubr.bf16.gmra.mrb[96].mxu0 %v4882_v0  ;;  %5827 = vmatprep.subr.bf16.mxu0 %v7773_v20 }
 0x852   : > { %v4357_v46 = vadd.f32 %v4356_v45, %v11326_v35  ;;  %v4470_v6 = vadd.f32 %v4469_v1, %v11329_v40  ;;  %v4358_v34 = vpop.f32.mrb[38].mxu0  ;;  %v4471_v19 = vpop.f32.mrb[166].mxu1 }
 0x853   : > { %v4359_v4 = vadd.f32 %v4358_v34, %v11319_v51  ;;  %v4472_v9 = vadd.f32 %v4471_v19, %v11322_v18  ;;  %v4360_v10 = vpop.f32.mrb[39].mxu0  ;;  %v4473_v29 = vpop.f32.mrb[167].mxu1  ;;  %v4802_v24 = vmax.f32 %v4355_v52, 0.0  ;;  %v4804_v62 = vmax.f32 %v4468_v41, 0.0  ;;  %v7771_v52 = vld [vmem:[%s9185_s15 + $0x1a0] ss:$8 sps:$4 sm:$0xff]  }
 0x854   : > { %v4361_v54 = vadd.f32 %v4360_v10, %v11326_v35  ;;  %v4474_v14 = vadd.f32 %v4473_v29, %v11329_v40  ;;  %v4803_v38 = vmax.f32 %v4357_v46, 0.0  ;;  %v4805_v15 = vmax.f32 %v4470_v6, 0.0  ;;  %v7776_v6 = vld [vmem:[%s9185_s15 + $0x1b4] ss:$8 sps:$4 sm:$0xff]   ;;  %5828 = vmatpush1.bf16.msra.mxu0 %v7771_v52 }
 0x855   : > { %v4810_v25 = vmax.f32 %v4359_v4, 0.0  ;;  %v4812_v17 = vmax.f32 %v4472_v9, 0.0  ;;  %5829 = vmatprep.subr.bf16.mxu0 %v7776_v6  ;;  %v3616_v6 = vsub.s32 6, %v12249_v57 }
 0x856   : > { %v4811_v56 = vmax.f32 %v4361_v54, 0.0  ;;  %v4813_v32 = vmax.f32 %v4474_v14, 0.0 }
 0x857   : > { %v4890_v49 = vpack.c.bf16 %v4810_v25, %v4802_v24  ;;  %v11419_v0 = vpack.c.bf16 %v4812_v17, %v4804_v62  ;;  %v7774_v17 = vld [vmem:[%s9185_s15 + $0x1b0] ss:$8 sps:$4 sm:$0xff]  }
 0x858   : > { %v4891_v45 = vpack.c.bf16 %v4811_v56, %v4803_v38  ;;  %v11421_v1 = vpack.c.bf16 %v4813_v32, %v4805_v15  ;;  %v4364_v8 = vpop.f32.mrb[40].mxu0  ;;  %v4477_v34 = vpop.f32.mrb[168].mxu1  ;;  %v7779_v32 = vld [vmem:[%s9185_s15 + $0x1c4] ss:$8 sps:$4 sm:$0xff]   ;;  %5830 = vmatpush1.bf16.msra.mxu0 %v7774_v17 }
 0x859   : > { %v4365_v41 = vadd.f32 %v4364_v8, %v11319_v51  ;;  %v4478_v3 = vadd.f32 %v4477_v34, %v11322_v18  ;;  %v4366_v19 = vpop.f32.mrb[41].mxu0  ;;  %v4479_v46 = vpop.f32.mrb[169].mxu1  ;;  %5831 = vmatprep.subr.bf16.mxu0 %v7779_v32  ;;  %v3620_v32 = vsub.s32 7, %v12249_v57 }
 0x85a   : > { %v4367_v4 = vadd.f32 %v4366_v19, %v11326_v35  ;;  %v4480_v9 = vadd.f32 %v4479_v46, %v11329_v40  ;;  %v4368_v10 = vpop.f32.mrb[42].mxu0  ;;  %v4481_v29 = vpop.f32.mrb[170].mxu1  ;;  %5776 = vmatprep.mubr.bf16.mxu0 %v4891_v45 }
 0x85b   : > { %v4369_v54 = vadd.f32 %v4368_v10, %v11319_v51  ;;  %v4482_v14 = vadd.f32 %v4481_v29, %v11322_v18  ;;  %v4370_v61 = vpop.f32.mrb[43].mxu0  ;;  %v4483_v24 = vpop.f32.mrb[171].mxu1  ;;  %5777 = vmatmul.mubr.bf16.gmra.mrb[100].mxu0 %v4890_v49  ;;  %v4818_v20 = vmax.f32 %v4365_v41, 0.0  ;;  %v4820_v38 = vmax.f32 %v4478_v3, 0.0 }
 0x85c   : > { %v4371_v62 = vadd.f32 %v4370_v61, %v11326_v35  ;;  %v4484_v25 = vadd.f32 %v4483_v24, %v11329_v40  ;;  %v4819_v45 = vmax.f32 %v4367_v4, 0.0  ;;  %v4821_v8 = vmax.f32 %v4480_v9, 0.0 }
 0x85d   : > { %v4826_v15 = vmax.f32 %v4369_v54, 0.0  ;;  %v4828_v56 = vmax.f32 %v4482_v14, 0.0  ;;  %v3608_v10 = vsub.s32 4, %v12249_v57  ;;  %v7777_v54 = vld [vmem:[%s9185_s15 + $0x1c0] ss:$8 sps:$4 sm:$0xff]   ;;  %v3612_v4 = vsub.s32 5, %v12249_v57 }
 0x85e   : > { %v4827_v34 = vmax.f32 %v4371_v62, 0.0  ;;  %v4829_v19 = vmax.f32 %v4484_v25, 0.0  ;;  %v7782_v62 = vld [vmem:[%s9185_s15 + $0x1d4] ss:$8 sps:$4 sm:$0xff]   ;;  %5832 = vmatpush1.bf16.msra.mxu0 %v7777_v54 }
 0x85f   : > { %v4898_v46 = vpack.c.bf16 %v4826_v15, %v4818_v20  ;;  %v11435_v49 = vpack.c.bf16 %v4828_v56, %v4820_v38  ;;  %5833 = vmatprep.subr.bf16.mxu0 %v7782_v62 }
 0x860   : > { %v4899_v29 = vpack.c.bf16 %v4827_v34, %v4819_v45  ;;  %v11438_v52 = vpack.c.bf16 %v4829_v19, %v4821_v8  ;;  %v4374_v41 = vpop.f32.mrb[44].mxu0  ;;  %v4487_v3 = vpop.f32.mrb[172].mxu1  ;;  %v11451_v34 = vrot.slane %v11314_v5, %v3608_v10 }
 0x861   : > { %v4375_v9 = vadd.f32 %v4374_v41, %v11319_v51  ;;  %v4488_v14 = vadd.f32 %v4487_v3, %v11322_v18  ;;  %v4376_v61 = vpop.f32.mrb[45].mxu0  ;;  %v4489_v24 = vpop.f32.mrb[173].mxu1  ;;  %v7780_v3 = vld [vmem:[%s9185_s15 + $0x1d0] ss:$8 sps:$4 sm:$0xff]  }
 0x862   : > { %v4377_v25 = vadd.f32 %v4376_v61, %v11326_v35  ;;  %v4490_v20 = vadd.f32 %v4489_v24, %v11329_v40  ;;  %v4378_v38 = vpop.f32.mrb[46].mxu0  ;;  %v4491_v17 = vpop.f32.mrb[174].mxu1  ;;  %5786 = vmatprep.mubr.bf16.mxu0 %v4899_v29  ;;  %v11458_v29 = vrot.slane %v11314_v5, %v3616_v6  ;;  %v7785_v24 = vld [vmem:[%s9185_s15 + $0x1e4] ss:$8 sps:$4 sm:$0xff]   ;;  %v11467_v6 = vrot.slane %v11314_v5, %v3620_v32 }
 0x863   : > { %v4379_v15 = vadd.f32 %v4378_v38, %v11319_v51  ;;  %v4492_v56 = vadd.f32 %v4491_v17, %v11322_v18  ;;  %v4380_v45 = vpop.f32.mrb[47].mxu0  ;;  %v4493_v8 = vpop.f32.mrb[175].mxu1  ;;  %5787 = vmatmul.mubr.bf16.gmra.mrb[104].mxu0 %v4898_v46  ;;  %v11461_v51 = vrot.slane %v11314_v5, %v3612_v4  ;;  %v4834_v18 = vmax.f32 %v4375_v9, 0.0 }
 0x864   : > { %v4381_v19 = vadd.f32 %v4380_v45, %v11326_v35  ;;  %v4494_v41 = vadd.f32 %v4493_v8, %v11329_v40  ;;  %v4836_v61 = vmax.f32 %v4488_v14, 0.0  ;;  %v4835_v57 = vmax.f32 %v4377_v25, 0.0  ;;  %5834 = vmatpush1.bf16.msra.mxu0 %v7780_v3  ;;  %v7783_v14 = vld [vmem:[%s9185_s15 + $0x1e0] ss:$8 sps:$4 sm:$0xff]  }
 0x865   : > { %v4842_v46 = vmax.f32 %v4379_v15, 0.0  ;;  %v4844_v10 = vmax.f32 %v4492_v56, 0.0  ;;  %v4837_v35 = vmax.f32 %v4490_v20, 0.0  ;;  %5835 = vmatprep.subr.bf16.mxu0 %v7785_v24  ;;  %v7788_v20 = vld [vmem:[%s9185_s15 + $0x1f4] ss:$8 sps:$4 sm:$0xff]  }
 0x866   : > { %v4843_v38 = vmax.f32 %v4381_v19, 0.0  ;;  %v4845_v40 = vmax.f32 %v4494_v41, 0.0  ;;  %v7786_v24 = vld [vmem:[%s9185_s15 + $0x1f0] ss:$8 sps:$4 sm:$0xff]  }
 0x867   : > { %v4906_v54 = vpack.c.bf16 %v4842_v46, %v4834_v18  ;;  %v11464_v17 = vpack.c.bf16 %v4844_v10, %v4836_v61 }
 0x868   : > { %v4907_v4 = vpack.c.bf16 %v4843_v38, %v4835_v57  ;;  %v11469_v45 = vpack.c.bf16 %v4845_v40, %v4837_v35  ;;  %5836 = vmatpush1.bf16.msra.mxu0 %v7783_v14  ;;  %v7791_v40 = vld [vmem:[%s9185_s15 + $0x204] ss:$8 sps:$4 sm:$0xff]  }
 0x869   : > { %v4530_v9 = vpop.f32.mrb[48].mxu0  ;;  %v4643_v15 = vpop.f32.mrb[176].mxu1  ;;  %5837 = vmatprep.subr.bf16.mxu0 %v7788_v20 }
 0x86a   : > { %v4531_v62 = vadd.f32 %v4530_v9, %v11451_v34  ;;  %v4532_v25 = vpop.f32.mrb[49].mxu0  ;;  %v4644_v56 = vadd.f32 %v4643_v15, %v11458_v29  ;;  %v4645_v19 = vpop.f32.mrb[177].mxu1  ;;  %5796 = vmatprep.mubr.bf16.mxu0 %v4907_v4 }
 0x86b   : > { %v4533_v8 = vadd.f32 %v4532_v25, %v11461_v51  ;;  %v4534_v5 = vpop.f32.mrb[50].mxu0  ;;  %v4646_v32 = vadd.f32 %v4645_v19, %v11467_v6  ;;  %v4647_v3 = vpop.f32.mrb[178].mxu1  ;;  %5797 = vmatmul.mubr.bf16.gmra.mrb[108].mxu0 %v4906_v54 }
 0x86c   : > { %v4535_v41 = vadd.f32 %v4534_v5, %v11451_v34  ;;  %v4536_v18 = vpop.f32.mrb[51].mxu0  ;;  %v4648_v61 = vadd.f32 %v4647_v3, %v11458_v29  ;;  %v4649_v10 = vpop.f32.mrb[179].mxu1  ;;  %5839 = vmatprep.mubr.bf16.mxu0 %v11341_v11  ;;  %v4726_v57 = vmax.f32 %v4531_v62, 0.0  ;;  %v4728_v4 = vmax.f32 %v4644_v56, 0.0  ;;  %5838 = vmatpush1.bf16.msra.mxu0 %v7786_v24 }
 0x86d   : > { %v4537_v46 = vadd.f32 %v4536_v18, %v11461_v51  ;;  %v4650_v38 = vadd.f32 %v4649_v10, %v11467_v6  ;;  %v4727_v9 = vmax.f32 %v4533_v8, 0.0  ;;  %v4729_v25 = vmax.f32 %v4646_v32, 0.0  ;;  %5920 = vmatprep.subr.bf16.mxu0 %v7791_v40  ;;  %v7794_v18 = vld [vmem:[%s9185_s15 + $0x214] ss:$8 sps:$4 sm:$0xff]  }
 0x86e   : > { %v4734_v35 = vmax.f32 %v4535_v41, 0.0  ;;  %v4736_v54 = vmax.f32 %v4648_v61, 0.0  ;;  %v7789_v41 = vld [vmem:[%s9185_s15 + $0x200] ss:$8 sps:$4 sm:$0xff]  }
 0x86f   : > { %v4735_v15 = vmax.f32 %v4537_v46, 0.0  ;;  %v4737_v5 = vmax.f32 %v4650_v38, 0.0 }
 0x870   : > { %v11484_v19 = vpack.c.bf16 %v4734_v35, %v4726_v57  ;;  %v11486_v14 = vpack.c.bf16 %v4736_v54, %v4728_v4  ;;  %v7792_v54 = vld [vmem:[%s9185_s15 + $0x210] ss:$8 sps:$4 sm:$0xff]  }
 0x871   : > { %v11488_v11 = vpack.c.bf16 %v4735_v15, %v4727_v9  ;;  %v4540_v62 = vpop.f32.mrb[52].mxu0  ;;  %v11491_v3 = vpack.c.bf16 %v4737_v5, %v4729_v25  ;;  %v4653_v56 = vpop.f32.mrb[180].mxu1 }
 0x872   : > { %v4541_v20 = vadd.f32 %v4540_v62, %v11451_v34  ;;  %v4542_v8 = vpop.f32.mrb[53].mxu0  ;;  %v4654_v32 = vadd.f32 %v4653_v56, %v11458_v29  ;;  %v4655_v46 = vpop.f32.mrb[181].mxu1  ;;  %v7797_v62 = vld [vmem:[%s9185_s15 + $0x224] ss:$8 sps:$4 sm:$0xff]  }
 0x873   : > { %v4543_v61 = vadd.f32 %v4542_v8, %v11461_v51  ;;  %v4544_v10 = vpop.f32.mrb[54].mxu0  ;;  %v4656_v57 = vadd.f32 %v4655_v46, %v11467_v6  ;;  %v4657_v35 = vpop.f32.mrb[182].mxu1  ;;  %5840 = vmatmul.mubr.bf16.vlgmr.msra.gmra.mrb[80].mxu0 %v11339_v21 }
 0x874   : > { %v4545_v24 = vadd.f32 %v4544_v10, %v11451_v34  ;;  %v4546_v38 = vpop.f32.mrb[55].mxu0  ;;  %v4658_v4 = vadd.f32 %v4657_v35, %v11458_v29  ;;  %v4659_v9 = vpop.f32.mrb[183].mxu1  ;;  %5849 = vmatprep.mubr.bf16.mxu0 %v11357_v42  ;;  %5921 = vmatpush1.bf16.msra.mxu0 %v7789_v41  ;;  %v4742_v15 = vmax.f32 %v4541_v20, 0.0  ;;  %v4744_v56 = vmax.f32 %v4654_v32, 0.0  ;;  %v7795_v20 = vld [vmem:[%s9185_s15 + $0x220] ss:$8 sps:$4 sm:$0xff]  }
 0x875   : > { %v4547_v40 = vadd.f32 %v4546_v38, %v11461_v51  ;;  %v4660_v5 = vadd.f32 %v4659_v9, %v11467_v6  ;;  %5922 = vmatprep.subr.bf16.mxu0 %v7794_v18  ;;  %v4743_v8 = vmax.f32 %v4543_v61, 0.0  ;;  %v4745_v10 = vmax.f32 %v4656_v57, 0.0 }
 0x876   : > { %v4750_v25 = vmax.f32 %v4545_v24, 0.0  ;;  %v4752_v21 = vmax.f32 %v4658_v4, 0.0  ;;  %v7800_v4 = vld [vmem:[%s9185_s15 + $0x234] ss:$8 sps:$4 sm:$0xff]  }
 0x877   : > { %v4751_v46 = vmax.f32 %v4547_v40, 0.0  ;;  %v4753_v38 = vmax.f32 %v4660_v5, 0.0 }
 0x878   : > { %v11506_v35 = vpack.c.bf16 %v4750_v25, %v4742_v15  ;;  %v11508_v39 = vpack.c.bf16 %v4752_v21, %v4744_v56  ;;  %5923 = vmatpush1.bf16.msra.mxu0 %v7792_v54 }
 0x879   : > { %v11510_v42 = vpack.c.bf16 %v4751_v46, %v4743_v8  ;;  %v4550_v41 = vpop.f32.mrb[56].mxu0  ;;  %v11513_v24 = vpack.c.bf16 %v4753_v38, %v4745_v10  ;;  %v4663_v32 = vpop.f32.mrb[184].mxu1  ;;  %5924 = vmatprep.subr.bf16.mxu0 %v7797_v62  ;;  %v7798_v46 = vld [vmem:[%s9185_s15 + $0x230] ss:$8 sps:$4 sm:$0xff]  }
 0x87a   : > { %v4551_v18 = vadd.f32 %v4550_v41, %v11451_v34  ;;  %v4552_v61 = vpop.f32.mrb[57].mxu0  ;;  %v4664_v57 = vadd.f32 %v4663_v32, %v11458_v29  ;;  %v4665_v9 = vpop.f32.mrb[185].mxu1  ;;  %v7803_v32 = vld [vmem:[%s9185_s15 + $0x244] ss:$8 sps:$4 sm:$0xff]  }
 0x87b   : > { %v4553_v40 = vadd.f32 %v4552_v61, %v11461_v51  ;;  %v4554_v15 = vpop.f32.mrb[58].mxu0  ;;  %v4666_v25 = vadd.f32 %v4665_v9, %v11467_v6  ;;  %v4667_v5 = vpop.f32.mrb[186].mxu1  ;;  %5850 = vmatmul.mubr.bf16.gmra.mrb[84].mxu0 %v11355_v16 }
 0x87c   : > { %v4555_v54 = vadd.f32 %v4554_v15, %v11451_v34  ;;  %v4556_v56 = vpop.f32.mrb[59].mxu0  ;;  %v4668_v8 = vadd.f32 %v4667_v5, %v11458_v29  ;;  %v4669_v21 = vpop.f32.mrb[187].mxu1  ;;  %5859 = vmatprep.mubr.bf16.mxu0 %v11373_v60  ;;  %5925 = vmatpush1.bf16.msra.mxu0 %v7795_v20  ;;  %v4758_v10 = vmax.f32 %v4551_v18, 0.0  ;;  %v4760_v61 = vmax.f32 %v4664_v57, 0.0  ;;  %v7801_v18 = vld [vmem:[%s9185_s15 + $0x240] ss:$8 sps:$4 sm:$0xff]  }
 0x87d   : > { %v4557_v62 = vadd.f32 %v4556_v56, %v11461_v51  ;;  %v4670_v41 = vadd.f32 %v4669_v21, %v11467_v6  ;;  %5926 = vmatprep.subr.bf16.mxu0 %v7800_v4  ;;  %v4759_v9 = vmax.f32 %v4553_v40, 0.0  ;;  %v4761_v5 = vmax.f32 %v4666_v25, 0.0 }
 0x87e   : > { %v4766_v38 = vmax.f32 %v4555_v54, 0.0  ;;  %v4768_v16 = vmax.f32 %v4668_v8, 0.0  ;;  %v7806_v8 = vld [vmem:[%s9185_s15 + $0x254] ss:$8 sps:$4 sm:$0xff]  }
 0x87f   : > { %v4767_v15 = vmax.f32 %v4557_v62, 0.0  ;;  %v4769_v56 = vmax.f32 %v4670_v41, 0.0 }
 0x880   : > { %v11528_v58 = vpack.c.bf16 %v4766_v38, %v4758_v10  ;;  %v11530_v23 = vpack.c.bf16 %v4768_v16, %v4760_v61  ;;  %5927 = vmatpush1.bf16.msra.mxu0 %v7798_v46 }
 0x881   : > { %v11532_v60 = vpack.c.bf16 %v4767_v15, %v4759_v9  ;;  %v4560_v20 = vpop.f32.mrb[60].mxu0  ;;  %v11535_v54 = vpack.c.bf16 %v4769_v56, %v4761_v5  ;;  %v4673_v57 = vpop.f32.mrb[188].mxu1  ;;  %5928 = vmatprep.subr.bf16.mxu0 %v7803_v32  ;;  %v7804_v15 = vld [vmem:[%s9185_s15 + $0x250] ss:$8 sps:$4 sm:$0xff]  }
 0x882   : > { %v4561_v4 = vadd.f32 %v4560_v20, %v11451_v34  ;;  %v4562_v40 = vpop.f32.mrb[61].mxu0  ;;  %v4674_v25 = vadd.f32 %v4673_v57, %v11458_v29  ;;  %v4675_v21 = vpop.f32.mrb[189].mxu1  ;;  %v7809_v57 = vld [vmem:[%s9185_s15 + $0x264] ss:$8 sps:$4 sm:$0xff]  }
 0x883   : > { %v4563_v62 = vadd.f32 %v4562_v40, %v11461_v51  ;;  %v4564_v10 = vpop.f32.mrb[62].mxu0  ;;  %v4676_v38 = vadd.f32 %v4675_v21, %v11467_v6  ;;  %v4677_v41 = vpop.f32.mrb[190].mxu1  ;;  %5860 = vmatmul.mubr.bf16.gmra.mrb[88].mxu0 %v11371_v37 }
 0x884   : > { %v4565_v46 = vadd.f32 %v4564_v10, %v11451_v34  ;;  %v4566_v61 = vpop.f32.mrb[63].mxu0  ;;  %v4678_v9 = vadd.f32 %v4677_v41, %v11458_v29  ;;  %v4679_v16 = vpop.f32.mrb[191].mxu1  ;;  %5869 = vmatprep.mubr.bf16.mxu0 %v11389_v33  ;;  %5929 = vmatpush1.bf16.msra.mxu0 %v7801_v18  ;;  %v4774_v5 = vmax.f32 %v4561_v4, 0.0  ;;  %v4776_v40 = vmax.f32 %v4674_v25, 0.0  ;;  %v7807_v4 = vld [vmem:[%s9185_s15 + $0x260] ss:$8 sps:$4 sm:$0xff]  }
 0x885   : > { %v4567_v32 = vadd.f32 %v4566_v61, %v11461_v51  ;;  %v4680_v20 = vadd.f32 %v4679_v16, %v11467_v6  ;;  %5930 = vmatprep.subr.bf16.mxu0 %v7806_v8  ;;  %v4775_v21 = vmax.f32 %v4563_v62, 0.0  ;;  %v4777_v41 = vmax.f32 %v4676_v38, 0.0 }
 0x886   : > { %v4782_v56 = vmax.f32 %v4565_v46, 0.0  ;;  %v4784_v37 = vmax.f32 %v4678_v9, 0.0  ;;  %v7812_v9 = vld [vmem:[%s9185_s15 + $0x274] ss:$8 sps:$4 sm:$0xff]  }
 0x887   : > { %v4783_v10 = vmax.f32 %v4567_v32, 0.0  ;;  %v4785_v61 = vmax.f32 %v4680_v20, 0.0 }
 0x888   : > { %v11550_v50 = vpack.c.bf16 %v4782_v56, %v4774_v5  ;;  %v11552_v59 = vpack.c.bf16 %v4784_v37, %v4776_v40  ;;  %5931 = vmatpush1.bf16.msra.mxu0 %v7804_v15 }
 0x889   : > { %v11554_v33 = vpack.c.bf16 %v4783_v10, %v4775_v21  ;;  %v4570_v18 = vpop.f32.mrb[64].mxu0  ;;  %v11557_v46 = vpack.c.bf16 %v4785_v61, %v4777_v41  ;;  %v4683_v25 = vpop.f32.mrb[192].mxu1  ;;  %5932 = vmatprep.subr.bf16.mxu0 %v7809_v57  ;;  %v7810_v10 = vld [vmem:[%s9185_s15 + $0x270] ss:$8 sps:$4 sm:$0xff]  }
 0x88a   : > { %v4571_v8 = vadd.f32 %v4570_v18, %v11451_v34  ;;  %v4572_v62 = vpop.f32.mrb[65].mxu0  ;;  %v4684_v38 = vadd.f32 %v4683_v25, %v11458_v29  ;;  %v4685_v16 = vpop.f32.mrb[193].mxu1  ;;  %v7815_v25 = vld [vmem:[%s9185_s15 + $0x284] ss:$8 sps:$4 sm:$0xff]  }
 0x88b   : > { %v4573_v32 = vadd.f32 %v4572_v62, %v11461_v51  ;;  %v4574_v5 = vpop.f32.mrb[66].mxu0  ;;  %v4686_v56 = vadd.f32 %v4685_v16, %v11467_v6  ;;  %v4687_v20 = vpop.f32.mrb[194].mxu1  ;;  %5870 = vmatmul.mubr.bf16.gmra.mrb[92].mxu0 %v11387_v2 }
 0x88c   : > { %v4575_v15 = vadd.f32 %v4574_v5, %v11451_v34  ;;  %v4576_v40 = vpop.f32.mrb[67].mxu0  ;;  %v4688_v21 = vadd.f32 %v4687_v20, %v11458_v29  ;;  %v4689_v37 = vpop.f32.mrb[195].mxu1  ;;  %5879 = vmatprep.mubr.bf16.mxu0 %v11405_v53  ;;  %5933 = vmatpush1.bf16.msra.mxu0 %v7807_v4  ;;  %v4790_v41 = vmax.f32 %v4571_v8, 0.0  ;;  %v4792_v62 = vmax.f32 %v4684_v38, 0.0  ;;  %v7813_v8 = vld [vmem:[%s9185_s15 + $0x280] ss:$8 sps:$4 sm:$0xff]  }
 0x88d   : > { %v4577_v57 = vadd.f32 %v4576_v40, %v11461_v51  ;;  %v4690_v18 = vadd.f32 %v4689_v37, %v11467_v6  ;;  %5934 = vmatprep.subr.bf16.mxu0 %v7812_v9  ;;  %v4791_v16 = vmax.f32 %v4573_v32, 0.0  ;;  %v4793_v20 = vmax.f32 %v4686_v56, 0.0 }
 0x88e   : > { %v4798_v61 = vmax.f32 %v4575_v15, 0.0  ;;  %v4800_v2 = vmax.f32 %v4688_v21, 0.0  ;;  %v7818_v21 = vld [vmem:[%s9185_s15 + $0x294] ss:$8 sps:$4 sm:$0xff]  }
 0x88f   : > { %v4799_v5 = vmax.f32 %v4577_v57, 0.0  ;;  %v4801_v40 = vmax.f32 %v4690_v18, 0.0 }
 0x890   : > { %v11572_v13 = vpack.c.bf16 %v4798_v61, %v4790_v41  ;;  %v11574_v30 = vpack.c.bf16 %v4800_v2, %v4792_v62  ;;  %5935 = vmatpush1.bf16.msra.mxu0 %v7810_v10 }
 0x891   : > { %v11576_v53 = vpack.c.bf16 %v4799_v5, %v4791_v16  ;;  %v4580_v4 = vpop.f32.mrb[68].mxu0  ;;  %v11579_v15 = vpack.c.bf16 %v4801_v40, %v4793_v20  ;;  %v4693_v38 = vpop.f32.mrb[196].mxu1  ;;  %5936 = vmatprep.subr.bf16.mxu0 %v7815_v25  ;;  %v7816_v5 = vld [vmem:[%s9185_s15 + $0x290] ss:$8 sps:$4 sm:$0xff]  }
 0x892   : > { %v4581_v9 = vadd.f32 %v4580_v4, %v11451_v34  ;;  %v4582_v32 = vpop.f32.mrb[69].mxu0  ;;  %v4694_v56 = vadd.f32 %v4693_v38, %v11458_v29  ;;  %v4695_v37 = vpop.f32.mrb[197].mxu1  ;;  %v7821_v38 = vld [vmem:[%s9185_s15 + $0x2a4] ss:$8 sps:$4 sm:$0xff]  }
 0x893   : > { %v4583_v57 = vadd.f32 %v4582_v32, %v11461_v51  ;;  %v4584_v41 = vpop.f32.mrb[70].mxu0  ;;  %v4696_v61 = vadd.f32 %v4695_v37, %v11467_v6  ;;  %v4697_v18 = vpop.f32.mrb[198].mxu1  ;;  %5880 = vmatmul.mubr.bf16.gmra.mrb[96].mxu0 %v11403_v7 }
 0x894   : > { %v4585_v10 = vadd.f32 %v4584_v41, %v11451_v34  ;;  %v4586_v62 = vpop.f32.mrb[71].mxu0  ;;  %v4698_v16 = vadd.f32 %v4697_v18, %v11458_v29  ;;  %v4699_v2 = vpop.f32.mrb[199].mxu1  ;;  %5889 = vmatprep.mubr.bf16.mxu0 %v11421_v1  ;;  %5937 = vmatpush1.bf16.msra.mxu0 %v7813_v8  ;;  %v4806_v20 = vmax.f32 %v4581_v9, 0.0  ;;  %v4808_v32 = vmax.f32 %v4694_v56, 0.0  ;;  %v7819_v9 = vld [vmem:[%s9185_s15 + $0x2a0] ss:$8 sps:$4 sm:$0xff]  }
 0x895   : > { %v4587_v25 = vadd.f32 %v4586_v62, %v11461_v51  ;;  %v4700_v4 = vadd.f32 %v4699_v2, %v11467_v6  ;;  %5938 = vmatprep.subr.bf16.mxu0 %v7818_v21  ;;  %v4807_v37 = vmax.f32 %v4583_v57, 0.0  ;;  %v4809_v18 = vmax.f32 %v4696_v61, 0.0 }
 0x896   : > { %v4814_v40 = vmax.f32 %v4585_v10, 0.0  ;;  %v4816_v7 = vmax.f32 %v4698_v16, 0.0  ;;  %v7824_v16 = vld [vmem:[%s9185_s15 + $0x2b4] ss:$8 sps:$4 sm:$0xff]  }
 0x897   : > { %v4815_v41 = vmax.f32 %v4587_v25, 0.0  ;;  %v4817_v62 = vmax.f32 %v4700_v4, 0.0 }
 0x898   : > { %v11594_v28 = vpack.c.bf16 %v4814_v40, %v4806_v20  ;;  %v11596_v36 = vpack.c.bf16 %v4816_v7, %v4808_v32  ;;  %5939 = vmatpush1.bf16.msra.mxu0 %v7816_v5 }
 0x899   : > { %v11598_v1 = vpack.c.bf16 %v4815_v41, %v4807_v37  ;;  %v4590_v8 = vpop.f32.mrb[72].mxu0  ;;  %v11601_v10 = vpack.c.bf16 %v4817_v62, %v4809_v18  ;;  %v4703_v56 = vpop.f32.mrb[200].mxu1  ;;  %5940 = vmatprep.subr.bf16.mxu0 %v7821_v38  ;;  %v7822_v41 = vld [vmem:[%s9185_s15 + $0x2b0] ss:$8 sps:$4 sm:$0xff]  }
 0x89a   : > { %v4591_v21 = vadd.f32 %v4590_v8, %v11451_v34  ;;  %v4592_v57 = vpop.f32.mrb[73].mxu0  ;;  %v4704_v61 = vadd.f32 %v4703_v56, %v11458_v29  ;;  %v4705_v2 = vpop.f32.mrb[201].mxu1  ;;  %v7827_v56 = vld [vmem:[%s9185_s15 + $0x2c4] ss:$8 sps:$4 sm:$0xff]  }
 0x89b   : > { %v4593_v25 = vadd.f32 %v4592_v57, %v11461_v51  ;;  %v4594_v20 = vpop.f32.mrb[74].mxu0  ;;  %v4706_v40 = vadd.f32 %v4705_v2, %v11467_v6  ;;  %v4707_v4 = vpop.f32.mrb[202].mxu1  ;;  %5890 = vmatmul.mubr.bf16.gmra.mrb[100].mxu0 %v11419_v0 }
 0x89c   : > { %v4595_v5 = vadd.f32 %v4594_v20, %v11451_v34  ;;  %v4596_v32 = vpop.f32.mrb[75].mxu0  ;;  %v4708_v37 = vadd.f32 %v4707_v4, %v11458_v29  ;;  %v4709_v7 = vpop.f32.mrb[203].mxu1  ;;  %5899 = vmatprep.mubr.bf16.mxu0 %v11438_v52  ;;  %5941 = vmatpush1.bf16.msra.mxu0 %v7819_v9  ;;  %v4822_v18 = vmax.f32 %v4591_v21, 0.0  ;;  %v4824_v57 = vmax.f32 %v4704_v61, 0.0  ;;  %v7825_v21 = vld [vmem:[%s9185_s15 + $0x2c0] ss:$8 sps:$4 sm:$0xff]  }
 0x89d   : > { %v4597_v38 = vadd.f32 %v4596_v32, %v11461_v51  ;;  %v4710_v8 = vadd.f32 %v4709_v7, %v11467_v6  ;;  %5942 = vmatprep.subr.bf16.mxu0 %v7824_v16  ;;  %v4823_v2 = vmax.f32 %v4593_v25, 0.0  ;;  %v4825_v4 = vmax.f32 %v4706_v40, 0.0 }
 0x89e   : > { %v4830_v62 = vmax.f32 %v4595_v5, 0.0  ;;  %v4832_v0 = vmax.f32 %v4708_v37, 0.0  ;;  %v7830_v37 = vld [vmem:[%s9185_s15 + $0x2d4] ss:$8 sps:$4 sm:$0xff]  }
 0x89f   : > { %v4831_v20 = vmax.f32 %v4597_v38, 0.0  ;;  %v4833_v32 = vmax.f32 %v4710_v8, 0.0 }
 0x8a0   : > { %v11616_v22 = vpack.c.bf16 %v4830_v62, %v4822_v18  ;;  %v11618_v43 = vpack.c.bf16 %v4832_v0, %v4824_v57  ;;  %5943 = vmatpush1.bf16.msra.mxu0 %v7822_v41 }
 0x8a1   : > { %v11620_v52 = vpack.c.bf16 %v4831_v20, %v4823_v2  ;;  %v4600_v9 = vpop.f32.mrb[76].mxu0  ;;  %v11623_v5 = vpack.c.bf16 %v4833_v32, %v4825_v4  ;;  %v4713_v61 = vpop.f32.mrb[204].mxu1  ;;  %5944 = vmatprep.subr.bf16.mxu0 %v7827_v56  ;;  %v7828_v20 = vld [vmem:[%s9185_s15 + $0x2d0] ss:$8 sps:$4 sm:$0xff]  }
 0x8a2   : > { %v4601_v16 = vadd.f32 %v4600_v9, %v11451_v34  ;;  %v4602_v25 = vpop.f32.mrb[77].mxu0  ;;  %v4714_v40 = vadd.f32 %v4713_v61, %v11458_v29  ;;  %v4715_v7 = vpop.f32.mrb[205].mxu1 }
 0x8a3   : > { %v4603_v38 = vadd.f32 %v4602_v25, %v11461_v51  ;;  %v4604_v18 = vpop.f32.mrb[78].mxu0  ;;  %v4716_v62 = vadd.f32 %v4715_v7, %v11467_v6  ;;  %v4717_v8 = vpop.f32.mrb[206].mxu1  ;;  %5900 = vmatmul.mubr.bf16.gmra.mrb[104].mxu0 %v11435_v49 }
 0x8a4   : > { %v4605_v41 = vadd.f32 %v4604_v18, %v11451_v34  ;;  %v4606_v57 = vpop.f32.mrb[79].mxu0  ;;  %v4718_v2 = vadd.f32 %v4717_v8, %v11458_v29  ;;  %v4719_v0 = vpop.f32.mrb[207].mxu1  ;;  %5909 = vmatprep.mubr.bf16.mxu0 %v11469_v45  ;;  %5945 = vmatpush1.bf16.msra.mxu0 %v7825_v21  ;;  %v4838_v4 = vmax.f32 %v4601_v16, 0.0  ;;  %v7833_v34 = vld [vmem:[%s9185_s15 + $0x2e4] ss:$8 sps:$4 sm:$0xff]   ;;  %v4840_v61 = vmax.f32 %v4714_v40, 0.0 }
 0x8a5   : > { %v4607_v56 = vadd.f32 %v4606_v57, %v11461_v51  ;;  %v4720_v9 = vadd.f32 %v4719_v0, %v11467_v6  ;;  %5946 = vmatprep.subr.bf16.mxu0 %v7830_v37  ;;  %v4839_v25 = vmax.f32 %v4603_v38, 0.0  ;;  %v4841_v51 = vmax.f32 %v4716_v62, 0.0  ;;  %v7831_v6 = vld [vmem:[%s9185_s15 + $0x2e0] ss:$8 sps:$4 sm:$0xff]   ;;  %v7836_v40 = vld [vmem:[%s9185_s15 + $0x2f4] ss:$8 sps:$4 sm:$0xff]  }
 0x8a6   : > { %v4846_v32 = vmax.f32 %v4605_v41, 0.0  ;;  %v4848_v49 = vmax.f32 %v4718_v2, 0.0  ;;  %v7834_v38 = vld [vmem:[%s9185_s15 + $0x2f0] ss:$8 sps:$4 sm:$0xff]   ;;  %v7839_v18 = vld [vmem:[%s9185_s15 + $0x304] ss:$8 sps:$4 sm:$0xff]  }
 0x8a7   : > { %v4847_v29 = vmax.f32 %v4607_v56, 0.0  ;;  %v4849_v45 = vmax.f32 %v4720_v9, 0.0  ;;  %v7837_v62 = vld [vmem:[%s9185_s15 + $0x300] ss:$8 sps:$4 sm:$0xff]   ;;  %v7842_v41 = vld [vmem:[%s9185_s15 + $0x314] ss:$8 sps:$4 sm:$0xff]  }
 0x8a8   : > { %v11638_v7 = vpack.c.bf16 %v4846_v32, %v4838_v4  ;;  %v11640_v21 = vpack.c.bf16 %v4848_v49, %v4840_v61  ;;  %5947 = vmatpush1.bf16.msra.mxu0 %v7828_v20  ;;  %v7843_v8 = vld [vmem:[%s9185_s15 + $0x320] ss:$8 sps:$4 sm:$0xff]   ;;  %v7848_v57 = vld [vmem:[%s9185_s15 + $0x334] ss:$8 sps:$4 sm:$0xff]   ;;  %v7876_v49 = vld [vmem:[%s9185_s15 + $0x3d0] ss:$8 sps:$4 sm:$0xff]  }
 0x8a9   : > { %v11642_v16 = vpack.c.bf16 %v4847_v29, %v4839_v25  ;;  %v11645_v37 = vpack.c.bf16 %v4849_v45, %v4841_v51  ;;  %5948 = vmatprep.subr.bf16.mxu0 %v7833_v34  ;;  %v7849_v2 = vld [vmem:[%s9185_s15 + $0x340] ss:$8 sps:$4 sm:$0xff]   ;;  %v7854_v56 = vld [vmem:[%s9185_s15 + $0x354] ss:$8 sps:$4 sm:$0xff]   ;;  %v7882_v51 = vld [vmem:[%s9185_s15 + $0x3f0] ss:$8 sps:$4 sm:$0xff]  }
 0x8aa   : > { %v7855_v0 = vld [vmem:[%s9185_s15 + $0x360] ss:$8 sps:$4 sm:$0xff]   ;;  %v7860_v20 = vld [vmem:[%s9185_s15 + $0x374] ss:$8 sps:$4 sm:$0xff]  }
 0x8ab   : > { %5910 = vmatmul.mubr.bf16.gmra.mrb[108].mxu0 %v11464_v17  ;;  %v7840_v17 = vld [vmem:[%s9185_s15 + $0x310] ss:$8 sps:$4 sm:$0xff]   ;;  %v7861_v4 = vld [vmem:[%s9185_s15 + $0x380] ss:$8 sps:$4 sm:$0xff]   ;;  %v7866_v32 = vld [vmem:[%s9185_s15 + $0x394] ss:$8 sps:$4 sm:$0xff]  }
 0x8ac   : > { %5949 = vmatpush1.bf16.msra.mxu0 %v7831_v6  ;;  %5952 = vmatprep.mubr.bf16.mxu0 %v11488_v11  ;;  %v7845_v11 = vld [vmem:[%s9185_s15 + $0x324] ss:$8 sps:$4 sm:$0xff]   ;;  %v7867_v9 = vld [vmem:[%s9185_s15 + $0x3a0] ss:$8 sps:$4 sm:$0xff]   ;;  %v7872_v34 = vld [vmem:[%s9185_s15 + $0x3b4] ss:$8 sps:$4 sm:$0xff]  }
 0x8ad   : > { %5950 = vmatprep.subr.bf16.mxu0 %v7836_v40  ;;  %v7873_v61 = vld [vmem:[%s9185_s15 + $0x3c0] ss:$8 sps:$4 sm:$0xff]   ;;  %v7878_v25 = vld [vmem:[%s9185_s15 + $0x3d4] ss:$8 sps:$4 sm:$0xff]  }
 0x8ae   : > { %v7884_v29 = vld [vmem:[%s9185_s15 + $0x3f4] ss:$8 sps:$4 sm:$0xff]  }
 0x8b0   : > { %5951 = vmatpush1.bf16.msra.mxu0 %v7834_v38 }
 0x8b1   : > { %6033 = vmatprep.subr.bf16.mxu0 %v7839_v18 }
 0x8b3   : > { %5953 = vmatmul.mubr.bf16.vlgmr.msra.gmra.mrb[80].mxu0 %v11484_v19  ;;  %v7846_v19 = vld [vmem:[%s9185_s15 + $0x330] ss:$8 sps:$4 sm:$0xff]  }
 0x8b4   : > { %5962 = vmatprep.mubr.bf16.mxu0 %v11510_v42  ;;  %6034 = vmatpush1.bf16.msra.mxu0 %v7837_v62  ;;  %v7851_v42 = vld [vmem:[%s9185_s15 + $0x344] ss:$8 sps:$4 sm:$0xff]  }
 0x8b5   : > { %6035 = vmatprep.subr.bf16.mxu0 %v7842_v41 }
 0x8b8   : > { %6036 = vmatpush1.bf16.msra.mxu0 %v7840_v17 }
 0x8b9   : > { %6037 = vmatprep.subr.bf16.mxu0 %v7845_v11 }
 0x8bb   : > { %5963 = vmatmul.mubr.bf16.gmra.mrb[84].mxu0 %v11506_v35  ;;  %v7852_v35 = vld [vmem:[%s9185_s15 + $0x350] ss:$8 sps:$4 sm:$0xff]  }
 0x8bc   : > { %5972 = vmatprep.mubr.bf16.mxu0 %v11532_v60  ;;  %6038 = vmatpush1.bf16.msra.mxu0 %v7843_v8  ;;  %v7857_v60 = vld [vmem:[%s9185_s15 + $0x364] ss:$8 sps:$4 sm:$0xff]  }
 0x8bd   : > { %6039 = vmatprep.subr.bf16.mxu0 %v7848_v57 }
 0x8c0   : > { %6040 = vmatpush1.bf16.msra.mxu0 %v7846_v19 }
 0x8c1   : > { %6041 = vmatprep.subr.bf16.mxu0 %v7851_v42 }
 0x8c3   : > { %5973 = vmatmul.mubr.bf16.gmra.mrb[88].mxu0 %v11528_v58  ;;  %v7858_v58 = vld [vmem:[%s9185_s15 + $0x370] ss:$8 sps:$4 sm:$0xff]  }
 0x8c4   : > { %5982 = vmatprep.mubr.bf16.mxu0 %v11554_v33  ;;  %6042 = vmatpush1.bf16.msra.mxu0 %v7849_v2  ;;  %v7863_v33 = vld [vmem:[%s9185_s15 + $0x384] ss:$8 sps:$4 sm:$0xff]  }
 0x8c5   : > { %6043 = vmatprep.subr.bf16.mxu0 %v7854_v56 }
 0x8c8   : > { %6044 = vmatpush1.bf16.msra.mxu0 %v7852_v35 }
 0x8c9   : > { %6045 = vmatprep.subr.bf16.mxu0 %v7857_v60 }
 0x8cb   : > { %5983 = vmatmul.mubr.bf16.gmra.mrb[92].mxu0 %v11550_v50  ;;  %v7864_v50 = vld [vmem:[%s9185_s15 + $0x390] ss:$8 sps:$4 sm:$0xff]  }
 0x8cc   : > { %5992 = vmatprep.mubr.bf16.mxu0 %v11576_v53  ;;  %6046 = vmatpush1.bf16.msra.mxu0 %v7855_v0  ;;  %v7869_v53 = vld [vmem:[%s9185_s15 + $0x3a4] ss:$8 sps:$4 sm:$0xff]  }
 0x8cd   : > { %6047 = vmatprep.subr.bf16.mxu0 %v7860_v20 }
 0x8d0   : > { %6048 = vmatpush1.bf16.msra.mxu0 %v7858_v58 }
 0x8d1   : > { %6049 = vmatprep.subr.bf16.mxu0 %v7863_v33 }
 0x8d3   : > { %5993 = vmatmul.mubr.bf16.gmra.mrb[96].mxu0 %v11572_v13  ;;  %v7870_v13 = vld [vmem:[%s9185_s15 + $0x3b0] ss:$8 sps:$4 sm:$0xff]  }
 0x8d4   : > { %6002 = vmatprep.mubr.bf16.mxu0 %v11598_v1  ;;  %6050 = vmatpush1.bf16.msra.mxu0 %v7861_v4  ;;  %v7875_v1 = vld [vmem:[%s9185_s15 + $0x3c4] ss:$8 sps:$4 sm:$0xff]  }
 0x8d5   : > { %6051 = vmatprep.subr.bf16.mxu0 %v7866_v32 }
 0x8d8   : > { %6052 = vmatpush1.bf16.msra.mxu0 %v7864_v50 }
 0x8d9   : > { %6053 = vmatprep.subr.bf16.mxu0 %v7869_v53 }
 0x8db   : > { %6003 = vmatmul.mubr.bf16.gmra.mrb[100].mxu0 %v11594_v28  ;;  %v7881_v28 = vld [vmem:[%s9185_s15 + $0x3e4] ss:$8 sps:$4 sm:$0xff]  }
 0x8dc   : > { %6012 = vmatprep.mubr.bf16.mxu0 %v11620_v52  ;;  %6054 = vmatpush1.bf16.msra.mxu0 %v7867_v9  ;;  %v7879_v52 = vld [vmem:[%s9185_s15 + $0x3e0] ss:$8 sps:$4 sm:$0xff]   ;;  %s12254_s15 = sld [smem:[#allocation35_spill]] }
 0x8dd   : > { %6055 = vmatprep.subr.bf16.mxu0 %v7872_v34 }
 0x8e0   : > { %6056 = vmatpush1.bf16.msra.mxu0 %v7870_v13 }
 0x8e1   : > { %6057 = vmatprep.subr.bf16.mxu0 %v7875_v1 }
 0x8e2   : > { %s12257_s19 = sand.u32 1, %s12254_s15  }
 0x8e3   : > { %6013 = vmatmul.mubr.bf16.gmra.mrb[104].mxu0 %v11616_v22  ;;  %s11726_s6 = scalar_lea.sflag [#allocation21], %s12257_s19 }
 0x8e4   : > { %6022 = vmatprep.mubr.bf16.mxu0 %v11642_v16  ;;  %6058 = vmatpush1.bf16.msra.mxu0 %v7873_v61 }
 0x8e5   : > { %6059 = vmatprep.subr.bf16.mxu0 %v7878_v25 }
 0x8e8   : > { %6060 = vmatpush1.bf16.msra.mxu0 %v7876_v49 }
 0x8e9   : > { %6061 = vmatprep.subr.bf16.mxu0 %v7881_v28 }
 0x8eb   : > { %6023 = vmatmul.mubr.bf16.gmra.mrb[108].mxu0 %v11638_v7 }
 0x8ec   : > { %6062 = vmatpush1.bf16.msra.mxu0 %v7879_v52  ;;  %6065 = vmatprep.mubr.bf16.mxu0 %v11491_v3 }
 0x8ed   : > { %6063 = vmatprep.subr.bf16.mxu0 %v7884_v29 }
 0x8f0   : > { %6064 = vmatpush1.bf16.msra.mxu0 %v7882_v51 }
 0x8f3   : > { %6066 = vmatmul.mubr.bf16.vlgmr.msra.gmra.mrb[80].mxu0 %v11486_v14 }
 0x8f4   : > { %6075 = vmatprep.mubr.bf16.mxu0 %v11513_v24 }
 0x8fb   : > { %6076 = vmatmul.mubr.bf16.gmra.mrb[84].mxu0 %v11508_v39 }
 0x8fc   : > { %6085 = vmatprep.mubr.bf16.mxu0 %v11535_v54 }
 0x903   : > { %6086 = vmatmul.mubr.bf16.gmra.mrb[88].mxu0 %v11530_v23 }
 0x904   : > { %6095 = vmatprep.mubr.bf16.mxu0 %v11557_v46 }
 0x90b   : > { %6096 = vmatmul.mubr.bf16.gmra.mrb[92].mxu0 %v11552_v59 }
 0x90c   : > { %6105 = vmatprep.mubr.bf16.mxu0 %v11579_v15 }
 0x913   : > { %6106 = vmatmul.mubr.bf16.gmra.mrb[96].mxu0 %v11574_v30 }
 0x914   : > { %6115 = vmatprep.mubr.bf16.mxu0 %v11601_v10 }
 0x91b   : > { %6116 = vmatmul.mubr.bf16.gmra.mrb[100].mxu0 %v11596_v36 }
 0x91c   : > { %6125 = vmatprep.mubr.bf16.mxu0 %v11623_v5 }
 0x923   : > { %6126 = vmatmul.mubr.bf16.gmra.mrb[104].mxu0 %v11618_v43 }
 0x924   : > { %6135 = vmatprep.mubr.bf16.mxu0 %v11645_v37 }
 0x92b   : > { %6136 = vmatmul.mubr.bf16.gmra.mrb[108].mxu0 %v11640_v21 }
 0x92c   : > { %8434 = shalt.err (!%p8431_p9)
}
 0x92d   : > { %s8435_s13 = scalar_lea.hbm %s11720_s16, 1024  ;;  %s8439_s0 = scalar_lea.hbm %s12256_s14, 4096 }
 0x92e   : > { %p8436_p4 = scmp.ne.s32.totalorder %s11720_s16, %s8435_s13  ;;  %p8440_p5 = scmp.lt.u32.totalorder %s11720_s16, %s12256_s14 }
 0x92f   : > { %p8441_p6 = scmp.lt.u32.totalorder %s8439_s0, %s8435_s13  ;;  %p8443_p0 = scmp.lt.u32.totalorder %s8435_s13, %s11720_s16 }
 0x930   : > { %p8437_p8 = pnand %p8436_p4, %p12258_p11 }
 0x931   : > { %p8442_p3 = por %p8441_p6, %p8440_p5 }
 0x932   : > { %p8438_p12 = pneg %p8437_p8 }
 0x933   : > { %p8444_p13 = por %p8443_p0, %p8442_p3 }
 0x935   : > { %p8445_p1 = pnand %p8444_p13, %p8438_p12 }
 0x937   : > { %8448 = shalt.err (!%p8445_p1)
}
 0x938   : > { %s8637_s30 = smov 64   ;;  %s8638_s20 = smov 4   ;;  %v12260_v3 = vld [vmem:[#allocation57_spill] sm:$0xff]  ;;  %v12261_v15 = vld [vmem:[#allocation58_spill] sm:$0xff]  ;;  %v12263_v7 = vld [vmem:[#allocation60_spill] sm:$0xff] }
 0x939   : > { %7386 = dma.vmem_to_hbm [thread:$0]  (%p12258_p11), %s11722_s2, 1024, %s11720_s16, %s11726_s6, %s8637_s30, %s8637_s30, %s8638_s20   ;;  %v12264_v38 = vld [vmem:[#allocation62_spill] sm:$0xff]  ;;  %v12265_v17 = vld [vmem:[#allocation61_spill] sm:$0xff]  ;;  %v12266_v57 = vld [vmem:[#allocation64_spill] sm:$0xff] }
 0x93a   : > { %s12259_s12 = scalar_lea.vmem [#allocation18], %s9156_s23  ;;  %v12267_v42 = vld [vmem:[#allocation63_spill] sm:$0xff]  ;;  %v12268_v52 = vld [vmem:[#allocation65_spill] sm:$0xff]  ;;  %s12281_s23 = sld [smem:[#allocation38_spill]] }
 0x93b   : > { %v5042_v43 = vld [vmem:[%s12259_s12] sm:$0x3]  ;;  %s6996_s26 = sshll.u32 %s12252_s18, 12  ;;  %s6230_s2 = sshll.u32 %s9198_s22, 4  ;;  %s11857_s2 = int_to_ptr.vmem [resolvable:$true] %s6230_s2 }
 0x93c   : > { %v11753_v22 = vrot.slane %v5042_v43, %v12250_v44  ;;  %v11756_v36 = vrot.slane %v5042_v43, %v12251_v31  ;;  %v12262_v31 = vld [vmem:[#allocation59_spill] sm:$0xff]  ;;  %s12283_s16 = sld [smem:[#allocation49_spill]]  ;;  %s12286_s17 = sld [smem:[#allocation104_spill]] }
 0x93d   : > { %s8449_s13 = scalar_lea.vmem %s11857_s2, 4096  ;;  %s8639_s25 = smov [#allocation19]  }
 0x93e   : > { %p8450_p11 = scmp.ne.s32.totalorder %s11857_s2, %s8449_s13  ;;  %s8453_s15 = sshll.u32 %s8639_s25, 4  ;;  %s8454_s15 = int_to_ptr.vmem [resolvable:$false] %s8453_s15 }
 0x93f   : > { %s8455_s0 = scalar_lea.vmem %s8454_s15, 8192  ;;  %p8456_p9 = scmp.lt.s32.totalorder %s11857_s2, %s8454_s15 }
 0x940   : > { %s12289_s18 = sand.u32 1, %s12281_s23   ;;  %p8457_p4 = scmp.lt.s32.totalorder %s8455_s0, %s8449_s13 }
 0x941   : > { %s11865_s21 = scalar_lea.sflag [#allocation6], %s12289_s18 }
 0x942   : > { %s12287_s11 = smov %s12286_s17  ;;  %s11855_s29 = scalar_lea.hbm %s12286_s17, %s6996_s26 }
 0x943   : > { %p12290_p7 = scmp.ne.s32.totalorder %s12283_s16, 0  ;;  %p8458_p8 = por %p8457_p4, %p8456_p9 }
 0x945   : > { %p8451_p2 = pnand %p8450_p11, %p12290_p7 }
 0x947   : > { %p8452_p10 = pneg %p8451_p2 }
 0x949   : > { %p8459_p12 = pnand %p8458_p8, %p8452_p10 }
 0x9c6   : > { %v6067_v30 = vpop.f32.mrb[80].mxu0 }
 0x9c7   : > { %v7236_v59 = vadd.f32 %v6067_v30, %v11753_v22  ;;  %v6069_v23 = vpop.f32.mrb[81].mxu0 }
 0x9c8   : > { %v7237_v39 = vadd.f32 %v6069_v23, %v11756_v36  ;;  %v6071_v14 = vpop.f32.mrb[82].mxu0 }
 0x9c9   : > { %v6146_v24 = vadd.f32 %v7236_v59, %v12260_v3  ;;  %v7238_v54 = vadd.f32 %v6071_v14, %v11753_v22  ;;  %v6073_v46 = vpop.f32.mrb[83].mxu0  ;;  %v12269_v59 = vld [vmem:[#allocation67_spill] sm:$0xff]  ;;  %v12270_v14 = vld [vmem:[#allocation66_spill] sm:$0xff] }
 0x9ca   : > { %v6147_v44 = vadd.f32 %v7237_v39, %v12261_v15  ;;  %v7239_v10 = vadd.f32 %v6073_v46, %v11756_v36  ;;  %v12272_v15 = vld [vmem:[#allocation68_spill] sm:$0xff] }
 0x9cb   : > { %6178 = vst [vmem:[%s9198_s22] sm:$0xff] %v6146_v24  ;;  %v6148_v5 = vadd.f32 %v7238_v54, %v12262_v31  ;;  %v12271_v54 = vld [vmem:[#allocation69_spill] sm:$0xff] }
 0x9cc   : > { %6179 = vst [vmem:[%s9198_s22 + $0x8] sm:$0xff] %v6147_v44  ;;  %v6149_v45 = vadd.f32 %v7239_v10, %v12263_v7 }
 0x9cd   : > { %6180 = vst [vmem:[%s9198_s22 + $0x10] sm:$0xff] %v6148_v5 }
 0x9ce   : > { %6181 = vst [vmem:[%s9198_s22 + $0x18] sm:$0xff] %v6149_v45  ;;  %v6077_v21 = vpop.f32.mrb[84].mxu0 }
 0x9cf   : > { %v7240_v16 = vadd.f32 %v6077_v21, %v11753_v22  ;;  %v6079_v6 = vpop.f32.mrb[85].mxu0  ;;  %v12273_v21 = vld [vmem:[#allocation71_spill] sm:$0xff] }
 0x9d0   : > { %v7241_v37 = vadd.f32 %v6079_v6, %v11756_v36  ;;  %v6081_v40 = vpop.f32.mrb[86].mxu0 }
 0x9d1   : > { %v6150_v18 = vadd.f32 %v7240_v16, %v12264_v38  ;;  %v7242_v62 = vadd.f32 %v6081_v40, %v11753_v22  ;;  %v6083_v41 = vpop.f32.mrb[87].mxu0  ;;  %v12274_v40 = vld [vmem:[#allocation70_spill] sm:$0xff] }
 0x9d2   : > { %v6151_v11 = vadd.f32 %v7241_v37, %v12265_v17  ;;  %v7243_v8 = vadd.f32 %v6083_v41, %v11756_v36  ;;  %v12276_v17 = vld [vmem:[#allocation72_spill] sm:$0xff] }
 0x9d3   : > { %6182 = vst [vmem:[%s9198_s22 + $0x20] sm:$0xff] %v6150_v18  ;;  %v6152_v19 = vadd.f32 %v7242_v62, %v12266_v57  ;;  %v12275_v62 = vld [vmem:[#allocation73_spill] sm:$0xff] }
 0x9d4   : > { %6183 = vst [vmem:[%s9198_s22 + $0x28] sm:$0xff] %v6151_v11  ;;  %v6153_v2 = vadd.f32 %v7243_v8, %v12267_v42 }
 0x9d5   : > { %6184 = vst [vmem:[%s9198_s22 + $0x30] sm:$0xff] %v6152_v19 }
 0x9d6   : > { %6185 = vst [vmem:[%s9198_s22 + $0x38] sm:$0xff] %v6153_v2  ;;  %v6087_v56 = vpop.f32.mrb[88].mxu0 }
 0x9d7   : > { %v7244_v35 = vadd.f32 %v6087_v56, %v11753_v22  ;;  %v6089_v60 = vpop.f32.mrb[89].mxu0  ;;  %v12277_v56 = vld [vmem:[#allocation75_spill] sm:$0xff] }
 0x9d8   : > { %v7245_v0 = vadd.f32 %v6089_v60, %v11756_v36  ;;  %v6091_v20 = vpop.f32.mrb[90].mxu0 }
 0x9d9   : > { %v6154_v58 = vadd.f32 %v7244_v35, %v10409_v55  ;;  %v7246_v33 = vadd.f32 %v6091_v20, %v11753_v22  ;;  %v6093_v4 = vpop.f32.mrb[91].mxu0  ;;  %v12278_v20 = vld [vmem:[#allocation74_spill] sm:$0xff] }
 0x9da   : > { %v6155_v32 = vadd.f32 %v7245_v0, %v10400_v26  ;;  %v7247_v50 = vadd.f32 %v6093_v4, %v11756_v36  ;;  %v12279_v4 = vld [vmem:[#allocation77_spill] sm:$0xff] }
 0x9db   : > { %6186 = vst [vmem:[%s9198_s22 + $0x40] sm:$0xff] %v6154_v58  ;;  %v6156_v53 = vadd.f32 %v7246_v33, %v10421_v12 }
 0x9dc   : > { %6187 = vst [vmem:[%s9198_s22 + $0x48] sm:$0xff] %v6155_v32  ;;  %v6157_v9 = vadd.f32 %v7247_v50, %v10412_v48  ;;  %v12280_v50 = vld [vmem:[#allocation76_spill] sm:$0xff] }
 0x9dd   : > { %6188 = vst [vmem:[%s9198_s22 + $0x50] sm:$0xff] %v6156_v53 }
 0x9de   : > { %6189 = vst [vmem:[%s9198_s22 + $0x58] sm:$0xff] %v6157_v9  ;;  %v6097_v55 = vpop.f32.mrb[92].mxu0 }
 0x9df   : > { %v7248_v34 = vadd.f32 %v6097_v55, %v11753_v22  ;;  %v6099_v13 = vpop.f32.mrb[93].mxu0 }
 0x9e0   : > { %v7249_v26 = vadd.f32 %v6099_v13, %v11756_v36  ;;  %v6101_v1 = vpop.f32.mrb[94].mxu0 }
 0x9e1   : > { %v6158_v61 = vadd.f32 %v7248_v34, %v10447_v63  ;;  %v7250_v25 = vadd.f32 %v6101_v1, %v11753_v22  ;;  %v6103_v12 = vpop.f32.mrb[95].mxu0  ;;  %v12282_v1 = vld [vmem:[#allocation79_spill] sm:$0xff] }
 0x9e2   : > { %v6159_v49 = vadd.f32 %v7249_v26, %v10443_v47  ;;  %v7251_v48 = vadd.f32 %v6103_v12, %v11756_v36 }
 0x9e3   : > { %6190 = vst [vmem:[%s9198_s22 + $0x60] sm:$0xff] %v6158_v61  ;;  %v6160_v28 = vadd.f32 %v7250_v25, %v10458_v27 }
 0x9e4   : > { %6191 = vst [vmem:[%s9198_s22 + $0x68] sm:$0xff] %v6159_v49  ;;  %v6161_v29 = vadd.f32 %v7251_v48, %v12268_v52  ;;  %v12284_v49 = vld [vmem:[#allocation78_spill] sm:$0xff]  ;;  %v12285_v52 = vld [vmem:[#allocation81_spill] sm:$0xff] }
 0x9e5   : > { %6192 = vst [vmem:[%s9198_s22 + $0x70] sm:$0xff] %v6160_v28 }
 0x9e6   : > { %6193 = vst [vmem:[%s9198_s22 + $0x78] sm:$0xff] %v6161_v29  ;;  %v6107_v63 = vpop.f32.mrb[96].mxu0 }
 0x9e7   : > { %v7252_v51 = vadd.f32 %v6107_v63, %v11753_v22  ;;  %v6109_v43 = vpop.f32.mrb[97].mxu0 }
 0x9e8   : > { %v7253_v47 = vadd.f32 %v6109_v43, %v11756_v36  ;;  %v6111_v30 = vpop.f32.mrb[98].mxu0 }
 0x9e9   : > { %v6162_v23 = vadd.f32 %v7252_v51, %v12269_v59  ;;  %v7254_v39 = vadd.f32 %v6111_v30, %v11753_v22  ;;  %v6113_v27 = vpop.f32.mrb[99].mxu0 }
 0x9ea   : > { %v6163_v3 = vadd.f32 %v7253_v47, %v12270_v14  ;;  %v7255_v24 = vadd.f32 %v6113_v27, %v11756_v36 }
 0x9eb   : > { %6194 = vst [vmem:[%s9198_s22 + $0x80] sm:$0xff] %v6162_v23  ;;  %v6164_v46 = vadd.f32 %v7254_v39, %v12271_v54 }
 0x9ec   : > { %6195 = vst [vmem:[%s9198_s22 + $0x88] sm:$0xff] %v6163_v3  ;;  %v6165_v44 = vadd.f32 %v7255_v24, %v12272_v15 }
 0x9ed   : > { %6196 = vst [vmem:[%s9198_s22 + $0x90] sm:$0xff] %v6164_v46 }
 0x9ee   : > { %6197 = vst [vmem:[%s9198_s22 + $0x98] sm:$0xff] %v6165_v44  ;;  %v6117_v10 = vpop.f32.mrb[100].mxu0 }
 0x9ef   : > { %v7256_v31 = vadd.f32 %v6117_v10, %v11753_v22  ;;  %v6119_v5 = vpop.f32.mrb[101].mxu0 }
 0x9f0   : > { %v7257_v7 = vadd.f32 %v6119_v5, %v11756_v36  ;;  %v6121_v45 = vpop.f32.mrb[102].mxu0 }
 0x9f1   : > { %v6166_v16 = vadd.f32 %v7256_v31, %v12273_v21  ;;  %v7258_v6 = vadd.f32 %v6121_v45, %v11753_v22  ;;  %v6123_v37 = vpop.f32.mrb[103].mxu0 }
 0x9f2   : > { %v6167_v38 = vadd.f32 %v7257_v7, %v12274_v40  ;;  %v7259_v18 = vadd.f32 %v6123_v37, %v11756_v36 }
 0x9f3   : > { %6198 = vst [vmem:[%s9198_s22 + $0xa0] sm:$0xff] %v6166_v16  ;;  %v6168_v41 = vadd.f32 %v7258_v6, %v12275_v62 }
 0x9f4   : > { %6199 = vst [vmem:[%s9198_s22 + $0xa8] sm:$0xff] %v6167_v38  ;;  %v6169_v11 = vadd.f32 %v7259_v18, %v12276_v17 }
 0x9f5   : > { %6200 = vst [vmem:[%s9198_s22 + $0xb0] sm:$0xff] %v6168_v41 }
 0x9f6   : > { %6201 = vst [vmem:[%s9198_s22 + $0xb8] sm:$0xff] %v6169_v11  ;;  %v6127_v8 = vpop.f32.mrb[104].mxu0 }
 0x9f7   : > { %v7260_v57 = vadd.f32 %v6127_v8, %v11753_v22  ;;  %v6129_v19 = vpop.f32.mrb[105].mxu0 }
 0x9f8   : > { %v7261_v42 = vadd.f32 %v6129_v19, %v11756_v36  ;;  %v6131_v2 = vpop.f32.mrb[106].mxu0 }
 0x9f9   : > { %v6170_v35 = vadd.f32 %v7260_v57, %v12277_v56  ;;  %v7262_v60 = vadd.f32 %v6131_v2, %v11753_v22  ;;  %v6133_v0 = vpop.f32.mrb[107].mxu0 }
 0x9fa   : > { %v6171_v58 = vadd.f32 %v7261_v42, %v12278_v20  ;;  %v7263_v33 = vadd.f32 %v6133_v0, %v11756_v36 }
 0x9fb   : > { %6202 = vst [vmem:[%s9198_s22 + $0xc0] sm:$0xff] %v6170_v35  ;;  %v6172_v32 = vadd.f32 %v7262_v60, %v12279_v4 }
 0x9fc   : > { %6203 = vst [vmem:[%s9198_s22 + $0xc8] sm:$0xff] %v6171_v58  ;;  %v6173_v53 = vadd.f32 %v7263_v33, %v12280_v50 }
 0x9fd   : > { %6204 = vst [vmem:[%s9198_s22 + $0xd0] sm:$0xff] %v6172_v32 }
 0x9fe   : > { %6205 = vst [vmem:[%s9198_s22 + $0xd8] sm:$0xff] %v6173_v53  ;;  %v6137_v9 = vpop.f32.mrb[108].mxu0 }
 0x9ff   : > { %v7264_v55 = vadd.f32 %v6137_v9, %v11753_v22  ;;  %v6139_v34 = vpop.f32.mrb[109].mxu0 }
 0xa00   : > { %v7265_v13 = vadd.f32 %v6139_v34, %v11756_v36  ;;  %v6141_v26 = vpop.f32.mrb[110].mxu0 }
 0xa01   : > { %v6174_v61 = vadd.f32 %v7264_v55, %v12282_v1  ;;  %v7266_v25 = vadd.f32 %v6141_v26, %v11753_v22  ;;  %v6143_v12 = vpop.f32.mrb[111].mxu0  ;;  %v12288_v22 = vld [vmem:[#allocation80_spill] sm:$0xff] }
 0xa02   : > { %v6175_v48 = vadd.f32 %v7265_v13, %v12284_v49  ;;  %v7267_v28 = vadd.f32 %v6143_v12, %v11756_v36 }
 0xa03   : > { %6206 = vst [vmem:[%s9198_s22 + $0xe0] sm:$0xff] %v6174_v61  ;;  %v6176_v29 = vadd.f32 %v7266_v25, %v12285_v52 }
 0xa04   : > { %6207 = vst [vmem:[%s9198_s22 + $0xe8] sm:$0xff] %v6175_v48  ;;  %v6177_v63 = vadd.f32 %v7267_v28, %v12288_v22 }
 0xa05   : > { %6208 = vst [vmem:[%s9198_s22 + $0xf0] sm:$0xff] %v6176_v29 }
 0xa06   : > { %6209 = vst [vmem:[%s9198_s22 + $0xf8] sm:$0xff] %v6177_v63 }
 0xa07   : > { %8462 = shalt.err (!%p8459_p12)
}
 0xa08   : > { %s8463_s22 = scalar_lea.hbm %s11855_s29, 4096  ;;  %s8467_s30 = scalar_lea.hbm %s12287_s11, 8192 }
 0xa09   : > { %p8464_p5 = scmp.ne.s32.totalorder %s11855_s29, %s8463_s22  ;;  %p8468_p0 = scmp.lt.u32.totalorder %s11855_s29, %s12287_s11 }
 0xa0a   : > { %p8469_p13 = scmp.lt.u32.totalorder %s8467_s30, %s8463_s22  ;;  %p8471_p11 = scmp.lt.u32.totalorder %s8463_s22, %s11855_s29 }
 0xa0b   : > { %p8465_p6 = pnand %p8464_p5, %p12290_p7 }
 0xa0c   : > { %p8470_p1 = por %p8469_p13, %p8468_p0 }
 0xa0d   : > { %p8466_p3 = pneg %p8465_p6 }
 0xa0e   : > { %p8472_p2 = por %p8471_p11, %p8470_p1 }
 0xa10   : > { %p8473_p10 = pnand %p8472_p2, %p8466_p3 }
 0xa12   : > { %8476 = shalt.err (!%p8473_p10)
}
 0xa13   : > { %s8640_s23 = smov 256   ;;  %s8641_s26 = smov 16  }
 0xa14   : > { %7385 = dma.vmem_to_hbm [thread:$0]  (%p12290_p7), %s11857_s2, 4096, %s11855_s29, %s11865_s21, %s8640_s23, %s8640_s23, %s8641_s26  }
 0xa15 PF: > { %s12291_s19 = sld [smem:[#allocation44_spill]]  ;;  %s12292_s6 = sld [smem:[#allocation37_spill]] }
 0xa16   : > { %s12293_s17 = sld [smem:[#allocation50_spill]] }
 0xa1b   : > { %p7425_p9 = scmp.ge.s32.totalorder %s12291_s19, 2  ;;  %s6263_s18 = sand.u32 1, %s12292_s6  }
 0xa1c   : > { %p12294_p4 = scmp.ne.s32.totalorder %s12293_s17, 0  ;;  %s6264_s13 = scalar_lea.sflag [#allocation6], %s6263_s18 }
 0xa1e   : > { %p7418_p8 = pnand %p7425_p9, %p12294_p4 }
 0xa20   : > { %8556 = dma.done.wait (!%p7418_p8), %s6264_s13, 4096  }
 0xa21   : > { %8558 = vsyncadd (!%p7418_p8), %s6264_s13, 4294963200  ;;  %s12295_s25 = sld [smem:[#allocation34_spill]] }
 0xa22   : > { %s12296_s15 = sld [smem:[#allocation53_spill]] }
 0xa27   : > { %s6272_s0 = sand.u32 1, %s12295_s25  }
 0xa28   : > { %p12297_p12 = scmp.ne.s32.totalorder %s12296_s15, 0  ;;  %s6273_s22 = scalar_lea.sflag [#allocation21], %s6272_s0 }
 0xa2a   : > { %p7421_p5 = pnand %p7425_p9, %p12297_p12 }
 0xa2c   : > { %8560 = dma.done.wait (!%p7421_p5), %s6273_s22, 1024  }
 0xa2d   : > { %8562 = vsyncadd (!%p7421_p5), %s6273_s22, 4294966272  ;;  %s43_s30 = sadd.s32 1, %s12291_s19   ;;  %s12299_s17 = sld [smem:[#allocation35_spill]] }
 0xa2e   : > { %p11897_p7 = scmp.ge.s32.totalorder %s43_s30, 6   ;;  %s12300_s18 = sld [smem:[#allocation36_spill]] }
 0xa2f   : > { %s12301_s19 = sld [smem:[#allocation51_spill]]  ;;  %s12303_s21 = sld [smem:[#allocation39_spill]] }
 0xa30   : > { %s12302_s20 = sld [smem:[#allocation38_spill]]  ;;  %s12304_s22 = sld [smem:[#allocation48_spill]] }
 0xa31   : > { %s12305_s16 = sld [smem:[#allocation40_spill]]  ;;  %s12306_s25 = sld [smem:[#allocation47_spill]] }
 0xa32   : > { %s12307_s27 = sld [smem:[#allocation43_spill]]  ;;  %s12308_s29 = sld [smem:[#allocation45_spill]] }
 0xa33   : > { %s12309_s10 = sld [smem:[#allocation46_spill]]  ;;  %s12310_s23 = smov %s8593_s24 }
 0xa34   : > { %s12312_s26 = smov %s8609_s28  ;;  %42 = sbr.rel (!%p11897_p7) target bundleno = 27 (0x1b), region = 223 }
 0xa37   : > { %s12311_s24 = smov %s12305_s16 }
 0xa38   : > { %s12313_s28 = smov %s12308_s29 }
 0xa39   : > { %s12314_s29 = smov %s12309_s10 }
 0xa3b   :  { %6278 = vsyncpa [#allocation5], 1 }
 0xa3c   :  { %6280 = vsyncpa [#allocation5 + $0x1], 1 }
 0xa3d   :  { %6281 = vsyncpa [#allocation8], 1 }
 0xa3e   :  { %6283 = vsyncpa [#allocation8 + $0x1], 1 }
 0xa3f   :  { %6284 = vsyncpa [#allocation11], 1 }
 0xa40   :  { %6286 = vsyncpa [#allocation11 + $0x1], 1 }
 0xa41   :  { %6287 = vsyncpa [#allocation14], 1 }
 0xa42   :  { %6289 = vsyncpa [#allocation14 + $0x1], 1 }
 0xa43   :  { %6290 = vsyncpa [#allocation17], 1 }
 0xa44   :  { %6292 = vsyncpa [#allocation17 + $0x1], 1 }
 0xa45   :  { %6293 = vsyncpa [#allocation6], 1 }
 0xa46   :  { %6295 = vsyncpa [#allocation6 + $0x1], 1 }
 0xa47   :  { %6296 = vsyncpa [#allocation21], 1 }
 0xa48   :  { %6298 = vsyncpa [#allocation21 + $0x1], 1 }
 0xa49   :  { %6299 = vsyncmov [#allocation3] }
 0xa4c   :  { %s6300_s12 = vpop.sfrf %6299 }
 0xa4d   :  { %p6969_p6 = scmp.ne.s32.totalorder %s6300_s12, 0 }
 0xa4f   :  { %6304 = shalt.err (%p6969_p6)  }

</bundles_post_ra>
